<compile_context>
chip_gen: v7x
topology: tpu7x:2x2x1
jax: 0.10.0
libtpu: 0.0.40
codegen_flags: <defaults>
</compile_context>

<pallas_src>
import functools
import math

import jax
import jax.numpy as jnp
from jax.experimental import pallas as pl
from jax.experimental.pallas import tpu as pltpu


def _round_up(x, m):
    return (x + m - 1) // m * m


def _tile(dim, cap, align):
    """Tile size (<= cap, `align`-aligned or equal to the padded dim) and padded dim."""
    t = min(cap, _round_up(dim, align))
    return t, _round_up(dim, t)


_TM_CAP, _TK_CAP, _TN_CAP = 256, 512, 256


# ----------------------------- GEMM (MXU) kernel -----------------------------

def _matmul_bias_kernel(a_ref, b_ref, bias_ref, o_ref, acc_ref):
    # (tm, tk) bf16 @ (tk, tn) bf16 -> f32 accumulation in VMEM scratch.
    @pl.when(pl.program_id(2) == 0)
    def _():
        acc_ref[...] = jnp.zeros_like(acc_ref)

    acc_ref[...] += jnp.dot(a_ref[...], b_ref[...],
                            preferred_element_type=jnp.float32)

    @pl.when(pl.program_id(2) == pl.num_programs(2) - 1)
    def _():
        o_ref[...] = acc_ref[...] + bias_ref[...]


@functools.lru_cache(maxsize=None)
def _build_matmul_bias(Mp, Kp, Np, tm, tk, tn):
    return pl.pallas_call(
        _matmul_bias_kernel,
        out_shape=jax.ShapeDtypeStruct((Mp, Np), jnp.float32),
        grid=(Mp // tm, Np // tn, Kp // tk),
        in_specs=[
            pl.BlockSpec((tm, tk), lambda i, j, k: (i, k)),
            pl.BlockSpec((tk, tn), lambda i, j, k: (k, j)),
            pl.BlockSpec((1, tn), lambda i, j, k: (0, j)),
        ],
        out_specs=pl.BlockSpec((tm, tn), lambda i, j, k: (i, j)),
        scratch_shapes=[pltpu.VMEM((tm, tn), jnp.float32)],
        compiler_params=pltpu.CompilerParams(
            dimension_semantics=("parallel", "parallel", "arbitrary"),
            vmem_limit_bytes=32 * 1024 * 1024,
        ),
    )


def _matmul_bias(a, wmat_p, bias):
    """a: (M, K) f32 patches; wmat_p: (Kp, Np) bf16 pre-padded; bias: (N,) f32."""
    M, K = a.shape
    N = bias.shape[0]
    Kp, Np = wmat_p.shape
    assert Kp >= K and Np >= N
    tm, Mp = _tile(M, _TM_CAP, 16)
    tk = min(_TK_CAP, Kp)
    tn = min(_TN_CAP, Np)
    a_p = jnp.pad(a, ((0, Mp - M), (0, Kp - K))).astype(jnp.bfloat16)
    bias_p = jnp.pad(bias, (0, Np - N)).reshape(1, Np)
    out = _build_matmul_bias(Mp, Kp, Np, tm, tk, tn)(a_p, wmat_p, bias_p)
    return out[:M, :N]


# ------------------- InstanceNorm / activation (VPU) kernels ------------------

def _in_normalize(x):
    # One-pass InstanceNorm2d stats (affine=False, biased var, eps=1e-5) over the
    # spatial axis of a (1, H*W, c_tile) block.
    inv = 1.0 / x.shape[1]
    mean = jnp.sum(x, axis=1, keepdims=True) * inv
    var = jnp.maximum(jnp.sum(x * x, axis=1, keepdims=True) * inv - mean * mean, 0.0)
    return (x - mean) * jax.lax.rsqrt(var + 1e-5)


def _in_relu_kernel(x_ref, o_ref):
    o_ref[...] = jnp.maximum(_in_normalize(x_ref[...]), 0.0)


def _in_relu_add_kernel(x_ref, s_ref, o_ref):
    # relu(IN(x)) + encoder skip (fused skip-add for the next decoder stage).
    o_ref[...] = jnp.maximum(_in_normalize(x_ref[...]), 0.0) + s_ref[...]


def _in_res_relu_kernel(x_ref, r_ref, o_ref):
    # ResnetBlock tail: relu(IN(x) + residual).
    o_ref[...] = jnp.maximum(_in_normalize(x_ref[...]) + r_ref[...], 0.0)


def _in_res_relu_add_kernel(x_ref, r_ref, s_ref, o_ref):
    # Last ResnetBlock tail fused with the first decoder skip add.
    o_ref[...] = jnp.maximum(_in_normalize(x_ref[...]) + r_ref[...], 0.0) + s_ref[...]


def _tanh_kernel(x_ref, o_ref):
    o_ref[...] = jnp.tanh(x_ref[...])


_ELEMWISE = {
    "in_relu": (_in_relu_kernel, 1),
    "in_relu_add": (_in_relu_add_kernel, 2),
    "in_res_relu": (_in_res_relu_kernel, 2),
    "in_res_relu_add": (_in_res_relu_add_kernel, 3),
    "tanh": (_tanh_kernel, 1),
}


@functools.lru_cache(maxsize=None)
def _build_elemwise(name, n, hw, c):
    kernel, n_in = _ELEMWISE[name]
    ct = 128 if c % 128 == 0 else c
    spec = pl.BlockSpec((1, hw, ct), lambda b, j: (b, 0, j))
    # TODO(synk): the spatial axis stays whole per block (IN needs a full spatial
    # reduction); partial-sum tiling over H*W would be needed for very large maps.
    return pl.pallas_call(
        kernel,
        out_shape=jax.ShapeDtypeStruct((n, hw, c), jnp.float32),
        grid=(n, c // ct),
        in_specs=[spec] * n_in,
        out_specs=spec,
        compiler_params=pltpu.CompilerParams(
            dimension_semantics=("parallel", "parallel")),
    )


def _elemwise(name, *xs):
    n, h, w, c = xs[0].shape
    flat = [v.reshape(n, h * w, c) for v in xs]
    return _build_elemwise(name, n, h * w, c)(*flat).reshape(n, h, w, c)


# ------------------------------ conv glue (NHWC) ------------------------------

def _im2col_nhwc(xp, kh, kw, stride):
    n, hp, wp, c = xp.shape
    ho = (hp - kh) // stride + 1
    wo = (wp - kw) // stride + 1
    if kh == 1 and kw == 1 and stride == 1:
        return xp.reshape(n * ho * wo, c), ho, wo
    taps = [xp[:, a:a + stride * ho:stride, b:b + stride * wo:stride, :]
            for a in range(kh) for b in range(kw)]
    patches = jnp.stack(taps, axis=3).reshape(n * ho * wo, kh * kw * c)
    return patches, ho, wo


def conv2d(x, p, ksize, stride=1, padding=0, pad_mode="constant"):
    # x: NHWC.  p: {"wmat": (Kp, Np) bf16, "bias": (Cout,) f32}
    n = x.shape[0]
    if padding > 0:
        x = jnp.pad(x, ((0, 0), (padding, padding), (padding, padding), (0, 0)),
                    mode=pad_mode)
    patches, ho, wo = _im2col_nhwc(x, ksize, ksize, stride)
    out = _matmul_bias(patches, p["wmat"], p["bias"])
    return out.reshape(n, ho, wo, p["bias"].shape[0])


# Sub-pixel decomposition of ConvTranspose2d(k=3, s=2, p=1, output_padding=1):
# output phase (dy, dx) covers positions (2i+dy, 2j+dx) and equals a small
# stride-1 conv over x.  Tap offsets (dh, dw) into x (zero-padded by 1 on the
# bottom/right) and the matching PyTorch weight[ci, co, kh, kw] spatial indices.
_CONVT_TAPS = (
    ((0, 0),),
    ((0, 1), (0, 0)),
    ((1, 0), (0, 0)),
    ((1, 1), (1, 0), (0, 1), (0, 0)),
)
_CONVT_WSEL = (
    ((1, 1),),
    ((1, 0), (1, 2)),
    ((0, 1), (2, 1)),
    ((0, 0), (0, 2), (2, 0), (2, 2)),
)


def conv_transpose2d(x, p):
    # x: NHWC (N, H, W, Cin).  p: {"wmats": [4 x (Kp, Np) bf16], "bias": (Cout,)}
    n, h, w, cin = x.shape
    cout = p["bias"].shape[0]
    xp = jnp.pad(x, ((0, 0), (0, 1), (0, 1), (0, 0)))
    phase = []
    for taps, wmat in zip(_CONVT_TAPS, p["wmats"]):
        slices = [xp[:, dh:dh + h, dw:dw + w, :] for dh, dw in taps]
        if len(slices) == 1:
            patches = slices[0].reshape(n * h * w, cin)
        else:
            patches = jnp.stack(slices, axis=3).reshape(n * h * w, len(slices) * cin)
        out = _matmul_bias(patches, wmat, p["bias"])
        phase.append(out.reshape(n, h, w, cout))
    top = jnp.stack([phase[0], phase[1]], axis=-2)     # (n, h, w, 2, c)
    bot = jnp.stack([phase[2], phase[3]], axis=-2)     # (n, h, w, 2, c)
    out = jnp.stack([top, bot], axis=2)                # (n, h, 2, w, 2, c)
    return out.reshape(n, 2 * h, 2 * w, cout)


# ------------------------------ parameter prep ------------------------------

def _pad_wmat(wmat):
    K, N = wmat.shape
    _, Kp = _tile(K, _TK_CAP, 128)
    _, Np = _tile(N, _TN_CAP, 128)
    return jnp.pad(wmat, ((0, Kp - K), (0, Np - N))).astype(jnp.bfloat16)


def _prep_conv(w, b):
    # w: (Cout, Cin, kh, kw)  -- PyTorch Conv2d layout.
    cout, cin, kh, kw = w.shape
    wmat = jnp.transpose(w, (2, 3, 1, 0)).reshape(kh * kw * cin, cout)
    return {"wmat": _pad_wmat(wmat), "bias": jnp.asarray(b, jnp.float32)}


def _prep_conv_transpose(w, b):
    # w: (Cin, Cout, 3, 3)  -- PyTorch ConvTranspose2d layout.
    wmats = []
    for sel in _CONVT_WSEL:
        wmat = jnp.concatenate([w[:, :, a, c] for a, c in sel], axis=0)  # (ntap*Cin, Cout)
        wmats.append(_pad_wmat(wmat))
    return {"wmats": wmats, "bias": jnp.asarray(b, jnp.float32)}


# ------------------------------- model forward -------------------------------

N_DOWNSAMPLE = 4
N_BLOCKS = 9


def resnet_block(blk, x, skip=None):
    c1, c2, c3 = blk
    out = conv2d(x, c1, 1)                       # 1x1
    out = _elemwise("in_relu", out)
    out = conv2d(out, c2, 3, padding=1)          # 3x3, pad 1
    out = _elemwise("in_relu", out)
    out = conv2d(out, c3, 1)                     # 1x1
    if skip is None:
        return _elemwise("in_res_relu", out, x)          # relu(IN(out) + x)
    return _elemwise("in_res_relu_add", out, x, skip)    # ... + encoder skip


def global_generator_forward(params, x, noise):
    # x: (1, input_nc - 1, H, W) NCHW; noise: (1, 1, H, W)  (torch.randn in ref).
    x = jnp.concatenate([x, noise], axis=1)
    y = jnp.transpose(x, (0, 2, 3, 1))                   # -> NHWC, once
    # model0: ReflectionPad(3) + Conv7x7 + InstanceNorm + ReLU
    y = conv2d(y, params["head"], 7, padding=3, pad_mode="reflect")
    y = _elemwise("in_relu", y)
    enc = [y]                                            # enc[0]=head, enc[1..4]=down
    # model1..4: stride-2 downsampling convs
    for i in range(N_DOWNSAMPLE):
        y = conv2d(y, params["down"][i], 3, stride=2, padding=1)
        y = _elemwise("in_relu", y)
        enc.append(y)
    # model5: 9 ResnetBlocks; the first decoder skip (enc[-1]) is fused into the
    # last block's IN + residual + ReLU kernel.
    for bi, blk in enumerate(params["resnet"]):
        y = resnet_block(blk, y, skip=enc[-1] if bi == N_BLOCKS - 1 else None)
    # model6..9: transposed-conv upsampling; each following stage's encoder-skip
    # add is fused into the preceding stage's InstanceNorm+ReLU kernel.
    for i in range(N_DOWNSAMPLE):
        z = conv_transpose2d(y, params["up"][i])
        if i < N_DOWNSAMPLE - 1:
            y = _elemwise("in_relu_add", z, enc[N_DOWNSAMPLE - 1 - i])
        else:
            y = _elemwise("in_relu", z)
    # model10: ReflectionPad(3) + Conv7x7 + Tanh
    y = conv2d(y, params["final"], 7, padding=3, pad_mode="reflect")
    y = _elemwise("tanh", y)
    return jnp.transpose(y, (0, 3, 1, 2))                # back to NCHW


# ------------------------------ parameter init ------------------------------

def init_params(key, input_nc, output_nc, ngf):
    def conv_p(k, cout, cin, ksz):
        k1, k2 = jax.random.split(k)
        fan = cin * ksz * ksz
        w = jax.random.normal(k1, (cout, cin, ksz, ksz), jnp.float32) / math.sqrt(fan)
        b = jax.random.normal(k2, (cout,), jnp.float32) * 0.01
        return _prep_conv(w, b)

    def convT_p(k, cin, cout, ksz):
        k1, k2 = jax.random.split(k)
        fan = cin * ksz * ksz
        w = jax.random.normal(k1, (cin, cout, ksz, ksz), jnp.float32) / math.sqrt(fan)
        b = jax.random.normal(k2, (cout,), jnp.float32) * 0.01
        return _prep_conv_transpose(w, b)

    keys = iter(jax.random.split(key, 64))
    params = {}
    params["head"] = conv_p(next(keys), ngf, input_nc, 7)
    params["down"] = [conv_p(next(keys), ngf * 2 ** (i + 1), ngf * 2 ** i, 3)
                      for i in range(N_DOWNSAMPLE)]
    dim = ngf * 2 ** N_DOWNSAMPLE
    planes = dim // 4
    params["resnet"] = [(conv_p(next(keys), planes, dim, 1),
                         conv_p(next(keys), planes, planes, 3),
                         conv_p(next(keys), dim, planes, 1))
                        for _ in range(N_BLOCKS)]
    params["up"] = [convT_p(next(keys), ngf * 2 ** (N_DOWNSAMPLE - i),
                            ngf * 2 ** (N_DOWNSAMPLE - 1 - i), 3)
                    for i in range(N_DOWNSAMPLE)]
    params["final"] = conv_p(next(keys), output_nc, ngf, 7)
    return params


# ---------------------------------- main ----------------------------------

if __name__ == "__main__":
    # The PyTorch forward concatenates a (1,1,H,W) random channel, so the first
    # conv's input_nc counts that extra channel and batch must be 1.
    input_nc, output_nc, ngf = 4, 3, 8
    H = W = 32

    key = jax.random.PRNGKey(0)
    kp, kx, kn = jax.random.split(key, 3)
    params = init_params(kp, input_nc, output_nc, ngf)
    x = jax.random.normal(kx, (1, input_nc - 1, H, W), jnp.float32)
    noise = jax.random.normal(kn, (1, 1, H, W), jnp.float32)

    fwd = jax.jit(global_generator_forward)
    out = jax.block_until_ready(fwd(params, x, noise))

    assert out.shape == (1, output_nc, H, W), out.shape
    assert jnp.all(jnp.isfinite(out))
    print("KERNEL_OK")
</pallas_src>

<mosaic_0001>
module attributes {stable_mosaic.version = 11 : i64} {
  func.func @_matmul_bias_kernel(%arg0: i32, %arg1: i32, %arg2: i32, %arg3: memref<256x256xbf16, #tpu.memory_space<vmem>>, %arg4: memref<256x128xbf16, #tpu.memory_space<vmem>>, %arg5: memref<1x128xf32, #tpu.memory_space<vmem>>, %arg6: memref<256x128xf32, #tpu.memory_space<vmem>>, %arg7: memref<256x128xf32, #tpu.memory_space<vmem>>) attributes {dimension_semantics = [#tpu.dimension_semantics<parallel>, #tpu.dimension_semantics<parallel>, #tpu.dimension_semantics<arbitrary>], iteration_bounds = array<i64: 4, 1, 1>, scalar_prefetch = 0 : i64, scratch_operands = 1 : i64, tpu.core_type = #tpu.core_type<tc>, window_params = [{transform_indices = @transform_0, window_bounds = array<i64: 256, 256>}, {transform_indices = @transform_1, window_bounds = array<i64: 256, 128>}, {transform_indices = @transform_2, window_bounds = array<i64: 1, 128>}, {transform_indices = @transform_3, window_bounds = array<i64: 256, 128>}]} {
    %c0_i32 = arith.constant 0 : i32
    %0 = arith.cmpi eq, %arg2, %c0_i32 : i32
    %1 = arith.extui %0 : i1 to i32
    %c0_i32_0 = arith.constant 0 : i32
    %2 = arith.cmpi ne, %1, %c0_i32_0 : i32
    scf.if %2 {
      %cst_10 = arith.constant 0.000000e+00 : f32
      %12 = vector.broadcast %cst_10 : f32 to vector<256x128xf32>
      %c0_11 = arith.constant 0 : index
      %c0_12 = arith.constant 0 : index
      %13 = vector.load %arg7[%c0_11, %c0_12] : memref<256x128xf32, #tpu.memory_space<vmem>>, vector<256x128xf32>
      tpu.vector_store %arg7[%c0_11, %c0_12], %12 {strides = array<i32>} : memref<256x128xf32, #tpu.memory_space<vmem>>, vector<256x128xf32>,
    } else {
    }
    %c0 = arith.constant 0 : index
    %c0_1 = arith.constant 0 : index
    %3 = vector.load %arg7[%c0, %c0_1] : memref<256x128xf32, #tpu.memory_space<vmem>>, vector<256x128xf32>
    %c0_2 = arith.constant 0 : index
    %c0_3 = arith.constant 0 : index
    %4 = vector.load %arg3[%c0_2, %c0_3] : memref<256x256xbf16, #tpu.memory_space<vmem>>, vector<256x256xbf16>
    %c0_4 = arith.constant 0 : index
    %c0_5 = arith.constant 0 : index
    %5 = vector.load %arg4[%c0_4, %c0_5] : memref<256x128xbf16, #tpu.memory_space<vmem>>, vector<256x128xbf16>
    %cst = arith.constant dense<0.000000e+00> : vector<256x128xf32>
    %6 = tpu.matmul %4, %5, %cst {dimension_numbers = #tpu.dot_dimension_numbers<[1], [0], [0], [1], [0, 0, 1, 1], [], []>} : vector<256x256xbf16>, vector<256x128xbf16>, vector<256x128xf32> -> vector<256x128xf32>
    %7 = arith.addf %3, %6 : vector<256x128xf32>
    %c0_6 = arith.constant 0 : index
    %c0_7 = arith.constant 0 : index
    %8 = vector.load %arg7[%c0_6, %c0_7] : memref<256x128xf32, #tpu.memory_space<vmem>>, vector<256x128xf32>
    tpu.vector_store %arg7[%c0_6, %c0_7], %7 {strides = array<i32>} : memref<256x128xf32, #tpu.memory_space<vmem>>, vector<256x128xf32>,
    %c0_i32_8 = arith.constant 0 : i32
    %9 = arith.cmpi eq, %arg2, %c0_i32_8 : i32
    %10 = arith.extui %9 : i1 to i32
    %c0_i32_9 = arith.constant 0 : i32
    %11 = arith.cmpi ne, %10, %c0_i32_9 : i32
    scf.if %11 {
      %c0_10 = arith.constant 0 : index
      %c0_11 = arith.constant 0 : index
      %12 = vector.load %arg7[%c0_10, %c0_11] : memref<256x128xf32, #tpu.memory_space<vmem>>, vector<256x128xf32>
      %c0_12 = arith.constant 0 : index
      %c0_13 = arith.constant 0 : index
      %13 = vector.load %arg5[%c0_12, %c0_13] : memref<1x128xf32, #tpu.memory_space<vmem>>, vector<1x128xf32>
      %14 = vector.broadcast %13 : vector<1x128xf32> to vector<256x128xf32>
      %15 = arith.addf %12, %14 : vector<256x128xf32>
      %c0_14 = arith.constant 0 : index
      %c0_15 = arith.constant 0 : index
      %16 = vector.load %arg6[%c0_14, %c0_15] : memref<256x128xf32, #tpu.memory_space<vmem>>, vector<256x128xf32>
      tpu.vector_store %arg6[%c0_14, %c0_15], %15 {strides = array<i32>} : memref<256x128xf32, #tpu.memory_space<vmem>>, vector<256x128xf32>,
    } else {
    }
    return
  }
  func.func @transform_0(%arg0: i32, %arg1: i32, %arg2: i32) -> (i32, i32) {
    %c0_i32 = arith.constant 0 : i32
    return %arg0, %arg2 : i32, i32
  }
  func.func @transform_1(%arg0: i32, %arg1: i32, %arg2: i32) -> (i32, i32) {
    %c0_i32 = arith.constant 0 : i32
    return %arg2, %arg1 : i32, i32
  }
  func.func @transform_2(%arg0: i32, %arg1: i32, %arg2: i32) -> (i32, i32) {
    %c0_i32 = arith.constant 0 : i32
    %c0_i32_0 = arith.constant 0 : i32
    return %c0_i32, %arg1 : i32, i32
  }
  func.func @transform_3(%arg0: i32, %arg1: i32, %arg2: i32) -> (i32, i32) {
    %c0_i32 = arith.constant 0 : i32
    return %arg0, %arg1 : i32, i32
  }
}

module attributes {stable_mosaic.version = 11 : i64} {
  func.func @_in_relu_kernel(%arg0: i32, %arg1: i32, %arg2: memref<1x1024x8xf32, #tpu.memory_space<vmem>>, %arg3: memref<1x1024x8xf32, #tpu.memory_space<vmem>>) attributes {dimension_semantics = [#tpu.dimension_semantics<parallel>, #tpu.dimension_semantics<parallel>], iteration_bounds = array<i64: 1, 1>, scalar_prefetch = 0 : i64, scratch_operands = 0 : i64, tpu.core_type = #tpu.core_type<tc>, window_params = [{transform_indices = @transform_0, window_bounds = array<i64: 1, 1024, 8>}, {transform_indices = @transform_1, window_bounds = array<i64: 1, 1024, 8>}]} {
    %c0 = arith.constant 0 : index
    %c0_0 = arith.constant 0 : index
    %c0_1 = arith.constant 0 : index
    %0 = vector.load %arg2[%c0, %c0_0, %c0_1] : memref<1x1024x8xf32, #tpu.memory_space<vmem>>, vector<1x1024x8xf32>
    %cst = arith.constant dense<0.000000e+00> : vector<1x8xf32>
    %1 = vector.multi_reduction <add>, %0, %cst [1] : vector<1x1024x8xf32> to vector<1x8xf32>
    %2 = vector.shape_cast %1 : vector<1x8xf32> to vector<1x1x8xf32>
    %cst_2 = arith.constant 9.765625E-4 : f32
    %3 = vector.broadcast %cst_2 : f32 to vector<1x1x8xf32>
    %4 = arith.mulf %2, %3 : vector<1x1x8xf32>
    %5 = arith.mulf %0, %0 : vector<1x1024x8xf32>
    %cst_3 = arith.constant dense<0.000000e+00> : vector<1x8xf32>
    %6 = vector.multi_reduction <add>, %5, %cst_3 [1] : vector<1x1024x8xf32> to vector<1x8xf32>
    %7 = vector.shape_cast %6 : vector<1x8xf32> to vector<1x1x8xf32>
    %cst_4 = arith.constant 9.765625E-4 : f32
    %8 = vector.broadcast %cst_4 : f32 to vector<1x1x8xf32>
    %9 = arith.mulf %7, %8 : vector<1x1x8xf32>
    %10 = arith.mulf %4, %4 : vector<1x1x8xf32>
    %11 = arith.subf %9, %10 : vector<1x1x8xf32>
    %cst_5 = arith.constant 0.000000e+00 : f32
    %12 = vector.broadcast %cst_5 : f32 to vector<1x1x8xf32>
    %13 = arith.maximumf %11, %12 : vector<1x1x8xf32>
    %14 = vector.broadcast %4 : vector<1x1x8xf32> to vector<1x1024x8xf32>
    %15 = arith.subf %0, %14 : vector<1x1024x8xf32>
    %cst_6 = arith.constant 9.99999974E-6 : f32
    %16 = vector.broadcast %cst_6 : f32 to vector<1x1x8xf32>
    %17 = arith.addf %13, %16 : vector<1x1x8xf32>
    %18 = math.rsqrt %17 : vector<1x1x8xf32>
    %19 = vector.broadcast %18 : vector<1x1x8xf32> to vector<1x1024x8xf32>
    %20 = arith.mulf %15, %19 : vector<1x1024x8xf32>
    %cst_7 = arith.constant 0.000000e+00 : f32
    %21 = vector.broadcast %cst_7 : f32 to vector<1x1024x8xf32>
    %22 = arith.maximumf %20, %21 : vector<1x1024x8xf32>
    %c0_8 = arith.constant 0 : index
    %c0_9 = arith.constant 0 : index
    %c0_10 = arith.constant 0 : index
    %23 = vector.load %arg3[%c0_8, %c0_9, %c0_10] : memref<1x1024x8xf32, #tpu.memory_space<vmem>>, vector<1x1024x8xf32>
    tpu.vector_store %arg3[%c0_8, %c0_9, %c0_10], %22 {strides = array<i32>} : memref<1x1024x8xf32, #tpu.memory_space<vmem>>, vector<1x1024x8xf32>,
    return
  }
  func.func @transform_0(%arg0: i32, %arg1: i32) -> (i32, i32, i32) {
    %c0_i32 = arith.constant 0 : i32
    %c0_i32_0 = arith.constant 0 : i32
    return %arg0, %c0_i32, %arg1 : i32, i32, i32
  }
  func.func @transform_1(%arg0: i32, %arg1: i32) -> (i32, i32, i32) {
    %c0_i32 = arith.constant 0 : i32
    %c0_i32_0 = arith.constant 0 : i32
    return %arg0, %c0_i32, %arg1 : i32, i32, i32
  }
}

module attributes {stable_mosaic.version = 11 : i64} {
  func.func @_matmul_bias_kernel(%arg0: i32, %arg1: i32, %arg2: i32, %arg3: memref<256x128xbf16, #tpu.memory_space<vmem>>, %arg4: memref<128x128xbf16, #tpu.memory_space<vmem>>, %arg5: memref<1x128xf32, #tpu.memory_space<vmem>>, %arg6: memref<256x128xf32, #tpu.memory_space<vmem>>, %arg7: memref<256x128xf32, #tpu.memory_space<vmem>>) attributes {dimension_semantics = [#tpu.dimension_semantics<parallel>, #tpu.dimension_semantics<parallel>, #tpu.dimension_semantics<arbitrary>], iteration_bounds = array<i64: 1, 1, 1>, scalar_prefetch = 0 : i64, scratch_operands = 1 : i64, tpu.core_type = #tpu.core_type<tc>, window_params = [{transform_indices = @transform_0, window_bounds = array<i64: 256, 128>}, {transform_indices = @transform_1, window_bounds = array<i64: 128, 128>}, {transform_indices = @transform_2, window_bounds = array<i64: 1, 128>}, {transform_indices = @transform_3, window_bounds = array<i64: 256, 128>}]} {
    %c0_i32 = arith.constant 0 : i32
    %0 = arith.cmpi eq, %arg2, %c0_i32 : i32
    %1 = arith.extui %0 : i1 to i32
    %c0_i32_0 = arith.constant 0 : i32
    %2 = arith.cmpi ne, %1, %c0_i32_0 : i32
    scf.if %2 {
      %cst_10 = arith.constant 0.000000e+00 : f32
      %12 = vector.broadcast %cst_10 : f32 to vector<256x128xf32>
      %c0_11 = arith.constant 0 : index
      %c0_12 = arith.constant 0 : index
      %13 = vector.load %arg7[%c0_11, %c0_12] : memref<256x128xf32, #tpu.memory_space<vmem>>, vector<256x128xf32>
      tpu.vector_store %arg7[%c0_11, %c0_12], %12 {strides = array<i32>} : memref<256x128xf32, #tpu.memory_space<vmem>>, vector<256x128xf32>,
    } else {
    }
    %c0 = arith.constant 0 : index
    %c0_1 = arith.constant 0 : index
    %3 = vector.load %arg7[%c0, %c0_1] : memref<256x128xf32, #tpu.memory_space<vmem>>, vector<256x128xf32>
    %c0_2 = arith.constant 0 : index
    %c0_3 = arith.constant 0 : index
    %4 = vector.load %arg3[%c0_2, %c0_3] : memref<256x128xbf16, #tpu.memory_space<vmem>>, vector<256x128xbf16>
    %c0_4 = arith.constant 0 : index
    %c0_5 = arith.constant 0 : index
    %5 = vector.load %arg4[%c0_4, %c0_5] : memref<128x128xbf16, #tpu.memory_space<vmem>>, vector<128x128xbf16>
    %cst = arith.constant dense<0.000000e+00> : vector<256x128xf32>
    %6 = tpu.matmul %4, %5, %cst {dimension_numbers = #tpu.dot_dimension_numbers<[1], [0], [0], [1], [0, 0, 1, 1], [], []>} : vector<256x128xbf16>, vector<128x128xbf16>, vector<256x128xf32> -> vector<256x128xf32>
    %7 = arith.addf %3, %6 : vector<256x128xf32>
    %c0_6 = arith.constant 0 : index
    %c0_7 = arith.constant 0 : index
    %8 = vector.load %arg7[%c0_6, %c0_7] : memref<256x128xf32, #tpu.memory_space<vmem>>, vector<256x128xf32>
    tpu.vector_store %arg7[%c0_6, %c0_7], %7 {strides = array<i32>} : memref<256x128xf32, #tpu.memory_space<vmem>>, vector<256x128xf32>,
    %c0_i32_8 = arith.constant 0 : i32
    %9 = arith.cmpi eq, %arg2, %c0_i32_8 : i32
    %10 = arith.extui %9 : i1 to i32
    %c0_i32_9 = arith.constant 0 : i32
    %11 = arith.cmpi ne, %10, %c0_i32_9 : i32
    scf.if %11 {
      %c0_10 = arith.constant 0 : index
      %c0_11 = arith.constant 0 : index
      %12 = vector.load %arg7[%c0_10, %c0_11] : memref<256x128xf32, #tpu.memory_space<vmem>>, vector<256x128xf32>
      %c0_12 = arith.constant 0 : index
      %c0_13 = arith.constant 0 : index
      %13 = vector.load %arg5[%c0_12, %c0_13] : memref<1x128xf32, #tpu.memory_space<vmem>>, vector<1x128xf32>
      %14 = vector.broadcast %13 : vector<1x128xf32> to vector<256x128xf32>
      %15 = arith.addf %12, %14 : vector<256x128xf32>
      %c0_14 = arith.constant 0 : index
      %c0_15 = arith.constant 0 : index
      %16 = vector.load %arg6[%c0_14, %c0_15] : memref<256x128xf32, #tpu.memory_space<vmem>>, vector<256x128xf32>
      tpu.vector_store %arg6[%c0_14, %c0_15], %15 {strides = array<i32>} : memref<256x128xf32, #tpu.memory_space<vmem>>, vector<256x128xf32>,
    } else {
    }
    return
  }
  func.func @transform_0(%arg0: i32, %arg1: i32, %arg2: i32) -> (i32, i32) {
    %c0_i32 = arith.constant 0 : i32
    return %arg0, %arg2 : i32, i32
  }
  func.func @transform_1(%arg0: i32, %arg1: i32, %arg2: i32) -> (i32, i32) {
    %c0_i32 = arith.constant 0 : i32
    return %arg2, %arg1 : i32, i32
  }
  func.func @transform_2(%arg0: i32, %arg1: i32, %arg2: i32) -> (i32, i32) {
    %c0_i32 = arith.constant 0 : i32
    %c0_i32_0 = arith.constant 0 : i32
    return %c0_i32, %arg1 : i32, i32
  }
  func.func @transform_3(%arg0: i32, %arg1: i32, %arg2: i32) -> (i32, i32) {
    %c0_i32 = arith.constant 0 : i32
    return %arg0, %arg1 : i32, i32
  }
}

module attributes {stable_mosaic.version = 11 : i64} {
  func.func @_in_relu_kernel(%arg0: i32, %arg1: i32, %arg2: memref<1x256x16xf32, #tpu.memory_space<vmem>>, %arg3: memref<1x256x16xf32, #tpu.memory_space<vmem>>) attributes {dimension_semantics = [#tpu.dimension_semantics<parallel>, #tpu.dimension_semantics<parallel>], iteration_bounds = array<i64: 1, 1>, scalar_prefetch = 0 : i64, scratch_operands = 0 : i64, tpu.core_type = #tpu.core_type<tc>, window_params = [{transform_indices = @transform_0, window_bounds = array<i64: 1, 256, 16>}, {transform_indices = @transform_1, window_bounds = array<i64: 1, 256, 16>}]} {
    %c0 = arith.constant 0 : index
    %c0_0 = arith.constant 0 : index
    %c0_1 = arith.constant 0 : index
    %0 = vector.load %arg2[%c0, %c0_0, %c0_1] : memref<1x256x16xf32, #tpu.memory_space<vmem>>, vector<1x256x16xf32>
    %cst = arith.constant dense<0.000000e+00> : vector<1x16xf32>
    %1 = vector.multi_reduction <add>, %0, %cst [1] : vector<1x256x16xf32> to vector<1x16xf32>
    %2 = vector.shape_cast %1 : vector<1x16xf32> to vector<1x1x16xf32>
    %cst_2 = arith.constant 3.906250e-03 : f32
    %3 = vector.broadcast %cst_2 : f32 to vector<1x1x16xf32>
    %4 = arith.mulf %2, %3 : vector<1x1x16xf32>
    %5 = arith.mulf %0, %0 : vector<1x256x16xf32>
    %cst_3 = arith.constant dense<0.000000e+00> : vector<1x16xf32>
    %6 = vector.multi_reduction <add>, %5, %cst_3 [1] : vector<1x256x16xf32> to vector<1x16xf32>
    %7 = vector.shape_cast %6 : vector<1x16xf32> to vector<1x1x16xf32>
    %cst_4 = arith.constant 3.906250e-03 : f32
    %8 = vector.broadcast %cst_4 : f32 to vector<1x1x16xf32>
    %9 = arith.mulf %7, %8 : vector<1x1x16xf32>
    %10 = arith.mulf %4, %4 : vector<1x1x16xf32>
    %11 = arith.subf %9, %10 : vector<1x1x16xf32>
    %cst_5 = arith.constant 0.000000e+00 : f32
    %12 = vector.broadcast %cst_5 : f32 to vector<1x1x16xf32>
    %13 = arith.maximumf %11, %12 : vector<1x1x16xf32>
    %14 = vector.broadcast %4 : vector<1x1x16xf32> to vector<1x256x16xf32>
    %15 = arith.subf %0, %14 : vector<1x256x16xf32>
    %cst_6 = arith.constant 9.99999974E-6 : f32
    %16 = vector.broadcast %cst_6 : f32 to vector<1x1x16xf32>
    %17 = arith.addf %13, %16 : vector<1x1x16xf32>
    %18 = math.rsqrt %17 : vector<1x1x16xf32>
    %19 = vector.broadcast %18 : vector<1x1x16xf32> to vector<1x256x16xf32>
    %20 = arith.mulf %15, %19 : vector<1x256x16xf32>
    %cst_7 = arith.constant 0.000000e+00 : f32
    %21 = vector.broadcast %cst_7 : f32 to vector<1x256x16xf32>
    %22 = arith.maximumf %20, %21 : vector<1x256x16xf32>
    %c0_8 = arith.constant 0 : index
    %c0_9 = arith.constant 0 : index
    %c0_10 = arith.constant 0 : index
    %23 = vector.load %arg3[%c0_8, %c0_9, %c0_10] : memref<1x256x16xf32, #tpu.memory_space<vmem>>, vector<1x256x16xf32>
    tpu.vector_store %arg3[%c0_8, %c0_9, %c0_10], %22 {strides = array<i32>} : memref<1x256x16xf32, #tpu.memory_space<vmem>>, vector<1x256x16xf32>,
    return
  }
  func.func @transform_0(%arg0: i32, %arg1: i32) -> (i32, i32, i32) {
    %c0_i32 = arith.constant 0 : i32
    %c0_i32_0 = arith.constant 0 : i32
    return %arg0, %c0_i32, %arg1 : i32, i32, i32
  }
  func.func @transform_1(%arg0: i32, %arg1: i32) -> (i32, i32, i32) {
    %c0_i32 = arith.constant 0 : i32
    %c0_i32_0 = arith.constant 0 : i32
    return %arg0, %c0_i32, %arg1 : i32, i32, i32
  }
}

module attributes {stable_mosaic.version = 11 : i64} {
  func.func @_matmul_bias_kernel(%arg0: i32, %arg1: i32, %arg2: i32, %arg3: memref<64x256xbf16, #tpu.memory_space<vmem>>, %arg4: memref<256x128xbf16, #tpu.memory_space<vmem>>, %arg5: memref<1x128xf32, #tpu.memory_space<vmem>>, %arg6: memref<64x128xf32, #tpu.memory_space<vmem>>, %arg7: memref<64x128xf32, #tpu.memory_space<vmem>>) attributes {dimension_semantics = [#tpu.dimension_semantics<parallel>, #tpu.dimension_semantics<parallel>, #tpu.dimension_semantics<arbitrary>], iteration_bounds = array<i64: 1, 1, 1>, scalar_prefetch = 0 : i64, scratch_operands = 1 : i64, tpu.core_type = #tpu.core_type<tc>, window_params = [{transform_indices = @transform_0, window_bounds = array<i64: 64, 256>}, {transform_indices = @transform_1, window_bounds = array<i64: 256, 128>}, {transform_indices = @transform_2, window_bounds = array<i64: 1, 128>}, {transform_indices = @transform_3, window_bounds = array<i64: 64, 128>}]} {
    %c0_i32 = arith.constant 0 : i32
    %0 = arith.cmpi eq, %arg2, %c0_i32 : i32
    %1 = arith.extui %0 : i1 to i32
    %c0_i32_0 = arith.constant 0 : i32
    %2 = arith.cmpi ne, %1, %c0_i32_0 : i32
    scf.if %2 {
      %cst_10 = arith.constant 0.000000e+00 : f32
      %12 = vector.broadcast %cst_10 : f32 to vector<64x128xf32>
      %c0_11 = arith.constant 0 : index
      %c0_12 = arith.constant 0 : index
      %13 = vector.load %arg7[%c0_11, %c0_12] : memref<64x128xf32, #tpu.memory_space<vmem>>, vector<64x128xf32>
      tpu.vector_store %arg7[%c0_11, %c0_12], %12 {strides = array<i32>} : memref<64x128xf32, #tpu.memory_space<vmem>>, vector<64x128xf32>,
    } else {
    }
    %c0 = arith.constant 0 : index
    %c0_1 = arith.constant 0 : index
    %3 = vector.load %arg7[%c0, %c0_1] : memref<64x128xf32, #tpu.memory_space<vmem>>, vector<64x128xf32>
    %c0_2 = arith.constant 0 : index
    %c0_3 = arith.constant 0 : index
    %4 = vector.load %arg3[%c0_2, %c0_3] : memref<64x256xbf16, #tpu.memory_space<vmem>>, vector<64x256xbf16>
    %c0_4 = arith.constant 0 : index
    %c0_5 = arith.constant 0 : index
    %5 = vector.load %arg4[%c0_4, %c0_5] : memref<256x128xbf16, #tpu.memory_space<vmem>>, vector<256x128xbf16>
    %cst = arith.constant dense<0.000000e+00> : vector<64x128xf32>
    %6 = tpu.matmul %4, %5, %cst {dimension_numbers = #tpu.dot_dimension_numbers<[1], [0], [0], [1], [0, 0, 1, 1], [], []>} : vector<64x256xbf16>, vector<256x128xbf16>, vector<64x128xf32> -> vector<64x128xf32>
    %7 = arith.addf %3, %6 : vector<64x128xf32>
    %c0_6 = arith.constant 0 : index
    %c0_7 = arith.constant 0 : index
    %8 = vector.load %arg7[%c0_6, %c0_7] : memref<64x128xf32, #tpu.memory_space<vmem>>, vector<64x128xf32>
    tpu.vector_store %arg7[%c0_6, %c0_7], %7 {strides = array<i32>} : memref<64x128xf32, #tpu.memory_space<vmem>>, vector<64x128xf32>,
    %c0_i32_8 = arith.constant 0 : i32
    %9 = arith.cmpi eq, %arg2, %c0_i32_8 : i32
    %10 = arith.extui %9 : i1 to i32
    %c0_i32_9 = arith.constant 0 : i32
    %11 = arith.cmpi ne, %10, %c0_i32_9 : i32
    scf.if %11 {
      %c0_10 = arith.constant 0 : index
      %c0_11 = arith.constant 0 : index
      %12 = vector.load %arg7[%c0_10, %c0_11] : memref<64x128xf32, #tpu.memory_space<vmem>>, vector<64x128xf32>
      %c0_12 = arith.constant 0 : index
      %c0_13 = arith.constant 0 : index
      %13 = vector.load %arg5[%c0_12, %c0_13] : memref<1x128xf32, #tpu.memory_space<vmem>>, vector<1x128xf32>
      %14 = vector.broadcast %13 : vector<1x128xf32> to vector<64x128xf32>
      %15 = arith.addf %12, %14 : vector<64x128xf32>
      %c0_14 = arith.constant 0 : index
      %c0_15 = arith.constant 0 : index
      %16 = vector.load %arg6[%c0_14, %c0_15] : memref<64x128xf32, #tpu.memory_space<vmem>>, vector<64x128xf32>
      tpu.vector_store %arg6[%c0_14, %c0_15], %15 {strides = array<i32>} : memref<64x128xf32, #tpu.memory_space<vmem>>, vector<64x128xf32>,
    } else {
    }
    return
  }
  func.func @transform_0(%arg0: i32, %arg1: i32, %arg2: i32) -> (i32, i32) {
    %c0_i32 = arith.constant 0 : i32
    return %arg0, %arg2 : i32, i32
  }
  func.func @transform_1(%arg0: i32, %arg1: i32, %arg2: i32) -> (i32, i32) {
    %c0_i32 = arith.constant 0 : i32
    return %arg2, %arg1 : i32, i32
  }
  func.func @transform_2(%arg0: i32, %arg1: i32, %arg2: i32) -> (i32, i32) {
    %c0_i32 = arith.constant 0 : i32
    %c0_i32_0 = arith.constant 0 : i32
    return %c0_i32, %arg1 : i32, i32
  }
  func.func @transform_3(%arg0: i32, %arg1: i32, %arg2: i32) -> (i32, i32) {
    %c0_i32 = arith.constant 0 : i32
    return %arg0, %arg1 : i32, i32
  }
}

module attributes {stable_mosaic.version = 11 : i64} {
  func.func @_in_relu_kernel(%arg0: i32, %arg1: i32, %arg2: memref<1x64x32xf32, #tpu.memory_space<vmem>>, %arg3: memref<1x64x32xf32, #tpu.memory_space<vmem>>) attributes {dimension_semantics = [#tpu.dimension_semantics<parallel>, #tpu.dimension_semantics<parallel>], iteration_bounds = array<i64: 1, 1>, scalar_prefetch = 0 : i64, scratch_operands = 0 : i64, tpu.core_type = #tpu.core_type<tc>, window_params = [{transform_indices = @transform_0, window_bounds = array<i64: 1, 64, 32>}, {transform_indices = @transform_1, window_bounds = array<i64: 1, 64, 32>}]} {
    %c0 = arith.constant 0 : index
    %c0_0 = arith.constant 0 : index
    %c0_1 = arith.constant 0 : index
    %0 = vector.load %arg2[%c0, %c0_0, %c0_1] : memref<1x64x32xf32, #tpu.memory_space<vmem>>, vector<1x64x32xf32>
    %cst = arith.constant dense<0.000000e+00> : vector<1x32xf32>
    %1 = vector.multi_reduction <add>, %0, %cst [1] : vector<1x64x32xf32> to vector<1x32xf32>
    %2 = vector.shape_cast %1 : vector<1x32xf32> to vector<1x1x32xf32>
    %cst_2 = arith.constant 1.562500e-02 : f32
    %3 = vector.broadcast %cst_2 : f32 to vector<1x1x32xf32>
    %4 = arith.mulf %2, %3 : vector<1x1x32xf32>
    %5 = arith.mulf %0, %0 : vector<1x64x32xf32>
    %cst_3 = arith.constant dense<0.000000e+00> : vector<1x32xf32>
    %6 = vector.multi_reduction <add>, %5, %cst_3 [1] : vector<1x64x32xf32> to vector<1x32xf32>
    %7 = vector.shape_cast %6 : vector<1x32xf32> to vector<1x1x32xf32>
    %cst_4 = arith.constant 1.562500e-02 : f32
    %8 = vector.broadcast %cst_4 : f32 to vector<1x1x32xf32>
    %9 = arith.mulf %7, %8 : vector<1x1x32xf32>
    %10 = arith.mulf %4, %4 : vector<1x1x32xf32>
    %11 = arith.subf %9, %10 : vector<1x1x32xf32>
    %cst_5 = arith.constant 0.000000e+00 : f32
    %12 = vector.broadcast %cst_5 : f32 to vector<1x1x32xf32>
    %13 = arith.maximumf %11, %12 : vector<1x1x32xf32>
    %14 = vector.broadcast %4 : vector<1x1x32xf32> to vector<1x64x32xf32>
    %15 = arith.subf %0, %14 : vector<1x64x32xf32>
    %cst_6 = arith.constant 9.99999974E-6 : f32
    %16 = vector.broadcast %cst_6 : f32 to vector<1x1x32xf32>
    %17 = arith.addf %13, %16 : vector<1x1x32xf32>
    %18 = math.rsqrt %17 : vector<1x1x32xf32>
    %19 = vector.broadcast %18 : vector<1x1x32xf32> to vector<1x64x32xf32>
    %20 = arith.mulf %15, %19 : vector<1x64x32xf32>
    %cst_7 = arith.constant 0.000000e+00 : f32
    %21 = vector.broadcast %cst_7 : f32 to vector<1x64x32xf32>
    %22 = arith.maximumf %20, %21 : vector<1x64x32xf32>
    %c0_8 = arith.constant 0 : index
    %c0_9 = arith.constant 0 : index
    %c0_10 = arith.constant 0 : index
    %23 = vector.load %arg3[%c0_8, %c0_9, %c0_10] : memref<1x64x32xf32, #tpu.memory_space<vmem>>, vector<1x64x32xf32>
    tpu.vector_store %arg3[%c0_8, %c0_9, %c0_10], %22 {strides = array<i32>} : memref<1x64x32xf32, #tpu.memory_space<vmem>>, vector<1x64x32xf32>,
    return
  }
  func.func @transform_0(%arg0: i32, %arg1: i32) -> (i32, i32, i32) {
    %c0_i32 = arith.constant 0 : i32
    %c0_i32_0 = arith.constant 0 : i32
    return %arg0, %c0_i32, %arg1 : i32, i32, i32
  }
  func.func @transform_1(%arg0: i32, %arg1: i32) -> (i32, i32, i32) {
    %c0_i32 = arith.constant 0 : i32
    %c0_i32_0 = arith.constant 0 : i32
    return %arg0, %c0_i32, %arg1 : i32, i32, i32
  }
}

module attributes {stable_mosaic.version = 11 : i64} {
  func.func @_matmul_bias_kernel(%arg0: i32, %arg1: i32, %arg2: i32, %arg3: memref<16x384xbf16, #tpu.memory_space<vmem>>, %arg4: memref<384x128xbf16, #tpu.memory_space<vmem>>, %arg5: memref<1x128xf32, #tpu.memory_space<vmem>>, %arg6: memref<16x128xf32, #tpu.memory_space<vmem>>, %arg7: memref<16x128xf32, #tpu.memory_space<vmem>>) attributes {dimension_semantics = [#tpu.dimension_semantics<parallel>, #tpu.dimension_semantics<parallel>, #tpu.dimension_semantics<arbitrary>], iteration_bounds = array<i64: 1, 1, 1>, scalar_prefetch = 0 : i64, scratch_operands = 1 : i64, tpu.core_type = #tpu.core_type<tc>, window_params = [{transform_indices = @transform_0, window_bounds = array<i64: 16, 384>}, {transform_indices = @transform_1, window_bounds = array<i64: 384, 128>}, {transform_indices = @transform_2, window_bounds = array<i64: 1, 128>}, {transform_indices = @transform_3, window_bounds = array<i64: 16, 128>}]} {
    %c0_i32 = arith.constant 0 : i32
    %0 = arith.cmpi eq, %arg2, %c0_i32 : i32
    %1 = arith.extui %0 : i1 to i32
    %c0_i32_0 = arith.constant 0 : i32
    %2 = arith.cmpi ne, %1, %c0_i32_0 : i32
    scf.if %2 {
      %cst_10 = arith.constant 0.000000e+00 : f32
      %12 = vector.broadcast %cst_10 : f32 to vector<16x128xf32>
      %c0_11 = arith.constant 0 : index
      %c0_12 = arith.constant 0 : index
      %13 = vector.load %arg7[%c0_11, %c0_12] : memref<16x128xf32, #tpu.memory_space<vmem>>, vector<16x128xf32>
      tpu.vector_store %arg7[%c0_11, %c0_12], %12 {strides = array<i32>} : memref<16x128xf32, #tpu.memory_space<vmem>>, vector<16x128xf32>,
    } else {
    }
    %c0 = arith.constant 0 : index
    %c0_1 = arith.constant 0 : index
    %3 = vector.load %arg7[%c0, %c0_1] : memref<16x128xf32, #tpu.memory_space<vmem>>, vector<16x128xf32>
    %c0_2 = arith.constant 0 : index
    %c0_3 = arith.constant 0 : index
    %4 = vector.load %arg3[%c0_2, %c0_3] : memref<16x384xbf16, #tpu.memory_space<vmem>>, vector<16x384xbf16>
    %c0_4 = arith.constant 0 : index
    %c0_5 = arith.constant 0 : index
    %5 = vector.load %arg4[%c0_4, %c0_5] : memref<384x128xbf16, #tpu.memory_space<vmem>>, vector<384x128xbf16>
    %cst = arith.constant dense<0.000000e+00> : vector<16x128xf32>
    %6 = tpu.matmul %4, %5, %cst {dimension_numbers = #tpu.dot_dimension_numbers<[1], [0], [0], [1], [0, 0, 1, 1], [], []>} : vector<16x384xbf16>, vector<384x128xbf16>, vector<16x128xf32> -> vector<16x128xf32>
    %7 = arith.addf %3, %6 : vector<16x128xf32>
    %c0_6 = arith.constant 0 : index
    %c0_7 = arith.constant 0 : index
    %8 = vector.load %arg7[%c0_6, %c0_7] : memref<16x128xf32, #tpu.memory_space<vmem>>, vector<16x128xf32>
    tpu.vector_store %arg7[%c0_6, %c0_7], %7 {strides = array<i32>} : memref<16x128xf32, #tpu.memory_space<vmem>>, vector<16x128xf32>,
    %c0_i32_8 = arith.constant 0 : i32
    %9 = arith.cmpi eq, %arg2, %c0_i32_8 : i32
    %10 = arith.extui %9 : i1 to i32
    %c0_i32_9 = arith.constant 0 : i32
    %11 = arith.cmpi ne, %10, %c0_i32_9 : i32
    scf.if %11 {
      %c0_10 = arith.constant 0 : index
      %c0_11 = arith.constant 0 : index
      %12 = vector.load %arg7[%c0_10, %c0_11] : memref<16x128xf32, #tpu.memory_space<vmem>>, vector<16x128xf32>
      %c0_12 = arith.constant 0 : index
      %c0_13 = arith.constant 0 : index
      %13 = vector.load %arg5[%c0_12, %c0_13] : memref<1x128xf32, #tpu.memory_space<vmem>>, vector<1x128xf32>
      %14 = vector.broadcast %13 : vector<1x128xf32> to vector<16x128xf32>
      %15 = arith.addf %12, %14 : vector<16x128xf32>
      %c0_14 = arith.constant 0 : index
      %c0_15 = arith.constant 0 : index
      %16 = vector.load %arg6[%c0_14, %c0_15] : memref<16x128xf32, #tpu.memory_space<vmem>>, vector<16x128xf32>
      tpu.vector_store %arg6[%c0_14, %c0_15], %15 {strides = array<i32>} : memref<16x128xf32, #tpu.memory_space<vmem>>, vector<16x128xf32>,
    } else {
    }
    return
  }
  func.func @transform_0(%arg0: i32, %arg1: i32, %arg2: i32) -> (i32, i32) {
    %c0_i32 = arith.constant 0 : i32
    return %arg0, %arg2 : i32, i32
  }
  func.func @transform_1(%arg0: i32, %arg1: i32, %arg2: i32) -> (i32, i32) {
    %c0_i32 = arith.constant 0 : i32
    return %arg2, %arg1 : i32, i32
  }
  func.func @transform_2(%arg0: i32, %arg1: i32, %arg2: i32) -> (i32, i32) {
    %c0_i32 = arith.constant 0 : i32
    %c0_i32_0 = arith.constant 0 : i32
    return %c0_i32, %arg1 : i32, i32
  }
  func.func @transform_3(%arg0: i32, %arg1: i32, %arg2: i32) -> (i32, i32) {
    %c0_i32 = arith.constant 0 : i32
    return %arg0, %arg1 : i32, i32
  }
}

module attributes {stable_mosaic.version = 11 : i64} {
  func.func @_in_relu_kernel(%arg0: i32, %arg1: i32, %arg2: memref<1x16x64xf32, #tpu.memory_space<vmem>>, %arg3: memref<1x16x64xf32, #tpu.memory_space<vmem>>) attributes {dimension_semantics = [#tpu.dimension_semantics<parallel>, #tpu.dimension_semantics<parallel>], iteration_bounds = array<i64: 1, 1>, scalar_prefetch = 0 : i64, scratch_operands = 0 : i64, tpu.core_type = #tpu.core_type<tc>, window_params = [{transform_indices = @transform_0, window_bounds = array<i64: 1, 16, 64>}, {transform_indices = @transform_1, window_bounds = array<i64: 1, 16, 64>}]} {
    %c0 = arith.constant 0 : index
    %c0_0 = arith.constant 0 : index
    %c0_1 = arith.constant 0 : index
    %0 = vector.load %arg2[%c0, %c0_0, %c0_1] : memref<1x16x64xf32, #tpu.memory_space<vmem>>, vector<1x16x64xf32>
    %cst = arith.constant dense<0.000000e+00> : vector<1x64xf32>
    %1 = vector.multi_reduction <add>, %0, %cst [1] : vector<1x16x64xf32> to vector<1x64xf32>
    %2 = vector.shape_cast %1 : vector<1x64xf32> to vector<1x1x64xf32>
    %cst_2 = arith.constant 6.250000e-02 : f32
    %3 = vector.broadcast %cst_2 : f32 to vector<1x1x64xf32>
    %4 = arith.mulf %2, %3 : vector<1x1x64xf32>
    %5 = arith.mulf %0, %0 : vector<1x16x64xf32>
    %cst_3 = arith.constant dense<0.000000e+00> : vector<1x64xf32>
    %6 = vector.multi_reduction <add>, %5, %cst_3 [1] : vector<1x16x64xf32> to vector<1x64xf32>
    %7 = vector.shape_cast %6 : vector<1x64xf32> to vector<1x1x64xf32>
    %cst_4 = arith.constant 6.250000e-02 : f32
    %8 = vector.broadcast %cst_4 : f32 to vector<1x1x64xf32>
    %9 = arith.mulf %7, %8 : vector<1x1x64xf32>
    %10 = arith.mulf %4, %4 : vector<1x1x64xf32>
    %11 = arith.subf %9, %10 : vector<1x1x64xf32>
    %cst_5 = arith.constant 0.000000e+00 : f32
    %12 = vector.broadcast %cst_5 : f32 to vector<1x1x64xf32>
    %13 = arith.maximumf %11, %12 : vector<1x1x64xf32>
    %14 = vector.broadcast %4 : vector<1x1x64xf32> to vector<1x16x64xf32>
    %15 = arith.subf %0, %14 : vector<1x16x64xf32>
    %cst_6 = arith.constant 9.99999974E-6 : f32
    %16 = vector.broadcast %cst_6 : f32 to vector<1x1x64xf32>
    %17 = arith.addf %13, %16 : vector<1x1x64xf32>
    %18 = math.rsqrt %17 : vector<1x1x64xf32>
    %19 = vector.broadcast %18 : vector<1x1x64xf32> to vector<1x16x64xf32>
    %20 = arith.mulf %15, %19 : vector<1x16x64xf32>
    %cst_7 = arith.constant 0.000000e+00 : f32
    %21 = vector.broadcast %cst_7 : f32 to vector<1x16x64xf32>
    %22 = arith.maximumf %20, %21 : vector<1x16x64xf32>
    %c0_8 = arith.constant 0 : index
    %c0_9 = arith.constant 0 : index
    %c0_10 = arith.constant 0 : index
    %23 = vector.load %arg3[%c0_8, %c0_9, %c0_10] : memref<1x16x64xf32, #tpu.memory_space<vmem>>, vector<1x16x64xf32>
    tpu.vector_store %arg3[%c0_8, %c0_9, %c0_10], %22 {strides = array<i32>} : memref<1x16x64xf32, #tpu.memory_space<vmem>>, vector<1x16x64xf32>,
    return
  }
  func.func @transform_0(%arg0: i32, %arg1: i32) -> (i32, i32, i32) {
    %c0_i32 = arith.constant 0 : i32
    %c0_i32_0 = arith.constant 0 : i32
    return %arg0, %c0_i32, %arg1 : i32, i32, i32
  }
  func.func @transform_1(%arg0: i32, %arg1: i32) -> (i32, i32, i32) {
    %c0_i32 = arith.constant 0 : i32
    %c0_i32_0 = arith.constant 0 : i32
    return %arg0, %c0_i32, %arg1 : i32, i32, i32
  }
}

module attributes {stable_mosaic.version = 11 : i64} {
  func.func @_matmul_bias_kernel(%arg0: i32, %arg1: i32, %arg2: i32, %arg3: memref<16x512xbf16, #tpu.memory_space<vmem>>, %arg4: memref<512x128xbf16, #tpu.memory_space<vmem>>, %arg5: memref<1x128xf32, #tpu.memory_space<vmem>>, %arg6: memref<16x128xf32, #tpu.memory_space<vmem>>, %arg7: memref<16x128xf32, #tpu.memory_space<vmem>>) attributes {dimension_semantics = [#tpu.dimension_semantics<parallel>, #tpu.dimension_semantics<parallel>, #tpu.dimension_semantics<arbitrary>], iteration_bounds = array<i64: 1, 1, 2>, scalar_prefetch = 0 : i64, scratch_operands = 1 : i64, tpu.core_type = #tpu.core_type<tc>, window_params = [{transform_indices = @transform_0, window_bounds = array<i64: 16, 512>}, {transform_indices = @transform_1, window_bounds = array<i64: 512, 128>}, {transform_indices = @transform_2, window_bounds = array<i64: 1, 128>}, {transform_indices = @transform_3, window_bounds = array<i64: 16, 128>}]} {
    %c0_i32 = arith.constant 0 : i32
    %0 = arith.cmpi eq, %arg2, %c0_i32 : i32
    %1 = arith.extui %0 : i1 to i32
    %c0_i32_0 = arith.constant 0 : i32
    %2 = arith.cmpi ne, %1, %c0_i32_0 : i32
    scf.if %2 {
      %cst_9 = arith.constant 0.000000e+00 : f32
      %12 = vector.broadcast %cst_9 : f32 to vector<16x128xf32>
      %c0_10 = arith.constant 0 : index
      %c0_11 = arith.constant 0 : index
      %13 = vector.load %arg7[%c0_10, %c0_11] : memref<16x128xf32, #tpu.memory_space<vmem>>, vector<16x128xf32>
      tpu.vector_store %arg7[%c0_10, %c0_11], %12 {strides = array<i32>} : memref<16x128xf32, #tpu.memory_space<vmem>>, vector<16x128xf32>,
    } else {
    }
    %c0 = arith.constant 0 : index
    %c0_1 = arith.constant 0 : index
    %3 = vector.load %arg7[%c0, %c0_1] : memref<16x128xf32, #tpu.memory_space<vmem>>, vector<16x128xf32>
    %c0_2 = arith.constant 0 : index
    %c0_3 = arith.constant 0 : index
    %4 = vector.load %arg3[%c0_2, %c0_3] : memref<16x512xbf16, #tpu.memory_space<vmem>>, vector<16x512xbf16>
    %c0_4 = arith.constant 0 : index
    %c0_5 = arith.constant 0 : index
    %5 = vector.load %arg4[%c0_4, %c0_5] : memref<512x128xbf16, #tpu.memory_space<vmem>>, vector<512x128xbf16>
    %cst = arith.constant dense<0.000000e+00> : vector<16x128xf32>
    %6 = tpu.matmul %4, %5, %cst {dimension_numbers = #tpu.dot_dimension_numbers<[1], [0], [0], [1], [0, 0, 1, 1], [], []>} : vector<16x512xbf16>, vector<512x128xbf16>, vector<16x128xf32> -> vector<16x128xf32>
    %7 = arith.addf %3, %6 : vector<16x128xf32>
    %c0_6 = arith.constant 0 : index
    %c0_7 = arith.constant 0 : index
    %8 = vector.load %arg7[%c0_6, %c0_7] : memref<16x128xf32, #tpu.memory_space<vmem>>, vector<16x128xf32>
    tpu.vector_store %arg7[%c0_6, %c0_7], %7 {strides = array<i32>} : memref<16x128xf32, #tpu.memory_space<vmem>>, vector<16x128xf32>,
    %c1_i32 = arith.constant 1 : i32
    %9 = arith.cmpi eq, %arg2, %c1_i32 : i32
    %10 = arith.extui %9 : i1 to i32
    %c0_i32_8 = arith.constant 0 : i32
    %11 = arith.cmpi ne, %10, %c0_i32_8 : i32
    scf.if %11 {
      %c0_9 = arith.constant 0 : index
      %c0_10 = arith.constant 0 : index
      %12 = vector.load %arg7[%c0_9, %c0_10] : memref<16x128xf32, #tpu.memory_space<vmem>>, vector<16x128xf32>
      %c0_11 = arith.constant 0 : index
      %c0_12 = arith.constant 0 : index
      %13 = vector.load %arg5[%c0_11, %c0_12] : memref<1x128xf32, #tpu.memory_space<vmem>>, vector<1x128xf32>
      %14 = vector.broadcast %13 : vector<1x128xf32> to vector<16x128xf32>
      %15 = arith.addf %12, %14 : vector<16x128xf32>
      %c0_13 = arith.constant 0 : index
      %c0_14 = arith.constant 0 : index
      %16 = vector.load %arg6[%c0_13, %c0_14] : memref<16x128xf32, #tpu.memory_space<vmem>>, vector<16x128xf32>
      tpu.vector_store %arg6[%c0_13, %c0_14], %15 {strides = array<i32>} : memref<16x128xf32, #tpu.memory_space<vmem>>, vector<16x128xf32>,
    } else {
    }
    return
  }
  func.func @transform_0(%arg0: i32, %arg1: i32, %arg2: i32) -> (i32, i32) {
    %c0_i32 = arith.constant 0 : i32
    return %arg0, %arg2 : i32, i32
  }
  func.func @transform_1(%arg0: i32, %arg1: i32, %arg2: i32) -> (i32, i32) {
    %c0_i32 = arith.constant 0 : i32
    return %arg2, %arg1 : i32, i32
  }
  func.func @transform_2(%arg0: i32, %arg1: i32, %arg2: i32) -> (i32, i32) {
    %c0_i32 = arith.constant 0 : i32
    %c0_i32_0 = arith.constant 0 : i32
    return %c0_i32, %arg1 : i32, i32
  }
  func.func @transform_3(%arg0: i32, %arg1: i32, %arg2: i32) -> (i32, i32) {
    %c0_i32 = arith.constant 0 : i32
    return %arg0, %arg1 : i32, i32
  }
}

module attributes {stable_mosaic.version = 11 : i64} {
  func.func @_matmul_bias_kernel(%arg0: i32, %arg1: i32, %arg2: i32, %arg3: memref<16x128xbf16, #tpu.memory_space<vmem>>, %arg4: memref<128x128xbf16, #tpu.memory_space<vmem>>, %arg5: memref<1x128xf32, #tpu.memory_space<vmem>>, %arg6: memref<16x128xf32, #tpu.memory_space<vmem>>, %arg7: memref<16x128xf32, #tpu.memory_space<vmem>>) attributes {dimension_semantics = [#tpu.dimension_semantics<parallel>, #tpu.dimension_semantics<parallel>, #tpu.dimension_semantics<arbitrary>], iteration_bounds = array<i64: 1, 1, 1>, scalar_prefetch = 0 : i64, scratch_operands = 1 : i64, tpu.core_type = #tpu.core_type<tc>, window_params = [{transform_indices = @transform_0, window_bounds = array<i64: 16, 128>}, {transform_indices = @transform_1, window_bounds = array<i64: 128, 128>}, {transform_indices = @transform_2, window_bounds = array<i64: 1, 128>}, {transform_indices = @transform_3, window_bounds = array<i64: 16, 128>}]} {
    %c0_i32 = arith.constant 0 : i32
    %0 = arith.cmpi eq, %arg2, %c0_i32 : i32
    %1 = arith.extui %0 : i1 to i32
    %c0_i32_0 = arith.constant 0 : i32
    %2 = arith.cmpi ne, %1, %c0_i32_0 : i32
    scf.if %2 {
      %cst_10 = arith.constant 0.000000e+00 : f32
      %12 = vector.broadcast %cst_10 : f32 to vector<16x128xf32>
      %c0_11 = arith.constant 0 : index
      %c0_12 = arith.constant 0 : index
      %13 = vector.load %arg7[%c0_11, %c0_12] : memref<16x128xf32, #tpu.memory_space<vmem>>, vector<16x128xf32>
      tpu.vector_store %arg7[%c0_11, %c0_12], %12 {strides = array<i32>} : memref<16x128xf32, #tpu.memory_space<vmem>>, vector<16x128xf32>,
    } else {
    }
    %c0 = arith.constant 0 : index
    %c0_1 = arith.constant 0 : index
    %3 = vector.load %arg7[%c0, %c0_1] : memref<16x128xf32, #tpu.memory_space<vmem>>, vector<16x128xf32>
    %c0_2 = arith.constant 0 : index
    %c0_3 = arith.constant 0 : index
    %4 = vector.load %arg3[%c0_2, %c0_3] : memref<16x128xbf16, #tpu.memory_space<vmem>>, vector<16x128xbf16>
    %c0_4 = arith.constant 0 : index
    %c0_5 = arith.constant 0 : index
    %5 = vector.load %arg4[%c0_4, %c0_5] : memref<128x128xbf16, #tpu.memory_space<vmem>>, vector<128x128xbf16>
    %cst = arith.constant dense<0.000000e+00> : vector<16x128xf32>
    %6 = tpu.matmul %4, %5, %cst {dimension_numbers = #tpu.dot_dimension_numbers<[1], [0], [0], [1], [0, 0, 1, 1], [], []>} : vector<16x128xbf16>, vector<128x128xbf16>, vector<16x128xf32> -> vector<16x128xf32>
    %7 = arith.addf %3, %6 : vector<16x128xf32>
    %c0_6 = arith.constant 0 : index
    %c0_7 = arith.constant 0 : index
    %8 = vector.load %arg7[%c0_6, %c0_7] : memref<16x128xf32, #tpu.memory_space<vmem>>, vector<16x128xf32>
    tpu.vector_store %arg7[%c0_6, %c0_7], %7 {strides = array<i32>} : memref<16x128xf32, #tpu.memory_space<vmem>>, vector<16x128xf32>,
    %c0_i32_8 = arith.constant 0 : i32
    %9 = arith.cmpi eq, %arg2, %c0_i32_8 : i32
    %10 = arith.extui %9 : i1 to i32
    %c0_i32_9 = arith.constant 0 : i32
    %11 = arith.cmpi ne, %10, %c0_i32_9 : i32
    scf.if %11 {
      %c0_10 = arith.constant 0 : index
      %c0_11 = arith.constant 0 : index
      %12 = vector.load %arg7[%c0_10, %c0_11] : memref<16x128xf32, #tpu.memory_space<vmem>>, vector<16x128xf32>
      %c0_12 = arith.constant 0 : index
      %c0_13 = arith.constant 0 : index
      %13 = vector.load %arg5[%c0_12, %c0_13] : memref<1x128xf32, #tpu.memory_space<vmem>>, vector<1x128xf32>
      %14 = vector.broadcast %13 : vector<1x128xf32> to vector<16x128xf32>
      %15 = arith.addf %12, %14 : vector<16x128xf32>
      %c0_14 = arith.constant 0 : index
      %c0_15 = arith.constant 0 : index
      %16 = vector.load %arg6[%c0_14, %c0_15] : memref<16x128xf32, #tpu.memory_space<vmem>>, vector<16x128xf32>
      tpu.vector_store %arg6[%c0_14, %c0_15], %15 {strides = array<i32>} : memref<16x128xf32, #tpu.memory_space<vmem>>, vector<16x128xf32>,
    } else {
    }
    return
  }
  func.func @transform_0(%arg0: i32, %arg1: i32, %arg2: i32) -> (i32, i32) {
    %c0_i32 = arith.constant 0 : i32
    return %arg0, %arg2 : i32, i32
  }
  func.func @transform_1(%arg0: i32, %arg1: i32, %arg2: i32) -> (i32, i32) {
    %c0_i32 = arith.constant 0 : i32
    return %arg2, %arg1 : i32, i32
  }
  func.func @transform_2(%arg0: i32, %arg1: i32, %arg2: i32) -> (i32, i32) {
    %c0_i32 = arith.constant 0 : i32
    %c0_i32_0 = arith.constant 0 : i32
    return %c0_i32, %arg1 : i32, i32
  }
  func.func @transform_3(%arg0: i32, %arg1: i32, %arg2: i32) -> (i32, i32) {
    %c0_i32 = arith.constant 0 : i32
    return %arg0, %arg1 : i32, i32
  }
}

module attributes {stable_mosaic.version = 11 : i64} {
  func.func @_in_relu_kernel(%arg0: i32, %arg1: i32, %arg2: memref<1x4x128xf32, #tpu.memory_space<vmem>>, %arg3: memref<1x4x128xf32, #tpu.memory_space<vmem>>) attributes {dimension_semantics = [#tpu.dimension_semantics<parallel>, #tpu.dimension_semantics<parallel>], iteration_bounds = array<i64: 1, 1>, scalar_prefetch = 0 : i64, scratch_operands = 0 : i64, tpu.core_type = #tpu.core_type<tc>, window_params = [{transform_indices = @transform_0, window_bounds = array<i64: 1, 4, 128>}, {transform_indices = @transform_1, window_bounds = array<i64: 1, 4, 128>}]} {
    %c0 = arith.constant 0 : index
    %c0_0 = arith.constant 0 : index
    %c0_1 = arith.constant 0 : index
    %0 = vector.load %arg2[%c0, %c0_0, %c0_1] : memref<1x4x128xf32, #tpu.memory_space<vmem>>, vector<1x4x128xf32>
    %cst = arith.constant dense<0.000000e+00> : vector<1x128xf32>
    %1 = vector.multi_reduction <add>, %0, %cst [1] : vector<1x4x128xf32> to vector<1x128xf32>
    %2 = vector.shape_cast %1 : vector<1x128xf32> to vector<1x1x128xf32>
    %cst_2 = arith.constant 2.500000e-01 : f32
    %3 = vector.broadcast %cst_2 : f32 to vector<1x1x128xf32>
    %4 = arith.mulf %2, %3 : vector<1x1x128xf32>
    %5 = arith.mulf %0, %0 : vector<1x4x128xf32>
    %cst_3 = arith.constant dense<0.000000e+00> : vector<1x128xf32>
    %6 = vector.multi_reduction <add>, %5, %cst_3 [1] : vector<1x4x128xf32> to vector<1x128xf32>
    %7 = vector.shape_cast %6 : vector<1x128xf32> to vector<1x1x128xf32>
    %cst_4 = arith.constant 2.500000e-01 : f32
    %8 = vector.broadcast %cst_4 : f32 to vector<1x1x128xf32>
    %9 = arith.mulf %7, %8 : vector<1x1x128xf32>
    %10 = arith.mulf %4, %4 : vector<1x1x128xf32>
    %11 = arith.subf %9, %10 : vector<1x1x128xf32>
    %cst_5 = arith.constant 0.000000e+00 : f32
    %12 = vector.broadcast %cst_5 : f32 to vector<1x1x128xf32>
    %13 = arith.maximumf %11, %12 : vector<1x1x128xf32>
    %14 = vector.broadcast %4 : vector<1x1x128xf32> to vector<1x4x128xf32>
    %15 = arith.subf %0, %14 : vector<1x4x128xf32>
    %cst_6 = arith.constant 9.99999974E-6 : f32
    %16 = vector.broadcast %cst_6 : f32 to vector<1x1x128xf32>
    %17 = arith.addf %13, %16 : vector<1x1x128xf32>
    %18 = math.rsqrt %17 : vector<1x1x128xf32>
    %19 = vector.broadcast %18 : vector<1x1x128xf32> to vector<1x4x128xf32>
    %20 = arith.mulf %15, %19 : vector<1x4x128xf32>
    %cst_7 = arith.constant 0.000000e+00 : f32
    %21 = vector.broadcast %cst_7 : f32 to vector<1x4x128xf32>
    %22 = arith.maximumf %20, %21 : vector<1x4x128xf32>
    %c0_8 = arith.constant 0 : index
    %c0_9 = arith.constant 0 : index
    %c0_10 = arith.constant 0 : index
    %23 = vector.load %arg3[%c0_8, %c0_9, %c0_10] : memref<1x4x128xf32, #tpu.memory_space<vmem>>, vector<1x4x128xf32>
    tpu.vector_store %arg3[%c0_8, %c0_9, %c0_10], %22 {strides = array<i32>} : memref<1x4x128xf32, #tpu.memory_space<vmem>>, vector<1x4x128xf32>,
    return
  }
  func.func @transform_0(%arg0: i32, %arg1: i32) -> (i32, i32, i32) {
    %c0_i32 = arith.constant 0 : i32
    %c0_i32_0 = arith.constant 0 : i32
    return %arg0, %c0_i32, %arg1 : i32, i32, i32
  }
  func.func @transform_1(%arg0: i32, %arg1: i32) -> (i32, i32, i32) {
    %c0_i32 = arith.constant 0 : i32
    %c0_i32_0 = arith.constant 0 : i32
    return %arg0, %c0_i32, %arg1 : i32, i32, i32
  }
}

module attributes {stable_mosaic.version = 11 : i64} {
  func.func @_in_relu_kernel(%arg0: i32, %arg1: i32, %arg2: memref<1x4x32xf32, #tpu.memory_space<vmem>>, %arg3: memref<1x4x32xf32, #tpu.memory_space<vmem>>) attributes {dimension_semantics = [#tpu.dimension_semantics<parallel>, #tpu.dimension_semantics<parallel>], iteration_bounds = array<i64: 1, 1>, scalar_prefetch = 0 : i64, scratch_operands = 0 : i64, tpu.core_type = #tpu.core_type<tc>, window_params = [{transform_indices = @transform_0, window_bounds = array<i64: 1, 4, 32>}, {transform_indices = @transform_1, window_bounds = array<i64: 1, 4, 32>}]} {
    %c0 = arith.constant 0 : index
    %c0_0 = arith.constant 0 : index
    %c0_1 = arith.constant 0 : index
    %0 = vector.load %arg2[%c0, %c0_0, %c0_1] : memref<1x4x32xf32, #tpu.memory_space<vmem>>, vector<1x4x32xf32>
    %cst = arith.constant dense<0.000000e+00> : vector<1x32xf32>
    %1 = vector.multi_reduction <add>, %0, %cst [1] : vector<1x4x32xf32> to vector<1x32xf32>
    %2 = vector.shape_cast %1 : vector<1x32xf32> to vector<1x1x32xf32>
    %cst_2 = arith.constant 2.500000e-01 : f32
    %3 = vector.broadcast %cst_2 : f32 to vector<1x1x32xf32>
    %4 = arith.mulf %2, %3 : vector<1x1x32xf32>
    %5 = arith.mulf %0, %0 : vector<1x4x32xf32>
    %cst_3 = arith.constant dense<0.000000e+00> : vector<1x32xf32>
    %6 = vector.multi_reduction <add>, %5, %cst_3 [1] : vector<1x4x32xf32> to vector<1x32xf32>
    %7 = vector.shape_cast %6 : vector<1x32xf32> to vector<1x1x32xf32>
    %cst_4 = arith.constant 2.500000e-01 : f32
    %8 = vector.broadcast %cst_4 : f32 to vector<1x1x32xf32>
    %9 = arith.mulf %7, %8 : vector<1x1x32xf32>
    %10 = arith.mulf %4, %4 : vector<1x1x32xf32>
    %11 = arith.subf %9, %10 : vector<1x1x32xf32>
    %cst_5 = arith.constant 0.000000e+00 : f32
    %12 = vector.broadcast %cst_5 : f32 to vector<1x1x32xf32>
    %13 = arith.maximumf %11, %12 : vector<1x1x32xf32>
    %14 = vector.broadcast %4 : vector<1x1x32xf32> to vector<1x4x32xf32>
    %15 = arith.subf %0, %14 : vector<1x4x32xf32>
    %cst_6 = arith.constant 9.99999974E-6 : f32
    %16 = vector.broadcast %cst_6 : f32 to vector<1x1x32xf32>
    %17 = arith.addf %13, %16 : vector<1x1x32xf32>
    %18 = math.rsqrt %17 : vector<1x1x32xf32>
    %19 = vector.broadcast %18 : vector<1x1x32xf32> to vector<1x4x32xf32>
    %20 = arith.mulf %15, %19 : vector<1x4x32xf32>
    %cst_7 = arith.constant 0.000000e+00 : f32
    %21 = vector.broadcast %cst_7 : f32 to vector<1x4x32xf32>
    %22 = arith.maximumf %20, %21 : vector<1x4x32xf32>
    %c0_8 = arith.constant 0 : index
    %c0_9 = arith.constant 0 : index
    %c0_10 = arith.constant 0 : index
    %23 = vector.load %arg3[%c0_8, %c0_9, %c0_10] : memref<1x4x32xf32, #tpu.memory_space<vmem>>, vector<1x4x32xf32>
    tpu.vector_store %arg3[%c0_8, %c0_9, %c0_10], %22 {strides = array<i32>} : memref<1x4x32xf32, #tpu.memory_space<vmem>>, vector<1x4x32xf32>,
    return
  }
  func.func @transform_0(%arg0: i32, %arg1: i32) -> (i32, i32, i32) {
    %c0_i32 = arith.constant 0 : i32
    %c0_i32_0 = arith.constant 0 : i32
    return %arg0, %c0_i32, %arg1 : i32, i32, i32
  }
  func.func @transform_1(%arg0: i32, %arg1: i32) -> (i32, i32, i32) {
    %c0_i32 = arith.constant 0 : i32
    %c0_i32_0 = arith.constant 0 : i32
    return %arg0, %c0_i32, %arg1 : i32, i32, i32
  }
}

module attributes {stable_mosaic.version = 11 : i64} {
  func.func @_in_res_relu_kernel(%arg0: i32, %arg1: i32, %arg2: memref<1x4x128xf32, #tpu.memory_space<vmem>>, %arg3: memref<1x4x128xf32, #tpu.memory_space<vmem>>, %arg4: memref<1x4x128xf32, #tpu.memory_space<vmem>>) attributes {dimension_semantics = [#tpu.dimension_semantics<parallel>, #tpu.dimension_semantics<parallel>], iteration_bounds = array<i64: 1, 1>, scalar_prefetch = 0 : i64, scratch_operands = 0 : i64, tpu.core_type = #tpu.core_type<tc>, window_params = [{transform_indices = @transform_0, window_bounds = array<i64: 1, 4, 128>}, {transform_indices = @transform_1, window_bounds = array<i64: 1, 4, 128>}, {transform_indices = @transform_2, window_bounds = array<i64: 1, 4, 128>}]} {
    %c0 = arith.constant 0 : index
    %c0_0 = arith.constant 0 : index
    %c0_1 = arith.constant 0 : index
    %0 = vector.load %arg2[%c0, %c0_0, %c0_1] : memref<1x4x128xf32, #tpu.memory_space<vmem>>, vector<1x4x128xf32>
    %cst = arith.constant dense<0.000000e+00> : vector<1x128xf32>
    %1 = vector.multi_reduction <add>, %0, %cst [1] : vector<1x4x128xf32> to vector<1x128xf32>
    %2 = vector.shape_cast %1 : vector<1x128xf32> to vector<1x1x128xf32>
    %cst_2 = arith.constant 2.500000e-01 : f32
    %3 = vector.broadcast %cst_2 : f32 to vector<1x1x128xf32>
    %4 = arith.mulf %2, %3 : vector<1x1x128xf32>
    %5 = arith.mulf %0, %0 : vector<1x4x128xf32>
    %cst_3 = arith.constant dense<0.000000e+00> : vector<1x128xf32>
    %6 = vector.multi_reduction <add>, %5, %cst_3 [1] : vector<1x4x128xf32> to vector<1x128xf32>
    %7 = vector.shape_cast %6 : vector<1x128xf32> to vector<1x1x128xf32>
    %cst_4 = arith.constant 2.500000e-01 : f32
    %8 = vector.broadcast %cst_4 : f32 to vector<1x1x128xf32>
    %9 = arith.mulf %7, %8 : vector<1x1x128xf32>
    %10 = arith.mulf %4, %4 : vector<1x1x128xf32>
    %11 = arith.subf %9, %10 : vector<1x1x128xf32>
    %cst_5 = arith.constant 0.000000e+00 : f32
    %12 = vector.broadcast %cst_5 : f32 to vector<1x1x128xf32>
    %13 = arith.maximumf %11, %12 : vector<1x1x128xf32>
    %14 = vector.broadcast %4 : vector<1x1x128xf32> to vector<1x4x128xf32>
    %15 = arith.subf %0, %14 : vector<1x4x128xf32>
    %cst_6 = arith.constant 9.99999974E-6 : f32
    %16 = vector.broadcast %cst_6 : f32 to vector<1x1x128xf32>
    %17 = arith.addf %13, %16 : vector<1x1x128xf32>
    %18 = math.rsqrt %17 : vector<1x1x128xf32>
    %19 = vector.broadcast %18 : vector<1x1x128xf32> to vector<1x4x128xf32>
    %20 = arith.mulf %15, %19 : vector<1x4x128xf32>
    %c0_7 = arith.constant 0 : index
    %c0_8 = arith.constant 0 : index
    %c0_9 = arith.constant 0 : index
    %21 = vector.load %arg3[%c0_7, %c0_8, %c0_9] : memref<1x4x128xf32, #tpu.memory_space<vmem>>, vector<1x4x128xf32>
    %22 = arith.addf %20, %21 : vector<1x4x128xf32>
    %cst_10 = arith.constant 0.000000e+00 : f32
    %23 = vector.broadcast %cst_10 : f32 to vector<1x4x128xf32>
    %24 = arith.maximumf %22, %23 : vector<1x4x128xf32>
    %c0_11 = arith.constant 0 : index
    %c0_12 = arith.constant 0 : index
    %c0_13 = arith.constant 0 : index
    %25 = vector.load %arg4[%c0_11, %c0_12, %c0_13] : memref<1x4x128xf32, #tpu.memory_space<vmem>>, vector<1x4x128xf32>
    tpu.vector_store %arg4[%c0_11, %c0_12, %c0_13], %24 {strides = array<i32>} : memref<1x4x128xf32, #tpu.memory_space<vmem>>, vector<1x4x128xf32>,
    return
  }
  func.func @transform_0(%arg0: i32, %arg1: i32) -> (i32, i32, i32) {
    %c0_i32 = arith.constant 0 : i32
    %c0_i32_0 = arith.constant 0 : i32
    return %arg0, %c0_i32, %arg1 : i32, i32, i32
  }
  func.func @transform_1(%arg0: i32, %arg1: i32) -> (i32, i32, i32) {
    %c0_i32 = arith.constant 0 : i32
    %c0_i32_0 = arith.constant 0 : i32
    return %arg0, %c0_i32, %arg1 : i32, i32, i32
  }
  func.func @transform_2(%arg0: i32, %arg1: i32) -> (i32, i32, i32) {
    %c0_i32 = arith.constant 0 : i32
    %c0_i32_0 = arith.constant 0 : i32
    return %arg0, %c0_i32, %arg1 : i32, i32, i32
  }
}

module attributes {stable_mosaic.version = 11 : i64} {
  func.func @_in_res_relu_add_kernel(%arg0: i32, %arg1: i32, %arg2: memref<1x4x128xf32, #tpu.memory_space<vmem>>, %arg3: memref<1x4x128xf32, #tpu.memory_space<vmem>>, %arg4: memref<1x4x128xf32, #tpu.memory_space<vmem>>, %arg5: memref<1x4x128xf32, #tpu.memory_space<vmem>>) attributes {dimension_semantics = [#tpu.dimension_semantics<parallel>, #tpu.dimension_semantics<parallel>], iteration_bounds = array<i64: 1, 1>, scalar_prefetch = 0 : i64, scratch_operands = 0 : i64, tpu.core_type = #tpu.core_type<tc>, window_params = [{transform_indices = @transform_0, window_bounds = array<i64: 1, 4, 128>}, {transform_indices = @transform_1, window_bounds = array<i64: 1, 4, 128>}, {transform_indices = @transform_2, window_bounds = array<i64: 1, 4, 128>}, {transform_indices = @transform_3, window_bounds = array<i64: 1, 4, 128>}]} {
    %c0 = arith.constant 0 : index
    %c0_0 = arith.constant 0 : index
    %c0_1 = arith.constant 0 : index
    %0 = vector.load %arg2[%c0, %c0_0, %c0_1] : memref<1x4x128xf32, #tpu.memory_space<vmem>>, vector<1x4x128xf32>
    %cst = arith.constant dense<0.000000e+00> : vector<1x128xf32>
    %1 = vector.multi_reduction <add>, %0, %cst [1] : vector<1x4x128xf32> to vector<1x128xf32>
    %2 = vector.shape_cast %1 : vector<1x128xf32> to vector<1x1x128xf32>
    %cst_2 = arith.constant 2.500000e-01 : f32
    %3 = vector.broadcast %cst_2 : f32 to vector<1x1x128xf32>
    %4 = arith.mulf %2, %3 : vector<1x1x128xf32>
    %5 = arith.mulf %0, %0 : vector<1x4x128xf32>
    %cst_3 = arith.constant dense<0.000000e+00> : vector<1x128xf32>
    %6 = vector.multi_reduction <add>, %5, %cst_3 [1] : vector<1x4x128xf32> to vector<1x128xf32>
    %7 = vector.shape_cast %6 : vector<1x128xf32> to vector<1x1x128xf32>
    %cst_4 = arith.constant 2.500000e-01 : f32
    %8 = vector.broadcast %cst_4 : f32 to vector<1x1x128xf32>
    %9 = arith.mulf %7, %8 : vector<1x1x128xf32>
    %10 = arith.mulf %4, %4 : vector<1x1x128xf32>
    %11 = arith.subf %9, %10 : vector<1x1x128xf32>
    %cst_5 = arith.constant 0.000000e+00 : f32
    %12 = vector.broadcast %cst_5 : f32 to vector<1x1x128xf32>
    %13 = arith.maximumf %11, %12 : vector<1x1x128xf32>
    %14 = vector.broadcast %4 : vector<1x1x128xf32> to vector<1x4x128xf32>
    %15 = arith.subf %0, %14 : vector<1x4x128xf32>
    %cst_6 = arith.constant 9.99999974E-6 : f32
    %16 = vector.broadcast %cst_6 : f32 to vector<1x1x128xf32>
    %17 = arith.addf %13, %16 : vector<1x1x128xf32>
    %18 = math.rsqrt %17 : vector<1x1x128xf32>
    %19 = vector.broadcast %18 : vector<1x1x128xf32> to vector<1x4x128xf32>
    %20 = arith.mulf %15, %19 : vector<1x4x128xf32>
    %c0_7 = arith.constant 0 : index
    %c0_8 = arith.constant 0 : index
    %c0_9 = arith.constant 0 : index
    %21 = vector.load %arg3[%c0_7, %c0_8, %c0_9] : memref<1x4x128xf32, #tpu.memory_space<vmem>>, vector<1x4x128xf32>
    %22 = arith.addf %20, %21 : vector<1x4x128xf32>
    %cst_10 = arith.constant 0.000000e+00 : f32
    %23 = vector.broadcast %cst_10 : f32 to vector<1x4x128xf32>
    %24 = arith.maximumf %22, %23 : vector<1x4x128xf32>
    %c0_11 = arith.constant 0 : index
    %c0_12 = arith.constant 0 : index
    %c0_13 = arith.constant 0 : index
    %25 = vector.load %arg4[%c0_11, %c0_12, %c0_13] : memref<1x4x128xf32, #tpu.memory_space<vmem>>, vector<1x4x128xf32>
    %26 = arith.addf %24, %25 : vector<1x4x128xf32>
    %c0_14 = arith.constant 0 : index
    %c0_15 = arith.constant 0 : index
    %c0_16 = arith.constant 0 : index
    %27 = vector.load %arg5[%c0_14, %c0_15, %c0_16] : memref<1x4x128xf32, #tpu.memory_space<vmem>>, vector<1x4x128xf32>
    tpu.vector_store %arg5[%c0_14, %c0_15, %c0_16], %26 {strides = array<i32>} : memref<1x4x128xf32, #tpu.memory_space<vmem>>, vector<1x4x128xf32>,
    return
  }
  func.func @transform_0(%arg0: i32, %arg1: i32) -> (i32, i32, i32) {
    %c0_i32 = arith.constant 0 : i32
    %c0_i32_0 = arith.constant 0 : i32
    return %arg0, %c0_i32, %arg1 : i32, i32, i32
  }
  func.func @transform_1(%arg0: i32, %arg1: i32) -> (i32, i32, i32) {
    %c0_i32 = arith.constant 0 : i32
    %c0_i32_0 = arith.constant 0 : i32
    return %arg0, %c0_i32, %arg1 : i32, i32, i32
  }
  func.func @transform_2(%arg0: i32, %arg1: i32) -> (i32, i32, i32) {
    %c0_i32 = arith.constant 0 : i32
    %c0_i32_0 = arith.constant 0 : i32
    return %arg0, %c0_i32, %arg1 : i32, i32, i32
  }
  func.func @transform_3(%arg0: i32, %arg1: i32) -> (i32, i32, i32) {
    %c0_i32 = arith.constant 0 : i32
    %c0_i32_0 = arith.constant 0 : i32
    return %arg0, %c0_i32, %arg1 : i32, i32, i32
  }
}

module attributes {stable_mosaic.version = 11 : i64} {
  func.func @_matmul_bias_kernel(%arg0: i32, %arg1: i32, %arg2: i32, %arg3: memref<16x128xbf16, #tpu.memory_space<vmem>>, %arg4: memref<128x128xbf16, #tpu.memory_space<vmem>>, %arg5: memref<1x128xf32, #tpu.memory_space<vmem>>, %arg6: memref<16x128xf32, #tpu.memory_space<vmem>>, %arg7: memref<16x128xf32, #tpu.memory_space<vmem>>) attributes {dimension_semantics = [#tpu.dimension_semantics<parallel>, #tpu.dimension_semantics<parallel>, #tpu.dimension_semantics<arbitrary>], iteration_bounds = array<i64: 1, 1, 1>, scalar_prefetch = 0 : i64, scratch_operands = 1 : i64, tpu.core_type = #tpu.core_type<tc>, window_params = [{transform_indices = @transform_0, window_bounds = array<i64: 16, 128>}, {transform_indices = @transform_1, window_bounds = array<i64: 128, 128>}, {transform_indices = @transform_2, window_bounds = array<i64: 1, 128>}, {transform_indices = @transform_3, window_bounds = array<i64: 16, 128>}]} {
    %c0_i32 = arith.constant 0 : i32
    %0 = arith.cmpi eq, %arg2, %c0_i32 : i32
    %1 = arith.extui %0 : i1 to i32
    %c0_i32_0 = arith.constant 0 : i32
    %2 = arith.cmpi ne, %1, %c0_i32_0 : i32
    scf.if %2 {
      %cst_10 = arith.constant 0.000000e+00 : f32
      %12 = vector.broadcast %cst_10 : f32 to vector<16x128xf32>
      %c0_11 = arith.constant 0 : index
      %c0_12 = arith.constant 0 : index
      %13 = vector.load %arg7[%c0_11, %c0_12] : memref<16x128xf32, #tpu.memory_space<vmem>>, vector<16x128xf32>
      tpu.vector_store %arg7[%c0_11, %c0_12], %12 {strides = array<i32>} : memref<16x128xf32, #tpu.memory_space<vmem>>, vector<16x128xf32>,
    } else {
    }
    %c0 = arith.constant 0 : index
    %c0_1 = arith.constant 0 : index
    %3 = vector.load %arg7[%c0, %c0_1] : memref<16x128xf32, #tpu.memory_space<vmem>>, vector<16x128xf32>
    %c0_2 = arith.constant 0 : index
    %c0_3 = arith.constant 0 : index
    %4 = vector.load %arg3[%c0_2, %c0_3] : memref<16x128xbf16, #tpu.memory_space<vmem>>, vector<16x128xbf16>
    %c0_4 = arith.constant 0 : index
    %c0_5 = arith.constant 0 : index
    %5 = vector.load %arg4[%c0_4, %c0_5] : memref<128x128xbf16, #tpu.memory_space<vmem>>, vector<128x128xbf16>
    %cst = arith.constant dense<0.000000e+00> : vector<16x128xf32>
    %6 = tpu.matmul %4, %5, %cst {dimension_numbers = #tpu.dot_dimension_numbers<[1], [0], [0], [1], [0, 0, 1, 1], [], []>} : vector<16x128xbf16>, vector<128x128xbf16>, vector<16x128xf32> -> vector<16x128xf32>
    %7 = arith.addf %3, %6 : vector<16x128xf32>
    %c0_6 = arith.constant 0 : index
    %c0_7 = arith.constant 0 : index
    %8 = vector.load %arg7[%c0_6, %c0_7] : memref<16x128xf32, #tpu.memory_space<vmem>>, vector<16x128xf32>
    tpu.vector_store %arg7[%c0_6, %c0_7], %7 {strides = array<i32>} : memref<16x128xf32, #tpu.memory_space<vmem>>, vector<16x128xf32>,
    %c0_i32_8 = arith.constant 0 : i32
    %9 = arith.cmpi eq, %arg2, %c0_i32_8 : i32
    %10 = arith.extui %9 : i1 to i32
    %c0_i32_9 = arith.constant 0 : i32
    %11 = arith.cmpi ne, %10, %c0_i32_9 : i32
    scf.if %11 {
      %c0_10 = arith.constant 0 : index
      %c0_11 = arith.constant 0 : index
      %12 = vector.load %arg7[%c0_10, %c0_11] : memref<16x128xf32, #tpu.memory_space<vmem>>, vector<16x128xf32>
      %c0_12 = arith.constant 0 : index
      %c0_13 = arith.constant 0 : index
      %13 = vector.load %arg5[%c0_12, %c0_13] : memref<1x128xf32, #tpu.memory_space<vmem>>, vector<1x128xf32>
      %14 = vector.broadcast %13 : vector<1x128xf32> to vector<16x128xf32>
      %15 = arith.addf %12, %14 : vector<16x128xf32>
      %c0_14 = arith.constant 0 : index
      %c0_15 = arith.constant 0 : index
      %16 = vector.load %arg6[%c0_14, %c0_15] : memref<16x128xf32, #tpu.memory_space<vmem>>, vector<16x128xf32>
      tpu.vector_store %arg6[%c0_14, %c0_15], %15 {strides = array<i32>} : memref<16x128xf32, #tpu.memory_space<vmem>>, vector<16x128xf32>,
    } else {
    }
    return
  }
  func.func @transform_0(%arg0: i32, %arg1: i32, %arg2: i32) -> (i32, i32) {
    %c0_i32 = arith.constant 0 : i32
    return %arg0, %arg2 : i32, i32
  }
  func.func @transform_1(%arg0: i32, %arg1: i32, %arg2: i32) -> (i32, i32) {
    %c0_i32 = arith.constant 0 : i32
    return %arg2, %arg1 : i32, i32
  }
  func.func @transform_2(%arg0: i32, %arg1: i32, %arg2: i32) -> (i32, i32) {
    %c0_i32 = arith.constant 0 : i32
    %c0_i32_0 = arith.constant 0 : i32
    return %c0_i32, %arg1 : i32, i32
  }
  func.func @transform_3(%arg0: i32, %arg1: i32, %arg2: i32) -> (i32, i32) {
    %c0_i32 = arith.constant 0 : i32
    return %arg0, %arg1 : i32, i32
  }
}

module attributes {stable_mosaic.version = 11 : i64} {
  func.func @_matmul_bias_kernel(%arg0: i32, %arg1: i32, %arg2: i32, %arg3: memref<16x256xbf16, #tpu.memory_space<vmem>>, %arg4: memref<256x128xbf16, #tpu.memory_space<vmem>>, %arg5: memref<1x128xf32, #tpu.memory_space<vmem>>, %arg6: memref<16x128xf32, #tpu.memory_space<vmem>>, %arg7: memref<16x128xf32, #tpu.memory_space<vmem>>) attributes {dimension_semantics = [#tpu.dimension_semantics<parallel>, #tpu.dimension_semantics<parallel>, #tpu.dimension_semantics<arbitrary>], iteration_bounds = array<i64: 1, 1, 1>, scalar_prefetch = 0 : i64, scratch_operands = 1 : i64, tpu.core_type = #tpu.core_type<tc>, window_params = [{transform_indices = @transform_0, window_bounds = array<i64: 16, 256>}, {transform_indices = @transform_1, window_bounds = array<i64: 256, 128>}, {transform_indices = @transform_2, window_bounds = array<i64: 1, 128>}, {transform_indices = @transform_3, window_bounds = array<i64: 16, 128>}]} {
    %c0_i32 = arith.constant 0 : i32
    %0 = arith.cmpi eq, %arg2, %c0_i32 : i32
    %1 = arith.extui %0 : i1 to i32
    %c0_i32_0 = arith.constant 0 : i32
    %2 = arith.cmpi ne, %1, %c0_i32_0 : i32
    scf.if %2 {
      %cst_10 = arith.constant 0.000000e+00 : f32
      %12 = vector.broadcast %cst_10 : f32 to vector<16x128xf32>
      %c0_11 = arith.constant 0 : index
      %c0_12 = arith.constant 0 : index
      %13 = vector.load %arg7[%c0_11, %c0_12] : memref<16x128xf32, #tpu.memory_space<vmem>>, vector<16x128xf32>
      tpu.vector_store %arg7[%c0_11, %c0_12], %12 {strides = array<i32>} : memref<16x128xf32, #tpu.memory_space<vmem>>, vector<16x128xf32>,
    } else {
    }
    %c0 = arith.constant 0 : index
    %c0_1 = arith.constant 0 : index
    %3 = vector.load %arg7[%c0, %c0_1] : memref<16x128xf32, #tpu.memory_space<vmem>>, vector<16x128xf32>
    %c0_2 = arith.constant 0 : index
    %c0_3 = arith.constant 0 : index
    %4 = vector.load %arg3[%c0_2, %c0_3] : memref<16x256xbf16, #tpu.memory_space<vmem>>, vector<16x256xbf16>
    %c0_4 = arith.constant 0 : index
    %c0_5 = arith.constant 0 : index
    %5 = vector.load %arg4[%c0_4, %c0_5] : memref<256x128xbf16, #tpu.memory_space<vmem>>, vector<256x128xbf16>
    %cst = arith.constant dense<0.000000e+00> : vector<16x128xf32>
    %6 = tpu.matmul %4, %5, %cst {dimension_numbers = #tpu.dot_dimension_numbers<[1], [0], [0], [1], [0, 0, 1, 1], [], []>} : vector<16x256xbf16>, vector<256x128xbf16>, vector<16x128xf32> -> vector<16x128xf32>
    %7 = arith.addf %3, %6 : vector<16x128xf32>
    %c0_6 = arith.constant 0 : index
    %c0_7 = arith.constant 0 : index
    %8 = vector.load %arg7[%c0_6, %c0_7] : memref<16x128xf32, #tpu.memory_space<vmem>>, vector<16x128xf32>
    tpu.vector_store %arg7[%c0_6, %c0_7], %7 {strides = array<i32>} : memref<16x128xf32, #tpu.memory_space<vmem>>, vector<16x128xf32>,
    %c0_i32_8 = arith.constant 0 : i32
    %9 = arith.cmpi eq, %arg2, %c0_i32_8 : i32
    %10 = arith.extui %9 : i1 to i32
    %c0_i32_9 = arith.constant 0 : i32
    %11 = arith.cmpi ne, %10, %c0_i32_9 : i32
    scf.if %11 {
      %c0_10 = arith.constant 0 : index
      %c0_11 = arith.constant 0 : index
      %12 = vector.load %arg7[%c0_10, %c0_11] : memref<16x128xf32, #tpu.memory_space<vmem>>, vector<16x128xf32>
      %c0_12 = arith.constant 0 : index
      %c0_13 = arith.constant 0 : index
      %13 = vector.load %arg5[%c0_12, %c0_13] : memref<1x128xf32, #tpu.memory_space<vmem>>, vector<1x128xf32>
      %14 = vector.broadcast %13 : vector<1x128xf32> to vector<16x128xf32>
      %15 = arith.addf %12, %14 : vector<16x128xf32>
      %c0_14 = arith.constant 0 : index
      %c0_15 = arith.constant 0 : index
      %16 = vector.load %arg6[%c0_14, %c0_15] : memref<16x128xf32, #tpu.memory_space<vmem>>, vector<16x128xf32>
      tpu.vector_store %arg6[%c0_14, %c0_15], %15 {strides = array<i32>} : memref<16x128xf32, #tpu.memory_space<vmem>>, vector<16x128xf32>,
    } else {
    }
    return
  }
  func.func @transform_0(%arg0: i32, %arg1: i32, %arg2: i32) -> (i32, i32) {
    %c0_i32 = arith.constant 0 : i32
    return %arg0, %arg2 : i32, i32
  }
  func.func @transform_1(%arg0: i32, %arg1: i32, %arg2: i32) -> (i32, i32) {
    %c0_i32 = arith.constant 0 : i32
    return %arg2, %arg1 : i32, i32
  }
  func.func @transform_2(%arg0: i32, %arg1: i32, %arg2: i32) -> (i32, i32) {
    %c0_i32 = arith.constant 0 : i32
    %c0_i32_0 = arith.constant 0 : i32
    return %c0_i32, %arg1 : i32, i32
  }
  func.func @transform_3(%arg0: i32, %arg1: i32, %arg2: i32) -> (i32, i32) {
    %c0_i32 = arith.constant 0 : i32
    return %arg0, %arg1 : i32, i32
  }
}

module attributes {stable_mosaic.version = 11 : i64} {
  func.func @_matmul_bias_kernel(%arg0: i32, %arg1: i32, %arg2: i32, %arg3: memref<16x512xbf16, #tpu.memory_space<vmem>>, %arg4: memref<512x128xbf16, #tpu.memory_space<vmem>>, %arg5: memref<1x128xf32, #tpu.memory_space<vmem>>, %arg6: memref<16x128xf32, #tpu.memory_space<vmem>>, %arg7: memref<16x128xf32, #tpu.memory_space<vmem>>) attributes {dimension_semantics = [#tpu.dimension_semantics<parallel>, #tpu.dimension_semantics<parallel>, #tpu.dimension_semantics<arbitrary>], iteration_bounds = array<i64: 1, 1, 1>, scalar_prefetch = 0 : i64, scratch_operands = 1 : i64, tpu.core_type = #tpu.core_type<tc>, window_params = [{transform_indices = @transform_0, window_bounds = array<i64: 16, 512>}, {transform_indices = @transform_1, window_bounds = array<i64: 512, 128>}, {transform_indices = @transform_2, window_bounds = array<i64: 1, 128>}, {transform_indices = @transform_3, window_bounds = array<i64: 16, 128>}]} {
    %c0_i32 = arith.constant 0 : i32
    %0 = arith.cmpi eq, %arg2, %c0_i32 : i32
    %1 = arith.extui %0 : i1 to i32
    %c0_i32_0 = arith.constant 0 : i32
    %2 = arith.cmpi ne, %1, %c0_i32_0 : i32
    scf.if %2 {
      %cst_10 = arith.constant 0.000000e+00 : f32
      %12 = vector.broadcast %cst_10 : f32 to vector<16x128xf32>
      %c0_11 = arith.constant 0 : index
      %c0_12 = arith.constant 0 : index
      %13 = vector.load %arg7[%c0_11, %c0_12] : memref<16x128xf32, #tpu.memory_space<vmem>>, vector<16x128xf32>
      tpu.vector_store %arg7[%c0_11, %c0_12], %12 {strides = array<i32>} : memref<16x128xf32, #tpu.memory_space<vmem>>, vector<16x128xf32>,
    } else {
    }
    %c0 = arith.constant 0 : index
    %c0_1 = arith.constant 0 : index
    %3 = vector.load %arg7[%c0, %c0_1] : memref<16x128xf32, #tpu.memory_space<vmem>>, vector<16x128xf32>
    %c0_2 = arith.constant 0 : index
    %c0_3 = arith.constant 0 : index
    %4 = vector.load %arg3[%c0_2, %c0_3] : memref<16x512xbf16, #tpu.memory_space<vmem>>, vector<16x512xbf16>
    %c0_4 = arith.constant 0 : index
    %c0_5 = arith.constant 0 : index
    %5 = vector.load %arg4[%c0_4, %c0_5] : memref<512x128xbf16, #tpu.memory_space<vmem>>, vector<512x128xbf16>
    %cst = arith.constant dense<0.000000e+00> : vector<16x128xf32>
    %6 = tpu.matmul %4, %5, %cst {dimension_numbers = #tpu.dot_dimension_numbers<[1], [0], [0], [1], [0, 0, 1, 1], [], []>} : vector<16x512xbf16>, vector<512x128xbf16>, vector<16x128xf32> -> vector<16x128xf32>
    %7 = arith.addf %3, %6 : vector<16x128xf32>
    %c0_6 = arith.constant 0 : index
    %c0_7 = arith.constant 0 : index
    %8 = vector.load %arg7[%c0_6, %c0_7] : memref<16x128xf32, #tpu.memory_space<vmem>>, vector<16x128xf32>
    tpu.vector_store %arg7[%c0_6, %c0_7], %7 {strides = array<i32>} : memref<16x128xf32, #tpu.memory_space<vmem>>, vector<16x128xf32>,
    %c0_i32_8 = arith.constant 0 : i32
    %9 = arith.cmpi eq, %arg2, %c0_i32_8 : i32
    %10 = arith.extui %9 : i1 to i32
    %c0_i32_9 = arith.constant 0 : i32
    %11 = arith.cmpi ne, %10, %c0_i32_9 : i32
    scf.if %11 {
      %c0_10 = arith.constant 0 : index
      %c0_11 = arith.constant 0 : index
      %12 = vector.load %arg7[%c0_10, %c0_11] : memref<16x128xf32, #tpu.memory_space<vmem>>, vector<16x128xf32>
      %c0_12 = arith.constant 0 : index
      %c0_13 = arith.constant 0 : index
      %13 = vector.load %arg5[%c0_12, %c0_13] : memref<1x128xf32, #tpu.memory_space<vmem>>, vector<1x128xf32>
      %14 = vector.broadcast %13 : vector<1x128xf32> to vector<16x128xf32>
      %15 = arith.addf %12, %14 : vector<16x128xf32>
      %c0_14 = arith.constant 0 : index
      %c0_15 = arith.constant 0 : index
      %16 = vector.load %arg6[%c0_14, %c0_15] : memref<16x128xf32, #tpu.memory_space<vmem>>, vector<16x128xf32>
      tpu.vector_store %arg6[%c0_14, %c0_15], %15 {strides = array<i32>} : memref<16x128xf32, #tpu.memory_space<vmem>>, vector<16x128xf32>,
    } else {
    }
    return
  }
  func.func @transform_0(%arg0: i32, %arg1: i32, %arg2: i32) -> (i32, i32) {
    %c0_i32 = arith.constant 0 : i32
    return %arg0, %arg2 : i32, i32
  }
  func.func @transform_1(%arg0: i32, %arg1: i32, %arg2: i32) -> (i32, i32) {
    %c0_i32 = arith.constant 0 : i32
    return %arg2, %arg1 : i32, i32
  }
  func.func @transform_2(%arg0: i32, %arg1: i32, %arg2: i32) -> (i32, i32) {
    %c0_i32 = arith.constant 0 : i32
    %c0_i32_0 = arith.constant 0 : i32
    return %c0_i32, %arg1 : i32, i32
  }
  func.func @transform_3(%arg0: i32, %arg1: i32, %arg2: i32) -> (i32, i32) {
    %c0_i32 = arith.constant 0 : i32
    return %arg0, %arg1 : i32, i32
  }
}

module attributes {stable_mosaic.version = 11 : i64} {
  func.func @_in_relu_add_kernel(%arg0: i32, %arg1: i32, %arg2: memref<1x16x64xf32, #tpu.memory_space<vmem>>, %arg3: memref<1x16x64xf32, #tpu.memory_space<vmem>>, %arg4: memref<1x16x64xf32, #tpu.memory_space<vmem>>) attributes {dimension_semantics = [#tpu.dimension_semantics<parallel>, #tpu.dimension_semantics<parallel>], iteration_bounds = array<i64: 1, 1>, scalar_prefetch = 0 : i64, scratch_operands = 0 : i64, tpu.core_type = #tpu.core_type<tc>, window_params = [{transform_indices = @transform_0, window_bounds = array<i64: 1, 16, 64>}, {transform_indices = @transform_1, window_bounds = array<i64: 1, 16, 64>}, {transform_indices = @transform_2, window_bounds = array<i64: 1, 16, 64>}]} {
    %c0 = arith.constant 0 : index
    %c0_0 = arith.constant 0 : index
    %c0_1 = arith.constant 0 : index
    %0 = vector.load %arg2[%c0, %c0_0, %c0_1] : memref<1x16x64xf32, #tpu.memory_space<vmem>>, vector<1x16x64xf32>
    %cst = arith.constant dense<0.000000e+00> : vector<1x64xf32>
    %1 = vector.multi_reduction <add>, %0, %cst [1] : vector<1x16x64xf32> to vector<1x64xf32>
    %2 = vector.shape_cast %1 : vector<1x64xf32> to vector<1x1x64xf32>
    %cst_2 = arith.constant 6.250000e-02 : f32
    %3 = vector.broadcast %cst_2 : f32 to vector<1x1x64xf32>
    %4 = arith.mulf %2, %3 : vector<1x1x64xf32>
    %5 = arith.mulf %0, %0 : vector<1x16x64xf32>
    %cst_3 = arith.constant dense<0.000000e+00> : vector<1x64xf32>
    %6 = vector.multi_reduction <add>, %5, %cst_3 [1] : vector<1x16x64xf32> to vector<1x64xf32>
    %7 = vector.shape_cast %6 : vector<1x64xf32> to vector<1x1x64xf32>
    %cst_4 = arith.constant 6.250000e-02 : f32
    %8 = vector.broadcast %cst_4 : f32 to vector<1x1x64xf32>
    %9 = arith.mulf %7, %8 : vector<1x1x64xf32>
    %10 = arith.mulf %4, %4 : vector<1x1x64xf32>
    %11 = arith.subf %9, %10 : vector<1x1x64xf32>
    %cst_5 = arith.constant 0.000000e+00 : f32
    %12 = vector.broadcast %cst_5 : f32 to vector<1x1x64xf32>
    %13 = arith.maximumf %11, %12 : vector<1x1x64xf32>
    %14 = vector.broadcast %4 : vector<1x1x64xf32> to vector<1x16x64xf32>
    %15 = arith.subf %0, %14 : vector<1x16x64xf32>
    %cst_6 = arith.constant 9.99999974E-6 : f32
    %16 = vector.broadcast %cst_6 : f32 to vector<1x1x64xf32>
    %17 = arith.addf %13, %16 : vector<1x1x64xf32>
    %18 = math.rsqrt %17 : vector<1x1x64xf32>
    %19 = vector.broadcast %18 : vector<1x1x64xf32> to vector<1x16x64xf32>
    %20 = arith.mulf %15, %19 : vector<1x16x64xf32>
    %cst_7 = arith.constant 0.000000e+00 : f32
    %21 = vector.broadcast %cst_7 : f32 to vector<1x16x64xf32>
    %22 = arith.maximumf %20, %21 : vector<1x16x64xf32>
    %c0_8 = arith.constant 0 : index
    %c0_9 = arith.constant 0 : index
    %c0_10 = arith.constant 0 : index
    %23 = vector.load %arg3[%c0_8, %c0_9, %c0_10] : memref<1x16x64xf32, #tpu.memory_space<vmem>>, vector<1x16x64xf32>
    %24 = arith.addf %22, %23 : vector<1x16x64xf32>
    %c0_11 = arith.constant 0 : index
    %c0_12 = arith.constant 0 : index
    %c0_13 = arith.constant 0 : index
    %25 = vector.load %arg4[%c0_11, %c0_12, %c0_13] : memref<1x16x64xf32, #tpu.memory_space<vmem>>, vector<1x16x64xf32>
    tpu.vector_store %arg4[%c0_11, %c0_12, %c0_13], %24 {strides = array<i32>} : memref<1x16x64xf32, #tpu.memory_space<vmem>>, vector<1x16x64xf32>,
    return
  }
  func.func @transform_0(%arg0: i32, %arg1: i32) -> (i32, i32, i32) {
    %c0_i32 = arith.constant 0 : i32
    %c0_i32_0 = arith.constant 0 : i32
    return %arg0, %c0_i32, %arg1 : i32, i32, i32
  }
  func.func @transform_1(%arg0: i32, %arg1: i32) -> (i32, i32, i32) {
    %c0_i32 = arith.constant 0 : i32
    %c0_i32_0 = arith.constant 0 : i32
    return %arg0, %c0_i32, %arg1 : i32, i32, i32
  }
  func.func @transform_2(%arg0: i32, %arg1: i32) -> (i32, i32, i32) {
    %c0_i32 = arith.constant 0 : i32
    %c0_i32_0 = arith.constant 0 : i32
    return %arg0, %c0_i32, %arg1 : i32, i32, i32
  }
}

module attributes {stable_mosaic.version = 11 : i64} {
  func.func @_in_relu_add_kernel(%arg0: i32, %arg1: i32, %arg2: memref<1x64x32xf32, #tpu.memory_space<vmem>>, %arg3: memref<1x64x32xf32, #tpu.memory_space<vmem>>, %arg4: memref<1x64x32xf32, #tpu.memory_space<vmem>>) attributes {dimension_semantics = [#tpu.dimension_semantics<parallel>, #tpu.dimension_semantics<parallel>], iteration_bounds = array<i64: 1, 1>, scalar_prefetch = 0 : i64, scratch_operands = 0 : i64, tpu.core_type = #tpu.core_type<tc>, window_params = [{transform_indices = @transform_0, window_bounds = array<i64: 1, 64, 32>}, {transform_indices = @transform_1, window_bounds = array<i64: 1, 64, 32>}, {transform_indices = @transform_2, window_bounds = array<i64: 1, 64, 32>}]} {
    %c0 = arith.constant 0 : index
    %c0_0 = arith.constant 0 : index
    %c0_1 = arith.constant 0 : index
    %0 = vector.load %arg2[%c0, %c0_0, %c0_1] : memref<1x64x32xf32, #tpu.memory_space<vmem>>, vector<1x64x32xf32>
    %cst = arith.constant dense<0.000000e+00> : vector<1x32xf32>
    %1 = vector.multi_reduction <add>, %0, %cst [1] : vector<1x64x32xf32> to vector<1x32xf32>
    %2 = vector.shape_cast %1 : vector<1x32xf32> to vector<1x1x32xf32>
    %cst_2 = arith.constant 1.562500e-02 : f32
    %3 = vector.broadcast %cst_2 : f32 to vector<1x1x32xf32>
    %4 = arith.mulf %2, %3 : vector<1x1x32xf32>
    %5 = arith.mulf %0, %0 : vector<1x64x32xf32>
    %cst_3 = arith.constant dense<0.000000e+00> : vector<1x32xf32>
    %6 = vector.multi_reduction <add>, %5, %cst_3 [1] : vector<1x64x32xf32> to vector<1x32xf32>
    %7 = vector.shape_cast %6 : vector<1x32xf32> to vector<1x1x32xf32>
    %cst_4 = arith.constant 1.562500e-02 : f32
    %8 = vector.broadcast %cst_4 : f32 to vector<1x1x32xf32>
    %9 = arith.mulf %7, %8 : vector<1x1x32xf32>
    %10 = arith.mulf %4, %4 : vector<1x1x32xf32>
    %11 = arith.subf %9, %10 : vector<1x1x32xf32>
    %cst_5 = arith.constant 0.000000e+00 : f32
    %12 = vector.broadcast %cst_5 : f32 to vector<1x1x32xf32>
    %13 = arith.maximumf %11, %12 : vector<1x1x32xf32>
    %14 = vector.broadcast %4 : vector<1x1x32xf32> to vector<1x64x32xf32>
    %15 = arith.subf %0, %14 : vector<1x64x32xf32>
    %cst_6 = arith.constant 9.99999974E-6 : f32
    %16 = vector.broadcast %cst_6 : f32 to vector<1x1x32xf32>
    %17 = arith.addf %13, %16 : vector<1x1x32xf32>
    %18 = math.rsqrt %17 : vector<1x1x32xf32>
    %19 = vector.broadcast %18 : vector<1x1x32xf32> to vector<1x64x32xf32>
    %20 = arith.mulf %15, %19 : vector<1x64x32xf32>
    %cst_7 = arith.constant 0.000000e+00 : f32
    %21 = vector.broadcast %cst_7 : f32 to vector<1x64x32xf32>
    %22 = arith.maximumf %20, %21 : vector<1x64x32xf32>
    %c0_8 = arith.constant 0 : index
    %c0_9 = arith.constant 0 : index
    %c0_10 = arith.constant 0 : index
    %23 = vector.load %arg3[%c0_8, %c0_9, %c0_10] : memref<1x64x32xf32, #tpu.memory_space<vmem>>, vector<1x64x32xf32>
    %24 = arith.addf %22, %23 : vector<1x64x32xf32>
    %c0_11 = arith.constant 0 : index
    %c0_12 = arith.constant 0 : index
    %c0_13 = arith.constant 0 : index
    %25 = vector.load %arg4[%c0_11, %c0_12, %c0_13] : memref<1x64x32xf32, #tpu.memory_space<vmem>>, vector<1x64x32xf32>
    tpu.vector_store %arg4[%c0_11, %c0_12, %c0_13], %24 {strides = array<i32>} : memref<1x64x32xf32, #tpu.memory_space<vmem>>, vector<1x64x32xf32>,
    return
  }
  func.func @transform_0(%arg0: i32, %arg1: i32) -> (i32, i32, i32) {
    %c0_i32 = arith.constant 0 : i32
    %c0_i32_0 = arith.constant 0 : i32
    return %arg0, %c0_i32, %arg1 : i32, i32, i32
  }
  func.func @transform_1(%arg0: i32, %arg1: i32) -> (i32, i32, i32) {
    %c0_i32 = arith.constant 0 : i32
    %c0_i32_0 = arith.constant 0 : i32
    return %arg0, %c0_i32, %arg1 : i32, i32, i32
  }
  func.func @transform_2(%arg0: i32, %arg1: i32) -> (i32, i32, i32) {
    %c0_i32 = arith.constant 0 : i32
    %c0_i32_0 = arith.constant 0 : i32
    return %arg0, %c0_i32, %arg1 : i32, i32, i32
  }
}

module attributes {stable_mosaic.version = 11 : i64} {
  func.func @_matmul_bias_kernel(%arg0: i32, %arg1: i32, %arg2: i32, %arg3: memref<64x128xbf16, #tpu.memory_space<vmem>>, %arg4: memref<128x128xbf16, #tpu.memory_space<vmem>>, %arg5: memref<1x128xf32, #tpu.memory_space<vmem>>, %arg6: memref<64x128xf32, #tpu.memory_space<vmem>>, %arg7: memref<64x128xf32, #tpu.memory_space<vmem>>) attributes {dimension_semantics = [#tpu.dimension_semantics<parallel>, #tpu.dimension_semantics<parallel>, #tpu.dimension_semantics<arbitrary>], iteration_bounds = array<i64: 1, 1, 1>, scalar_prefetch = 0 : i64, scratch_operands = 1 : i64, tpu.core_type = #tpu.core_type<tc>, window_params = [{transform_indices = @transform_0, window_bounds = array<i64: 64, 128>}, {transform_indices = @transform_1, window_bounds = array<i64: 128, 128>}, {transform_indices = @transform_2, window_bounds = array<i64: 1, 128>}, {transform_indices = @transform_3, window_bounds = array<i64: 64, 128>}]} {
    %c0_i32 = arith.constant 0 : i32
    %0 = arith.cmpi eq, %arg2, %c0_i32 : i32
    %1 = arith.extui %0 : i1 to i32
    %c0_i32_0 = arith.constant 0 : i32
    %2 = arith.cmpi ne, %1, %c0_i32_0 : i32
    scf.if %2 {
      %cst_10 = arith.constant 0.000000e+00 : f32
      %12 = vector.broadcast %cst_10 : f32 to vector<64x128xf32>
      %c0_11 = arith.constant 0 : index
      %c0_12 = arith.constant 0 : index
      %13 = vector.load %arg7[%c0_11, %c0_12] : memref<64x128xf32, #tpu.memory_space<vmem>>, vector<64x128xf32>
      tpu.vector_store %arg7[%c0_11, %c0_12], %12 {strides = array<i32>} : memref<64x128xf32, #tpu.memory_space<vmem>>, vector<64x128xf32>,
    } else {
    }
    %c0 = arith.constant 0 : index
    %c0_1 = arith.constant 0 : index
    %3 = vector.load %arg7[%c0, %c0_1] : memref<64x128xf32, #tpu.memory_space<vmem>>, vector<64x128xf32>
    %c0_2 = arith.constant 0 : index
    %c0_3 = arith.constant 0 : index
    %4 = vector.load %arg3[%c0_2, %c0_3] : memref<64x128xbf16, #tpu.memory_space<vmem>>, vector<64x128xbf16>
    %c0_4 = arith.constant 0 : index
    %c0_5 = arith.constant 0 : index
    %5 = vector.load %arg4[%c0_4, %c0_5] : memref<128x128xbf16, #tpu.memory_space<vmem>>, vector<128x128xbf16>
    %cst = arith.constant dense<0.000000e+00> : vector<64x128xf32>
    %6 = tpu.matmul %4, %5, %cst {dimension_numbers = #tpu.dot_dimension_numbers<[1], [0], [0], [1], [0, 0, 1, 1], [], []>} : vector<64x128xbf16>, vector<128x128xbf16>, vector<64x128xf32> -> vector<64x128xf32>
    %7 = arith.addf %3, %6 : vector<64x128xf32>
    %c0_6 = arith.constant 0 : index
    %c0_7 = arith.constant 0 : index
    %8 = vector.load %arg7[%c0_6, %c0_7] : memref<64x128xf32, #tpu.memory_space<vmem>>, vector<64x128xf32>
    tpu.vector_store %arg7[%c0_6, %c0_7], %7 {strides = array<i32>} : memref<64x128xf32, #tpu.memory_space<vmem>>, vector<64x128xf32>,
    %c0_i32_8 = arith.constant 0 : i32
    %9 = arith.cmpi eq, %arg2, %c0_i32_8 : i32
    %10 = arith.extui %9 : i1 to i32
    %c0_i32_9 = arith.constant 0 : i32
    %11 = arith.cmpi ne, %10, %c0_i32_9 : i32
    scf.if %11 {
      %c0_10 = arith.constant 0 : index
      %c0_11 = arith.constant 0 : index
      %12 = vector.load %arg7[%c0_10, %c0_11] : memref<64x128xf32, #tpu.memory_space<vmem>>, vector<64x128xf32>
      %c0_12 = arith.constant 0 : index
      %c0_13 = arith.constant 0 : index
      %13 = vector.load %arg5[%c0_12, %c0_13] : memref<1x128xf32, #tpu.memory_space<vmem>>, vector<1x128xf32>
      %14 = vector.broadcast %13 : vector<1x128xf32> to vector<64x128xf32>
      %15 = arith.addf %12, %14 : vector<64x128xf32>
      %c0_14 = arith.constant 0 : index
      %c0_15 = arith.constant 0 : index
      %16 = vector.load %arg6[%c0_14, %c0_15] : memref<64x128xf32, #tpu.memory_space<vmem>>, vector<64x128xf32>
      tpu.vector_store %arg6[%c0_14, %c0_15], %15 {strides = array<i32>} : memref<64x128xf32, #tpu.memory_space<vmem>>, vector<64x128xf32>,
    } else {
    }
    return
  }
  func.func @transform_0(%arg0: i32, %arg1: i32, %arg2: i32) -> (i32, i32) {
    %c0_i32 = arith.constant 0 : i32
    return %arg0, %arg2 : i32, i32
  }
  func.func @transform_1(%arg0: i32, %arg1: i32, %arg2: i32) -> (i32, i32) {
    %c0_i32 = arith.constant 0 : i32
    return %arg2, %arg1 : i32, i32
  }
  func.func @transform_2(%arg0: i32, %arg1: i32, %arg2: i32) -> (i32, i32) {
    %c0_i32 = arith.constant 0 : i32
    %c0_i32_0 = arith.constant 0 : i32
    return %c0_i32, %arg1 : i32, i32
  }
  func.func @transform_3(%arg0: i32, %arg1: i32, %arg2: i32) -> (i32, i32) {
    %c0_i32 = arith.constant 0 : i32
    return %arg0, %arg1 : i32, i32
  }
}

module attributes {stable_mosaic.version = 11 : i64} {
  func.func @_in_relu_add_kernel(%arg0: i32, %arg1: i32, %arg2: memref<1x256x16xf32, #tpu.memory_space<vmem>>, %arg3: memref<1x256x16xf32, #tpu.memory_space<vmem>>, %arg4: memref<1x256x16xf32, #tpu.memory_space<vmem>>) attributes {dimension_semantics = [#tpu.dimension_semantics<parallel>, #tpu.dimension_semantics<parallel>], iteration_bounds = array<i64: 1, 1>, scalar_prefetch = 0 : i64, scratch_operands = 0 : i64, tpu.core_type = #tpu.core_type<tc>, window_params = [{transform_indices = @transform_0, window_bounds = array<i64: 1, 256, 16>}, {transform_indices = @transform_1, window_bounds = array<i64: 1, 256, 16>}, {transform_indices = @transform_2, window_bounds = array<i64: 1, 256, 16>}]} {
    %c0 = arith.constant 0 : index
    %c0_0 = arith.constant 0 : index
    %c0_1 = arith.constant 0 : index
    %0 = vector.load %arg2[%c0, %c0_0, %c0_1] : memref<1x256x16xf32, #tpu.memory_space<vmem>>, vector<1x256x16xf32>
    %cst = arith.constant dense<0.000000e+00> : vector<1x16xf32>
    %1 = vector.multi_reduction <add>, %0, %cst [1] : vector<1x256x16xf32> to vector<1x16xf32>
    %2 = vector.shape_cast %1 : vector<1x16xf32> to vector<1x1x16xf32>
    %cst_2 = arith.constant 3.906250e-03 : f32
    %3 = vector.broadcast %cst_2 : f32 to vector<1x1x16xf32>
    %4 = arith.mulf %2, %3 : vector<1x1x16xf32>
    %5 = arith.mulf %0, %0 : vector<1x256x16xf32>
    %cst_3 = arith.constant dense<0.000000e+00> : vector<1x16xf32>
    %6 = vector.multi_reduction <add>, %5, %cst_3 [1] : vector<1x256x16xf32> to vector<1x16xf32>
    %7 = vector.shape_cast %6 : vector<1x16xf32> to vector<1x1x16xf32>
    %cst_4 = arith.constant 3.906250e-03 : f32
    %8 = vector.broadcast %cst_4 : f32 to vector<1x1x16xf32>
    %9 = arith.mulf %7, %8 : vector<1x1x16xf32>
    %10 = arith.mulf %4, %4 : vector<1x1x16xf32>
    %11 = arith.subf %9, %10 : vector<1x1x16xf32>
    %cst_5 = arith.constant 0.000000e+00 : f32
    %12 = vector.broadcast %cst_5 : f32 to vector<1x1x16xf32>
    %13 = arith.maximumf %11, %12 : vector<1x1x16xf32>
    %14 = vector.broadcast %4 : vector<1x1x16xf32> to vector<1x256x16xf32>
    %15 = arith.subf %0, %14 : vector<1x256x16xf32>
    %cst_6 = arith.constant 9.99999974E-6 : f32
    %16 = vector.broadcast %cst_6 : f32 to vector<1x1x16xf32>
    %17 = arith.addf %13, %16 : vector<1x1x16xf32>
    %18 = math.rsqrt %17 : vector<1x1x16xf32>
    %19 = vector.broadcast %18 : vector<1x1x16xf32> to vector<1x256x16xf32>
    %20 = arith.mulf %15, %19 : vector<1x256x16xf32>
    %cst_7 = arith.constant 0.000000e+00 : f32
    %21 = vector.broadcast %cst_7 : f32 to vector<1x256x16xf32>
    %22 = arith.maximumf %20, %21 : vector<1x256x16xf32>
    %c0_8 = arith.constant 0 : index
    %c0_9 = arith.constant 0 : index
    %c0_10 = arith.constant 0 : index
    %23 = vector.load %arg3[%c0_8, %c0_9, %c0_10] : memref<1x256x16xf32, #tpu.memory_space<vmem>>, vector<1x256x16xf32>
    %24 = arith.addf %22, %23 : vector<1x256x16xf32>
    %c0_11 = arith.constant 0 : index
    %c0_12 = arith.constant 0 : index
    %c0_13 = arith.constant 0 : index
    %25 = vector.load %arg4[%c0_11, %c0_12, %c0_13] : memref<1x256x16xf32, #tpu.memory_space<vmem>>, vector<1x256x16xf32>
    tpu.vector_store %arg4[%c0_11, %c0_12, %c0_13], %24 {strides = array<i32>} : memref<1x256x16xf32, #tpu.memory_space<vmem>>, vector<1x256x16xf32>,
    return
  }
  func.func @transform_0(%arg0: i32, %arg1: i32) -> (i32, i32, i32) {
    %c0_i32 = arith.constant 0 : i32
    %c0_i32_0 = arith.constant 0 : i32
    return %arg0, %c0_i32, %arg1 : i32, i32, i32
  }
  func.func @transform_1(%arg0: i32, %arg1: i32) -> (i32, i32, i32) {
    %c0_i32 = arith.constant 0 : i32
    %c0_i32_0 = arith.constant 0 : i32
    return %arg0, %c0_i32, %arg1 : i32, i32, i32
  }
  func.func @transform_2(%arg0: i32, %arg1: i32) -> (i32, i32, i32) {
    %c0_i32 = arith.constant 0 : i32
    %c0_i32_0 = arith.constant 0 : i32
    return %arg0, %c0_i32, %arg1 : i32, i32, i32
  }
}

module attributes {stable_mosaic.version = 11 : i64} {
  func.func @_matmul_bias_kernel(%arg0: i32, %arg1: i32, %arg2: i32, %arg3: memref<256x512xbf16, #tpu.memory_space<vmem>>, %arg4: memref<512x128xbf16, #tpu.memory_space<vmem>>, %arg5: memref<1x128xf32, #tpu.memory_space<vmem>>, %arg6: memref<256x128xf32, #tpu.memory_space<vmem>>, %arg7: memref<256x128xf32, #tpu.memory_space<vmem>>) attributes {dimension_semantics = [#tpu.dimension_semantics<parallel>, #tpu.dimension_semantics<parallel>, #tpu.dimension_semantics<arbitrary>], iteration_bounds = array<i64: 4, 1, 1>, scalar_prefetch = 0 : i64, scratch_operands = 1 : i64, tpu.core_type = #tpu.core_type<tc>, window_params = [{transform_indices = @transform_0, window_bounds = array<i64: 256, 512>}, {transform_indices = @transform_1, window_bounds = array<i64: 512, 128>}, {transform_indices = @transform_2, window_bounds = array<i64: 1, 128>}, {transform_indices = @transform_3, window_bounds = array<i64: 256, 128>}]} {
    %c0_i32 = arith.constant 0 : i32
    %0 = arith.cmpi eq, %arg2, %c0_i32 : i32
    %1 = arith.extui %0 : i1 to i32
    %c0_i32_0 = arith.constant 0 : i32
    %2 = arith.cmpi ne, %1, %c0_i32_0 : i32
    scf.if %2 {
      %cst_10 = arith.constant 0.000000e+00 : f32
      %12 = vector.broadcast %cst_10 : f32 to vector<256x128xf32>
      %c0_11 = arith.constant 0 : index
      %c0_12 = arith.constant 0 : index
      %13 = vector.load %arg7[%c0_11, %c0_12] : memref<256x128xf32, #tpu.memory_space<vmem>>, vector<256x128xf32>
      tpu.vector_store %arg7[%c0_11, %c0_12], %12 {strides = array<i32>} : memref<256x128xf32, #tpu.memory_space<vmem>>, vector<256x128xf32>,
    } else {
    }
    %c0 = arith.constant 0 : index
    %c0_1 = arith.constant 0 : index
    %3 = vector.load %arg7[%c0, %c0_1] : memref<256x128xf32, #tpu.memory_space<vmem>>, vector<256x128xf32>
    %c0_2 = arith.constant 0 : index
    %c0_3 = arith.constant 0 : index
    %4 = vector.load %arg3[%c0_2, %c0_3] : memref<256x512xbf16, #tpu.memory_space<vmem>>, vector<256x512xbf16>
    %c0_4 = arith.constant 0 : index
    %c0_5 = arith.constant 0 : index
    %5 = vector.load %arg4[%c0_4, %c0_5] : memref<512x128xbf16, #tpu.memory_space<vmem>>, vector<512x128xbf16>
    %cst = arith.constant dense<0.000000e+00> : vector<256x128xf32>
    %6 = tpu.matmul %4, %5, %cst {dimension_numbers = #tpu.dot_dimension_numbers<[1], [0], [0], [1], [0, 0, 1, 1], [], []>} : vector<256x512xbf16>, vector<512x128xbf16>, vector<256x128xf32> -> vector<256x128xf32>
    %7 = arith.addf %3, %6 : vector<256x128xf32>
    %c0_6 = arith.constant 0 : index
    %c0_7 = arith.constant 0 : index
    %8 = vector.load %arg7[%c0_6, %c0_7] : memref<256x128xf32, #tpu.memory_space<vmem>>, vector<256x128xf32>
    tpu.vector_store %arg7[%c0_6, %c0_7], %7 {strides = array<i32>} : memref<256x128xf32, #tpu.memory_space<vmem>>, vector<256x128xf32>,
    %c0_i32_8 = arith.constant 0 : i32
    %9 = arith.cmpi eq, %arg2, %c0_i32_8 : i32
    %10 = arith.extui %9 : i1 to i32
    %c0_i32_9 = arith.constant 0 : i32
    %11 = arith.cmpi ne, %10, %c0_i32_9 : i32
    scf.if %11 {
      %c0_10 = arith.constant 0 : index
      %c0_11 = arith.constant 0 : index
      %12 = vector.load %arg7[%c0_10, %c0_11] : memref<256x128xf32, #tpu.memory_space<vmem>>, vector<256x128xf32>
      %c0_12 = arith.constant 0 : index
      %c0_13 = arith.constant 0 : index
      %13 = vector.load %arg5[%c0_12, %c0_13] : memref<1x128xf32, #tpu.memory_space<vmem>>, vector<1x128xf32>
      %14 = vector.broadcast %13 : vector<1x128xf32> to vector<256x128xf32>
      %15 = arith.addf %12, %14 : vector<256x128xf32>
      %c0_14 = arith.constant 0 : index
      %c0_15 = arith.constant 0 : index
      %16 = vector.load %arg6[%c0_14, %c0_15] : memref<256x128xf32, #tpu.memory_space<vmem>>, vector<256x128xf32>
      tpu.vector_store %arg6[%c0_14, %c0_15], %15 {strides = array<i32>} : memref<256x128xf32, #tpu.memory_space<vmem>>, vector<256x128xf32>,
    } else {
    }
    return
  }
  func.func @transform_0(%arg0: i32, %arg1: i32, %arg2: i32) -> (i32, i32) {
    %c0_i32 = arith.constant 0 : i32
    return %arg0, %arg2 : i32, i32
  }
  func.func @transform_1(%arg0: i32, %arg1: i32, %arg2: i32) -> (i32, i32) {
    %c0_i32 = arith.constant 0 : i32
    return %arg2, %arg1 : i32, i32
  }
  func.func @transform_2(%arg0: i32, %arg1: i32, %arg2: i32) -> (i32, i32) {
    %c0_i32 = arith.constant 0 : i32
    %c0_i32_0 = arith.constant 0 : i32
    return %c0_i32, %arg1 : i32, i32
  }
  func.func @transform_3(%arg0: i32, %arg1: i32, %arg2: i32) -> (i32, i32) {
    %c0_i32 = arith.constant 0 : i32
    return %arg0, %arg1 : i32, i32
  }
}

module attributes {stable_mosaic.version = 11 : i64} {
  func.func @_tanh_kernel(%arg0: i32, %arg1: i32, %arg2: memref<1x1024x3xf32, #tpu.memory_space<vmem>>, %arg3: memref<1x1024x3xf32, #tpu.memory_space<vmem>>) attributes {dimension_semantics = [#tpu.dimension_semantics<parallel>, #tpu.dimension_semantics<parallel>], iteration_bounds = array<i64: 1, 1>, scalar_prefetch = 0 : i64, scratch_operands = 0 : i64, tpu.core_type = #tpu.core_type<tc>, window_params = [{transform_indices = @transform_0, window_bounds = array<i64: 1, 1024, 3>}, {transform_indices = @transform_1, window_bounds = array<i64: 1, 1024, 3>}]} {
    %c0 = arith.constant 0 : index
    %c0_0 = arith.constant 0 : index
    %c0_1 = arith.constant 0 : index
    %0 = vector.load %arg2[%c0, %c0_0, %c0_1] : memref<1x1024x3xf32, #tpu.memory_space<vmem>>, vector<1x1024x3xf32>
    %1 = math.tanh %0 : vector<1x1024x3xf32>
    %c0_2 = arith.constant 0 : index
    %c0_3 = arith.constant 0 : index
    %c0_4 = arith.constant 0 : index
    %2 = vector.load %arg3[%c0_2, %c0_3, %c0_4] : memref<1x1024x3xf32, #tpu.memory_space<vmem>>, vector<1x1024x3xf32>
    tpu.vector_store %arg3[%c0_2, %c0_3, %c0_4], %1 {strides = array<i32>} : memref<1x1024x3xf32, #tpu.memory_space<vmem>>, vector<1x1024x3xf32>,
    return
  }
  func.func @transform_0(%arg0: i32, %arg1: i32) -> (i32, i32, i32) {
    %c0_i32 = arith.constant 0 : i32
    %c0_i32_0 = arith.constant 0 : i32
    return %arg0, %c0_i32, %arg1 : i32, i32, i32
  }
  func.func @transform_1(%arg0: i32, %arg1: i32) -> (i32, i32, i32) {
    %c0_i32 = arith.constant 0 : i32
    %c0_i32_0 = arith.constant 0 : i32
    return %arg0, %c0_i32, %arg1 : i32, i32, i32
  }
}

</mosaic_0001>

<bundles_post_ra>
// kernel: global_generator_forward.86
= control target key start
LH: loop header
LB: loop body
LE: loop exit
PB: predicated region body
PF: predicated region fallthrough
CT: control target
= control target key end

     0   :  { %s1425_s12 = smov 0   ;;  %s1427_s13 = smov 0   ;;  %s1618_s0 = inlined_call_operand.vmem [shape: bf16[1024,256], index: 0, kind: input, shape index: {}]   ;;  %s1619_s1 = inlined_call_operand.vmem [shape: bf16[256,128], index: 1, kind: input, shape index: {}]   ;;  %s1620_s2 = inlined_call_operand.vmem [shape: f32[1,128], index: 2, kind: input, shape index: {}]   ;;  %s1621_s3 = inlined_call_operand.vmem [shape: f32[1024,128], index: 3, kind: output, shape index: {}]  }
   0x1   :  { %s1429_s14 = smov 0  }
   0x2 LB: > { %s32_s15 = sadd.s32 1, %s1399_s13  ;;  %p1107_p0 = scmp.ge.s32.totalorder %s1403_s14, 1  ;;  %s1403_s14 = sphi %s1429_s14, %s13_s14   ;;  %s1399_s13 = sphi %s1427_s13, %s1623_s13   ;;  %s1395_s12 = sphi %s1425_s12, %s1622_s12  }
   0x3   : > { %p34_p1 = scmp.ge.s32.totalorder %s32_s15, 4  ;;  %p191_p2 = scmp.lt.s32.totalorder %s1403_s14, 5 }
   0x5   : > { %s1625_s15 = smov (%p34_p1, %s32_s15), 0  ;;  %p192_p3 = pnand %p1107_p0, %p191_p2 }
   0x6   : > { %v1317_v0 = vld [vmem:[%s1619_s1 + $0x40] sm:$0xff] (!%p192_p3)   ;;  %s1108_s18 = sshll.u32 (!%p192_p3), %s1395_s12, 5  ;;  %v1319_v2 = vld [vmem:[%s1619_s1 + $0x48] sm:$0xff] (!%p192_p3)   ;;  %v1321_v4 = vld [vmem:[%s1619_s1 + $0x50] sm:$0xff] (!%p192_p3)  }
   0x7   : > { %195 = sbr.rel (%p192_p3) target bundleno = 315 (0x13b), region = 32  ;;  %v1318_v1 = vld [vmem:[%s1619_s1] sm:$0xff] (!%p192_p3)   ;;  %1165 = vmatprep.subr.bf16.mxu0 (!%p192_p3), %v1317_v0  ;;  %1277 = vmatprep.subr.bf16.mxu1 (!%p192_p3), %v1317_v0  ;;  %v1320_v3 = vld [vmem:[%s1619_s1 + $0x8] sm:$0xff] (!%p192_p3)   ;;  %p236_p4 = scmp.lt.s32.totalorder (!%p192_p3), %s1108_s18, 127  ;;  %v1322_v5 = vld [vmem:[%s1619_s1 + $0x10] sm:$0xff] (!%p192_p3)  }
   0x8   : > { %1166 = vmatpush3.bf16.msra.mxu0 (!%p192_p3), %v1318_v1  ;;  %1285 = vmatpush3.bf16.msra.mxu1 (!%p192_p3), %v1318_v1  ;;  %v1323_v6 = vld [vmem:[%s1619_s1 + $0x58] sm:$0xff] (!%p192_p3)   ;;  %v1325_v8 = vld [vmem:[%s1619_s1 + $0x60] sm:$0xff] (!%p192_p3)   ;;  %v1327_v10 = vld [vmem:[%s1619_s1 + $0x68] sm:$0xff] (!%p192_p3)  }
   0x9   : > { %1167 = vmatprep.subr.bf16.mxu0 (!%p192_p3), %v1319_v2  ;;  %1278 = vmatprep.subr.bf16.mxu1 (!%p192_p3), %v1319_v2  ;;  %v1324_v7 = vld [vmem:[%s1619_s1 + $0x18] sm:$0xff] (!%p192_p3)   ;;  %v1326_v9 = vld [vmem:[%s1619_s1 + $0x20] sm:$0xff] (!%p192_p3)   ;;  %v1328_v13 = vld [vmem:[%s1619_s1 + $0x28] sm:$0xff] (!%p192_p3)  }
   0xa   : > { %v1329_v14 = vld [vmem:[%s1619_s1 + $0x70] sm:$0xff] (!%p192_p3)   ;;  %v1331_v16 = vld [vmem:[%s1619_s1 + $0x78] sm:$0xff] (!%p192_p3)   ;;  %v1536_v51 = vld [vmem:[%s1620_s2] ss:$0 sm:$0xff] (!%p192_p3) }
   0xb   : > { %v1330_v15 = vld [vmem:[%s1619_s1 + $0x30] sm:$0xff] (!%p192_p3)   ;;  %v1332_v17 = vld [vmem:[%s1619_s1 + $0x38] sm:$0xff] (!%p192_p3)  }
   0xc   : > { %1168 = vmatpush3.bf16.msra.mxu0 (!%p192_p3), %v1320_v3  ;;  %1286 = vmatpush3.bf16.msra.mxu1 (!%p192_p3), %v1320_v3 }
   0xd   : > { %1169 = vmatprep.subr.bf16.mxu0 (!%p192_p3), %v1321_v4  ;;  %1279 = vmatprep.subr.bf16.mxu1 (!%p192_p3), %v1321_v4 }
   0xe   : > { %s1627_s18 = smov (!%p236_p4, %s1108_s18), 127 }
   0xf   : > { %s1164_s6 = sshll.u32 %s1627_s18, 3 }
  0x10   : > { %1170 = vmatpush3.bf16.msra.mxu0 %v1322_v5  ;;  %1287 = vmatpush3.bf16.msra.mxu1 %v1322_v5  ;;  %s1478_s11 = scalar_lea.vmem %s1618_s0, %s1164_s6  ;;  %s1543_s8 = scalar_lea.vmem %s1621_s3, %s1164_s6 }
  0x11   : > { %1171 = vmatprep.subr.bf16.mxu0 %v1323_v6  ;;  %1280 = vmatprep.subr.bf16.mxu1 %v1323_v6  ;;  %v1335_v11 = vld [vmem:[%s1478_s11 + $0x4] ss:$8 sps:$4 sm:$0xff]   ;;  %v1333_v18 = vld [vmem:[%s1478_s11] ss:$8 sps:$4 sm:$0xff]   ;;  %v1339_v20 = vld [vmem:[%s1478_s11 + $0x14] ss:$8 sps:$4 sm:$0xff]  }
  0x12   : > { %v1338_v12 = vld [vmem:[%s1478_s11 + $0x84] ss:$8 sps:$4 sm:$0xff]   ;;  %688 = vmatprep.mubr.bf16.mxu0 %v1335_v11  ;;  %v1336_v19 = vld [vmem:[%s1478_s11 + $0x80] ss:$8 sps:$4 sm:$0xff]   ;;  %v1341_v21 = vld [vmem:[%s1478_s11 + $0x94] ss:$8 sps:$4 sm:$0xff]  }
  0x13   : > { %752 = vmatprep.mubr.bf16.mxu1 %v1338_v12  ;;  %v1343_v22 = vld [vmem:[%s1478_s11 + $0x10] ss:$8 sps:$4 sm:$0xff]   ;;  %v1345_v24 = vld [vmem:[%s1478_s11 + $0x24] ss:$8 sps:$4 sm:$0xff]   ;;  %v1349_v26 = vld [vmem:[%s1478_s11 + $0x20] ss:$8 sps:$4 sm:$0xff]  }
  0x14   : > { %1172 = vmatpush3.bf16.msra.mxu0 %v1324_v7  ;;  %1288 = vmatpush3.bf16.msra.mxu1 %v1324_v7  ;;  %v1344_v23 = vld [vmem:[%s1478_s11 + $0x90] ss:$8 sps:$4 sm:$0xff]   ;;  %v1347_v25 = vld [vmem:[%s1478_s11 + $0xa4] ss:$8 sps:$4 sm:$0xff]   ;;  %v1350_v27 = vld [vmem:[%s1478_s11 + $0xa0] ss:$8 sps:$4 sm:$0xff]  }
  0x15   : > { %1173 = vmatprep.subr.bf16.mxu0 %v1325_v8  ;;  %1281 = vmatprep.subr.bf16.mxu1 %v1325_v8  ;;  %v1351_v28 = vld [vmem:[%s1478_s11 + $0x34] ss:$8 sps:$4 sm:$0xff]   ;;  %v1355_v30 = vld [vmem:[%s1478_s11 + $0x30] ss:$8 sps:$4 sm:$0xff]   ;;  %v1357_v32 = vld [vmem:[%s1478_s11 + $0x44] ss:$8 sps:$4 sm:$0xff]  }
  0x16   : > { %v1353_v29 = vld [vmem:[%s1478_s11 + $0xb4] ss:$8 sps:$4 sm:$0xff]   ;;  %v1356_v31 = vld [vmem:[%s1478_s11 + $0xb0] ss:$8 sps:$4 sm:$0xff]   ;;  %v1359_v33 = vld [vmem:[%s1478_s11 + $0xc4] ss:$8 sps:$4 sm:$0xff]  }
  0x17   : > { %v1361_v34 = vld [vmem:[%s1478_s11 + $0x40] ss:$8 sps:$4 sm:$0xff]   ;;  %v1363_v36 = vld [vmem:[%s1478_s11 + $0x54] ss:$8 sps:$4 sm:$0xff]   ;;  %v1367_v38 = vld [vmem:[%s1478_s11 + $0x50] ss:$8 sps:$4 sm:$0xff]  }
  0x18   : > { %1174 = vmatpush3.bf16.msra.mxu0 %v1326_v9  ;;  %1289 = vmatpush3.bf16.msra.mxu1 %v1326_v9  ;;  %v1362_v35 = vld [vmem:[%s1478_s11 + $0xc0] ss:$8 sps:$4 sm:$0xff]   ;;  %v1365_v37 = vld [vmem:[%s1478_s11 + $0xd4] ss:$8 sps:$4 sm:$0xff]   ;;  %v1368_v39 = vld [vmem:[%s1478_s11 + $0xd0] ss:$8 sps:$4 sm:$0xff]  }
  0x19   : > { %1175 = vmatprep.subr.bf16.mxu0 %v1327_v10  ;;  %1282 = vmatprep.subr.bf16.mxu1 %v1327_v10  ;;  %v1369_v40 = vld [vmem:[%s1478_s11 + $0x64] ss:$8 sps:$4 sm:$0xff]   ;;  %v1373_v42 = vld [vmem:[%s1478_s11 + $0x60] ss:$8 sps:$4 sm:$0xff]   ;;  %v1375_v44 = vld [vmem:[%s1478_s11 + $0x74] ss:$8 sps:$4 sm:$0xff]  }
  0x1a   : > { %v1371_v41 = vld [vmem:[%s1478_s11 + $0xe4] ss:$8 sps:$4 sm:$0xff]   ;;  %v1374_v43 = vld [vmem:[%s1478_s11 + $0xe0] ss:$8 sps:$4 sm:$0xff]   ;;  %v1377_v45 = vld [vmem:[%s1478_s11 + $0xf4] ss:$8 sps:$4 sm:$0xff]  }
  0x1b   : > { %v1379_v46 = vld [vmem:[%s1478_s11 + $0x70] ss:$8 sps:$4 sm:$0xff]  }
  0x1c   : > { %1176 = vmatpush3.bf16.msra.mxu0 %v1328_v13  ;;  %1290 = vmatpush3.bf16.msra.mxu1 %v1328_v13  ;;  %v1380_v47 = vld [vmem:[%s1478_s11 + $0xf0] ss:$8 sps:$4 sm:$0xff]  }
  0x1d   : > { %1177 = vmatprep.subr.bf16.mxu0 %v1329_v14  ;;  %1283 = vmatprep.subr.bf16.mxu1 %v1329_v14 }
  0x20   : > { %1178 = vmatpush3.bf16.msra.mxu0 %v1330_v15  ;;  %1291 = vmatpush3.bf16.msra.mxu1 %v1330_v15 }
  0x21   : > { %1179 = vmatprep.subr.bf16.mxu0 %v1331_v16  ;;  %1284 = vmatprep.subr.bf16.mxu1 %v1331_v16 }
  0x24   : > { %1180 = vmatpush3.bf16.msra.mxu0 %v1332_v17  ;;  %1292 = vmatpush3.bf16.msra.mxu1 %v1332_v17 }
  0x27   : > { %689 = vmatmul.mubr.bf16.vlgmr.msra.gmra.mrb[0].mxu0 %v1333_v18  ;;  %753 = vmatmul.mubr.bf16.vlgmr.msra.gmra.mrb[0].mxu1 %v1336_v19 }
  0x28   : > { %696 = vmatprep.mubr.bf16.mxu0 %v1339_v20  ;;  %760 = vmatprep.mubr.bf16.mxu1 %v1341_v21 }
  0x2f   : > { %697 = vmatmul.mubr.bf16.gmra.mrb[4].mxu0 %v1343_v22  ;;  %761 = vmatmul.mubr.bf16.gmra.mrb[4].mxu1 %v1344_v23 }
  0x30   : > { %704 = vmatprep.mubr.bf16.mxu0 %v1345_v24  ;;  %768 = vmatprep.mubr.bf16.mxu1 %v1347_v25 }
  0x37   : > { %705 = vmatmul.mubr.bf16.gmra.mrb[8].mxu0 %v1349_v26  ;;  %769 = vmatmul.mubr.bf16.gmra.mrb[8].mxu1 %v1350_v27 }
  0x38   : > { %712 = vmatprep.mubr.bf16.mxu0 %v1351_v28  ;;  %776 = vmatprep.mubr.bf16.mxu1 %v1353_v29 }
  0x3f   : > { %713 = vmatmul.mubr.bf16.gmra.mrb[12].mxu0 %v1355_v30  ;;  %777 = vmatmul.mubr.bf16.gmra.mrb[12].mxu1 %v1356_v31 }
  0x40   : > { %720 = vmatprep.mubr.bf16.mxu0 %v1357_v32  ;;  %784 = vmatprep.mubr.bf16.mxu1 %v1359_v33 }
  0x47   : > { %721 = vmatmul.mubr.bf16.gmra.mrb[16].mxu0 %v1361_v34  ;;  %785 = vmatmul.mubr.bf16.gmra.mrb[16].mxu1 %v1362_v35 }
  0x48   : > { %728 = vmatprep.mubr.bf16.mxu0 %v1363_v36  ;;  %792 = vmatprep.mubr.bf16.mxu1 %v1365_v37 }
  0x4f   : > { %729 = vmatmul.mubr.bf16.gmra.mrb[20].mxu0 %v1367_v38  ;;  %793 = vmatmul.mubr.bf16.gmra.mrb[20].mxu1 %v1368_v39 }
  0x50   : > { %736 = vmatprep.mubr.bf16.mxu0 %v1369_v40  ;;  %800 = vmatprep.mubr.bf16.mxu1 %v1371_v41 }
  0x57   : > { %737 = vmatmul.mubr.bf16.gmra.mrb[24].mxu0 %v1373_v42  ;;  %801 = vmatmul.mubr.bf16.gmra.mrb[24].mxu1 %v1374_v43 }
  0x58   : > { %744 = vmatprep.mubr.bf16.mxu0 %v1375_v44  ;;  %808 = vmatprep.mubr.bf16.mxu1 %v1377_v45 }
  0x5f   : > { %745 = vmatmul.mubr.bf16.gmra.mrb[28].mxu0 %v1379_v46  ;;  %809 = vmatmul.mubr.bf16.gmra.mrb[28].mxu1 %v1380_v47 }
  0xfa   : > { %v1181_v48 = vpop.f32.mrb[0].mxu0  ;;  %v1229_v49 = vpop.f32.mrb[0].mxu1 }
  0xfb   : > { %v1182_v50 = vpop.f32.mrb[1].mxu0  ;;  %v1230_v52 = vpop.f32.mrb[1].mxu1 }
  0xfc   : > { %v1183_v53 = vadd.f32 %v1182_v50, %v1181_v48  ;;  %v1231_v54 = vadd.f32 %v1230_v52, %v1229_v49  ;;  %v1184_v55 = vpop.f32.mrb[2].mxu0  ;;  %v1232_v56 = vpop.f32.mrb[2].mxu1 }
  0xfd   : > { %v1185_v57 = vpop.f32.mrb[3].mxu0  ;;  %v1233_v58 = vpop.f32.mrb[3].mxu1 }
  0xfe   : > { %v923_v59 = vadd.f32 %v1183_v53, %v1536_v51  ;;  %v939_v60 = vadd.f32 %v1231_v54, %v1536_v51  ;;  %v1186_v61 = vadd.f32 %v1185_v57, %v1184_v55  ;;  %v1234_v62 = vadd.f32 %v1233_v58, %v1232_v56 }
 0x100   : > { %955 = vst [vmem:[%s1543_s8] sm:$0xff] %v923_v59  ;;  %971 = vst [vmem:[%s1543_s8 + $0x80] sm:$0xff] %v939_v60  ;;  %v924_v63 = vadd.f32 %v1186_v61, %v1536_v51  ;;  %v940_v0 = vadd.f32 %v1234_v62, %v1536_v51 }
 0x102   : > { %956 = vst [vmem:[%s1543_s8 + $0x8] sm:$0xff] %v924_v63  ;;  %972 = vst [vmem:[%s1543_s8 + $0x88] sm:$0xff] %v940_v0  ;;  %v1187_v1 = vpop.f32.mrb[4].mxu0  ;;  %v1235_v2 = vpop.f32.mrb[4].mxu1 }
 0x103   : > { %v1188_v3 = vpop.f32.mrb[5].mxu0  ;;  %v1236_v4 = vpop.f32.mrb[5].mxu1 }
 0x104   : > { %v1189_v5 = vadd.f32 %v1188_v3, %v1187_v1  ;;  %v1237_v6 = vadd.f32 %v1236_v4, %v1235_v2  ;;  %v1190_v7 = vpop.f32.mrb[6].mxu0  ;;  %v1238_v8 = vpop.f32.mrb[6].mxu1 }
 0x105   : > { %v1191_v9 = vpop.f32.mrb[7].mxu0  ;;  %v1239_v10 = vpop.f32.mrb[7].mxu1 }
 0x106   : > { %v925_v11 = vadd.f32 %v1189_v5, %v1536_v51  ;;  %v941_v12 = vadd.f32 %v1237_v6, %v1536_v51  ;;  %v1192_v13 = vadd.f32 %v1191_v9, %v1190_v7  ;;  %v1240_v14 = vadd.f32 %v1239_v10, %v1238_v8 }
 0x108   : > { %957 = vst [vmem:[%s1543_s8 + $0x10] sm:$0xff] %v925_v11  ;;  %973 = vst [vmem:[%s1543_s8 + $0x90] sm:$0xff] %v941_v12  ;;  %v926_v15 = vadd.f32 %v1192_v13, %v1536_v51  ;;  %v942_v16 = vadd.f32 %v1240_v14, %v1536_v51 }
 0x10a   : > { %958 = vst [vmem:[%s1543_s8 + $0x18] sm:$0xff] %v926_v15  ;;  %974 = vst [vmem:[%s1543_s8 + $0x98] sm:$0xff] %v942_v16  ;;  %v1193_v17 = vpop.f32.mrb[8].mxu0  ;;  %v1241_v18 = vpop.f32.mrb[8].mxu1 }
 0x10b   : > { %v1194_v19 = vpop.f32.mrb[9].mxu0  ;;  %v1242_v20 = vpop.f32.mrb[9].mxu1 }
 0x10c   : > { %v1195_v21 = vadd.f32 %v1194_v19, %v1193_v17  ;;  %v1243_v22 = vadd.f32 %v1242_v20, %v1241_v18  ;;  %v1196_v23 = vpop.f32.mrb[10].mxu0  ;;  %v1244_v24 = vpop.f32.mrb[10].mxu1 }
 0x10d   : > { %v1197_v25 = vpop.f32.mrb[11].mxu0  ;;  %v1245_v26 = vpop.f32.mrb[11].mxu1 }
 0x10e   : > { %v927_v27 = vadd.f32 %v1195_v21, %v1536_v51  ;;  %v943_v28 = vadd.f32 %v1243_v22, %v1536_v51  ;;  %v1198_v29 = vadd.f32 %v1197_v25, %v1196_v23  ;;  %v1246_v30 = vadd.f32 %v1245_v26, %v1244_v24 }
 0x110   : > { %959 = vst [vmem:[%s1543_s8 + $0x20] sm:$0xff] %v927_v27  ;;  %975 = vst [vmem:[%s1543_s8 + $0xa0] sm:$0xff] %v943_v28  ;;  %v928_v31 = vadd.f32 %v1198_v29, %v1536_v51  ;;  %v944_v32 = vadd.f32 %v1246_v30, %v1536_v51 }
 0x112   : > { %960 = vst [vmem:[%s1543_s8 + $0x28] sm:$0xff] %v928_v31  ;;  %976 = vst [vmem:[%s1543_s8 + $0xa8] sm:$0xff] %v944_v32  ;;  %v1199_v33 = vpop.f32.mrb[12].mxu0  ;;  %v1247_v34 = vpop.f32.mrb[12].mxu1 }
 0x113   : > { %v1200_v35 = vpop.f32.mrb[13].mxu0  ;;  %v1248_v36 = vpop.f32.mrb[13].mxu1 }
 0x114   : > { %v1201_v37 = vadd.f32 %v1200_v35, %v1199_v33  ;;  %v1249_v38 = vadd.f32 %v1248_v36, %v1247_v34  ;;  %v1202_v39 = vpop.f32.mrb[14].mxu0  ;;  %v1250_v40 = vpop.f32.mrb[14].mxu1 }
 0x115   : > { %v1203_v41 = vpop.f32.mrb[15].mxu0  ;;  %v1251_v42 = vpop.f32.mrb[15].mxu1 }
 0x116   : > { %v929_v43 = vadd.f32 %v1201_v37, %v1536_v51  ;;  %v945_v44 = vadd.f32 %v1249_v38, %v1536_v51  ;;  %v1204_v45 = vadd.f32 %v1203_v41, %v1202_v39  ;;  %v1252_v46 = vadd.f32 %v1251_v42, %v1250_v40 }
 0x118   : > { %961 = vst [vmem:[%s1543_s8 + $0x30] sm:$0xff] %v929_v43  ;;  %977 = vst [vmem:[%s1543_s8 + $0xb0] sm:$0xff] %v945_v44  ;;  %v930_v47 = vadd.f32 %v1204_v45, %v1536_v51  ;;  %v946_v48 = vadd.f32 %v1252_v46, %v1536_v51 }
 0x11a   : > { %962 = vst [vmem:[%s1543_s8 + $0x38] sm:$0xff] %v930_v47  ;;  %978 = vst [vmem:[%s1543_s8 + $0xb8] sm:$0xff] %v946_v48  ;;  %v1205_v49 = vpop.f32.mrb[16].mxu0  ;;  %v1253_v50 = vpop.f32.mrb[16].mxu1 }
 0x11b   : > { %v1206_v52 = vpop.f32.mrb[17].mxu0  ;;  %v1254_v53 = vpop.f32.mrb[17].mxu1 }
 0x11c   : > { %v1207_v54 = vadd.f32 %v1206_v52, %v1205_v49  ;;  %v1255_v55 = vadd.f32 %v1254_v53, %v1253_v50  ;;  %v1208_v56 = vpop.f32.mrb[18].mxu0  ;;  %v1256_v57 = vpop.f32.mrb[18].mxu1 }
 0x11d   : > { %v1209_v58 = vpop.f32.mrb[19].mxu0  ;;  %v1257_v59 = vpop.f32.mrb[19].mxu1 }
 0x11e   : > { %v931_v60 = vadd.f32 %v1207_v54, %v1536_v51  ;;  %v947_v61 = vadd.f32 %v1255_v55, %v1536_v51  ;;  %v1210_v62 = vadd.f32 %v1209_v58, %v1208_v56  ;;  %v1258_v63 = vadd.f32 %v1257_v59, %v1256_v57 }
 0x120   : > { %963 = vst [vmem:[%s1543_s8 + $0x40] sm:$0xff] %v931_v60  ;;  %979 = vst [vmem:[%s1543_s8 + $0xc0] sm:$0xff] %v947_v61  ;;  %v932_v0 = vadd.f32 %v1210_v62, %v1536_v51  ;;  %v948_v1 = vadd.f32 %v1258_v63, %v1536_v51 }
 0x122   : > { %964 = vst [vmem:[%s1543_s8 + $0x48] sm:$0xff] %v932_v0  ;;  %980 = vst [vmem:[%s1543_s8 + $0xc8] sm:$0xff] %v948_v1  ;;  %v1211_v2 = vpop.f32.mrb[20].mxu0  ;;  %v1259_v3 = vpop.f32.mrb[20].mxu1 }
 0x123   : > { %v1212_v4 = vpop.f32.mrb[21].mxu0  ;;  %v1260_v5 = vpop.f32.mrb[21].mxu1 }
 0x124   : > { %v1213_v6 = vadd.f32 %v1212_v4, %v1211_v2  ;;  %v1261_v7 = vadd.f32 %v1260_v5, %v1259_v3  ;;  %v1214_v8 = vpop.f32.mrb[22].mxu0  ;;  %v1262_v9 = vpop.f32.mrb[22].mxu1 }
 0x125   : > { %v1215_v10 = vpop.f32.mrb[23].mxu0  ;;  %v1263_v11 = vpop.f32.mrb[23].mxu1 }
 0x126   : > { %v933_v12 = vadd.f32 %v1213_v6, %v1536_v51  ;;  %v949_v13 = vadd.f32 %v1261_v7, %v1536_v51  ;;  %v1216_v14 = vadd.f32 %v1215_v10, %v1214_v8  ;;  %v1264_v15 = vadd.f32 %v1263_v11, %v1262_v9 }
 0x128   : > { %965 = vst [vmem:[%s1543_s8 + $0x50] sm:$0xff] %v933_v12  ;;  %981 = vst [vmem:[%s1543_s8 + $0xd0] sm:$0xff] %v949_v13  ;;  %v934_v16 = vadd.f32 %v1216_v14, %v1536_v51  ;;  %v950_v17 = vadd.f32 %v1264_v15, %v1536_v51 }
 0x12a   : > { %966 = vst [vmem:[%s1543_s8 + $0x58] sm:$0xff] %v934_v16  ;;  %982 = vst [vmem:[%s1543_s8 + $0xd8] sm:$0xff] %v950_v17  ;;  %v1217_v18 = vpop.f32.mrb[24].mxu0  ;;  %v1265_v19 = vpop.f32.mrb[24].mxu1 }
 0x12b   : > { %v1218_v20 = vpop.f32.mrb[25].mxu0  ;;  %v1266_v21 = vpop.f32.mrb[25].mxu1 }
 0x12c   : > { %v1219_v22 = vadd.f32 %v1218_v20, %v1217_v18  ;;  %v1267_v23 = vadd.f32 %v1266_v21, %v1265_v19  ;;  %v1220_v24 = vpop.f32.mrb[26].mxu0  ;;  %v1268_v25 = vpop.f32.mrb[26].mxu1 }
 0x12d   : > { %v1221_v26 = vpop.f32.mrb[27].mxu0  ;;  %v1269_v27 = vpop.f32.mrb[27].mxu1 }
 0x12e   : > { %v935_v28 = vadd.f32 %v1219_v22, %v1536_v51  ;;  %v951_v29 = vadd.f32 %v1267_v23, %v1536_v51  ;;  %v1222_v30 = vadd.f32 %v1221_v26, %v1220_v24  ;;  %v1270_v31 = vadd.f32 %v1269_v27, %v1268_v25 }
 0x130   : > { %967 = vst [vmem:[%s1543_s8 + $0x60] sm:$0xff] %v935_v28  ;;  %983 = vst [vmem:[%s1543_s8 + $0xe0] sm:$0xff] %v951_v29  ;;  %v936_v32 = vadd.f32 %v1222_v30, %v1536_v51  ;;  %v952_v33 = vadd.f32 %v1270_v31, %v1536_v51 }
 0x132   : > { %968 = vst [vmem:[%s1543_s8 + $0x68] sm:$0xff] %v936_v32  ;;  %984 = vst [vmem:[%s1543_s8 + $0xe8] sm:$0xff] %v952_v33  ;;  %v1223_v34 = vpop.f32.mrb[28].mxu0  ;;  %v1271_v35 = vpop.f32.mrb[28].mxu1 }
 0x133   : > { %v1224_v36 = vpop.f32.mrb[29].mxu0  ;;  %v1272_v37 = vpop.f32.mrb[29].mxu1 }
 0x134   : > { %v1225_v38 = vadd.f32 %v1224_v36, %v1223_v34  ;;  %v1273_v39 = vadd.f32 %v1272_v37, %v1271_v35  ;;  %v1226_v40 = vpop.f32.mrb[30].mxu0  ;;  %v1274_v41 = vpop.f32.mrb[30].mxu1 }
 0x135   : > { %v1227_v42 = vpop.f32.mrb[31].mxu0  ;;  %v1275_v43 = vpop.f32.mrb[31].mxu1 }
 0x136   : > { %v937_v44 = vadd.f32 %v1225_v38, %v1536_v51  ;;  %v953_v45 = vadd.f32 %v1273_v39, %v1536_v51  ;;  %v1228_v46 = vadd.f32 %v1227_v42, %v1226_v40  ;;  %v1276_v47 = vadd.f32 %v1275_v43, %v1274_v41 }
 0x138   : > { %969 = vst [vmem:[%s1543_s8 + $0x70] sm:$0xff] %v937_v44  ;;  %985 = vst [vmem:[%s1543_s8 + $0xf0] sm:$0xff] %v953_v45  ;;  %v938_v48 = vadd.f32 %v1228_v46, %v1536_v51  ;;  %v954_v49 = vadd.f32 %v1276_v47, %v1536_v51 }
 0x13a   : > { %970 = vst [vmem:[%s1543_s8 + $0x78] sm:$0xff] %v938_v48  ;;  %986 = vst [vmem:[%s1543_s8 + $0xf8] sm:$0xff] %v954_v49 }
 0x13b PF: > { %s13_s14 = sadd.s32 1, %s1403_s14   ;;  %s1622_s12 = smov %s1399_s13 }
 0x13c   : > { %p10_p5 = scmp.ge.s32.totalorder %s13_s14, 6   ;;  %s1623_s13 = smov %s1625_s15 }
 0x13e   :  { %12 = sbr.rel (!%p10_p5) target bundleno = 2 (0x2), region = 76 }

// kernel: global_generator_forward.87
= control target key start
LH: loop header
LB: loop body
LE: loop exit
PB: predicated region body
PF: predicated region fallthrough
CT: control target
= control target key end

     0   :  { %vm136_vm0 = vcmask 64512   ;;  %s4323_s0 = inlined_call_operand.vmem [shape: f32[1,1024,8], index: 0, kind: input, shape index: {}]   ;;  %s4324_s1 = inlined_call_operand.vmem [shape: f32[1,1024,8], index: 1, kind: output, shape index: {}]  }
   0x1   :  { %v1397_v0 = vld [vmem:[%s4323_s0] sm:$0xff]  ;;  %v1402_v1 = vld [vmem:[%s4323_s0 + $0x8] sm:$0xff]  ;;  %v1407_v2 = vld [vmem:[%s4323_s0 + $0x10] sm:$0xff] }
   0x2   :  { %v1412_v3 = vld [vmem:[%s4323_s0 + $0x18] sm:$0xff]  ;;  %v137_v4 = vsel %vm136_vm0, %v1397_v0, 0.0  ;;  %v138_v5 = vsel %vm136_vm0, %v1402_v1, 0.0  ;;  %v140_v6 = vsel %vm136_vm0, %v1407_v2, 0.0  ;;  %v1423_v7 = vld [vmem:[%s4323_s0 + $0x20] sm:$0xff]  ;;  %v1430_v10 = vld [vmem:[%s4323_s0 + $0x28] sm:$0xff] }
   0x3   :  { %v139_v8 = vadd.f32 %v138_v5, %v137_v4  ;;  %v142_v9 = vsel %vm136_vm0, %v1412_v3, 0.0  ;;  %v144_v12 = vsel %vm136_vm0, %v1423_v7, 0.0  ;;  %v1437_v13 = vld [vmem:[%s4323_s0 + $0x30] sm:$0xff]  ;;  %v146_v15 = vsel %vm136_vm0, %v1430_v10, 0.0  ;;  %v1444_v16 = vld [vmem:[%s4323_s0 + $0x38] sm:$0xff]  ;;  %v1451_v19 = vld [vmem:[%s4323_s0 + $0x40] sm:$0xff] }
   0x4   :  { %v148_v18 = vsel %vm136_vm0, %v1437_v13, 0.0  ;;  %v150_v21 = vsel %vm136_vm0, %v1444_v16, 0.0  ;;  %v1458_v22 = vld [vmem:[%s4323_s0 + $0x48] sm:$0xff]  ;;  %v152_v24 = vsel %vm136_vm0, %v1451_v19, 0.0  ;;  %v1465_v25 = vld [vmem:[%s4323_s0 + $0x50] sm:$0xff]  ;;  %v1472_v28 = vld [vmem:[%s4323_s0 + $0x58] sm:$0xff] }
   0x5   :  { %v141_v11 = vadd.f32 %v140_v6, %v139_v8  ;;  %v154_v27 = vsel %vm136_vm0, %v1458_v22, 0.0  ;;  %v156_v30 = vsel %vm136_vm0, %v1465_v25, 0.0  ;;  %v1479_v31 = vld [vmem:[%s4323_s0 + $0x60] sm:$0xff]  ;;  %v158_v33 = vsel %vm136_vm0, %v1472_v28, 0.0  ;;  %v1486_v34 = vld [vmem:[%s4323_s0 + $0x68] sm:$0xff]  ;;  %v1493_v37 = vld [vmem:[%s4323_s0 + $0x70] sm:$0xff] }
   0x6   :  { %v160_v36 = vsel %vm136_vm0, %v1479_v31, 0.0  ;;  %v162_v39 = vsel %vm136_vm0, %v1486_v34, 0.0  ;;  %v1500_v40 = vld [vmem:[%s4323_s0 + $0x78] sm:$0xff]  ;;  %v164_v42 = vsel %vm136_vm0, %v1493_v37, 0.0  ;;  %v1507_v43 = vld [vmem:[%s4323_s0 + $0x80] sm:$0xff]  ;;  %v1514_v46 = vld [vmem:[%s4323_s0 + $0x88] sm:$0xff] }
   0x7   :  { %v143_v14 = vadd.f32 %v142_v9, %v141_v11  ;;  %v166_v45 = vsel %vm136_vm0, %v1500_v40, 0.0  ;;  %v168_v48 = vsel %vm136_vm0, %v1507_v43, 0.0  ;;  %v1521_v49 = vld [vmem:[%s4323_s0 + $0x90] sm:$0xff]  ;;  %v170_v51 = vsel %vm136_vm0, %v1514_v46, 0.0  ;;  %v1528_v52 = vld [vmem:[%s4323_s0 + $0x98] sm:$0xff]  ;;  %v1535_v55 = vld [vmem:[%s4323_s0 + $0xa0] sm:$0xff] }
   0x8   :  { %v172_v54 = vsel %vm136_vm0, %v1521_v49, 0.0  ;;  %v174_v57 = vsel %vm136_vm0, %v1528_v52, 0.0  ;;  %v1542_v58 = vld [vmem:[%s4323_s0 + $0xa8] sm:$0xff]  ;;  %v176_v60 = vsel %vm136_vm0, %v1535_v55, 0.0  ;;  %v1549_v61 = vld [vmem:[%s4323_s0 + $0xb0] sm:$0xff]  ;;  %v1556_v4 = vld [vmem:[%s4323_s0 + $0xb8] sm:$0xff] }
   0x9   :  { %v145_v17 = vadd.f32 %v144_v12, %v143_v14  ;;  %v178_v63 = vsel %vm136_vm0, %v1542_v58, 0.0  ;;  %v180_v6 = vsel %vm136_vm0, %v1549_v61, 0.0  ;;  %v1563_v8 = vld [vmem:[%s4323_s0 + $0xc0] sm:$0xff]  ;;  %v182_v11 = vsel %vm136_vm0, %v1556_v4, 0.0  ;;  %v1570_v12 = vld [vmem:[%s4323_s0 + $0xc8] sm:$0xff] }
   0xb   :  { %v147_v20 = vadd.f32 %v146_v15, %v145_v17  ;;  %v184_v15 = vsel %vm136_vm0, %v1563_v8, 0.0  ;;  %v1577_v17 = vld [vmem:[%s4323_s0 + $0xd0] sm:$0xff] }
   0xd   :  { %v149_v23 = vadd.f32 %v148_v18, %v147_v20  ;;  %v186_v20 = vsel %vm136_vm0, %v1570_v12, 0.0 }
   0xf   :  { %v151_v26 = vadd.f32 %v150_v21, %v149_v23  ;;  %v1584_v21 = vld [vmem:[%s4323_s0 + $0xd8] sm:$0xff] }
  0x11   :  { %v153_v29 = vadd.f32 %v152_v24, %v151_v26  ;;  %v188_v24 = vsel %vm136_vm0, %v1577_v17, 0.0  ;;  %v399_v26 = vmul.f32 %v1397_v0, %v1397_v0  ;;  %v1606_v0 = vld [vmem:[%s4323_s0 + $0xe8] sm:$0xff] }
  0x13   :  { %v155_v32 = vadd.f32 %v154_v27, %v153_v29  ;;  %v400_v27 = vmul.f32 %v1402_v1, %v1402_v1  ;;  %v401_v29 = vmul.f32 %v1407_v2, %v1407_v2  ;;  %v403_v2 = vmul.f32 %v1423_v7, %v1423_v7 }
  0x14   :  { %v404_v7 = vmul.f32 %v1430_v10, %v1430_v10  ;;  %v1638_v10 = vld [vmem:[%s4323_s0 + $0x100] sm:$0xff] }
  0x15   :  { %v157_v35 = vadd.f32 %v156_v30, %v155_v32  ;;  %v1597_v30 = vld [vmem:[%s4323_s0 + $0xe0] sm:$0xff] }
  0x17   :  { %v159_v38 = vadd.f32 %v158_v33, %v157_v35  ;;  %v190_v33 = vsel %vm136_vm0, %v1584_v21, 0.0  ;;  %v402_v35 = vmul.f32 %v1412_v3, %v1412_v3  ;;  %v1618_v3 = vld [vmem:[%s4323_s0 + $0xf0] sm:$0xff] }
  0x19   :  { %v161_v41 = vadd.f32 %v160_v36, %v159_v38  ;;  %v192_v36 = vsel %vm136_vm0, %v1597_v30, 0.0  ;;  %v527_v38 = vsel %vm136_vm0, %v399_v26, 0.0 }
  0x1b   :  { %v163_v44 = vadd.f32 %v162_v39, %v161_v41  ;;  %v528_v39 = vsel %vm136_vm0, %v400_v27, 0.0  ;;  %v530_v41 = vsel %vm136_vm0, %v401_v29, 0.0 }
  0x1d   :  { %v165_v47 = vadd.f32 %v164_v42, %v163_v44  ;;  %v529_v44 = vadd.f32 %v528_v39, %v527_v38 }
  0x1f   :  { %v167_v50 = vadd.f32 %v166_v45, %v165_v47  ;;  %v194_v45 = vsel %vm136_vm0, %v1606_v0, 0.0  ;;  %v532_v47 = vsel %vm136_vm0, %v402_v35, 0.0 }
  0x21   :  { %v169_v53 = vadd.f32 %v168_v48, %v167_v50  ;;  %v1628_v48 = vld [vmem:[%s4323_s0 + $0xf8] sm:$0xff] }
  0x23   :  { %v171_v56 = vadd.f32 %v170_v51, %v169_v53  ;;  %v531_v51 = vadd.f32 %v530_v41, %v529_v44  ;;  %v196_v53 = vsel %vm136_vm0, %v1618_v3, 0.0  ;;  %v411_v44 = vmul.f32 %v1479_v31, %v1479_v31  ;;  %v1708_v31 = vld [vmem:[%s4323_s0 + $0x138] sm:$0xff] }
  0x25   :  { %v173_v59 = vadd.f32 %v172_v54, %v171_v56  ;;  %v405_v54 = vmul.f32 %v1437_v13, %v1437_v13  ;;  %v534_v56 = vsel %vm136_vm0, %v403_v2, 0.0  ;;  %v1648_v13 = vld [vmem:[%s4323_s0 + $0x108] sm:$0xff] }
  0x27   :  { %v175_v62 = vadd.f32 %v174_v57, %v173_v59  ;;  %v533_v59 = vadd.f32 %v532_v47, %v531_v51  ;;  %v412_v51 = vmul.f32 %v1486_v34, %v1486_v34  ;;  %v1718_v34 = vld [vmem:[%s4323_s0 + $0x140] sm:$0xff] }
  0x29   :  { %v177_v5 = vadd.f32 %v176_v60, %v175_v62  ;;  %v198_v60 = vsel %vm136_vm0, %v1628_v48, 0.0  ;;  %v406_v62 = vmul.f32 %v1444_v16, %v1444_v16  ;;  %v1658_v16 = vld [vmem:[%s4323_s0 + $0x110] sm:$0xff] }
  0x2a   :  { %v204_v29 = vsel %vm136_vm0, %v1658_v16, 0.0 }
  0x2b   :  { %v179_v9 = vadd.f32 %v178_v63, %v177_v5  ;;  %v536_v63 = vsel %vm136_vm0, %v404_v7, 0.0 }
  0x2d   :  { %v181_v14 = vadd.f32 %v180_v6, %v179_v9  ;;  %v535_v6 = vadd.f32 %v534_v56, %v533_v59  ;;  %v200_v9 = vsel %vm136_vm0, %v1638_v10, 0.0  ;;  %v413_v59 = vmul.f32 %v1493_v37, %v1493_v37  ;;  %v1728_v37 = vld [vmem:[%s4323_s0 + $0x148] sm:$0xff] }
  0x2f   :  { %v183_v18 = vadd.f32 %v182_v11, %v181_v14  ;;  %v407_v11 = vmul.f32 %v1451_v19, %v1451_v19  ;;  %v538_v14 = vsel %vm136_vm0, %v405_v54, 0.0  ;;  %v1668_v19 = vld [vmem:[%s4323_s0 + $0x118] sm:$0xff] }
  0x30   :  { %v206_v2 = vsel %vm136_vm0, %v1668_v19, 0.0 }
  0x31   :  { %v185_v23 = vadd.f32 %v184_v15, %v183_v18  ;;  %v537_v18 = vadd.f32 %v536_v63, %v535_v6  ;;  %v414_v6 = vmul.f32 %v1500_v40, %v1500_v40  ;;  %v1738_v40 = vld [vmem:[%s4323_s0 + $0x150] sm:$0xff] }
  0x33   :  { %v187_v32 = vadd.f32 %v186_v20, %v185_v23  ;;  %v202_v20 = vsel %vm136_vm0, %v1648_v13, 0.0  ;;  %v408_v23 = vmul.f32 %v1458_v22, %v1458_v22  ;;  %v539_v27 = vadd.f32 %v538_v14, %v537_v18  ;;  %v1678_v22 = vld [vmem:[%s4323_s0 + $0x120] sm:$0xff] }
  0x34   :  { %v415_v18 = vmul.f32 %v1507_v43, %v1507_v43  ;;  %v1748_v43 = vld [vmem:[%s4323_s0 + $0x158] sm:$0xff] }
  0x35   :  { %v189_v1 = vadd.f32 %v188_v24, %v187_v32  ;;  %v540_v24 = vsel %vm136_vm0, %v406_v62, 0.0  ;;  %v409_v32 = vmul.f32 %v1465_v25, %v1465_v25  ;;  %v544_v38 = vsel %vm136_vm0, %v408_v23, 0.0  ;;  %v1688_v25 = vld [vmem:[%s4323_s0 + $0x128] sm:$0xff] }
  0x37   :  { %v191_v42 = vadd.f32 %v190_v33, %v189_v1  ;;  %v542_v33 = vsel %vm136_vm0, %v407_v11, 0.0  ;;  %v541_v1 = vadd.f32 %v540_v24, %v539_v27  ;;  %v416_v27 = vmul.f32 %v1514_v46, %v1514_v46  ;;  %v1758_v46 = vld [vmem:[%s4323_s0 + $0x160] sm:$0xff] }
  0x39   :  { %v193_v50 = vadd.f32 %v192_v36, %v191_v42  ;;  %v410_v36 = vmul.f32 %v1472_v28, %v1472_v28  ;;  %v543_v41 = vadd.f32 %v542_v33, %v541_v1  ;;  %v208_v42 = vsel %vm136_vm0, %v1678_v22, 0.0  ;;  %v1698_v28 = vld [vmem:[%s4323_s0 + $0x130] sm:$0xff] }
  0x3a   :  { %v417_v1 = vmul.f32 %v1521_v49, %v1521_v49  ;;  %v1768_v49 = vld [vmem:[%s4323_s0 + $0x168] sm:$0xff] }
  0x3b   :  { %v195_v57 = vadd.f32 %v194_v45, %v193_v50  ;;  %v546_v45 = vsel %vm136_vm0, %v409_v32, 0.0  ;;  %v545_v47 = vadd.f32 %v544_v38, %v543_v41  ;;  %v210_v50 = vsel %vm136_vm0, %v1688_v25, 0.0 }
  0x3c   :  { %v418_v41 = vmul.f32 %v1528_v52, %v1528_v52  ;;  %v1778_v52 = vld [vmem:[%s4323_s0 + $0x170] sm:$0xff] }
  0x3d   :  { %v197_v5 = vadd.f32 %v196_v53, %v195_v57  ;;  %v548_v53 = vsel %vm136_vm0, %v410_v36, 0.0  ;;  %v547_v56 = vadd.f32 %v546_v45, %v545_v47  ;;  %v212_v57 = vsel %vm136_vm0, %v1698_v28, 0.0 }
  0x3e   :  { %v419_v47 = vmul.f32 %v1535_v55, %v1535_v55  ;;  %v1788_v55 = vld [vmem:[%s4323_s0 + $0x178] sm:$0xff] }
  0x3f   :  { %v199_v15 = vadd.f32 %v198_v60, %v197_v5  ;;  %v550_v60 = vsel %vm136_vm0, %v411_v44, 0.0  ;;  %v549_v63 = vadd.f32 %v548_v53, %v547_v56  ;;  %v214_v5 = vsel %vm136_vm0, %v1708_v31, 0.0 }
  0x40   :  { %v420_v56 = vmul.f32 %v1542_v58, %v1542_v58  ;;  %v1798_v58 = vld [vmem:[%s4323_s0 + $0x180] sm:$0xff] }
  0x41   :  { %v201_v26 = vadd.f32 %v200_v9, %v199_v15  ;;  %v552_v9 = vsel %vm136_vm0, %v412_v51, 0.0  ;;  %v551_v14 = vadd.f32 %v550_v60, %v549_v63  ;;  %v216_v15 = vsel %vm136_vm0, %v1718_v34, 0.0 }
  0x42   :  { %v421_v63 = vmul.f32 %v1549_v61, %v1549_v61  ;;  %v1808_v61 = vld [vmem:[%s4323_s0 + $0x188] sm:$0xff] }
  0x43   :  { %v203_v35 = vadd.f32 %v202_v20, %v201_v26  ;;  %v554_v20 = vsel %vm136_vm0, %v413_v59, 0.0  ;;  %v553_v24 = vadd.f32 %v552_v9, %v551_v14  ;;  %v218_v26 = vsel %vm136_vm0, %v1728_v37, 0.0 }
  0x44   :  { %v422_v14 = vmul.f32 %v1556_v4, %v1556_v4  ;;  %v1818_v4 = vld [vmem:[%s4323_s0 + $0x190] sm:$0xff] }
  0x45   :  { %v205_v39 = vadd.f32 %v204_v29, %v203_v35  ;;  %v556_v29 = vsel %vm136_vm0, %v414_v6, 0.0  ;;  %v555_v33 = vadd.f32 %v554_v20, %v553_v24  ;;  %v220_v35 = vsel %vm136_vm0, %v1738_v40, 0.0 }
  0x46   :  { %v423_v24 = vmul.f32 %v1563_v8, %v1563_v8  ;;  %v1828_v8 = vld [vmem:[%s4323_s0 + $0x198] sm:$0xff] }
  0x47   :  { %v207_v7 = vadd.f32 %v206_v2, %v205_v39  ;;  %v558_v2 = vsel %vm136_vm0, %v415_v18, 0.0  ;;  %v557_v38 = vadd.f32 %v556_v29, %v555_v33  ;;  %v222_v39 = vsel %vm136_vm0, %v1748_v43, 0.0 }
  0x48   :  { %v424_v33 = vmul.f32 %v1570_v12, %v1570_v12  ;;  %v1838_v12 = vld [vmem:[%s4323_s0 + $0x1a0] sm:$0xff] }
  0x49   :  { %v209_v54 = vadd.f32 %v208_v42, %v207_v7  ;;  %v560_v42 = vsel %vm136_vm0, %v416_v27, 0.0  ;;  %v559_v45 = vadd.f32 %v558_v2, %v557_v38  ;;  %v224_v7 = vsel %vm136_vm0, %v1758_v46, 0.0 }
  0x4a   :  { %v425_v38 = vmul.f32 %v1577_v17, %v1577_v17  ;;  %v1848_v17 = vld [vmem:[%s4323_s0 + $0x1a8] sm:$0xff] }
  0x4b   :  { %v211_v62 = vadd.f32 %v210_v50, %v209_v54  ;;  %v562_v50 = vsel %vm136_vm0, %v417_v1, 0.0  ;;  %v561_v53 = vadd.f32 %v560_v42, %v559_v45  ;;  %v226_v54 = vsel %vm136_vm0, %v1768_v49, 0.0 }
  0x4c   :  { %v426_v45 = vmul.f32 %v1584_v21, %v1584_v21  ;;  %v1858_v21 = vld [vmem:[%s4323_s0 + $0x1b0] sm:$0xff] }
  0x4d   :  { %v213_v11 = vadd.f32 %v212_v57, %v211_v62  ;;  %v564_v57 = vsel %vm136_vm0, %v418_v41, 0.0  ;;  %v563_v60 = vadd.f32 %v562_v50, %v561_v53  ;;  %v228_v62 = vsel %vm136_vm0, %v1778_v52, 0.0 }
  0x4e   :  { %v427_v53 = vmul.f32 %v1597_v30, %v1597_v30  ;;  %v1868_v30 = vld [vmem:[%s4323_s0 + $0x1b8] sm:$0xff] }
  0x4f   :  { %v215_v23 = vadd.f32 %v214_v5, %v213_v11  ;;  %v566_v5 = vsel %vm136_vm0, %v419_v47, 0.0  ;;  %v565_v9 = vadd.f32 %v564_v57, %v563_v60  ;;  %v230_v11 = vsel %vm136_vm0, %v1788_v55, 0.0 }
  0x50   :  { %v428_v60 = vmul.f32 %v1606_v0, %v1606_v0  ;;  %v1878_v0 = vld [vmem:[%s4323_s0 + $0x1c0] sm:$0xff] }
  0x51   :  { %v217_v32 = vadd.f32 %v216_v15, %v215_v23  ;;  %v568_v15 = vsel %vm136_vm0, %v420_v56, 0.0  ;;  %v567_v20 = vadd.f32 %v566_v5, %v565_v9  ;;  %v232_v23 = vsel %vm136_vm0, %v1798_v58, 0.0 }
  0x52   :  { %v429_v9 = vmul.f32 %v1618_v3, %v1618_v3  ;;  %v1888_v3 = vld [vmem:[%s4323_s0 + $0x1c8] sm:$0xff] }
  0x53   :  { %v219_v36 = vadd.f32 %v218_v26, %v217_v32  ;;  %v570_v26 = vsel %vm136_vm0, %v421_v63, 0.0  ;;  %v569_v29 = vadd.f32 %v568_v15, %v567_v20  ;;  %v234_v32 = vsel %vm136_vm0, %v1808_v61, 0.0 }
  0x54   :  { %v430_v20 = vmul.f32 %v1628_v48, %v1628_v48  ;;  %v1898_v48 = vld [vmem:[%s4323_s0 + $0x1d0] sm:$0xff] }
  0x55   :  { %v221_v44 = vadd.f32 %v220_v35, %v219_v36  ;;  %v572_v35 = vsel %vm136_vm0, %v422_v14, 0.0  ;;  %v571_v2 = vadd.f32 %v570_v26, %v569_v29  ;;  %v236_v36 = vsel %vm136_vm0, %v1818_v4, 0.0 }
  0x56   :  { %v431_v29 = vmul.f32 %v1638_v10, %v1638_v10  ;;  %v1908_v10 = vld [vmem:[%s4323_s0 + $0x1d8] sm:$0xff] }
  0x57   :  { %v223_v51 = vadd.f32 %v222_v39, %v221_v44  ;;  %v574_v39 = vsel %vm136_vm0, %v423_v24, 0.0  ;;  %v573_v42 = vadd.f32 %v572_v35, %v571_v2  ;;  %v238_v44 = vsel %vm136_vm0, %v1828_v8, 0.0 }
  0x58   :  { %v432_v2 = vmul.f32 %v1648_v13, %v1648_v13  ;;  %v1918_v13 = vld [vmem:[%s4323_s0 + $0x1e0] sm:$0xff] }
  0x59   :  { %v225_v59 = vadd.f32 %v224_v7, %v223_v51  ;;  %v576_v7 = vsel %vm136_vm0, %v424_v33, 0.0  ;;  %v575_v50 = vadd.f32 %v574_v39, %v573_v42  ;;  %v240_v51 = vsel %vm136_vm0, %v1838_v12, 0.0 }
  0x5a   :  { %v433_v42 = vmul.f32 %v1658_v16, %v1658_v16  ;;  %v1928_v16 = vld [vmem:[%s4323_s0 + $0x1e8] sm:$0xff] }
  0x5b   :  { %v227_v6 = vadd.f32 %v226_v54, %v225_v59  ;;  %v578_v54 = vsel %vm136_vm0, %v425_v38, 0.0  ;;  %v577_v57 = vadd.f32 %v576_v7, %v575_v50  ;;  %v242_v59 = vsel %vm136_vm0, %v1848_v17, 0.0 }
  0x5c   :  { %v434_v50 = vmul.f32 %v1668_v19, %v1668_v19  ;;  %v1938_v19 = vld [vmem:[%s4323_s0 + $0x1f0] sm:$0xff] }
  0x5d   :  { %v229_v18 = vadd.f32 %v228_v62, %v227_v6  ;;  %v580_v62 = vsel %vm136_vm0, %v426_v45, 0.0  ;;  %v579_v5 = vadd.f32 %v578_v54, %v577_v57  ;;  %v244_v6 = vsel %vm136_vm0, %v1858_v21, 0.0 }
  0x5e   :  { %v435_v57 = vmul.f32 %v1678_v22, %v1678_v22  ;;  %v1948_v22 = vld [vmem:[%s4323_s0 + $0x1f8] sm:$0xff] }
  0x5f   :  { %v231_v27 = vadd.f32 %v230_v11, %v229_v18  ;;  %v582_v11 = vsel %vm136_vm0, %v427_v53, 0.0  ;;  %v581_v15 = vadd.f32 %v580_v62, %v579_v5  ;;  %v246_v18 = vsel %vm136_vm0, %v1868_v30, 0.0 }
  0x60   :  { %v436_v5 = vmul.f32 %v1688_v25, %v1688_v25  ;;  %v1958_v25 = vld [vmem:[%s4323_s0 + $0x200] sm:$0xff] }
  0x61   :  { %v233_v1 = vadd.f32 %v232_v23, %v231_v27  ;;  %v584_v23 = vsel %vm136_vm0, %v428_v60, 0.0  ;;  %v583_v26 = vadd.f32 %v582_v11, %v581_v15  ;;  %v248_v27 = vsel %vm136_vm0, %v1878_v0, 0.0 }
  0x62   :  { %v437_v15 = vmul.f32 %v1698_v28, %v1698_v28  ;;  %v1968_v28 = vld [vmem:[%s4323_s0 + $0x208] sm:$0xff] }
  0x63   :  { %v235_v41 = vadd.f32 %v234_v32, %v233_v1  ;;  %v586_v32 = vsel %vm136_vm0, %v429_v9, 0.0  ;;  %v585_v35 = vadd.f32 %v584_v23, %v583_v26  ;;  %v250_v1 = vsel %vm136_vm0, %v1888_v3, 0.0 }
  0x64   :  { %v438_v26 = vmul.f32 %v1708_v31, %v1708_v31  ;;  %v1978_v31 = vld [vmem:[%s4323_s0 + $0x210] sm:$0xff] }
  0x65   :  { %v237_v47 = vadd.f32 %v236_v36, %v235_v41  ;;  %v588_v36 = vsel %vm136_vm0, %v430_v20, 0.0  ;;  %v587_v39 = vadd.f32 %v586_v32, %v585_v35  ;;  %v252_v41 = vsel %vm136_vm0, %v1898_v48, 0.0 }
  0x66   :  { %v439_v35 = vmul.f32 %v1718_v34, %v1718_v34  ;;  %v1988_v34 = vld [vmem:[%s4323_s0 + $0x218] sm:$0xff] }
  0x67   :  { %v239_v56 = vadd.f32 %v238_v44, %v237_v47  ;;  %v590_v44 = vsel %vm136_vm0, %v431_v29, 0.0  ;;  %v589_v7 = vadd.f32 %v588_v36, %v587_v39  ;;  %v254_v47 = vsel %vm136_vm0, %v1908_v10, 0.0 }
  0x68   :  { %v440_v39 = vmul.f32 %v1728_v37, %v1728_v37  ;;  %v1998_v37 = vld [vmem:[%s4323_s0 + $0x220] sm:$0xff] }
  0x69   :  { %v241_v63 = vadd.f32 %v240_v51, %v239_v56  ;;  %v592_v51 = vsel %vm136_vm0, %v432_v2, 0.0  ;;  %v591_v54 = vadd.f32 %v590_v44, %v589_v7  ;;  %v256_v56 = vsel %vm136_vm0, %v1918_v13, 0.0 }
  0x6a   :  { %v441_v7 = vmul.f32 %v1738_v40, %v1738_v40  ;;  %v2008_v40 = vld [vmem:[%s4323_s0 + $0x228] sm:$0xff] }
  0x6b   :  { %v243_v14 = vadd.f32 %v242_v59, %v241_v63  ;;  %v594_v59 = vsel %vm136_vm0, %v433_v42, 0.0  ;;  %v593_v62 = vadd.f32 %v592_v51, %v591_v54  ;;  %v258_v63 = vsel %vm136_vm0, %v1928_v16, 0.0 }
  0x6c   :  { %v442_v54 = vmul.f32 %v1748_v43, %v1748_v43  ;;  %v2018_v43 = vld [vmem:[%s4323_s0 + $0x230] sm:$0xff] }
  0x6d   :  { %v245_v24 = vadd.f32 %v244_v6, %v243_v14  ;;  %v596_v6 = vsel %vm136_vm0, %v434_v50, 0.0  ;;  %v595_v11 = vadd.f32 %v594_v59, %v593_v62  ;;  %v260_v14 = vsel %vm136_vm0, %v1938_v19, 0.0 }
  0x6e   :  { %v443_v62 = vmul.f32 %v1758_v46, %v1758_v46  ;;  %v2028_v46 = vld [vmem:[%s4323_s0 + $0x238] sm:$0xff] }
  0x6f   :  { %v247_v33 = vadd.f32 %v246_v18, %v245_v24  ;;  %v598_v18 = vsel %vm136_vm0, %v435_v57, 0.0  ;;  %v597_v23 = vadd.f32 %v596_v6, %v595_v11  ;;  %v262_v24 = vsel %vm136_vm0, %v1948_v22, 0.0 }
  0x70   :  { %v444_v11 = vmul.f32 %v1768_v49, %v1768_v49  ;;  %v2038_v49 = vld [vmem:[%s4323_s0 + $0x240] sm:$0xff] }
  0x71   :  { %v249_v38 = vadd.f32 %v248_v27, %v247_v33  ;;  %v600_v27 = vsel %vm136_vm0, %v436_v5, 0.0  ;;  %v599_v32 = vadd.f32 %v598_v18, %v597_v23  ;;  %v264_v33 = vsel %vm136_vm0, %v1958_v25, 0.0 }
  0x72   :  { %v445_v23 = vmul.f32 %v1778_v52, %v1778_v52  ;;  %v2048_v52 = vld [vmem:[%s4323_s0 + $0x248] sm:$0xff] }
  0x73   :  { %v251_v45 = vadd.f32 %v250_v1, %v249_v38  ;;  %v602_v1 = vsel %vm136_vm0, %v437_v15, 0.0  ;;  %v601_v36 = vadd.f32 %v600_v27, %v599_v32  ;;  %v266_v38 = vsel %vm136_vm0, %v1968_v28, 0.0 }
  0x74   :  { %v446_v32 = vmul.f32 %v1788_v55, %v1788_v55  ;;  %v2058_v55 = vld [vmem:[%s4323_s0 + $0x250] sm:$0xff] }
  0x75   :  { %v253_v53 = vadd.f32 %v252_v41, %v251_v45  ;;  %v604_v41 = vsel %vm136_vm0, %v438_v26, 0.0  ;;  %v603_v44 = vadd.f32 %v602_v1, %v601_v36  ;;  %v268_v45 = vsel %vm136_vm0, %v1978_v31, 0.0 }
  0x76   :  { %v447_v36 = vmul.f32 %v1798_v58, %v1798_v58  ;;  %v2068_v58 = vld [vmem:[%s4323_s0 + $0x258] sm:$0xff] }
  0x77   :  { %v255_v60 = vadd.f32 %v254_v47, %v253_v53  ;;  %v606_v47 = vsel %vm136_vm0, %v439_v35, 0.0  ;;  %v605_v51 = vadd.f32 %v604_v41, %v603_v44  ;;  %v270_v53 = vsel %vm136_vm0, %v1988_v34, 0.0 }
  0x78   :  { %v448_v44 = vmul.f32 %v1808_v61, %v1808_v61  ;;  %v2078_v61 = vld [vmem:[%s4323_s0 + $0x260] sm:$0xff] }
  0x79   :  { %v257_v9 = vadd.f32 %v256_v56, %v255_v60  ;;  %v608_v56 = vsel %vm136_vm0, %v440_v39, 0.0  ;;  %v607_v59 = vadd.f32 %v606_v47, %v605_v51  ;;  %v272_v60 = vsel %vm136_vm0, %v1998_v37, 0.0 }
  0x7a   :  { %v449_v51 = vmul.f32 %v1818_v4, %v1818_v4  ;;  %v2088_v4 = vld [vmem:[%s4323_s0 + $0x268] sm:$0xff] }
  0x7b   :  { %v259_v20 = vadd.f32 %v258_v63, %v257_v9  ;;  %v610_v63 = vsel %vm136_vm0, %v441_v7, 0.0  ;;  %v609_v6 = vadd.f32 %v608_v56, %v607_v59  ;;  %v274_v9 = vsel %vm136_vm0, %v2008_v40, 0.0 }
  0x7c   :  { %v450_v59 = vmul.f32 %v1828_v8, %v1828_v8  ;;  %v2098_v8 = vld [vmem:[%s4323_s0 + $0x270] sm:$0xff] }
  0x7d   :  { %v261_v29 = vadd.f32 %v260_v14, %v259_v20  ;;  %v612_v14 = vsel %vm136_vm0, %v442_v54, 0.0  ;;  %v611_v18 = vadd.f32 %v610_v63, %v609_v6  ;;  %v276_v20 = vsel %vm136_vm0, %v2018_v43, 0.0 }
  0x7e   :  { %v451_v6 = vmul.f32 %v1838_v12, %v1838_v12  ;;  %v2108_v12 = vld [vmem:[%s4323_s0 + $0x278] sm:$0xff] }
  0x7f   :  { %v263_v2 = vadd.f32 %v262_v24, %v261_v29  ;;  %v614_v24 = vsel %vm136_vm0, %v443_v62, 0.0  ;;  %v613_v27 = vadd.f32 %v612_v14, %v611_v18  ;;  %v278_v29 = vsel %vm136_vm0, %v2028_v46, 0.0 }
  0x80   :  { %v452_v18 = vmul.f32 %v1848_v17, %v1848_v17  ;;  %v2118_v17 = vld [vmem:[%s4323_s0 + $0x280] sm:$0xff] }
  0x81   :  { %v265_v42 = vadd.f32 %v264_v33, %v263_v2  ;;  %v616_v33 = vsel %vm136_vm0, %v444_v11, 0.0  ;;  %v615_v1 = vadd.f32 %v614_v24, %v613_v27  ;;  %v280_v2 = vsel %vm136_vm0, %v2038_v49, 0.0 }
  0x82   :  { %v453_v27 = vmul.f32 %v1858_v21, %v1858_v21  ;;  %v2128_v21 = vld [vmem:[%s4323_s0 + $0x288] sm:$0xff] }
  0x83   :  { %v267_v50 = vadd.f32 %v266_v38, %v265_v42  ;;  %v618_v38 = vsel %vm136_vm0, %v445_v23, 0.0  ;;  %v617_v41 = vadd.f32 %v616_v33, %v615_v1  ;;  %v282_v42 = vsel %vm136_vm0, %v2048_v52, 0.0 }
  0x84   :  { %v454_v1 = vmul.f32 %v1868_v30, %v1868_v30  ;;  %v2138_v30 = vld [vmem:[%s4323_s0 + $0x290] sm:$0xff] }
  0x85   :  { %v269_v57 = vadd.f32 %v268_v45, %v267_v50  ;;  %v620_v45 = vsel %vm136_vm0, %v446_v32, 0.0  ;;  %v619_v47 = vadd.f32 %v618_v38, %v617_v41  ;;  %v284_v50 = vsel %vm136_vm0, %v2058_v55, 0.0 }
  0x86   :  { %v455_v41 = vmul.f32 %v1878_v0, %v1878_v0  ;;  %v2148_v0 = vld [vmem:[%s4323_s0 + $0x298] sm:$0xff] }
  0x87   :  { %v271_v5 = vadd.f32 %v270_v53, %v269_v57  ;;  %v622_v53 = vsel %vm136_vm0, %v447_v36, 0.0  ;;  %v621_v56 = vadd.f32 %v620_v45, %v619_v47  ;;  %v286_v57 = vsel %vm136_vm0, %v2068_v58, 0.0 }
  0x88   :  { %v456_v47 = vmul.f32 %v1888_v3, %v1888_v3  ;;  %v2158_v3 = vld [vmem:[%s4323_s0 + $0x2a0] sm:$0xff] }
  0x89   :  { %v273_v15 = vadd.f32 %v272_v60, %v271_v5  ;;  %v624_v60 = vsel %vm136_vm0, %v448_v44, 0.0  ;;  %v623_v63 = vadd.f32 %v622_v53, %v621_v56  ;;  %v288_v5 = vsel %vm136_vm0, %v2078_v61, 0.0 }
  0x8a   :  { %v457_v56 = vmul.f32 %v1898_v48, %v1898_v48  ;;  %v2168_v48 = vld [vmem:[%s4323_s0 + $0x2a8] sm:$0xff] }
  0x8b   :  { %v275_v26 = vadd.f32 %v274_v9, %v273_v15  ;;  %v626_v9 = vsel %vm136_vm0, %v449_v51, 0.0  ;;  %v625_v14 = vadd.f32 %v624_v60, %v623_v63  ;;  %v290_v15 = vsel %vm136_vm0, %v2088_v4, 0.0 }
  0x8c   :  { %v458_v63 = vmul.f32 %v1908_v10, %v1908_v10  ;;  %v2178_v10 = vld [vmem:[%s4323_s0 + $0x2b0] sm:$0xff] }
  0x8d   :  { %v277_v35 = vadd.f32 %v276_v20, %v275_v26  ;;  %v628_v20 = vsel %vm136_vm0, %v450_v59, 0.0  ;;  %v627_v24 = vadd.f32 %v626_v9, %v625_v14  ;;  %v292_v26 = vsel %vm136_vm0, %v2098_v8, 0.0 }
  0x8e   :  { %v459_v14 = vmul.f32 %v1918_v13, %v1918_v13  ;;  %v2188_v13 = vld [vmem:[%s4323_s0 + $0x2b8] sm:$0xff] }
  0x8f   :  { %v279_v39 = vadd.f32 %v278_v29, %v277_v35  ;;  %v630_v29 = vsel %vm136_vm0, %v451_v6, 0.0  ;;  %v629_v33 = vadd.f32 %v628_v20, %v627_v24  ;;  %v294_v35 = vsel %vm136_vm0, %v2108_v12, 0.0 }
  0x90   :  { %v460_v24 = vmul.f32 %v1928_v16, %v1928_v16  ;;  %v2198_v16 = vld [vmem:[%s4323_s0 + $0x2c0] sm:$0xff] }
  0x91   :  { %v281_v7 = vadd.f32 %v280_v2, %v279_v39  ;;  %v632_v2 = vsel %vm136_vm0, %v452_v18, 0.0  ;;  %v631_v38 = vadd.f32 %v630_v29, %v629_v33  ;;  %v296_v39 = vsel %vm136_vm0, %v2118_v17, 0.0 }
  0x92   :  { %v461_v33 = vmul.f32 %v1938_v19, %v1938_v19  ;;  %v2208_v19 = vld [vmem:[%s4323_s0 + $0x2c8] sm:$0xff] }
  0x93   :  { %v283_v54 = vadd.f32 %v282_v42, %v281_v7  ;;  %v634_v42 = vsel %vm136_vm0, %v453_v27, 0.0  ;;  %v633_v45 = vadd.f32 %v632_v2, %v631_v38  ;;  %v298_v7 = vsel %vm136_vm0, %v2128_v21, 0.0 }
  0x94   :  { %v462_v38 = vmul.f32 %v1948_v22, %v1948_v22  ;;  %v2218_v22 = vld [vmem:[%s4323_s0 + $0x2d0] sm:$0xff] }
  0x95   :  { %v285_v62 = vadd.f32 %v284_v50, %v283_v54  ;;  %v636_v50 = vsel %vm136_vm0, %v454_v1, 0.0  ;;  %v635_v53 = vadd.f32 %v634_v42, %v633_v45  ;;  %v300_v54 = vsel %vm136_vm0, %v2138_v30, 0.0 }
  0x96   :  { %v463_v45 = vmul.f32 %v1958_v25, %v1958_v25  ;;  %v2228_v25 = vld [vmem:[%s4323_s0 + $0x2d8] sm:$0xff] }
  0x97   :  { %v287_v11 = vadd.f32 %v286_v57, %v285_v62  ;;  %v638_v57 = vsel %vm136_vm0, %v455_v41, 0.0  ;;  %v637_v60 = vadd.f32 %v636_v50, %v635_v53  ;;  %v302_v62 = vsel %vm136_vm0, %v2148_v0, 0.0 }
  0x98   :  { %v464_v53 = vmul.f32 %v1968_v28, %v1968_v28  ;;  %v2238_v28 = vld [vmem:[%s4323_s0 + $0x2e0] sm:$0xff] }
  0x99   :  { %v289_v23 = vadd.f32 %v288_v5, %v287_v11  ;;  %v640_v5 = vsel %vm136_vm0, %v456_v47, 0.0  ;;  %v639_v9 = vadd.f32 %v638_v57, %v637_v60  ;;  %v304_v11 = vsel %vm136_vm0, %v2158_v3, 0.0 }
  0x9a   :  { %v465_v60 = vmul.f32 %v1978_v31, %v1978_v31  ;;  %v2248_v31 = vld [vmem:[%s4323_s0 + $0x2e8] sm:$0xff] }
  0x9b   :  { %v291_v32 = vadd.f32 %v290_v15, %v289_v23  ;;  %v642_v15 = vsel %vm136_vm0, %v457_v56, 0.0  ;;  %v641_v20 = vadd.f32 %v640_v5, %v639_v9  ;;  %v306_v23 = vsel %vm136_vm0, %v2168_v48, 0.0  ;;  %4422 = vst [vmem:[#allocation2_spill] sm:$0xff] %v2248_v31 }
  0x9c   :  { %v466_v9 = vmul.f32 %v1988_v34, %v1988_v34  ;;  %v2258_v34 = vld [vmem:[%s4323_s0 + $0x2f0] sm:$0xff] }
  0x9d   :  { %v293_v36 = vadd.f32 %v292_v26, %v291_v32  ;;  %v644_v26 = vsel %vm136_vm0, %v458_v63, 0.0  ;;  %v643_v29 = vadd.f32 %v642_v15, %v641_v20  ;;  %v308_v32 = vsel %vm136_vm0, %v2178_v10, 0.0 }
  0x9e   :  { %v467_v20 = vmul.f32 %v1998_v37, %v1998_v37  ;;  %v2268_v37 = vld [vmem:[%s4323_s0 + $0x2f8] sm:$0xff] }
  0x9f   :  { %v295_v44 = vadd.f32 %v294_v35, %v293_v36  ;;  %v646_v35 = vsel %vm136_vm0, %v459_v14, 0.0  ;;  %v645_v2 = vadd.f32 %v644_v26, %v643_v29  ;;  %v310_v36 = vsel %vm136_vm0, %v2188_v13, 0.0  ;;  %4423 = vst [vmem:[#allocation3_spill] sm:$0xff] %v2268_v37 }
  0xa0   :  { %v468_v29 = vmul.f32 %v2008_v40, %v2008_v40  ;;  %v2278_v40 = vld [vmem:[%s4323_s0 + $0x300] sm:$0xff] }
  0xa1   :  { %v297_v51 = vadd.f32 %v296_v39, %v295_v44  ;;  %v648_v39 = vsel %vm136_vm0, %v460_v24, 0.0  ;;  %v647_v42 = vadd.f32 %v646_v35, %v645_v2  ;;  %v312_v44 = vsel %vm136_vm0, %v2198_v16, 0.0 }
  0xa2   :  { %v469_v2 = vmul.f32 %v2018_v43, %v2018_v43  ;;  %v2288_v43 = vld [vmem:[%s4323_s0 + $0x308] sm:$0xff] }
  0xa3   :  { %v299_v59 = vadd.f32 %v298_v7, %v297_v51  ;;  %v650_v7 = vsel %vm136_vm0, %v461_v33, 0.0  ;;  %v649_v50 = vadd.f32 %v648_v39, %v647_v42  ;;  %v314_v51 = vsel %vm136_vm0, %v2208_v19, 0.0  ;;  %4424 = vst [vmem:[#allocation4_spill] sm:$0xff] %v2288_v43 }
  0xa4   :  { %v470_v42 = vmul.f32 %v2028_v46, %v2028_v46  ;;  %v2298_v46 = vld [vmem:[%s4323_s0 + $0x310] sm:$0xff] }
  0xa5   :  { %v301_v6 = vadd.f32 %v300_v54, %v299_v59  ;;  %v652_v54 = vsel %vm136_vm0, %v462_v38, 0.0  ;;  %v651_v57 = vadd.f32 %v650_v7, %v649_v50  ;;  %v316_v59 = vsel %vm136_vm0, %v2218_v22, 0.0  ;;  %4425 = vst [vmem:[#allocation5_spill] sm:$0xff] %v2298_v46 }
  0xa6   :  { %v471_v50 = vmul.f32 %v2038_v49, %v2038_v49 }
  0xa7   :  { %v303_v18 = vadd.f32 %v302_v62, %v301_v6  ;;  %v654_v62 = vsel %vm136_vm0, %v463_v45, 0.0  ;;  %v653_v5 = vadd.f32 %v652_v54, %v651_v57  ;;  %v318_v6 = vsel %vm136_vm0, %v2228_v25, 0.0 }
  0xa8   :  { %v472_v57 = vmul.f32 %v2048_v52, %v2048_v52 }
  0xa9   :  { %v305_v27 = vadd.f32 %v304_v11, %v303_v18  ;;  %v656_v11 = vsel %vm136_vm0, %v464_v53, 0.0  ;;  %v655_v15 = vadd.f32 %v654_v62, %v653_v5  ;;  %v320_v18 = vsel %vm136_vm0, %v2238_v28, 0.0 }
  0xaa   :  { %v332_v5 = vsel %vm136_vm0, %v2298_v46, 0.0 }
  0xab   :  { %v307_v1 = vadd.f32 %v306_v23, %v305_v27  ;;  %v658_v23 = vsel %vm136_vm0, %v465_v60, 0.0  ;;  %v657_v26 = vadd.f32 %v656_v11, %v655_v15  ;;  %v322_v27 = vsel %vm136_vm0, %v2248_v31, 0.0  ;;  %v2308_v60 = vld [vmem:[%s4323_s0 + $0x318] sm:$0xff]  ;;  %v2318_v11 = vld [vmem:[%s4323_s0 + $0x320] sm:$0xff] }
  0xac   :  { %4426 = vst [vmem:[#allocation6_spill] sm:$0xff] %v2308_v60  ;;  %4427 = vst [vmem:[#allocation7_spill] sm:$0xff] %v2318_v11 }
  0xad   :  { %v309_v41 = vadd.f32 %v308_v32, %v307_v1  ;;  %v660_v32 = vsel %vm136_vm0, %v466_v9, 0.0  ;;  %v659_v35 = vadd.f32 %v658_v23, %v657_v26  ;;  %v324_v1 = vsel %vm136_vm0, %v2258_v34, 0.0 }
  0xae   :  { %v670_v9 = vsel %vm136_vm0, %v471_v50, 0.0  ;;  %v672_v23 = vsel %vm136_vm0, %v472_v57, 0.0  ;;  %v2358_v50 = vld [vmem:[%s4323_s0 + $0x340] sm:$0xff] }
  0xaf   :  { %v311_v47 = vadd.f32 %v310_v36, %v309_v41  ;;  %v662_v36 = vsel %vm136_vm0, %v467_v20, 0.0  ;;  %v661_v39 = vadd.f32 %v660_v32, %v659_v35  ;;  %v326_v41 = vsel %vm136_vm0, %v2268_v37, 0.0  ;;  %v2338_v35 = vld [vmem:[%s4323_s0 + $0x330] sm:$0xff]  ;;  %4431 = vst [vmem:[#allocation11_spill] sm:$0xff] %v2358_v50 }
  0xb0   :  { %v474_v20 = vmul.f32 %v2068_v58, %v2068_v58  ;;  %v475_v32 = vmul.f32 %v2078_v61, %v2078_v61  ;;  %4429 = vst [vmem:[#allocation9_spill] sm:$0xff] %v2338_v35 }
  0xb1   :  { %v313_v56 = vadd.f32 %v312_v44, %v311_v47  ;;  %v664_v44 = vsel %vm136_vm0, %v468_v29, 0.0  ;;  %v663_v7 = vadd.f32 %v662_v36, %v661_v39  ;;  %v328_v47 = vsel %vm136_vm0, %v2278_v40, 0.0 }
  0xb2   :  { %v336_v29 = vsel %vm136_vm0, %v2318_v11, 0.0  ;;  %v676_v39 = vsel %vm136_vm0, %v474_v20, 0.0 }
  0xb3   :  { %v315_v63 = vadd.f32 %v314_v51, %v313_v56  ;;  %v666_v51 = vsel %vm136_vm0, %v469_v2, 0.0  ;;  %v665_v54 = vadd.f32 %v664_v44, %v663_v7  ;;  %v330_v56 = vsel %vm136_vm0, %v2288_v43, 0.0 }
  0xb4   :  { %v477_v7 = vmul.f32 %v2098_v8, %v2098_v8 }
  0xb5   :  { %v317_v14 = vadd.f32 %v316_v59, %v315_v63  ;;  %v668_v59 = vsel %vm136_vm0, %v470_v42, 0.0  ;;  %v667_v63 = vadd.f32 %v666_v51, %v665_v54 }
  0xb7   :  { %v319_v24 = vadd.f32 %v318_v6, %v317_v14  ;;  %v473_v6 = vmul.f32 %v2058_v55, %v2058_v55  ;;  %v669_v15 = vadd.f32 %v668_v59, %v667_v63  ;;  %v2368_v59 = vld [vmem:[%s4323_s0 + $0x348] sm:$0xff] }
  0xb8   :  { %v346_v20 = vsel %vm136_vm0, %v2368_v59, 0.0 }
  0xb9   :  { %v321_v33 = vadd.f32 %v320_v18, %v319_v24  ;;  %v334_v18 = vsel %vm136_vm0, %v2308_v60, 0.0  ;;  %v2328_v24 = vld [vmem:[%s4323_s0 + $0x328] sm:$0xff] }
  0xba   :  { %4428 = vst [vmem:[#allocation8_spill] sm:$0xff] %v2328_v24  ;;  %v338_v36 = vsel %vm136_vm0, %v2328_v24, 0.0 }
  0xbb   :  { %v323_v38 = vadd.f32 %v322_v27, %v321_v33  ;;  %v671_v27 = vadd.f32 %v670_v9, %v669_v15  ;;  %v674_v33 = vsel %vm136_vm0, %v473_v6, 0.0  ;;  %v479_v6 = vmul.f32 %v2118_v17, %v2118_v17 }
  0xbc   :  { %v682_v9 = vsel %vm136_vm0, %v477_v7, 0.0  ;;  %v2408_v7 = vld [vmem:[%s4323_s0 + $0x368] sm:$0xff] }
  0xbd   :  { %v325_v45 = vadd.f32 %v324_v1, %v323_v38  ;;  %v673_v2 = vadd.f32 %v672_v23, %v671_v27  ;;  %v476_v38 = vmul.f32 %v2088_v4, %v2088_v4  ;;  %v480_v23 = vmul.f32 %v2128_v21, %v2128_v21  ;;  %v2388_v27 = vld [vmem:[%s4323_s0 + $0x358] sm:$0xff]  ;;  %4435 = vst [vmem:[#allocation15_spill] sm:$0xff] %v2408_v7 }
  0xbe   :  { %4433 = vst [vmem:[#allocation13_spill] sm:$0xff] %v2388_v27 }
  0xbf   :  { %v327_v53 = vadd.f32 %v326_v41, %v325_v45  ;;  %v2348_v41 = vld [vmem:[%s4323_s0 + $0x338] sm:$0xff]  ;;  %v675_v44 = vadd.f32 %v674_v33, %v673_v2  ;;  %v340_v45 = vsel %vm136_vm0, %v2338_v35, 0.0  ;;  %v680_v57 = vsel %vm136_vm0, %v476_v38, 0.0 }
  0xc0   :  { %4430 = vst [vmem:[#allocation10_spill] sm:$0xff] %v2348_v41  ;;  %v342_v54 = vsel %vm136_vm0, %v2348_v41, 0.0  ;;  %v686_v2 = vsel %vm136_vm0, %v479_v6, 0.0  ;;  %v484_v6 = vmul.f32 %v2168_v48, %v2168_v48 }
  0xc1   :  { %v329_v62 = vadd.f32 %v328_v47, %v327_v53  ;;  %v678_v47 = vsel %vm136_vm0, %v475_v32, 0.0  ;;  %v677_v53 = vadd.f32 %v676_v39, %v675_v44  ;;  %v482_v44 = vmul.f32 %v2148_v0, %v2148_v0 }
  0xc3   :  { %v331_v14 = vadd.f32 %v330_v56, %v329_v62  ;;  %v478_v56 = vmul.f32 %v2108_v12, %v2108_v12  ;;  %v679_v63 = vadd.f32 %v678_v47, %v677_v53 }
  0xc5   :  { %v333_v26 = vadd.f32 %v332_v5, %v331_v14  ;;  %v344_v5 = vsel %vm136_vm0, %v2358_v50, 0.0  ;;  %v2378_v14 = vld [vmem:[%s4323_s0 + $0x350] sm:$0xff] }
  0xc6   :  { %4432 = vst [vmem:[#allocation12_spill] sm:$0xff] %v2378_v14  ;;  %v348_v33 = vsel %vm136_vm0, %v2378_v14, 0.0 }
  0xc7   :  { %v335_v1 = vadd.f32 %v334_v18, %v333_v26  ;;  %v681_v18 = vadd.f32 %v680_v57, %v679_v63  ;;  %v684_v26 = vsel %vm136_vm0, %v478_v56, 0.0  ;;  %v2418_v57 = vld [vmem:[%s4323_s0 + $0x370] sm:$0xff] }
  0xc8   :  { %4436 = vst [vmem:[#allocation16_spill] sm:$0xff] %v2418_v57 }
  0xc9   :  { %v337_v42 = vadd.f32 %v336_v29, %v335_v1  ;;  %v683_v32 = vadd.f32 %v682_v9, %v681_v18  ;;  %v481_v1 = vmul.f32 %v2138_v30, %v2138_v30  ;;  %v692_v9 = vsel %vm136_vm0, %v482_v44, 0.0 }
  0xcb   :  { %v339_v51 = vadd.f32 %v338_v36, %v337_v42  ;;  %v2398_v36 = vld [vmem:[%s4323_s0 + $0x360] sm:$0xff]  ;;  %v685_v39 = vadd.f32 %v684_v26, %v683_v32  ;;  %v350_v42 = vsel %vm136_vm0, %v2388_v27, 0.0  ;;  %v690_v56 = vsel %vm136_vm0, %v481_v1, 0.0 }
  0xcc   :  { %4434 = vst [vmem:[#allocation14_spill] sm:$0xff] %v2398_v36  ;;  %v352_v53 = vsel %vm136_vm0, %v2398_v36, 0.0  ;;  %v485_v26 = vmul.f32 %v2178_v10, %v2178_v10  ;;  %v2438_v32 = vld [vmem:[%s4323_s0 + $0x380] sm:$0xff] }
  0xcd   :  { %v341_v62 = vadd.f32 %v340_v45, %v339_v51  ;;  %v688_v45 = vsel %vm136_vm0, %v480_v23, 0.0  ;;  %v687_v51 = vadd.f32 %v686_v2, %v685_v39  ;;  %v356_v23 = vsel %vm136_vm0, %v2418_v57, 0.0 }
  0xce   :  { %v696_v39 = vsel %vm136_vm0, %v484_v6, 0.0 }
  0xcf   :  { %v343_v15 = vadd.f32 %v342_v54, %v341_v62  ;;  %v483_v54 = vmul.f32 %v2158_v3, %v2158_v3  ;;  %v689_v63 = vadd.f32 %v688_v45, %v687_v51  ;;  %v487_v51 = vmul.f32 %v2198_v16, %v2198_v16 }
  0xd1   :  { %v345_v29 = vadd.f32 %v344_v5, %v343_v15  ;;  %v354_v5 = vsel %vm136_vm0, %v2408_v7, 0.0  ;;  %v2428_v15 = vld [vmem:[%s4323_s0 + $0x378] sm:$0xff] }
  0xd2   :  { %v358_v2 = vsel %vm136_vm0, %v2428_v15, 0.0 }
  0xd3   :  { %v347_v38 = vadd.f32 %v346_v20, %v345_v29  ;;  %v691_v20 = vadd.f32 %v690_v56, %v689_v63  ;;  %v694_v29 = vsel %vm136_vm0, %v483_v54, 0.0  ;;  %v2458_v54 = vld [vmem:[%s4323_s0 + $0x390] sm:$0xff] }
  0xd5   :  { %v349_v47 = vadd.f32 %v348_v33, %v347_v38  ;;  %v693_v1 = vadd.f32 %v692_v9, %v691_v20  ;;  %v486_v38 = vmul.f32 %v2188_v13, %v2188_v13  ;;  %v2468_v9 = vld [vmem:[%s4323_s0 + $0x398] sm:$0xff] }
  0xd7   :  { %v351_v62 = vadd.f32 %v350_v42, %v349_v47  ;;  %v2448_v42 = vld [vmem:[%s4323_s0 + $0x388] sm:$0xff]  ;;  %v695_v45 = vadd.f32 %v694_v29, %v693_v1  ;;  %v360_v47 = vsel %vm136_vm0, %v2438_v32, 0.0  ;;  %v700_v6 = vsel %vm136_vm0, %v486_v38, 0.0 }
  0xd8   :  { %v362_v63 = vsel %vm136_vm0, %v2448_v42, 0.0  ;;  %v702_v29 = vsel %vm136_vm0, %v487_v51, 0.0  ;;  %v366_v38 = vsel %vm136_vm0, %v2468_v9, 0.0 }
  0xd9   :  { %v353_v18 = vadd.f32 %v352_v53, %v351_v62  ;;  %v698_v53 = vsel %vm136_vm0, %v485_v26, 0.0  ;;  %v697_v62 = vadd.f32 %v696_v39, %v695_v45  ;;  %v489_v26 = vmul.f32 %v2218_v22, %v2218_v22  ;;  %v2488_v45 = vld [vmem:[%s4323_s0 + $0x3a8] sm:$0xff] }
  0xda   :  { %v490_v39 = vmul.f32 %v2228_v25, %v2228_v25 }
  0xdb   :  { %v355_v33 = vadd.f32 %v354_v5, %v353_v18  ;;  %v488_v5 = vmul.f32 %v2208_v19, %v2208_v19  ;;  %v699_v20 = vadd.f32 %v698_v53, %v697_v62  ;;  %v706_v62 = vsel %vm136_vm0, %v489_v26, 0.0  ;;  %v2508_v26 = vld [vmem:[%s4323_s0 + $0x3b8] sm:$0xff] }
  0xdd   :  { %v357_v44 = vadd.f32 %v356_v23, %v355_v33  ;;  %v364_v23 = vsel %vm136_vm0, %v2458_v54, 0.0  ;;  %v2478_v33 = vld [vmem:[%s4323_s0 + $0x3a0] sm:$0xff] }
  0xde   :  { %4437 = vst [vmem:[#allocation17_spill] sm:$0xff] %v2478_v33  ;;  %v368_v53 = vsel %vm136_vm0, %v2478_v33, 0.0 }
  0xdf   :  { %v359_v56 = vadd.f32 %v358_v2, %v357_v44  ;;  %v701_v2 = vadd.f32 %v700_v6, %v699_v20  ;;  %v704_v44 = vsel %vm136_vm0, %v488_v5, 0.0  ;;  %v492_v20 = vmul.f32 %v2248_v31, %v2248_v31  ;;  %v2523_v31 = vld [vmem:[%s4323_s0 + $0x3c0] sm:$0xff] }
  0xe1   :  { %v361_v18 = vadd.f32 %v360_v47, %v359_v56  ;;  %v703_v51 = vadd.f32 %v702_v29, %v701_v2  ;;  %v491_v56 = vmul.f32 %v2238_v28, %v2238_v28 }
  0xe3   :  { %v363_v1 = vadd.f32 %v362_v63, %v361_v18  ;;  %v2498_v63 = vld [vmem:[%s4323_s0 + $0x3b0] sm:$0xff]  ;;  %v705_v6 = vadd.f32 %v704_v44, %v703_v51  ;;  %v370_v18 = vsel %vm136_vm0, %v2488_v45, 0.0  ;;  %v710_v44 = vsel %vm136_vm0, %v491_v56, 0.0 }
  0xe4   :  { %v372_v2 = vsel %vm136_vm0, %v2498_v63, 0.0  ;;  %v495_v56 = vmul.f32 %v2278_v40, %v2278_v40 }
  0xe5   :  { %v365_v47 = vadd.f32 %v364_v23, %v363_v1  ;;  %v708_v23 = vsel %vm136_vm0, %v490_v39, 0.0  ;;  %v707_v1 = vadd.f32 %v706_v62, %v705_v6  ;;  %v494_v39 = vmul.f32 %v2268_v37, %v2268_v37  ;;  %v4517_v37 = vld [vmem:[#allocation15_spill] sm:$0xff] }
  0xe7   :  { %v367_v5 = vadd.f32 %v366_v38, %v365_v47  ;;  %v493_v38 = vmul.f32 %v2258_v34, %v2258_v34  ;;  %v709_v51 = vadd.f32 %v708_v23, %v707_v1  ;;  %v716_v1 = vsel %vm136_vm0, %v494_v39, 0.0 }
  0xe9   :  { %v369_v29 = vadd.f32 %v368_v53, %v367_v5  ;;  %v712_v53 = vsel %vm136_vm0, %v492_v20, 0.0  ;;  %v374_v5 = vsel %vm136_vm0, %v2508_v26, 0.0  ;;  %v711_v6 = vadd.f32 %v710_v44, %v709_v51 }
  0xea   :  { %v496_v20 = vmul.f32 %v2288_v43, %v2288_v43  ;;  %v497_v51 = vmul.f32 %v2298_v46, %v2298_v46  ;;  %v499_v46 = vmul.f32 %v2318_v11, %v2318_v11  ;;  %v501_v11 = vmul.f32 %v2338_v35, %v2338_v35 }
  0xeb   :  { %v371_v47 = vadd.f32 %v370_v18, %v369_v29  ;;  %v714_v18 = vsel %vm136_vm0, %v493_v38, 0.0  ;;  %v713_v23 = vadd.f32 %v712_v53, %v711_v6  ;;  %v718_v38 = vsel %vm136_vm0, %v495_v56, 0.0 }
  0xec   :  { %v720_v39 = vsel %vm136_vm0, %v496_v20, 0.0  ;;  %v722_v56 = vsel %vm136_vm0, %v497_v51, 0.0  ;;  %v726_v51 = vsel %vm136_vm0, %v499_v46, 0.0  ;;  %v503_v35 = vmul.f32 %v2358_v50, %v2358_v50 }
  0xed   :  { %v373_v62 = vadd.f32 %v372_v2, %v371_v47  ;;  %v376_v2 = vsel %vm136_vm0, %v2523_v31, 0.0  ;;  %v715_v44 = vadd.f32 %v714_v18, %v713_v23  ;;  %v2536_v47 = vld [vmem:[%s4323_s0 + $0x3c8] sm:$0xff]  ;;  %v2549_v23 = vld [vmem:[%s4323_s0 + $0x3d0] sm:$0xff]  ;;  %v730_v46 = vsel %vm136_vm0, %v501_v11, 0.0 }
  0xee   :  { %4438 = vst [vmem:[#allocation18_spill] sm:$0xff] %v2536_v47  ;;  %v378_v6 = vsel %vm136_vm0, %v2536_v47, 0.0  ;;  %4439 = vst [vmem:[#allocation19_spill] sm:$0xff] %v2549_v23  ;;  %v505_v50 = vmul.f32 %v2378_v14, %v2378_v14  ;;  %v734_v11 = vsel %vm136_vm0, %v503_v35, 0.0  ;;  %v507_v14 = vmul.f32 %v2398_v36, %v2398_v36 }
  0xef   :  { %v375_v29 = vadd.f32 %v374_v5, %v373_v62  ;;  %v717_v53 = vadd.f32 %v716_v1, %v715_v44  ;;  %v498_v5 = vmul.f32 %v2308_v60, %v2308_v60  ;;  %v380_v44 = vsel %vm136_vm0, %v2549_v23, 0.0 }
  0xf0   :  { %v738_v35 = vsel %vm136_vm0, %v505_v50, 0.0  ;;  %v509_v36 = vmul.f32 %v2418_v57, %v2418_v57  ;;  %v742_v50 = vsel %vm136_vm0, %v507_v14, 0.0  ;;  %v512_v14 = vmul.f32 %v2448_v42, %v2448_v42 }
  0xf1   :  { %v377_v62 = vadd.f32 %v376_v2, %v375_v29  ;;  %v719_v18 = vadd.f32 %v718_v38, %v717_v53  ;;  %v500_v2 = vmul.f32 %v2328_v24, %v2328_v24  ;;  %v724_v20 = vsel %vm136_vm0, %v498_v5, 0.0  ;;  %v2562_v53 = vld [vmem:[%s4323_s0 + $0x3d8] sm:$0xff] }
  0xf2   :  { %4440 = vst [vmem:[#allocation20_spill] sm:$0xff] %v2562_v53 }
  0xf3   :  { %v721_v29 = vadd.f32 %v720_v39, %v719_v18  ;;  %v379_v1 = vadd.f32 %v378_v6, %v377_v62  ;;  %v502_v6 = vmul.f32 %v2348_v41, %v2348_v41  ;;  %v728_v5 = vsel %vm136_vm0, %v500_v2, 0.0 }
  0xf4   :  { %v382_v18 = vsel %vm136_vm0, %v2562_v53, 0.0 }
  0xf5   :  { %v723_v38 = vadd.f32 %v722_v56, %v721_v29  ;;  %v381_v39 = vadd.f32 %v380_v44, %v379_v1  ;;  %v2575_v29 = vld [vmem:[%s4323_s0 + $0x3e0] sm:$0xff]  ;;  %v504_v44 = vmul.f32 %v2368_v59, %v2368_v59  ;;  %v732_v2 = vsel %vm136_vm0, %v502_v6, 0.0 }
  0xf6   :  { %4441 = vst [vmem:[#allocation21_spill] sm:$0xff] %v2575_v29 }
  0xf7   :  { %v725_v62 = vadd.f32 %v724_v20, %v723_v38  ;;  %v383_v20 = vadd.f32 %v382_v18, %v381_v39  ;;  %v384_v38 = vsel %vm136_vm0, %v2575_v29, 0.0  ;;  %v506_v18 = vmul.f32 %v2388_v27, %v2388_v27 }
  0xf8   :  { %v736_v6 = vsel %vm136_vm0, %v504_v44, 0.0 }
  0xf9   :  { %v727_v56 = vadd.f32 %v726_v51, %v725_v62  ;;  %v2588_v62 = vld [vmem:[%s4323_s0 + $0x3e8] sm:$0xff]  ;;  %v740_v44 = vsel %vm136_vm0, %v506_v18, 0.0 }
  0xfa   :  { %4442 = vst [vmem:[#allocation22_spill] sm:$0xff] %v2588_v62 }
  0xfb   :  { %v729_v1 = vadd.f32 %v728_v5, %v727_v56  ;;  %v385_v5 = vadd.f32 %v384_v38, %v383_v20  ;;  %v386_v56 = vsel %vm136_vm0, %v2588_v62, 0.0  ;;  %v508_v38 = vmul.f32 %v2408_v7, %v2408_v7 }
  0xfc   :  { %v746_v7 = vsel %vm136_vm0, %v509_v36, 0.0  ;;  %v752_v36 = vsel %vm136_vm0, %v512_v14, 0.0 }
  0xfd   :  { %v731_v51 = vadd.f32 %v730_v46, %v729_v1  ;;  %v2601_v1 = vld [vmem:[%s4323_s0 + $0x3f0] sm:$0xff]  ;;  %v744_v18 = vsel %vm136_vm0, %v508_v38, 0.0  ;;  %v513_v38 = vmul.f32 %v2458_v54, %v2458_v54 }
  0xfe   :  { %4443 = vst [vmem:[#allocation23_spill] sm:$0xff] %v2601_v1 }
  0xff   :  { %v733_v39 = vadd.f32 %v732_v2, %v731_v51  ;;  %v387_v2 = vadd.f32 %v386_v56, %v385_v5  ;;  %v388_v51 = vsel %vm136_vm0, %v2601_v1, 0.0  ;;  %v510_v56 = vmul.f32 %v2428_v15, %v2428_v15 }
 0x101   :  { %v735_v46 = vadd.f32 %v734_v11, %v733_v39  ;;  %v2614_v39 = vld [vmem:[%s4323_s0 + $0x3f8] sm:$0xff] }
 0x102   :  { %4444 = vst [vmem:[#allocation24_spill] sm:$0xff] %v2614_v39 }
 0x103   :  { %v737_v20 = vadd.f32 %v736_v6, %v735_v46  ;;  %v389_v6 = vadd.f32 %v388_v51, %v387_v2  ;;  %v390_v46 = vsel %vm136_vm0, %v2614_v39, 0.0  ;;  %v748_v2 = vsel %vm136_vm0, %v510_v56, 0.0 }
 0x105   :  { %v739_v11 = vadd.f32 %v738_v35, %v737_v20  ;;  %v511_v20 = vmul.f32 %v2438_v32, %v2438_v32  ;;  %v391_v57 = vadd.f32 %v390_v46, %v389_v6  ;;  %v515_v6 = vmul.f32 %v2478_v33, %v2478_v33 }
 0x106   :  { %v754_v46 = vsel %vm136_vm0, %v513_v38, 0.0 }
 0x107   :  { %v741_v5 = vadd.f32 %v740_v44, %v739_v11  ;;  %v750_v51 = vsel %vm136_vm0, %v511_v20, 0.0 }
 0x109   :  { %v743_v35 = vadd.f32 %v742_v50, %v741_v5  ;;  %v392_v50 = vrot.slane %v391_v57, 4  ;;  %v514_v5 = vmul.f32 %v2468_v9, %v2468_v9 }
 0x10b   :  { %v745_v27 = vadd.f32 %v744_v18, %v743_v35  ;;  %v756_v35 = vsel %vm136_vm0, %v514_v5, 0.0 }
 0x10d   :  { %v747_v44 = vadd.f32 %v746_v7, %v745_v27  ;;  %v393_v27 = vadd.f32 %v392_v50, %v391_v57  ;;  %v516_v7 = vmul.f32 %v2488_v45, %v2488_v45  ;;  %v519_v57 = vmul.f32 %v2523_v31, %v2523_v31 }
 0x10f   :  { %v749_v11 = vadd.f32 %v748_v2, %v747_v44  ;;  %v517_v2 = vmul.f32 %v2498_v63, %v2498_v63  ;;  %v758_v44 = vsel %vm136_vm0, %v515_v6, 0.0  ;;  %v760_v38 = vsel %vm136_vm0, %v516_v7, 0.0 }
 0x111   :  { %v751_v18 = vadd.f32 %v750_v51, %v749_v11  ;;  %v394_v51 = vrot.slane %v393_v27, 2  ;;  %v518_v11 = vmul.f32 %v2508_v26, %v2508_v26  ;;  %v762_v50 = vsel %vm136_vm0, %v517_v2, 0.0 }
 0x113   :  { %v753_v56 = vadd.f32 %v752_v36, %v751_v18  ;;  %v395_v18 = vadd.f32 %v394_v51, %v393_v27  ;;  %v764_v6 = vsel %vm136_vm0, %v518_v11, 0.0  ;;  %v523_v27 = vmul.f32 %v2575_v29, %v2575_v29 }
 0x115   :  { %v755_v20 = vadd.f32 %v754_v46, %v753_v56  ;;  %v520_v46 = vmul.f32 %v2536_v47, %v2536_v47 }
 0x117   :  { %v757_v14 = vadd.f32 %v756_v35, %v755_v20  ;;  %v521_v35 = vmul.f32 %v2549_v23, %v2549_v23  ;;  %v766_v20 = vsel %vm136_vm0, %v519_v57, 0.0  ;;  %v768_v2 = vsel %vm136_vm0, %v520_v46, 0.0 }
 0x119   :  { %v759_v36 = vadd.f32 %v758_v44, %v757_v14  ;;  %v396_v44 = vrot.slane %v395_v18, 1  ;;  %v522_v14 = vmul.f32 %v2562_v53, %v2562_v53  ;;  %v770_v51 = vsel %vm136_vm0, %v521_v35, 0.0 }
 0x11b   :  { %v761_v5 = vadd.f32 %v760_v38, %v759_v36  ;;  %v397_v36 = vadd.f32 %v396_v44, %v395_v18  ;;  %v772_v57 = vsel %vm136_vm0, %v522_v14, 0.0 }
 0x11d   :  { %v763_v56 = vadd.f32 %v762_v50, %v761_v5  ;;  %v524_v50 = vmul.f32 %v2588_v62, %v2588_v62 }
 0x11f   :  { %v765_v7 = vadd.f32 %v764_v6, %v763_v56  ;;  %v525_v6 = vmul.f32 %v2601_v1, %v2601_v1  ;;  %v774_v56 = vsel %vm136_vm0, %v523_v27, 0.0  ;;  %v776_v35 = vsel %vm136_vm0, %v524_v50, 0.0  ;;  %v2683_v27 = vld [vmem:[%s4323_s0] sm:$0xff]  ;;  %v2760_v50 = vld [vmem:[%s4323_s0 + $0x58] sm:$0xff] }
 0x120   :  { %4449 = vst [vmem:[#allocation29_spill] sm:$0xff] %v2760_v50  ;;  %v2802_v50 = vld [vmem:[%s4323_s0 + $0x88] sm:$0xff] }
 0x121   :  { %v767_v38 = vadd.f32 %v766_v20, %v765_v7  ;;  %v2669_v20 = vmul.f32 0.0009765625, %v397_v36  ;;  %v526_v7 = vmul.f32 %v2614_v39, %v2614_v39  ;;  %v778_v44 = vsel %vm136_vm0, %v525_v6, 0.0  ;;  %v2690_v36 = vld [vmem:[%s4323_s0 + $0x8] sm:$0xff]  ;;  %v2704_v6 = vld [vmem:[%s4323_s0 + $0x18] sm:$0xff]  ;;  %4455 = vst [vmem:[#allocation35_spill] sm:$0xff] %v2802_v50 }
 0x122   :  { %v2844_v50 = vld [vmem:[%s4323_s0 + $0xb8] sm:$0xff] }
 0x123   :  { %v769_v11 = vadd.f32 %v768_v2, %v767_v38  ;;  %v780_v14 = vsel %vm136_vm0, %v526_v7, 0.0  ;;  %v2678_v38 = vmul.f32 %v2669_v20, %v2669_v20  ;;  %v2732_v7 = vld [vmem:[%s4323_s0 + $0x38] sm:$0xff]  ;;  %4461 = vst [vmem:[#allocation41_spill] sm:$0xff] %v2844_v50  ;;  %v2886_v50 = vld [vmem:[%s4323_s0 + $0xe8] sm:$0xff]  ;;  %v4519_v24 = vsub.f32 %v2683_v27, %v2669_v20 }
 0x124   :  { %4445 = vst [vmem:[#allocation25_spill] sm:$0xff] %v2732_v7  ;;  %4467 = vst [vmem:[#allocation47_spill] sm:$0xff] %v2886_v50  ;;  %v2928_v50 = vld [vmem:[%s4323_s0 + $0x118] sm:$0xff]  ;;  %v4522_v60 = vsub.f32 %v2704_v6, %v2669_v20 }
 0x125   :  { %v771_v5 = vadd.f32 %v770_v51, %v769_v11  ;;  %v2767_v51 = vld [vmem:[%s4323_s0 + $0x60] sm:$0xff]  ;;  %4473 = vst [vmem:[#allocation53_spill] sm:$0xff] %v2928_v50 }
 0x126   :  { %4450 = vst [vmem:[#allocation30_spill] sm:$0xff] %v2767_v51  ;;  %v2809_v51 = vld [vmem:[%s4323_s0 + $0x90] sm:$0xff] }
 0x127   :  { %v773_v46 = vadd.f32 %v772_v57, %v771_v5  ;;  %v2697_v57 = vld [vmem:[%s4323_s0 + $0x10] sm:$0xff]  ;;  %4456 = vst [vmem:[#allocation36_spill] sm:$0xff] %v2809_v51  ;;  %v2879_v51 = vld [vmem:[%s4323_s0 + $0xe0] sm:$0xff] }
 0x128   :  { %4466 = vst [vmem:[#allocation46_spill] sm:$0xff] %v2879_v51  ;;  %v2921_v51 = vld [vmem:[%s4323_s0 + $0x110] sm:$0xff]  ;;  %v4521_v43 = vsub.f32 %v2697_v57, %v2669_v20 }
 0x129   :  { %v775_v18 = vadd.f32 %v774_v56, %v773_v46  ;;  %v2711_v46 = vld [vmem:[%s4323_s0 + $0x20] sm:$0xff]  ;;  %v2781_v56 = vld [vmem:[%s4323_s0 + $0x70] sm:$0xff]  ;;  %4472 = vst [vmem:[#allocation52_spill] sm:$0xff] %v2921_v51 }
 0x12a   :  { %4452 = vst [vmem:[#allocation32_spill] sm:$0xff] %v2781_v56  ;;  %v2823_v56 = vld [vmem:[%s4323_s0 + $0xa0] sm:$0xff]  ;;  %v4523_v27 = vsub.f32 %v2711_v46, %v2669_v20 }
 0x12b   :  { %v777_v2 = vadd.f32 %v776_v35, %v775_v18  ;;  %v2718_v35 = vld [vmem:[%s4323_s0 + $0x28] sm:$0xff]  ;;  %v2739_v18 = vld [vmem:[%s4323_s0 + $0x40] sm:$0xff]  ;;  %4458 = vst [vmem:[#allocation38_spill] sm:$0xff] %v2823_v56  ;;  %v2865_v56 = vld [vmem:[%s4323_s0 + $0xd0] sm:$0xff] }
 0x12c   :  { %4446 = vst [vmem:[#allocation26_spill] sm:$0xff] %v2739_v18  ;;  %4464 = vst [vmem:[#allocation44_spill] sm:$0xff] %v2865_v56  ;;  %v2907_v56 = vld [vmem:[%s4323_s0 + $0x100] sm:$0xff]  ;;  %v4526_v39 = vld [vmem:[#allocation25_spill] sm:$0xff] }
 0x12d   :  { %v779_v11 = vadd.f32 %v778_v44, %v777_v2  ;;  %v2725_v44 = vld [vmem:[%s4323_s0 + $0x30] sm:$0xff]  ;;  %v2746_v2 = vld [vmem:[%s4323_s0 + $0x48] sm:$0xff]  ;;  %4470 = vst [vmem:[#allocation50_spill] sm:$0xff] %v2907_v56  ;;  %v2963_v51 = vld [vmem:[%s4323_s0 + $0x140] sm:$0xff]  ;;  %v4527_v6 = vsub.f32 %v4526_v39, %v2669_v20 }
 0x12e   :  { %4447 = vst [vmem:[#allocation27_spill] sm:$0xff] %v2746_v2  ;;  %v2788_v2 = vld [vmem:[%s4323_s0 + $0x78] sm:$0xff]  ;;  %4478 = vst [vmem:[#allocation58_spill] sm:$0xff] %v2963_v51  ;;  %v2977_v56 = vld [vmem:[%s4323_s0 + $0x150] sm:$0xff]  ;;  %v4525_v57 = vsub.f32 %v2725_v44, %v2669_v20 }
 0x12f   :  { %v781_v5 = vadd.f32 %v780_v14, %v779_v11  ;;  %v2753_v14 = vld [vmem:[%s4323_s0 + $0x50] sm:$0xff]  ;;  %v2774_v11 = vld [vmem:[%s4323_s0 + $0x68] sm:$0xff]  ;;  %4453 = vst [vmem:[#allocation33_spill] sm:$0xff] %v2788_v2  ;;  %4480 = vst [vmem:[#allocation60_spill] sm:$0xff] %v2977_v56 }
 0x130   :  { %4448 = vst [vmem:[#allocation28_spill] sm:$0xff] %v2753_v14  ;;  %4451 = vst [vmem:[#allocation31_spill] sm:$0xff] %v2774_v11  ;;  %v2795_v14 = vld [vmem:[%s4323_s0 + $0x80] sm:$0xff]  ;;  %v2816_v11 = vld [vmem:[%s4323_s0 + $0x98] sm:$0xff] }
 0x131   :  { %v782_v18 = vrot.slane %v781_v5, 4  ;;  %4454 = vst [vmem:[#allocation34_spill] sm:$0xff] %v2795_v14  ;;  %4457 = vst [vmem:[#allocation37_spill] sm:$0xff] %v2816_v11  ;;  %v2830_v2 = vld [vmem:[%s4323_s0 + $0xa8] sm:$0xff]  ;;  %v2837_v14 = vld [vmem:[%s4323_s0 + $0xb0] sm:$0xff] }
 0x132   :  { %4459 = vst [vmem:[#allocation39_spill] sm:$0xff] %v2830_v2  ;;  %4460 = vst [vmem:[#allocation40_spill] sm:$0xff] %v2837_v14  ;;  %v2858_v11 = vld [vmem:[%s4323_s0 + $0xc8] sm:$0xff]  ;;  %v3005_v51 = vld [vmem:[%s4323_s0 + $0x170] sm:$0xff] }
 0x133   :  { %v783_v7 = vadd.f32 %v782_v18, %v781_v5  ;;  %v2851_v5 = vld [vmem:[%s4323_s0 + $0xc0] sm:$0xff]  ;;  %4463 = vst [vmem:[#allocation43_spill] sm:$0xff] %v2858_v11  ;;  %v2872_v18 = vld [vmem:[%s4323_s0 + $0xd8] sm:$0xff]  ;;  %4484 = vst [vmem:[#allocation64_spill] sm:$0xff] %v3005_v51 }
 0x134   :  { %4462 = vst [vmem:[#allocation42_spill] sm:$0xff] %v2851_v5  ;;  %4465 = vst [vmem:[#allocation45_spill] sm:$0xff] %v2872_v18  ;;  %v2893_v5 = vld [vmem:[%s4323_s0 + $0xf0] sm:$0xff]  ;;  %v2900_v11 = vld [vmem:[%s4323_s0 + $0xf8] sm:$0xff] }
 0x135   :  { %v784_v14 = vrot.slane %v783_v7, 2  ;;  %4468 = vst [vmem:[#allocation48_spill] sm:$0xff] %v2893_v5  ;;  %4469 = vst [vmem:[#allocation49_spill] sm:$0xff] %v2900_v11  ;;  %v2914_v18 = vld [vmem:[%s4323_s0 + $0x108] sm:$0xff]  ;;  %v2935_v5 = vld [vmem:[%s4323_s0 + $0x120] sm:$0xff] }
 0x136   :  { %4471 = vst [vmem:[#allocation51_spill] sm:$0xff] %v2914_v18  ;;  %4474 = vst [vmem:[#allocation54_spill] sm:$0xff] %v2935_v5  ;;  %v2942_v11 = vld [vmem:[%s4323_s0 + $0x128] sm:$0xff]  ;;  %v2956_v18 = vld [vmem:[%s4323_s0 + $0x138] sm:$0xff] }
 0x137   :  { %v785_v2 = vadd.f32 %v784_v14, %v783_v7  ;;  %4475 = vst [vmem:[#allocation55_spill] sm:$0xff] %v2942_v11  ;;  %v2949_v7 = vld [vmem:[%s4323_s0 + $0x130] sm:$0xff]  ;;  %4477 = vst [vmem:[#allocation57_spill] sm:$0xff] %v2956_v18  ;;  %v2970_v14 = vld [vmem:[%s4323_s0 + $0x148] sm:$0xff] }
 0x138   :  { %4476 = vst [vmem:[#allocation56_spill] sm:$0xff] %v2949_v7  ;;  %4479 = vst [vmem:[#allocation59_spill] sm:$0xff] %v2970_v14  ;;  %v2984_v11 = vld [vmem:[%s4323_s0 + $0x158] sm:$0xff]  ;;  %v2991_v7 = vld [vmem:[%s4323_s0 + $0x160] sm:$0xff] }
 0x139   :  { %v786_v5 = vrot.slane %v785_v2, 1  ;;  %4481 = vst [vmem:[#allocation61_spill] sm:$0xff] %v2984_v11  ;;  %4482 = vst [vmem:[#allocation62_spill] sm:$0xff] %v2991_v7  ;;  %v2998_v18 = vld [vmem:[%s4323_s0 + $0x168] sm:$0xff]  ;;  %v3012_v14 = vld [vmem:[%s4323_s0 + $0x178] sm:$0xff] }
 0x13a   :  { %4483 = vst [vmem:[#allocation63_spill] sm:$0xff] %v2998_v18  ;;  %4485 = vst [vmem:[#allocation65_spill] sm:$0xff] %v3012_v14  ;;  %v3019_v56 = vld [vmem:[%s4323_s0 + $0x180] sm:$0xff]  ;;  %v3026_v11 = vld [vmem:[%s4323_s0 + $0x188] sm:$0xff] }
 0x13b   :  { %4486 = vst [vmem:[#allocation66_spill] sm:$0xff] %v3019_v56  ;;  %4487 = vst [vmem:[#allocation67_spill] sm:$0xff] %v3026_v11  ;;  %v787_v50 = vadd.f32 %v786_v5, %v785_v2  ;;  %v3033_v7 = vld [vmem:[%s4323_s0 + $0x190] sm:$0xff]  ;;  %v3040_v18 = vld [vmem:[%s4323_s0 + $0x198] sm:$0xff] }
 0x13c   :  { %4488 = vst [vmem:[#allocation68_spill] sm:$0xff] %v3033_v7  ;;  %4489 = vst [vmem:[#allocation69_spill] sm:$0xff] %v3040_v18  ;;  %v3047_v2 = vld [vmem:[%s4323_s0 + $0x1a0] sm:$0xff]  ;;  %v3054_v14 = vld [vmem:[%s4323_s0 + $0x1a8] sm:$0xff] }
 0x13d   :  { %4490 = vst [vmem:[#allocation70_spill] sm:$0xff] %v3047_v2  ;;  %4491 = vst [vmem:[#allocation71_spill] sm:$0xff] %v3054_v14  ;;  %v3061_v56 = vld [vmem:[%s4323_s0 + $0x1b0] sm:$0xff]  ;;  %v3068_v5 = vld [vmem:[%s4323_s0 + $0x1b8] sm:$0xff]  ;;  %v788_v7 = vmul.f32 0.0009765625, %v787_v50 }
 0x13e   :  { %4492 = vst [vmem:[#allocation72_spill] sm:$0xff] %v3061_v56  ;;  %4493 = vst [vmem:[#allocation73_spill] sm:$0xff] %v3068_v5  ;;  %v3075_v51 = vld [vmem:[%s4323_s0 + $0x1c0] sm:$0xff]  ;;  %v3082_v18 = vld [vmem:[%s4323_s0 + $0x1c8] sm:$0xff] }
 0x13f   :  { %4494 = vst [vmem:[#allocation74_spill] sm:$0xff] %v3075_v51  ;;  %4495 = vst [vmem:[#allocation75_spill] sm:$0xff] %v3082_v18  ;;  %v3089_v2 = vld [vmem:[%s4323_s0 + $0x1d0] sm:$0xff]  ;;  %v3096_v50 = vld [vmem:[%s4323_s0 + $0x1d8] sm:$0xff]  ;;  %v790_v51 = vsub.f32 %v788_v7, %v2678_v38 }
 0x140   :  { %4496 = vst [vmem:[#allocation76_spill] sm:$0xff] %v3089_v2  ;;  %4497 = vst [vmem:[#allocation77_spill] sm:$0xff] %v3096_v50  ;;  %v3103_v56 = vld [vmem:[%s4323_s0 + $0x1e0] sm:$0xff]  ;;  %v3110_v5 = vld [vmem:[%s4323_s0 + $0x1e8] sm:$0xff] }
 0x141   :  { %4498 = vst [vmem:[#allocation78_spill] sm:$0xff] %v3103_v56  ;;  %4499 = vst [vmem:[#allocation79_spill] sm:$0xff] %v3110_v5  ;;  %v3117_v14 = vld [vmem:[%s4323_s0 + $0x1f0] sm:$0xff]  ;;  %v3124_v18 = vld [vmem:[%s4323_s0 + $0x1f8] sm:$0xff] }
 0x142   :  { %4500 = vst [vmem:[#allocation80_spill] sm:$0xff] %v3117_v14  ;;  %4501 = vst [vmem:[#allocation81_spill] sm:$0xff] %v3124_v18  ;;  %v3132_v2 = vld [vmem:[%s4323_s0 + $0x200] sm:$0xff]  ;;  %v3139_v50 = vld [vmem:[%s4323_s0 + $0x208] sm:$0xff]  ;;  %v4520_v18 = vsub.f32 %v2690_v36, %v2669_v20  ;;  %v4524_v36 = vsub.f32 %v2718_v35, %v2669_v20 }
 0x143   :  { %4502 = vst [vmem:[#allocation82_spill] sm:$0xff] %v3132_v2  ;;  %4503 = vst [vmem:[#allocation83_spill] sm:$0xff] %v3139_v50  ;;  %v3146_v38 = vld [vmem:[%s4323_s0 + $0x210] sm:$0xff]  ;;  %v3153_v5 = vld [vmem:[%s4323_s0 + $0x218] sm:$0xff]  ;;  %v791_v2 = vmax.f32 %v790_v51, 0.0 }
 0x144   :  { %4504 = vst [vmem:[#allocation84_spill] sm:$0xff] %v3146_v38  ;;  %4505 = vst [vmem:[#allocation85_spill] sm:$0xff] %v3153_v5  ;;  %v3160_v14 = vld [vmem:[%s4323_s0 + $0x220] sm:$0xff]  ;;  %v3167_v7 = vld [vmem:[%s4323_s0 + $0x228] sm:$0xff] }
 0x145   :  { %4506 = vst [vmem:[#allocation86_spill] sm:$0xff] %v3160_v14  ;;  %4507 = vst [vmem:[#allocation87_spill] sm:$0xff] %v3167_v7  ;;  %v3174_v56 = vld [vmem:[%s4323_s0 + $0x230] sm:$0xff]  ;;  %v3181_v50 = vld [vmem:[%s4323_s0 + $0x238] sm:$0xff]  ;;  %v920_v11 = vadd.f32 1e-05, %v791_v2 }
 0x146   :  { %4508 = vst [vmem:[#allocation88_spill] sm:$0xff] %v3174_v56  ;;  %v4513_v5 = vld [vmem:[#allocation11_spill] sm:$0xff]  ;;  %v4514_v14 = vld [vmem:[#allocation12_spill] sm:$0xff]  ;;  %v4515_v38 = vld [vmem:[#allocation13_spill] sm:$0xff] }
 0x147   :  { %1310 = vrsqrt.f32 %v920_v11  ;;  %v4510_v11 = vld [vmem:[#allocation5_spill] sm:$0xff]  ;;  %v4516_v7 = vld [vmem:[#allocation14_spill] sm:$0xff]  ;;  %v4518_v51 = vld [vmem:[#allocation16_spill] sm:$0xff] }
 0x148   :  { %v4530_v39 = vld [vmem:[#allocation27_spill] sm:$0xff]  ;;  %v4532_v44 = vld [vmem:[#allocation28_spill] sm:$0xff] }
 0x151   :  { %v3289_v33 = vpop.eup %1310 }
 0x152   :  { %v922_v41 = vmul.f32 %v3289_v33, %v4519_v24  ;;  %v923_v53 = vmul.f32 %v3289_v33, %v4520_v18  ;;  %v924_v56 = vmul.f32 %v3289_v33, %v4521_v43  ;;  %v925_v2 = vmul.f32 %v3289_v33, %v4522_v60 }
 0x153   :  { %v926_v24 = vmul.f32 %v3289_v33, %v4523_v27  ;;  %v927_v18 = vmul.f32 %v3289_v33, %v4524_v36  ;;  %v928_v43 = vmul.f32 %v3289_v33, %v4525_v57  ;;  %v929_v60 = vmul.f32 %v3289_v33, %v4527_v6  ;;  %v4534_v36 = vld [vmem:[#allocation29_spill] sm:$0xff]  ;;  %v4536_v57 = vld [vmem:[#allocation30_spill] sm:$0xff] }
 0x154   :  { %v1050_v1 = vmax.f32 %v922_v41, 0.0  ;;  %v1051_v62 = vmax.f32 %v923_v53, 0.0  ;;  %v1052_v46 = vmax.f32 %v924_v56, 0.0  ;;  %v1053_v29 = vmax.f32 %v925_v2, 0.0  ;;  %v4528_v41 = vld [vmem:[#allocation26_spill] sm:$0xff] }
 0x155   :  { %v1054_v27 = vmax.f32 %v926_v24, 0.0  ;;  %v1055_v23 = vmax.f32 %v927_v18, 0.0  ;;  %v1056_v47 = vmax.f32 %v928_v43, 0.0  ;;  %v1057_v35 = vmax.f32 %v929_v60, 0.0  ;;  %v4538_v60 = vld [vmem:[#allocation31_spill] sm:$0xff] }
 0x156   :  { %1178 = vst.msk [vmem:[%s4324_s1] sm:$0xff] %vm136_vm0, %v1050_v1  ;;  %1179 = vst.msk [vmem:[%s4324_s1 + $0x8] sm:$0xff] %vm136_vm0, %v1051_v62  ;;  %v4529_v53 = vsub.f32 %v4528_v41, %v2669_v20  ;;  %v4531_v56 = vsub.f32 %v4530_v39, %v2669_v20  ;;  %v4533_v2 = vsub.f32 %v4532_v44, %v2669_v20 }
 0x157   :  { %1180 = vst.msk [vmem:[%s4324_s1 + $0x10] sm:$0xff] %vm136_vm0, %v1052_v46  ;;  %1181 = vst.msk [vmem:[%s4324_s1 + $0x18] sm:$0xff] %vm136_vm0, %v1053_v29  ;;  %v4535_v18 = vsub.f32 %v4534_v36, %v2669_v20  ;;  %v4537_v43 = vsub.f32 %v4536_v57, %v2669_v20  ;;  %v4539_v46 = vsub.f32 %v4538_v60, %v2669_v20 }
 0x158   :  { %v930_v1 = vmul.f32 %v3289_v33, %v4529_v53  ;;  %v931_v62 = vmul.f32 %v3289_v33, %v4531_v56  ;;  %v932_v24 = vmul.f32 %v3289_v33, %v4533_v2  ;;  %1182 = vst.msk [vmem:[%s4324_s1 + $0x20] sm:$0xff] %vm136_vm0, %v1054_v27  ;;  %1183 = vst.msk [vmem:[%s4324_s1 + $0x28] sm:$0xff] %vm136_vm0, %v1055_v23  ;;  %v4540_v27 = vld [vmem:[#allocation32_spill] sm:$0xff]  ;;  %v4542_v53 = vld [vmem:[#allocation33_spill] sm:$0xff] }
 0x159   :  { %v933_v29 = vmul.f32 %v3289_v33, %v4535_v18  ;;  %1184 = vst.msk [vmem:[%s4324_s1 + $0x30] sm:$0xff] %vm136_vm0, %v1056_v47  ;;  %1185 = vst.msk [vmem:[%s4324_s1 + $0x38] sm:$0xff] %vm136_vm0, %v1057_v35  ;;  %v934_v6 = vmul.f32 %v3289_v33, %v4537_v43  ;;  %v935_v23 = vmul.f32 %v3289_v33, %v4539_v46 }
 0x15a   :  { %v4541_v41 = vsub.f32 %v4540_v27, %v2669_v20  ;;  %v4543_v39 = vsub.f32 %v4542_v53, %v2669_v20  ;;  %v1058_v56 = vmax.f32 %v930_v1, 0.0  ;;  %v1059_v44 = vmax.f32 %v931_v62, 0.0  ;;  %v4544_v1 = vld [vmem:[#allocation34_spill] sm:$0xff] }
 0x15b   :  { %v1060_v2 = vmax.f32 %v932_v24, 0.0  ;;  %v1061_v36 = vmax.f32 %v933_v29, 0.0  ;;  %v1062_v18 = vmax.f32 %v934_v6, 0.0  ;;  %v1063_v57 = vmax.f32 %v935_v23, 0.0  ;;  %v4546_v29 = vld [vmem:[#allocation35_spill] sm:$0xff]  ;;  %v4548_v23 = vld [vmem:[#allocation36_spill] sm:$0xff] }
 0x15c   :  { %v936_v47 = vmul.f32 %v3289_v33, %v4541_v41  ;;  %v937_v35 = vmul.f32 %v3289_v33, %v4543_v39  ;;  %1186 = vst.msk [vmem:[%s4324_s1 + $0x40] sm:$0xff] %vm136_vm0, %v1058_v56  ;;  %1187 = vst.msk [vmem:[%s4324_s1 + $0x48] sm:$0xff] %vm136_vm0, %v1059_v44  ;;  %v4545_v62 = vsub.f32 %v4544_v1, %v2669_v20 }
 0x15d   :  { %1188 = vst.msk [vmem:[%s4324_s1 + $0x50] sm:$0xff] %vm136_vm0, %v1060_v2  ;;  %1189 = vst.msk [vmem:[%s4324_s1 + $0x58] sm:$0xff] %vm136_vm0, %v1061_v36  ;;  %v4547_v6 = vsub.f32 %v4546_v29, %v2669_v20  ;;  %v4549_v27 = vsub.f32 %v4548_v23, %v2669_v20  ;;  %v4554_v2 = vld [vmem:[#allocation39_spill] sm:$0xff] }
 0x15e   :  { %v1064_v43 = vmax.f32 %v936_v47, 0.0  ;;  %v1065_v60 = vmax.f32 %v937_v35, 0.0  ;;  %v938_v24 = vmul.f32 %v3289_v33, %v4545_v62  ;;  %v4550_v47 = vld [vmem:[#allocation37_spill] sm:$0xff]  ;;  %1190 = vst.msk [vmem:[%s4324_s1 + $0x60] sm:$0xff] %vm136_vm0, %v1062_v18  ;;  %1191 = vst.msk [vmem:[%s4324_s1 + $0x68] sm:$0xff] %vm136_vm0, %v1063_v57  ;;  %v4552_v35 = vld [vmem:[#allocation38_spill] sm:$0xff]  ;;  %v4555_v36 = vsub.f32 %v4554_v2, %v2669_v20 }
 0x15f   :  { %v939_v46 = vmul.f32 %v3289_v33, %v4547_v6  ;;  %v940_v41 = vmul.f32 %v3289_v33, %v4549_v27  ;;  %v4551_v53 = vsub.f32 %v4550_v47, %v2669_v20  ;;  %v4553_v56 = vsub.f32 %v4552_v35, %v2669_v20  ;;  %v4556_v57 = vld [vmem:[#allocation40_spill] sm:$0xff]  ;;  %v4558_v62 = vld [vmem:[#allocation41_spill] sm:$0xff] }
 0x160   :  { %1192 = vst.msk [vmem:[%s4324_s1 + $0x70] sm:$0xff] %vm136_vm0, %v1064_v43  ;;  %1193 = vst.msk [vmem:[%s4324_s1 + $0x78] sm:$0xff] %vm136_vm0, %v1065_v60  ;;  %v943_v18 = vmul.f32 %v3289_v33, %v4555_v36  ;;  %v4557_v1 = vsub.f32 %v4556_v57, %v2669_v20  ;;  %v4559_v29 = vsub.f32 %v4558_v62, %v2669_v20  ;;  %v1066_v6 = vmax.f32 %v938_v24, 0.0  ;;  %v4560_v24 = vld [vmem:[#allocation42_spill] sm:$0xff] }
 0x161   :  { %v941_v39 = vmul.f32 %v3289_v33, %v4551_v53  ;;  %v942_v44 = vmul.f32 %v3289_v33, %v4553_v56  ;;  %v1067_v23 = vmax.f32 %v939_v46, 0.0  ;;  %v1068_v27 = vmax.f32 %v940_v41, 0.0 }
 0x162   :  { %v944_v43 = vmul.f32 %v3289_v33, %v4557_v1  ;;  %v945_v60 = vmul.f32 %v3289_v33, %v4559_v29  ;;  %v1071_v35 = vmax.f32 %v943_v18, 0.0  ;;  %1194 = vst.msk [vmem:[%s4324_s1 + $0x80] sm:$0xff] %vm136_vm0, %v1066_v6  ;;  %v4561_v46 = vsub.f32 %v4560_v24, %v2669_v20  ;;  %v4564_v18 = vld [vmem:[#allocation44_spill] sm:$0xff] }
 0x163   :  { %v1069_v47 = vmax.f32 %v941_v39, 0.0  ;;  %v1070_v53 = vmax.f32 %v942_v44, 0.0  ;;  %1195 = vst.msk [vmem:[%s4324_s1 + $0x88] sm:$0xff] %vm136_vm0, %v1067_v23  ;;  %1196 = vst.msk [vmem:[%s4324_s1 + $0x90] sm:$0xff] %vm136_vm0, %v1068_v27  ;;  %v4562_v39 = vld [vmem:[#allocation43_spill] sm:$0xff]  ;;  %v4565_v57 = vsub.f32 %v4564_v18, %v2669_v20 }
 0x164   :  { %v1072_v56 = vmax.f32 %v944_v43, 0.0  ;;  %v1073_v2 = vmax.f32 %v945_v60, 0.0  ;;  %v946_v41 = vmul.f32 %v3289_v33, %v4561_v46  ;;  %v4563_v44 = vsub.f32 %v4562_v39, %v2669_v20  ;;  %v4566_v43 = vld [vmem:[#allocation45_spill] sm:$0xff]  ;;  %1199 = vst.msk [vmem:[%s4324_s1 + $0xa8] sm:$0xff] %vm136_vm0, %v1071_v35  ;;  %v4568_v60 = vld [vmem:[#allocation46_spill] sm:$0xff]  ;;  %v4570_v27 = vld [vmem:[#allocation47_spill] sm:$0xff] }
 0x165   :  { %1197 = vst.msk [vmem:[%s4324_s1 + $0x98] sm:$0xff] %vm136_vm0, %v1069_v47  ;;  %v948_v1 = vmul.f32 %v3289_v33, %v4565_v57  ;;  %v4567_v62 = vsub.f32 %v4566_v43, %v2669_v20  ;;  %1198 = vst.msk [vmem:[%s4324_s1 + $0xa0] sm:$0xff] %vm136_vm0, %v1070_v53  ;;  %v4569_v6 = vsub.f32 %v4568_v60, %v2669_v20  ;;  %v4572_v35 = vld [vmem:[#allocation48_spill] sm:$0xff]  ;;  %v4574_v46 = vld [vmem:[#allocation49_spill] sm:$0xff] }
 0x166   :  { %v947_v36 = vmul.f32 %v3289_v33, %v4563_v44  ;;  %1200 = vst.msk [vmem:[%s4324_s1 + $0xb0] sm:$0xff] %vm136_vm0, %v1072_v56  ;;  %1201 = vst.msk [vmem:[%s4324_s1 + $0xb8] sm:$0xff] %vm136_vm0, %v1073_v2  ;;  %v4571_v47 = vsub.f32 %v4570_v27, %v2669_v20  ;;  %v4573_v24 = vsub.f32 %v4572_v35, %v2669_v20  ;;  %v1074_v44 = vmax.f32 %v946_v41, 0.0  ;;  %v4576_v41 = vld [vmem:[#allocation50_spill] sm:$0xff] }
 0x167   :  { %v949_v29 = vmul.f32 %v3289_v33, %v4567_v62  ;;  %v950_v23 = vmul.f32 %v3289_v33, %v4569_v6  ;;  %v4575_v39 = vsub.f32 %v4574_v46, %v2669_v20  ;;  %v1076_v57 = vmax.f32 %v948_v1, 0.0 }
 0x168   :  { %v951_v53 = vmul.f32 %v3289_v33, %v4571_v47  ;;  %v952_v56 = vmul.f32 %v3289_v33, %v4573_v24  ;;  %v1075_v18 = vmax.f32 %v947_v36, 0.0  ;;  %1202 = vst.msk [vmem:[%s4324_s1 + $0xc0] sm:$0xff] %vm136_vm0, %v1074_v44  ;;  %v4577_v36 = vsub.f32 %v4576_v41, %v2669_v20 }
 0x169   :  { %v953_v2 = vmul.f32 %v3289_v33, %v4575_v39  ;;  %v1077_v43 = vmax.f32 %v949_v29, 0.0  ;;  %v1078_v62 = vmax.f32 %v950_v23, 0.0  ;;  %1204 = vst.msk [vmem:[%s4324_s1 + $0xd0] sm:$0xff] %vm136_vm0, %v1076_v57  ;;  %v4578_v29 = vld [vmem:[#allocation51_spill] sm:$0xff] }
 0x16a   :  { %v1079_v60 = vmax.f32 %v951_v53, 0.0  ;;  %v1080_v6 = vmax.f32 %v952_v56, 0.0  ;;  %1203 = vst.msk [vmem:[%s4324_s1 + $0xc8] sm:$0xff] %vm136_vm0, %v1075_v18  ;;  %v954_v1 = vmul.f32 %v3289_v33, %v4577_v36  ;;  %v4579_v23 = vsub.f32 %v4578_v29, %v2669_v20  ;;  %v4580_v53 = vld [vmem:[#allocation52_spill] sm:$0xff]  ;;  %v4582_v56 = vld [vmem:[#allocation53_spill] sm:$0xff]  ;;  %v4586_v57 = vld [vmem:[#allocation55_spill] sm:$0xff] }
 0x16b   :  { %v1081_v27 = vmax.f32 %v953_v2, 0.0  ;;  %1205 = vst.msk [vmem:[%s4324_s1 + $0xd8] sm:$0xff] %vm136_vm0, %v1077_v43  ;;  %v4581_v35 = vsub.f32 %v4580_v53, %v2669_v20  ;;  %v4583_v46 = vsub.f32 %v4582_v56, %v2669_v20  ;;  %1206 = vst.msk [vmem:[%s4324_s1 + $0xe0] sm:$0xff] %vm136_vm0, %v1078_v62  ;;  %v4584_v2 = vld [vmem:[#allocation54_spill] sm:$0xff]  ;;  %v4587_v43 = vsub.f32 %v4586_v57, %v2669_v20  ;;  %v4590_v36 = vld [vmem:[#allocation57_spill] sm:$0xff] }
 0x16c   :  { %v955_v47 = vmul.f32 %v3289_v33, %v4579_v23  ;;  %1207 = vst.msk [vmem:[%s4324_s1 + $0xe8] sm:$0xff] %vm136_vm0, %v1079_v60  ;;  %1208 = vst.msk [vmem:[%s4324_s1 + $0xf0] sm:$0xff] %vm136_vm0, %v1080_v6  ;;  %v4585_v44 = vsub.f32 %v4584_v2, %v2669_v20  ;;  %v4588_v60 = vld [vmem:[#allocation56_spill] sm:$0xff]  ;;  %v4591_v29 = vsub.f32 %v4590_v36, %v2669_v20  ;;  %v1082_v23 = vmax.f32 %v954_v1, 0.0  ;;  %v4592_v1 = vld [vmem:[#allocation58_spill] sm:$0xff] }
 0x16d   :  { %v956_v24 = vmul.f32 %v3289_v33, %v4581_v35  ;;  %v957_v39 = vmul.f32 %v3289_v33, %v4583_v46  ;;  %1209 = vst.msk [vmem:[%s4324_s1 + $0xf8] sm:$0xff] %vm136_vm0, %v1081_v27  ;;  %v959_v62 = vmul.f32 %v3289_v33, %v4587_v43  ;;  %v4589_v41 = vsub.f32 %v4588_v60, %v2669_v20 }
 0x16e   :  { %v958_v18 = vmul.f32 %v3289_v33, %v4585_v44  ;;  %v961_v27 = vmul.f32 %v3289_v33, %v4591_v29  ;;  %v1083_v53 = vmax.f32 %v955_v47, 0.0  ;;  %1210 = vst.msk [vmem:[%s4324_s1 + $0x100] sm:$0xff] %vm136_vm0, %v1082_v23  ;;  %v4593_v47 = vsub.f32 %v4592_v1, %v2669_v20 }
 0x16f   :  { %v960_v6 = vmul.f32 %v3289_v33, %v4589_v41  ;;  %v1084_v35 = vmax.f32 %v956_v24, 0.0  ;;  %v1085_v56 = vmax.f32 %v957_v39, 0.0  ;;  %v1087_v2 = vmax.f32 %v959_v62, 0.0  ;;  %v4594_v39 = vld [vmem:[#allocation59_spill] sm:$0xff]  ;;  %v4596_v62 = vld [vmem:[#allocation60_spill] sm:$0xff] }
 0x170   :  { %v1086_v46 = vmax.f32 %v958_v18, 0.0  ;;  %v1089_v57 = vmax.f32 %v961_v27, 0.0  ;;  %1211 = vst.msk [vmem:[%s4324_s1 + $0x108] sm:$0xff] %vm136_vm0, %v1083_v53  ;;  %v962_v24 = vmul.f32 %v3289_v33, %v4593_v47  ;;  %v4595_v18 = vsub.f32 %v4594_v39, %v2669_v20  ;;  %v4600_v27 = vld [vmem:[#allocation62_spill] sm:$0xff]  ;;  %v4606_v47 = vld [vmem:[#allocation65_spill] sm:$0xff] }
 0x171   :  { %v1088_v44 = vmax.f32 %v960_v6, 0.0  ;;  %1212 = vst.msk [vmem:[%s4324_s1 + $0x110] sm:$0xff] %vm136_vm0, %v1084_v35  ;;  %1213 = vst.msk [vmem:[%s4324_s1 + $0x118] sm:$0xff] %vm136_vm0, %v1085_v56  ;;  %v4597_v60 = vsub.f32 %v4596_v62, %v2669_v20  ;;  %v4598_v6 = vld [vmem:[#allocation61_spill] sm:$0xff]  ;;  %v4601_v23 = vsub.f32 %v4600_v27, %v2669_v20  ;;  %v4602_v35 = vld [vmem:[#allocation63_spill] sm:$0xff]  ;;  %v4607_v39 = vsub.f32 %v4606_v47, %v2669_v20 }
 0x172   :  { %v963_v43 = vmul.f32 %v3289_v33, %v4595_v18  ;;  %v4599_v36 = vsub.f32 %v4598_v6, %v2669_v20  ;;  %1214 = vst.msk [vmem:[%s4324_s1 + $0x120] sm:$0xff] %vm136_vm0, %v1086_v46  ;;  %1215 = vst.msk [vmem:[%s4324_s1 + $0x128] sm:$0xff] %vm136_vm0, %v1087_v2  ;;  %v4603_v56 = vsub.f32 %v4602_v35, %v2669_v20  ;;  %v4604_v2 = vld [vmem:[#allocation64_spill] sm:$0xff]  ;;  %v1090_v18 = vmax.f32 %v962_v24, 0.0  ;;  %v4608_v24 = vld [vmem:[#allocation66_spill] sm:$0xff] }
 0x173   :  { %v964_v41 = vmul.f32 %v3289_v33, %v4597_v60  ;;  %1216 = vst.msk [vmem:[%s4324_s1 + $0x130] sm:$0xff] %vm136_vm0, %v1088_v44  ;;  %1217 = vst.msk [vmem:[%s4324_s1 + $0x138] sm:$0xff] %vm136_vm0, %v1089_v57  ;;  %v966_v53 = vmul.f32 %v3289_v33, %v4601_v23  ;;  %v4605_v1 = vsub.f32 %v4604_v2, %v2669_v20 }
 0x174   :  { %v965_v29 = vmul.f32 %v3289_v33, %v4599_v36  ;;  %v967_v46 = vmul.f32 %v3289_v33, %v4603_v56  ;;  %v969_v57 = vmul.f32 %v3289_v33, %v4607_v39  ;;  %v1091_v62 = vmax.f32 %v963_v43, 0.0  ;;  %1218 = vst.msk [vmem:[%s4324_s1 + $0x140] sm:$0xff] %vm136_vm0, %v1090_v18 }
 0x175   :  { %v968_v44 = vmul.f32 %v3289_v33, %v4605_v1  ;;  %v1092_v60 = vmax.f32 %v964_v41, 0.0  ;;  %v1094_v36 = vmax.f32 %v966_v53, 0.0  ;;  %v4609_v43 = vsub.f32 %v4608_v24, %v2669_v20 }
 0x176   :  { %v1093_v6 = vmax.f32 %v965_v29, 0.0  ;;  %v1095_v27 = vmax.f32 %v967_v46, 0.0  ;;  %v1097_v35 = vmax.f32 %v969_v57, 0.0  ;;  %1219 = vst.msk [vmem:[%s4324_s1 + $0x148] sm:$0xff] %vm136_vm0, %v1091_v62  ;;  %v4610_v29 = vld [vmem:[#allocation67_spill] sm:$0xff]  ;;  %v4612_v46 = vld [vmem:[#allocation68_spill] sm:$0xff] }
 0x177   :  { %v1096_v23 = vmax.f32 %v968_v44, 0.0  ;;  %1220 = vst.msk [vmem:[%s4324_s1 + $0x150] sm:$0xff] %vm136_vm0, %v1092_v60  ;;  %v970_v41 = vmul.f32 %v3289_v33, %v4609_v43  ;;  %v4611_v53 = vsub.f32 %v4610_v29, %v2669_v20  ;;  %v4613_v2 = vsub.f32 %v4612_v46, %v2669_v20  ;;  %v4614_v44 = vld [vmem:[#allocation69_spill] sm:$0xff]  ;;  %1222 = vst.msk [vmem:[%s4324_s1 + $0x160] sm:$0xff] %vm136_vm0, %v1094_v36  ;;  %v4616_v57 = vld [vmem:[#allocation70_spill] sm:$0xff] }
 0x178   :  { %1221 = vst.msk [vmem:[%s4324_s1 + $0x158] sm:$0xff] %vm136_vm0, %v1093_v6  ;;  %v4615_v47 = vsub.f32 %v4614_v44, %v2669_v20  ;;  %1223 = vst.msk [vmem:[%s4324_s1 + $0x168] sm:$0xff] %vm136_vm0, %v1095_v27  ;;  %v4617_v18 = vsub.f32 %v4616_v57, %v2669_v20  ;;  %v4618_v60 = vld [vmem:[#allocation71_spill] sm:$0xff]  ;;  %v4620_v27 = vld [vmem:[#allocation72_spill] sm:$0xff] }
 0x179   :  { %v971_v56 = vmul.f32 %v3289_v33, %v4611_v53  ;;  %v972_v1 = vmul.f32 %v3289_v33, %v4613_v2  ;;  %1224 = vst.msk [vmem:[%s4324_s1 + $0x170] sm:$0xff] %vm136_vm0, %v1096_v23  ;;  %1225 = vst.msk [vmem:[%s4324_s1 + $0x178] sm:$0xff] %vm136_vm0, %v1097_v35  ;;  %v4619_v6 = vsub.f32 %v4618_v60, %v2669_v20  ;;  %v4622_v43 = vld [vmem:[#allocation73_spill] sm:$0xff]  ;;  %v1098_v53 = vmax.f32 %v970_v41, 0.0  ;;  %v4624_v41 = vld [vmem:[#allocation74_spill] sm:$0xff] }
 0x17a   :  { %v973_v39 = vmul.f32 %v3289_v33, %v4615_v47  ;;  %v974_v62 = vmul.f32 %v3289_v33, %v4617_v18  ;;  %v4621_v24 = vsub.f32 %v4620_v27, %v2669_v20  ;;  %v4623_v29 = vsub.f32 %v4622_v43, %v2669_v20 }
 0x17b   :  { %v975_v36 = vmul.f32 %v3289_v33, %v4619_v6  ;;  %v1099_v46 = vmax.f32 %v971_v56, 0.0  ;;  %v1100_v2 = vmax.f32 %v972_v1, 0.0  ;;  %1226 = vst.msk [vmem:[%s4324_s1 + $0x180] sm:$0xff] %vm136_vm0, %v1098_v53  ;;  %v4625_v56 = vsub.f32 %v4624_v41, %v2669_v20 }
 0x17c   :  { %v976_v23 = vmul.f32 %v3289_v33, %v4621_v24  ;;  %v977_v35 = vmul.f32 %v3289_v33, %v4623_v29  ;;  %v1101_v44 = vmax.f32 %v973_v39, 0.0  ;;  %v1102_v47 = vmax.f32 %v974_v62, 0.0  ;;  %v4626_v39 = vld [vmem:[#allocation75_spill] sm:$0xff] }
 0x17d   :  { %v1103_v57 = vmax.f32 %v975_v36, 0.0  ;;  %1227 = vst.msk [vmem:[%s4324_s1 + $0x188] sm:$0xff] %vm136_vm0, %v1099_v46  ;;  %1228 = vst.msk [vmem:[%s4324_s1 + $0x190] sm:$0xff] %vm136_vm0, %v1100_v2  ;;  %v978_v1 = vmul.f32 %v3289_v33, %v4625_v56  ;;  %v4627_v62 = vsub.f32 %v4626_v39, %v2669_v20  ;;  %v4628_v36 = vld [vmem:[#allocation76_spill] sm:$0xff]  ;;  %v4634_v2 = vld [vmem:[#allocation79_spill] sm:$0xff] }
 0x17e   :  { %v1104_v18 = vmax.f32 %v976_v23, 0.0  ;;  %v1105_v60 = vmax.f32 %v977_v35, 0.0  ;;  %1229 = vst.msk [vmem:[%s4324_s1 + $0x198] sm:$0xff] %vm136_vm0, %v1101_v44  ;;  %v4629_v27 = vsub.f32 %v4628_v36, %v2669_v20  ;;  %v4630_v23 = vld [vmem:[#allocation77_spill] sm:$0xff]  ;;  %1230 = vst.msk [vmem:[%s4324_s1 + $0x1a0] sm:$0xff] %vm136_vm0, %v1102_v47  ;;  %v4632_v35 = vld [vmem:[#allocation78_spill] sm:$0xff]  ;;  %v4635_v44 = vsub.f32 %v4634_v2, %v2669_v20 }
 0x17f   :  { %v979_v6 = vmul.f32 %v3289_v33, %v4627_v62  ;;  %v4631_v43 = vsub.f32 %v4630_v23, %v2669_v20  ;;  %1231 = vst.msk [vmem:[%s4324_s1 + $0x1a8] sm:$0xff] %vm136_vm0, %v1103_v57  ;;  %v4633_v53 = vsub.f32 %v4632_v35, %v2669_v20  ;;  %v4636_v57 = vld [vmem:[#allocation80_spill] sm:$0xff]  ;;  %v4638_v56 = vld [vmem:[#allocation81_spill] sm:$0xff]  ;;  %v1106_v62 = vmax.f32 %v978_v1, 0.0  ;;  %v4640_v1 = vld [vmem:[#allocation82_spill] sm:$0xff] }
 0x180   :  { %v980_v24 = vmul.f32 %v3289_v33, %v4629_v27  ;;  %1232 = vst.msk [vmem:[%s4324_s1 + $0x1b0] sm:$0xff] %vm136_vm0, %v1104_v18  ;;  %1233 = vst.msk [vmem:[%s4324_s1 + $0x1b8] sm:$0xff] %vm136_vm0, %v1105_v60  ;;  %v983_v47 = vmul.f32 %v3289_v33, %v4635_v44  ;;  %v4637_v41 = vsub.f32 %v4636_v57, %v2669_v20 }
 0x181   :  { %v981_v29 = vmul.f32 %v3289_v33, %v4631_v43  ;;  %v982_v46 = vmul.f32 %v3289_v33, %v4633_v53  ;;  %v4639_v39 = vsub.f32 %v4638_v56, %v2669_v20  ;;  %v1107_v36 = vmax.f32 %v979_v6, 0.0  ;;  %1234 = vst.msk [vmem:[%s4324_s1 + $0x1c0] sm:$0xff] %vm136_vm0, %v1106_v62 }
 0x182   :  { %v984_v18 = vmul.f32 %v3289_v33, %v4637_v41  ;;  %v1108_v27 = vmax.f32 %v980_v24, 0.0  ;;  %v1111_v35 = vmax.f32 %v983_v47, 0.0  ;;  %v4641_v6 = vsub.f32 %v4640_v1, %v2669_v20  ;;  %v4644_v47 = vld [vmem:[#allocation84_spill] sm:$0xff] }
 0x183   :  { %v985_v60 = vmul.f32 %v3289_v33, %v4639_v39  ;;  %v1109_v23 = vmax.f32 %v981_v29, 0.0  ;;  %v1110_v43 = vmax.f32 %v982_v46, 0.0  ;;  %1235 = vst.msk [vmem:[%s4324_s1 + $0x1c8] sm:$0xff] %vm136_vm0, %v1107_v36  ;;  %v4642_v29 = vld [vmem:[#allocation83_spill] sm:$0xff]  ;;  %v4645_v57 = vsub.f32 %v4644_v47, %v2669_v20 }
 0x184   :  { %v1112_v53 = vmax.f32 %v984_v18, 0.0  ;;  %1236 = vst.msk [vmem:[%s4324_s1 + $0x1d0] sm:$0xff] %vm136_vm0, %v1108_v27  ;;  %v986_v24 = vmul.f32 %v3289_v33, %v4641_v6  ;;  %v4643_v46 = vsub.f32 %v4642_v29, %v2669_v20  ;;  %v4646_v18 = vld [vmem:[#allocation85_spill] sm:$0xff]  ;;  %1239 = vst.msk [vmem:[%s4324_s1 + $0x1e8] sm:$0xff] %vm136_vm0, %v1111_v35  ;;  %v4650_v27 = vld [vmem:[#allocation87_spill] sm:$0xff]  ;;  %v4654_v6 = vsub.f32 %v3181_v50, %v2669_v20 }
 0x185   :  { %v1113_v2 = vmax.f32 %v985_v60, 0.0  ;;  %1237 = vst.msk [vmem:[%s4324_s1 + $0x1d8] sm:$0xff] %vm136_vm0, %v1109_v23  ;;  %v988_v41 = vmul.f32 %v3289_v33, %v4645_v57  ;;  %v4647_v56 = vsub.f32 %v4646_v18, %v2669_v20  ;;  %1238 = vst.msk [vmem:[%s4324_s1 + $0x1e0] sm:$0xff] %vm136_vm0, %v1110_v43  ;;  %v4648_v60 = vld [vmem:[#allocation86_spill] sm:$0xff]  ;;  %v4651_v23 = vsub.f32 %v4650_v27, %v2669_v20  ;;  %v4652_v35 = vld [vmem:[#allocation88_spill] sm:$0xff] }
 0x186   :  { %v987_v44 = vmul.f32 %v3289_v33, %v4643_v46  ;;  %1240 = vst.msk [vmem:[%s4324_s1 + $0x1f0] sm:$0xff] %vm136_vm0, %v1112_v53  ;;  %v4649_v62 = vsub.f32 %v4648_v60, %v2669_v20  ;;  %v4653_v1 = vsub.f32 %v4652_v35, %v2669_v20  ;;  %v1114_v29 = vmax.f32 %v986_v24, 0.0 }
 0x187   :  { %v989_v39 = vmul.f32 %v3289_v33, %v4647_v56  ;;  %1241 = vst.msk [vmem:[%s4324_s1 + $0x1f8] sm:$0xff] %vm136_vm0, %v1113_v2  ;;  %v991_v43 = vmul.f32 %v3289_v33, %v4651_v23  ;;  %v993_v2 = vmul.f32 %v3289_v33, %v4654_v6  ;;  %v1116_v47 = vmax.f32 %v988_v41, 0.0 }
 0x188   :  { %v990_v36 = vmul.f32 %v3289_v33, %v4649_v62  ;;  %v992_v53 = vmul.f32 %v3289_v33, %v4653_v1  ;;  %v1115_v46 = vmax.f32 %v987_v44, 0.0  ;;  %1242 = vst.msk [vmem:[%s4324_s1 + $0x200] sm:$0xff] %vm136_vm0, %v1114_v29  ;;  %v4655_v50 = vsub.f32 %v2038_v49, %v2669_v20 }
 0x189   :  { %v1117_v57 = vmax.f32 %v989_v39, 0.0  ;;  %v1119_v56 = vmax.f32 %v991_v43, 0.0  ;;  %v1121_v62 = vmax.f32 %v993_v2, 0.0  ;;  %1244 = vst.msk [vmem:[%s4324_s1 + $0x210] sm:$0xff] %vm136_vm0, %v1116_v47  ;;  %v4656_v44 = vsub.f32 %v2048_v52, %v2669_v20 }
 0x18a   :  { %v1118_v18 = vmax.f32 %v990_v36, 0.0  ;;  %v1120_v60 = vmax.f32 %v992_v53, 0.0  ;;  %1243 = vst.msk [vmem:[%s4324_s1 + $0x208] sm:$0xff] %vm136_vm0, %v1115_v46  ;;  %v994_v24 = vmul.f32 %v3289_v33, %v4655_v50  ;;  %v4657_v39 = vsub.f32 %v2058_v55, %v2669_v20 }
 0x18b   :  { %1245 = vst.msk [vmem:[%s4324_s1 + $0x218] sm:$0xff] %vm136_vm0, %v1117_v57  ;;  %v995_v41 = vmul.f32 %v3289_v33, %v4656_v44  ;;  %v4658_v27 = vsub.f32 %v2068_v58, %v2669_v20  ;;  %1247 = vst.msk [vmem:[%s4324_s1 + $0x228] sm:$0xff] %vm136_vm0, %v1119_v56  ;;  %v4659_v49 = vsub.f32 %v2078_v61, %v2669_v20 }
 0x18c   :  { %v996_v36 = vmul.f32 %v3289_v33, %v4657_v39  ;;  %1246 = vst.msk [vmem:[%s4324_s1 + $0x220] sm:$0xff] %vm136_vm0, %v1118_v18  ;;  %1248 = vst.msk [vmem:[%s4324_s1 + $0x230] sm:$0xff] %vm136_vm0, %v1120_v60  ;;  %v4660_v55 = vsub.f32 %v2088_v4, %v2669_v20  ;;  %v4661_v43 = vsub.f32 %v2098_v8, %v2669_v20  ;;  %v1122_v6 = vmax.f32 %v994_v24, 0.0 }
 0x18d   :  { %v997_v23 = vmul.f32 %v3289_v33, %v4658_v27  ;;  %1249 = vst.msk [vmem:[%s4324_s1 + $0x238] sm:$0xff] %vm136_vm0, %v1121_v62  ;;  %v998_v52 = vmul.f32 %v3289_v33, %v4659_v49  ;;  %v4662_v1 = vsub.f32 %v2108_v12, %v2669_v20  ;;  %v1123_v2 = vmax.f32 %v995_v41, 0.0 }
 0x18e   :  { %v999_v58 = vmul.f32 %v3289_v33, %v4660_v55  ;;  %v1000_v35 = vmul.f32 %v3289_v33, %v4661_v43  ;;  %v1124_v61 = vmax.f32 %v996_v36, 0.0  ;;  %1250 = vst.msk [vmem:[%s4324_s1 + $0x240] sm:$0xff] %vm136_vm0, %v1122_v6  ;;  %v4663_v8 = vsub.f32 %v2118_v17, %v2669_v20 }
 0x18f   :  { %v1001_v53 = vmul.f32 %v3289_v33, %v4662_v1  ;;  %v1125_v29 = vmax.f32 %v997_v23, 0.0  ;;  %v1126_v46 = vmax.f32 %v998_v52, 0.0  ;;  %1251 = vst.msk [vmem:[%s4324_s1 + $0x248] sm:$0xff] %vm136_vm0, %v1123_v2  ;;  %v4664_v18 = vsub.f32 %v2128_v21, %v2669_v20 }
 0x190   :  { %v1127_v47 = vmax.f32 %v999_v58, 0.0  ;;  %v1128_v57 = vmax.f32 %v1000_v35, 0.0  ;;  %1252 = vst.msk [vmem:[%s4324_s1 + $0x250] sm:$0xff] %vm136_vm0, %v1124_v61  ;;  %v1002_v12 = vmul.f32 %v3289_v33, %v4663_v8  ;;  %v4665_v60 = vsub.f32 %v2138_v30, %v2669_v20 }
 0x191   :  { %v1129_v4 = vmax.f32 %v1001_v53, 0.0  ;;  %1253 = vst.msk [vmem:[%s4324_s1 + $0x258] sm:$0xff] %vm136_vm0, %v1125_v29  ;;  %v1003_v56 = vmul.f32 %v3289_v33, %v4664_v18  ;;  %v4666_v50 = vsub.f32 %v2148_v0, %v2669_v20  ;;  %1254 = vst.msk [vmem:[%s4324_s1 + $0x260] sm:$0xff] %vm136_vm0, %v1126_v46  ;;  %v4667_v17 = vsub.f32 %v2158_v3, %v2669_v20 }
 0x192   :  { %v1004_v62 = vmul.f32 %v3289_v33, %v4665_v60  ;;  %1255 = vst.msk [vmem:[%s4324_s1 + $0x268] sm:$0xff] %vm136_vm0, %v1127_v47  ;;  %1256 = vst.msk [vmem:[%s4324_s1 + $0x270] sm:$0xff] %vm136_vm0, %v1128_v57  ;;  %v4668_v30 = vsub.f32 %v2168_v48, %v2669_v20  ;;  %v4669_v44 = vsub.f32 %v2178_v10, %v2669_v20  ;;  %v1130_v27 = vmax.f32 %v1002_v12, 0.0  ;;  %v4679_v47 = vld [vmem:[#allocation3_spill] sm:$0xff] }
 0x193   :  { %v1005_v24 = vmul.f32 %v3289_v33, %v4666_v50  ;;  %1257 = vst.msk [vmem:[%s4324_s1 + $0x278] sm:$0xff] %vm136_vm0, %v1129_v4  ;;  %v1006_v21 = vmul.f32 %v3289_v33, %v4667_v17  ;;  %v4670_v39 = vsub.f32 %v2188_v13, %v2669_v20  ;;  %v1131_v23 = vmax.f32 %v1003_v56, 0.0  ;;  %v4682_v17 = vld [vmem:[#allocation4_spill] sm:$0xff] }
 0x194   :  { %v1007_v0 = vmul.f32 %v3289_v33, %v4668_v30  ;;  %v1008_v41 = vmul.f32 %v3289_v33, %v4669_v44  ;;  %v1132_v3 = vmax.f32 %v1004_v62, 0.0  ;;  %1258 = vst.msk [vmem:[%s4324_s1 + $0x280] sm:$0xff] %vm136_vm0, %v1130_v27  ;;  %v4671_v10 = vsub.f32 %v2198_v16, %v2669_v20 }
 0x195   :  { %v1009_v36 = vmul.f32 %v3289_v33, %v4670_v39  ;;  %v1133_v49 = vmax.f32 %v1005_v24, 0.0  ;;  %v1134_v52 = vmax.f32 %v1006_v21, 0.0  ;;  %1259 = vst.msk [vmem:[%s4324_s1 + $0x288] sm:$0xff] %vm136_vm0, %v1131_v23  ;;  %v4672_v43 = vsub.f32 %v2208_v19, %v2669_v20  ;;  %v4689_v23 = vld [vmem:[#allocation8_spill] sm:$0xff] }
 0x196   :  { %v1135_v55 = vmax.f32 %v1007_v0, 0.0  ;;  %v1136_v58 = vmax.f32 %v1008_v41, 0.0  ;;  %1260 = vst.msk [vmem:[%s4324_s1 + $0x290] sm:$0xff] %vm136_vm0, %v1132_v3  ;;  %v1010_v13 = vmul.f32 %v3289_v33, %v4671_v10  ;;  %v4673_v1 = vsub.f32 %v2218_v22, %v2669_v20  ;;  %v4676_v22 = vld [vmem:[#allocation2_spill] sm:$0xff] }
 0x197   :  { %v1137_v48 = vmax.f32 %v1009_v36, 0.0  ;;  %1261 = vst.msk [vmem:[%s4324_s1 + $0x298] sm:$0xff] %vm136_vm0, %v1133_v49  ;;  %v1011_v35 = vmul.f32 %v3289_v33, %v4672_v43  ;;  %v4674_v6 = vsub.f32 %v2228_v25, %v2669_v20  ;;  %1262 = vst.msk [vmem:[%s4324_s1 + $0x2a0] sm:$0xff] %vm136_vm0, %v1134_v52  ;;  %v4675_v16 = vsub.f32 %v2238_v28, %v2669_v20  ;;  %v4685_v41 = vld [vmem:[#allocation6_spill] sm:$0xff]  ;;  %v4691_v52 = vld [vmem:[#allocation9_spill] sm:$0xff] }
 0x198   :  { %v1012_v53 = vmul.f32 %v3289_v33, %v4673_v1  ;;  %1263 = vst.msk [vmem:[%s4324_s1 + $0x2a8] sm:$0xff] %vm136_vm0, %v1135_v55  ;;  %1264 = vst.msk [vmem:[%s4324_s1 + $0x2b0] sm:$0xff] %vm136_vm0, %v1136_v58  ;;  %v4677_v25 = vsub.f32 %v4676_v22, %v2669_v20  ;;  %v4678_v29 = vsub.f32 %v2258_v34, %v2669_v20  ;;  %v1138_v8 = vmax.f32 %v1010_v13, 0.0 }
 0x199   :  { %v1013_v2 = vmul.f32 %v3289_v33, %v4674_v6  ;;  %1265 = vst.msk [vmem:[%s4324_s1 + $0x2b8] sm:$0xff] %vm136_vm0, %v1137_v48  ;;  %v1014_v19 = vmul.f32 %v3289_v33, %v4675_v16  ;;  %v4680_v57 = vsub.f32 %v4679_v47, %v2669_v20  ;;  %v1139_v12 = vmax.f32 %v1011_v35, 0.0  ;;  %v4693_v48 = vld [vmem:[#allocation10_spill] sm:$0xff] }
 0x19a   :  { %v1015_v61 = vmul.f32 %v3289_v33, %v4677_v25  ;;  %v1016_v46 = vmul.f32 %v3289_v33, %v4678_v29  ;;  %v1140_v28 = vmax.f32 %v1012_v53, 0.0  ;;  %1266 = vst.msk [vmem:[%s4324_s1 + $0x2c0] sm:$0xff] %vm136_vm0, %v1138_v8  ;;  %v4681_v34 = vsub.f32 %v2278_v40, %v2669_v20  ;;  %v4687_v40 = vld [vmem:[#allocation7_spill] sm:$0xff] }
 0x19b   :  { %v1017_v4 = vmul.f32 %v3289_v33, %v4680_v57  ;;  %v1141_v18 = vmax.f32 %v1013_v2, 0.0  ;;  %v1142_v56 = vmax.f32 %v1014_v19, 0.0  ;;  %1267 = vst.msk [vmem:[%s4324_s1 + $0x2c8] sm:$0xff] %vm136_vm0, %v1139_v12  ;;  %v4683_v21 = vsub.f32 %v4682_v17, %v2669_v20 }
 0x19c   :  { %v1143_v60 = vmax.f32 %v1015_v61, 0.0  ;;  %v1144_v62 = vmax.f32 %v1016_v46, 0.0  ;;  %1268 = vst.msk [vmem:[%s4324_s1 + $0x2d0] sm:$0xff] %vm136_vm0, %v1140_v28  ;;  %v1018_v24 = vmul.f32 %v3289_v33, %v4681_v34  ;;  %v4684_v0 = vsub.f32 %v4510_v11, %v2669_v20 }
 0x19d   :  { %v1145_v50 = vmax.f32 %v1017_v4, 0.0  ;;  %1269 = vst.msk [vmem:[%s4324_s1 + $0x2d8] sm:$0xff] %vm136_vm0, %v1141_v18  ;;  %v1019_v30 = vmul.f32 %v3289_v33, %v4683_v21  ;;  %v4686_v39 = vsub.f32 %v4685_v41, %v2669_v20  ;;  %1270 = vst.msk [vmem:[%s4324_s1 + $0x2e0] sm:$0xff] %vm136_vm0, %v1142_v56  ;;  %v4688_v11 = vsub.f32 %v4687_v40, %v2669_v20 }
 0x19e   :  { %v1020_v44 = vmul.f32 %v3289_v33, %v4684_v0  ;;  %1271 = vst.msk [vmem:[%s4324_s1 + $0x2e8] sm:$0xff] %vm136_vm0, %v1143_v60  ;;  %1272 = vst.msk [vmem:[%s4324_s1 + $0x2f0] sm:$0xff] %vm136_vm0, %v1144_v62  ;;  %v4690_v3 = vsub.f32 %v4689_v23, %v2669_v20  ;;  %v4692_v55 = vsub.f32 %v4691_v52, %v2669_v20  ;;  %v1146_v43 = vmax.f32 %v1018_v24, 0.0 }
 0x19f   :  { %v1021_v36 = vmul.f32 %v3289_v33, %v4686_v39  ;;  %1273 = vst.msk [vmem:[%s4324_s1 + $0x2f8] sm:$0xff] %vm136_vm0, %v1145_v50  ;;  %v1022_v27 = vmul.f32 %v3289_v33, %v4688_v11  ;;  %v4694_v10 = vsub.f32 %v4693_v48, %v2669_v20  ;;  %v1147_v35 = vmax.f32 %v1019_v30, 0.0 }
 0x1a0   :  { %v1023_v49 = vmul.f32 %v3289_v33, %v4690_v3  ;;  %v1024_v58 = vmul.f32 %v3289_v33, %v4692_v55  ;;  %v1148_v1 = vmax.f32 %v1020_v44, 0.0  ;;  %1274 = vst.msk [vmem:[%s4324_s1 + $0x300] sm:$0xff] %vm136_vm0, %v1146_v43  ;;  %v4695_v22 = vsub.f32 %v4513_v5, %v2669_v20 }
 0x1a1   :  { %v1025_v13 = vmul.f32 %v3289_v33, %v4694_v10  ;;  %v1149_v53 = vmax.f32 %v1021_v36, 0.0  ;;  %v1150_v6 = vmax.f32 %v1022_v27, 0.0  ;;  %1275 = vst.msk [vmem:[%s4324_s1 + $0x308] sm:$0xff] %vm136_vm0, %v1147_v35  ;;  %v4696_v61 = vsub.f32 %v2368_v59, %v2669_v20  ;;  %v4713_v10 = vld [vmem:[#allocation18_spill] sm:$0xff]  ;;  %v4715_v35 = vld [vmem:[#allocation19_spill] sm:$0xff] }
 0x1a2   :  { %v1151_v2 = vmax.f32 %v1023_v49, 0.0  ;;  %v1152_v16 = vmax.f32 %v1024_v58, 0.0  ;;  %1276 = vst.msk [vmem:[%s4324_s1 + $0x310] sm:$0xff] %vm136_vm0, %v1148_v1  ;;  %v1026_v25 = vmul.f32 %v3289_v33, %v4695_v22  ;;  %v4697_v46 = vsub.f32 %v4514_v14, %v2669_v20 }
 0x1a3   :  { %v1153_v19 = vmax.f32 %v1025_v13, 0.0  ;;  %1277 = vst.msk [vmem:[%s4324_s1 + $0x318] sm:$0xff] %vm136_vm0, %v1149_v53  ;;  %v1027_v29 = vmul.f32 %v3289_v33, %v4696_v61  ;;  %v4698_v57 = vsub.f32 %v4515_v38, %v2669_v20  ;;  %1278 = vst.msk [vmem:[%s4324_s1 + $0x320] sm:$0xff] %vm136_vm0, %v1150_v6  ;;  %v4699_v59 = vsub.f32 %v4516_v7, %v2669_v20  ;;  %v4717_v6 = vld [vmem:[#allocation20_spill] sm:$0xff] }
 0x1a4   :  { %v1028_v47 = vmul.f32 %v3289_v33, %v4697_v46  ;;  %1279 = vst.msk [vmem:[%s4324_s1 + $0x328] sm:$0xff] %vm136_vm0, %v1151_v2  ;;  %1280 = vst.msk [vmem:[%s4324_s1 + $0x330] sm:$0xff] %vm136_vm0, %v1152_v16  ;;  %v4700_v5 = vsub.f32 %v4517_v37, %v2669_v20  ;;  %v4701_v8 = vsub.f32 %v4518_v51, %v2669_v20  ;;  %v1154_v56 = vmax.f32 %v1026_v25, 0.0  ;;  %v4721_v25 = vld [vmem:[#allocation22_spill] sm:$0xff]  ;;  %v4723_v46 = vld [vmem:[#allocation23_spill] sm:$0xff] }
 0x1a5   :  { %v1029_v4 = vmul.f32 %v3289_v33, %v4698_v57  ;;  %1281 = vst.msk [vmem:[%s4324_s1 + $0x338] sm:$0xff] %vm136_vm0, %v1153_v19  ;;  %v1030_v14 = vmul.f32 %v3289_v33, %v4699_v59  ;;  %v4702_v28 = vsub.f32 %v2428_v15, %v2669_v20  ;;  %v1155_v60 = vmax.f32 %v1027_v29, 0.0 }
 0x1a6   :  { %v1031_v38 = vmul.f32 %v3289_v33, %v4700_v5  ;;  %v1032_v12 = vmul.f32 %v3289_v33, %v4701_v8  ;;  %v1156_v7 = vmax.f32 %v1028_v47, 0.0  ;;  %1282 = vst.msk [vmem:[%s4324_s1 + $0x340] sm:$0xff] %vm136_vm0, %v1154_v56  ;;  %v4703_v15 = vsub.f32 %v2438_v32, %v2669_v20  ;;  %v4707_v32 = vld [vmem:[#allocation17_spill] sm:$0xff] }
 0x1a7   :  { %v1033_v18 = vmul.f32 %v3289_v33, %v4702_v28  ;;  %v1157_v62 = vmax.f32 %v1029_v4, 0.0  ;;  %v1158_v50 = vmax.f32 %v1030_v14, 0.0  ;;  %1283 = vst.msk [vmem:[%s4324_s1 + $0x348] sm:$0xff] %vm136_vm0, %v1155_v60  ;;  %v4704_v17 = vsub.f32 %v2448_v42, %v2669_v20  ;;  %v4725_v4 = vld [vmem:[#allocation24_spill] sm:$0xff] }
 0x1a8   :  { %v1159_v34 = vmax.f32 %v1031_v38, 0.0  ;;  %v1160_v24 = vmax.f32 %v1032_v12, 0.0  ;;  %1284 = vst.msk [vmem:[%s4324_s1 + $0x350] sm:$0xff] %vm136_vm0, %v1156_v7  ;;  %v1034_v51 = vmul.f32 %v3289_v33, %v4703_v15  ;;  %v4705_v30 = vsub.f32 %v2458_v54, %v2669_v20 }
 0x1a9   :  { %v1161_v37 = vmax.f32 %v1033_v18, 0.0  ;;  %1285 = vst.msk [vmem:[%s4324_s1 + $0x358] sm:$0xff] %vm136_vm0, %v1157_v62  ;;  %v1035_v21 = vmul.f32 %v3289_v33, %v4704_v17  ;;  %v4706_v44 = vsub.f32 %v2468_v9, %v2669_v20  ;;  %1286 = vst.msk [vmem:[%s4324_s1 + $0x360] sm:$0xff] %vm136_vm0, %v1158_v50  ;;  %v4708_v42 = vsub.f32 %v4707_v32, %v2669_v20 }
 0x1aa   :  { %v1036_v0 = vmul.f32 %v3289_v33, %v4705_v30  ;;  %1287 = vst.msk [vmem:[%s4324_s1 + $0x368] sm:$0xff] %vm136_vm0, %v1159_v34  ;;  %1288 = vst.msk [vmem:[%s4324_s1 + $0x370] sm:$0xff] %vm136_vm0, %v1160_v24  ;;  %v4709_v9 = vsub.f32 %v2488_v45, %v2669_v20  ;;  %v4710_v36 = vsub.f32 %v2498_v63, %v2669_v20  ;;  %v1162_v23 = vmax.f32 %v1034_v51, 0.0 }
 0x1ab   :  { %v1037_v41 = vmul.f32 %v3289_v33, %v4706_v44  ;;  %1289 = vst.msk [vmem:[%s4324_s1 + $0x378] sm:$0xff] %vm136_vm0, %v1161_v37  ;;  %v1038_v54 = vmul.f32 %v3289_v33, %v4708_v42  ;;  %v4711_v11 = vsub.f32 %v2508_v26, %v2669_v20  ;;  %v1163_v3 = vmax.f32 %v1035_v21, 0.0 }
 0x1ac   :  { %v1039_v39 = vmul.f32 %v3289_v33, %v4709_v9  ;;  %v1040_v40 = vmul.f32 %v3289_v33, %v4710_v36  ;;  %v1164_v49 = vmax.f32 %v1036_v0, 0.0  ;;  %1290 = vst.msk [vmem:[%s4324_s1 + $0x380] sm:$0xff] %vm136_vm0, %v1162_v23  ;;  %v4712_v63 = vsub.f32 %v2523_v31, %v2669_v20  ;;  %v4719_v31 = vld [vmem:[#allocation21_spill] sm:$0xff] }
 0x1ad   :  { %v1041_v27 = vmul.f32 %v3289_v33, %v4711_v11  ;;  %v1165_v52 = vmax.f32 %v1037_v41, 0.0  ;;  %v1166_v55 = vmax.f32 %v1038_v54, 0.0  ;;  %1291 = vst.msk [vmem:[%s4324_s1 + $0x388] sm:$0xff] %vm136_vm0, %v1163_v3  ;;  %v4714_v13 = vsub.f32 %v4713_v10, %v2669_v20 }
 0x1ae   :  { %v1167_v58 = vmax.f32 %v1039_v39, 0.0  ;;  %v1168_v48 = vmax.f32 %v1040_v40, 0.0  ;;  %1292 = vst.msk [vmem:[%s4324_s1 + $0x390] sm:$0xff] %vm136_vm0, %v1164_v49  ;;  %v1042_v26 = vmul.f32 %v3289_v33, %v4712_v63  ;;  %v4716_v1 = vsub.f32 %v4715_v35, %v2669_v20 }
 0x1af   :  { %v1169_v45 = vmax.f32 %v1041_v27, 0.0  ;;  %1293 = vst.msk [vmem:[%s4324_s1 + $0x398] sm:$0xff] %vm136_vm0, %v1165_v52  ;;  %v1043_v43 = vmul.f32 %v3289_v33, %v4714_v13  ;;  %v4718_v2 = vsub.f32 %v4717_v6, %v2669_v20  ;;  %1294 = vst.msk [vmem:[%s4324_s1 + $0x3a0] sm:$0xff] %vm136_vm0, %v1166_v55  ;;  %v4720_v19 = vsub.f32 %v4719_v31, %v2669_v20 }
 0x1b0   :  { %v1044_v53 = vmul.f32 %v3289_v33, %v4716_v1  ;;  %1295 = vst.msk [vmem:[%s4324_s1 + $0x3a8] sm:$0xff] %vm136_vm0, %v1167_v58  ;;  %1296 = vst.msk [vmem:[%s4324_s1 + $0x3b0] sm:$0xff] %vm136_vm0, %v1168_v48  ;;  %v4722_v61 = vsub.f32 %v4721_v25, %v2669_v20  ;;  %v4724_v47 = vsub.f32 %v4723_v46, %v2669_v20  ;;  %v1170_v5 = vmax.f32 %v1042_v26, 0.0 }
 0x1b1   :  { %v1045_v16 = vmul.f32 %v3289_v33, %v4718_v2  ;;  %1297 = vst.msk [vmem:[%s4324_s1 + $0x3b8] sm:$0xff] %vm136_vm0, %v1169_v45  ;;  %v1046_v22 = vmul.f32 %v3289_v33, %v4720_v19  ;;  %v4726_v59 = vsub.f32 %v4725_v4, %v2669_v20  ;;  %v1171_v38 = vmax.f32 %v1043_v43, 0.0 }
 0x1b2   :  { %v1047_v29 = vmul.f32 %v3289_v33, %v4722_v61  ;;  %v1048_v57 = vmul.f32 %v3289_v33, %v4724_v47  ;;  %v1172_v8 = vmax.f32 %v1044_v53, 0.0  ;;  %1298 = vst.msk [vmem:[%s4324_s1 + $0x3c0] sm:$0xff] %vm136_vm0, %v1170_v5 }
 0x1b3   :  { %v1049_v14 = vmul.f32 %v3289_v33, %v4726_v59  ;;  %v1173_v12 = vmax.f32 %v1045_v16, 0.0  ;;  %v1174_v28 = vmax.f32 %v1046_v22, 0.0  ;;  %1299 = vst.msk [vmem:[%s4324_s1 + $0x3c8] sm:$0xff] %vm136_vm0, %v1171_v38 }
 0x1b4   :  { %v1175_v18 = vmax.f32 %v1047_v29, 0.0  ;;  %v1176_v56 = vmax.f32 %v1048_v57, 0.0  ;;  %1300 = vst.msk [vmem:[%s4324_s1 + $0x3d0] sm:$0xff] %vm136_vm0, %v1172_v8 }
 0x1b5   :  { %v1177_v60 = vmax.f32 %v1049_v14, 0.0  ;;  %1301 = vst.msk [vmem:[%s4324_s1 + $0x3d8] sm:$0xff] %vm136_vm0, %v1173_v12  ;;  %1302 = vst.msk [vmem:[%s4324_s1 + $0x3e0] sm:$0xff] %vm136_vm0, %v1174_v28 }
 0x1b6   :  { %1303 = vst.msk [vmem:[%s4324_s1 + $0x3e8] sm:$0xff] %vm136_vm0, %v1175_v18  ;;  %1304 = vst.msk [vmem:[%s4324_s1 + $0x3f0] sm:$0xff] %vm136_vm0, %v1176_v56 }
 0x1b7   :  { %1305 = vst.msk [vmem:[%s4324_s1 + $0x3f8] sm:$0xff] %vm136_vm0, %v1177_v60 }

// kernel: global_generator_forward.88
= control target key start
LH: loop header
LB: loop body
LE: loop exit
PB: predicated region body
PF: predicated region fallthrough
CT: control target
= control target key end

     0   :  { %s972_s1 = inlined_call_operand.vmem [shape: bf16[128,128], index: 1, kind: input, shape index: {}]   ;;  %s973_s0 = inlined_call_operand.vmem [shape: bf16[256,128], index: 0, kind: input, shape index: {}]   ;;  %s974_s2 = inlined_call_operand.vmem [shape: f32[1,128], index: 2, kind: input, shape index: {}]   ;;  %s975_s3 = inlined_call_operand.vmem [shape: f32[256,128], index: 3, kind: output, shape index: {}]  }
   0x1   :  { %v723_v0 = vld [vmem:[%s972_s1] sm:$0xff]   ;;  %v724_v1 = vld [vmem:[%s972_s1 + $0x8] sm:$0xff]   ;;  %v725_v2 = vld [vmem:[%s972_s1 + $0x10] sm:$0xff]  }
   0x2   :  { %659 = vmatprep.subr.bf16.mxu0 %v723_v0  ;;  %707 = vmatprep.subr.bf16.mxu1 %v723_v0  ;;  %v726_v3 = vld [vmem:[%s972_s1 + $0x18] sm:$0xff]   ;;  %v731_v4 = vld [vmem:[%s973_s0] sm:$0xff]   ;;  %v728_v7 = vld [vmem:[%s972_s1 + $0x28] sm:$0xff]  }
   0x3   :  { %660 = vmatpush3.bf16.msra.mxu0 %v723_v0  ;;  %715 = vmatpush3.bf16.msra.mxu1 %v723_v0  ;;  %v732_v5 = vld [vmem:[%s973_s0 + $0x40] sm:$0xff]   ;;  %v729_v8 = vld [vmem:[%s972_s1 + $0x30] sm:$0xff]   ;;  %v730_v9 = vld [vmem:[%s972_s1 + $0x38] sm:$0xff]  }
   0x4   :  { %661 = vmatprep.subr.bf16.mxu0 %v724_v1  ;;  %708 = vmatprep.subr.bf16.mxu1 %v724_v1  ;;  %v727_v6 = vld [vmem:[%s972_s1 + $0x20] sm:$0xff]   ;;  %v733_v10 = vld [vmem:[%s973_s0 + $0x8] sm:$0xff]   ;;  %v735_v12 = vld [vmem:[%s973_s0 + $0x10] sm:$0xff]  }
   0x5   :  { %675 = vmatprep.mubr.bf16.mxu0 %v731_v4  ;;  %691 = vmatprep.mubr.bf16.mxu1 %v732_v5  ;;  %v734_v11 = vld [vmem:[%s973_s0 + $0x48] sm:$0xff]   ;;  %v736_v13 = vld [vmem:[%s973_s0 + $0x50] sm:$0xff]   ;;  %v737_v14 = vld [vmem:[%s973_s0 + $0x18] sm:$0xff]  }
   0x6   :  { %v738_v15 = vld [vmem:[%s973_s0 + $0x58] sm:$0xff]   ;;  %v739_v16 = vld [vmem:[%s973_s0 + $0x20] sm:$0xff]   ;;  %v741_v18 = vld [vmem:[%s973_s0 + $0x28] sm:$0xff]  }
   0x7   :  { %662 = vmatpush3.bf16.msra.mxu0 %v724_v1  ;;  %716 = vmatpush3.bf16.msra.mxu1 %v724_v1  ;;  %v740_v17 = vld [vmem:[%s973_s0 + $0x60] sm:$0xff]   ;;  %v742_v19 = vld [vmem:[%s973_s0 + $0x68] sm:$0xff]   ;;  %v743_v20 = vld [vmem:[%s973_s0 + $0x30] sm:$0xff]  }
   0x8   :  { %663 = vmatprep.subr.bf16.mxu0 %v725_v2  ;;  %709 = vmatprep.subr.bf16.mxu1 %v725_v2  ;;  %v744_v21 = vld [vmem:[%s973_s0 + $0x70] sm:$0xff]   ;;  %v745_v22 = vld [vmem:[%s973_s0 + $0x38] sm:$0xff]   ;;  %v842_v24 = vld [vmem:[%s974_s2] ss:$0 sm:$0xff] }
   0x9   :  { %v746_v23 = vld [vmem:[%s973_s0 + $0x78] sm:$0xff]  }
   0xb   :  { %664 = vmatpush3.bf16.msra.mxu0 %v725_v2  ;;  %717 = vmatpush3.bf16.msra.mxu1 %v725_v2 }
   0xc   :  { %665 = vmatprep.subr.bf16.mxu0 %v726_v3  ;;  %710 = vmatprep.subr.bf16.mxu1 %v726_v3 }
   0xf   :  { %666 = vmatpush3.bf16.msra.mxu0 %v726_v3  ;;  %718 = vmatpush3.bf16.msra.mxu1 %v726_v3 }
  0x10   :  { %667 = vmatprep.subr.bf16.mxu0 %v727_v6  ;;  %711 = vmatprep.subr.bf16.mxu1 %v727_v6 }
  0x13   :  { %668 = vmatpush3.bf16.msra.mxu0 %v727_v6  ;;  %719 = vmatpush3.bf16.msra.mxu1 %v727_v6 }
  0x14   :  { %669 = vmatprep.subr.bf16.mxu0 %v728_v7  ;;  %712 = vmatprep.subr.bf16.mxu1 %v728_v7 }
  0x17   :  { %670 = vmatpush3.bf16.msra.mxu0 %v728_v7  ;;  %720 = vmatpush3.bf16.msra.mxu1 %v728_v7 }
  0x18   :  { %671 = vmatprep.subr.bf16.mxu0 %v729_v8  ;;  %713 = vmatprep.subr.bf16.mxu1 %v729_v8 }
  0x1b   :  { %672 = vmatpush3.bf16.msra.mxu0 %v729_v8  ;;  %721 = vmatpush3.bf16.msra.mxu1 %v729_v8 }
  0x1c   :  { %673 = vmatprep.subr.bf16.mxu0 %v730_v9  ;;  %714 = vmatprep.subr.bf16.mxu1 %v730_v9 }
  0x1f   :  { %674 = vmatpush3.bf16.msra.mxu0 %v730_v9  ;;  %722 = vmatpush3.bf16.msra.mxu1 %v730_v9 }
  0x22   :  { %676 = vmatmul.mubr.bf16.vlgmr.msra.gmra.mrb[0].mxu0 %v733_v10  ;;  %692 = vmatmul.mubr.bf16.vlgmr.msra.gmra.mrb[0].mxu1 %v734_v11 }
  0x23   :  { %679 = vmatprep.mubr.bf16.mxu0 %v735_v12  ;;  %695 = vmatprep.mubr.bf16.mxu1 %v736_v13 }
  0x2a   :  { %680 = vmatmul.mubr.bf16.gmra.mrb[4].mxu0 %v737_v14  ;;  %696 = vmatmul.mubr.bf16.gmra.mrb[4].mxu1 %v738_v15 }
  0x2b   :  { %683 = vmatprep.mubr.bf16.mxu0 %v739_v16  ;;  %699 = vmatprep.mubr.bf16.mxu1 %v740_v17 }
  0x32   :  { %684 = vmatmul.mubr.bf16.gmra.mrb[8].mxu0 %v741_v18  ;;  %700 = vmatmul.mubr.bf16.gmra.mrb[8].mxu1 %v742_v19 }
  0x33   :  { %687 = vmatprep.mubr.bf16.mxu0 %v743_v20  ;;  %703 = vmatprep.mubr.bf16.mxu1 %v744_v21 }
  0x3a   :  { %688 = vmatmul.mubr.bf16.gmra.mrb[12].mxu0 %v745_v22  ;;  %704 = vmatmul.mubr.bf16.gmra.mrb[12].mxu1 %v746_v23 }
  0xf5   :  { %v677_v25 = vpop.f32.mrb[0].mxu0  ;;  %v693_v26 = vpop.f32.mrb[0].mxu1 }
  0xf6   :  { %v544_v27 = vadd.f32 %v677_v25, %v842_v24  ;;  %v560_v28 = vadd.f32 %v693_v26, %v842_v24  ;;  %v309_v29 = vpop.f32.mrb[1].mxu0  ;;  %v373_v30 = vpop.f32.mrb[1].mxu1 }
  0xf7   :  { %v542_v31 = vadd.f32 %v842_v24, %v309_v29  ;;  %v558_v32 = vadd.f32 %v842_v24, %v373_v30  ;;  %v678_v33 = vpop.f32.mrb[2].mxu0  ;;  %v694_v34 = vpop.f32.mrb[2].mxu1 }
  0xf8   :  { %576 = vst [vmem:[%s975_s3 + $0x10] sm:$0xff] %v544_v27  ;;  %592 = vst [vmem:[%s975_s3 + $0x90] sm:$0xff] %v560_v28  ;;  %v545_v35 = vadd.f32 %v678_v33, %v842_v24  ;;  %v561_v36 = vadd.f32 %v694_v34, %v842_v24  ;;  %v312_v37 = vpop.f32.mrb[3].mxu0  ;;  %v376_v38 = vpop.f32.mrb[3].mxu1 }
  0xf9   :  { %574 = vst [vmem:[%s975_s3] sm:$0xff] %v542_v31  ;;  %590 = vst [vmem:[%s975_s3 + $0x80] sm:$0xff] %v558_v32  ;;  %v543_v39 = vadd.f32 %v842_v24, %v312_v37  ;;  %v559_v40 = vadd.f32 %v842_v24, %v376_v38 }
  0xfa   :  { %577 = vst [vmem:[%s975_s3 + $0x18] sm:$0xff] %v545_v35  ;;  %593 = vst [vmem:[%s975_s3 + $0x98] sm:$0xff] %v561_v36 }
  0xfb   :  { %575 = vst [vmem:[%s975_s3 + $0x8] sm:$0xff] %v543_v39  ;;  %591 = vst [vmem:[%s975_s3 + $0x88] sm:$0xff] %v559_v40 }
  0xfd   :  { %v681_v41 = vpop.f32.mrb[4].mxu0  ;;  %v697_v42 = vpop.f32.mrb[4].mxu1 }
  0xfe   :  { %v548_v43 = vadd.f32 %v681_v41, %v842_v24  ;;  %v564_v44 = vadd.f32 %v697_v42, %v842_v24  ;;  %v325_v45 = vpop.f32.mrb[5].mxu0  ;;  %v389_v46 = vpop.f32.mrb[5].mxu1 }
  0xff   :  { %v546_v47 = vadd.f32 %v842_v24, %v325_v45  ;;  %v562_v48 = vadd.f32 %v842_v24, %v389_v46  ;;  %v682_v49 = vpop.f32.mrb[6].mxu0  ;;  %v698_v50 = vpop.f32.mrb[6].mxu1 }
 0x100   :  { %580 = vst [vmem:[%s975_s3 + $0x30] sm:$0xff] %v548_v43  ;;  %596 = vst [vmem:[%s975_s3 + $0xb0] sm:$0xff] %v564_v44  ;;  %v549_v51 = vadd.f32 %v682_v49, %v842_v24  ;;  %v565_v52 = vadd.f32 %v698_v50, %v842_v24  ;;  %v328_v53 = vpop.f32.mrb[7].mxu0  ;;  %v392_v54 = vpop.f32.mrb[7].mxu1 }
 0x101   :  { %578 = vst [vmem:[%s975_s3 + $0x20] sm:$0xff] %v546_v47  ;;  %594 = vst [vmem:[%s975_s3 + $0xa0] sm:$0xff] %v562_v48  ;;  %v547_v55 = vadd.f32 %v842_v24, %v328_v53  ;;  %v563_v56 = vadd.f32 %v842_v24, %v392_v54 }
 0x102   :  { %581 = vst [vmem:[%s975_s3 + $0x38] sm:$0xff] %v549_v51  ;;  %597 = vst [vmem:[%s975_s3 + $0xb8] sm:$0xff] %v565_v52 }
 0x103   :  { %579 = vst [vmem:[%s975_s3 + $0x28] sm:$0xff] %v547_v55  ;;  %595 = vst [vmem:[%s975_s3 + $0xa8] sm:$0xff] %v563_v56 }
 0x105   :  { %v685_v57 = vpop.f32.mrb[8].mxu0  ;;  %v701_v58 = vpop.f32.mrb[8].mxu1 }
 0x106   :  { %v552_v59 = vadd.f32 %v685_v57, %v842_v24  ;;  %v568_v60 = vadd.f32 %v701_v58, %v842_v24  ;;  %v341_v61 = vpop.f32.mrb[9].mxu0  ;;  %v405_v62 = vpop.f32.mrb[9].mxu1 }
 0x107   :  { %v550_v63 = vadd.f32 %v842_v24, %v341_v61  ;;  %v566_v0 = vadd.f32 %v842_v24, %v405_v62  ;;  %v686_v1 = vpop.f32.mrb[10].mxu0  ;;  %v702_v2 = vpop.f32.mrb[10].mxu1 }
 0x108   :  { %584 = vst [vmem:[%s975_s3 + $0x50] sm:$0xff] %v552_v59  ;;  %600 = vst [vmem:[%s975_s3 + $0xd0] sm:$0xff] %v568_v60  ;;  %v553_v3 = vadd.f32 %v686_v1, %v842_v24  ;;  %v569_v4 = vadd.f32 %v702_v2, %v842_v24  ;;  %v344_v5 = vpop.f32.mrb[11].mxu0  ;;  %v408_v6 = vpop.f32.mrb[11].mxu1 }
 0x109   :  { %582 = vst [vmem:[%s975_s3 + $0x40] sm:$0xff] %v550_v63  ;;  %598 = vst [vmem:[%s975_s3 + $0xc0] sm:$0xff] %v566_v0  ;;  %v551_v7 = vadd.f32 %v842_v24, %v344_v5  ;;  %v567_v8 = vadd.f32 %v842_v24, %v408_v6 }
 0x10a   :  { %585 = vst [vmem:[%s975_s3 + $0x58] sm:$0xff] %v553_v3  ;;  %601 = vst [vmem:[%s975_s3 + $0xd8] sm:$0xff] %v569_v4 }
 0x10b   :  { %583 = vst [vmem:[%s975_s3 + $0x48] sm:$0xff] %v551_v7  ;;  %599 = vst [vmem:[%s975_s3 + $0xc8] sm:$0xff] %v567_v8 }
 0x10d   :  { %v689_v9 = vpop.f32.mrb[12].mxu0  ;;  %v705_v10 = vpop.f32.mrb[12].mxu1 }
 0x10e   :  { %v556_v11 = vadd.f32 %v689_v9, %v842_v24  ;;  %v572_v12 = vadd.f32 %v705_v10, %v842_v24  ;;  %v357_v13 = vpop.f32.mrb[13].mxu0  ;;  %v421_v14 = vpop.f32.mrb[13].mxu1 }
 0x10f   :  { %v554_v15 = vadd.f32 %v842_v24, %v357_v13  ;;  %v570_v16 = vadd.f32 %v842_v24, %v421_v14  ;;  %v690_v17 = vpop.f32.mrb[14].mxu0  ;;  %v706_v18 = vpop.f32.mrb[14].mxu1 }
 0x110   :  { %588 = vst [vmem:[%s975_s3 + $0x70] sm:$0xff] %v556_v11  ;;  %604 = vst [vmem:[%s975_s3 + $0xf0] sm:$0xff] %v572_v12  ;;  %v557_v19 = vadd.f32 %v690_v17, %v842_v24  ;;  %v573_v20 = vadd.f32 %v706_v18, %v842_v24  ;;  %v360_v21 = vpop.f32.mrb[15].mxu0  ;;  %v424_v22 = vpop.f32.mrb[15].mxu1 }
 0x111   :  { %586 = vst [vmem:[%s975_s3 + $0x60] sm:$0xff] %v554_v15  ;;  %602 = vst [vmem:[%s975_s3 + $0xe0] sm:$0xff] %v570_v16  ;;  %v555_v23 = vadd.f32 %v842_v24, %v360_v21  ;;  %v571_v25 = vadd.f32 %v842_v24, %v424_v22 }
 0x112   :  { %589 = vst [vmem:[%s975_s3 + $0x78] sm:$0xff] %v557_v19  ;;  %605 = vst [vmem:[%s975_s3 + $0xf8] sm:$0xff] %v573_v20 }
 0x113   :  { %587 = vst [vmem:[%s975_s3 + $0x68] sm:$0xff] %v555_v23  ;;  %603 = vst [vmem:[%s975_s3 + $0xe8] sm:$0xff] %v571_v25 }

// kernel: global_generator_forward.89
= control target key start
LH: loop header
LB: loop body
LE: loop exit
PB: predicated region body
PF: predicated region fallthrough
CT: control target
= control target key end

     0   :  { %vm40_vm0 = vcmask 130048   ;;  %s948_s0 = inlined_call_operand.vmem [shape: f32[1,256,16], index: 0, kind: input, shape index: {}]   ;;  %s949_s1 = inlined_call_operand.vmem [shape: f32[1,256,16], index: 1, kind: output, shape index: {}]  }
   0x1   :  { %v365_v0 = vld [vmem:[%s948_s0] sm:$0xff]  ;;  %v370_v1 = vld [vmem:[%s948_s0 + $0x8] sm:$0xff]  ;;  %v375_v2 = vld [vmem:[%s948_s0 + $0x10] sm:$0xff] }
   0x2   :  { %v380_v3 = vld [vmem:[%s948_s0 + $0x18] sm:$0xff]  ;;  %v41_v4 = vsel %vm40_vm0, %v365_v0, 0.0  ;;  %v42_v5 = vsel %vm40_vm0, %v370_v1, 0.0  ;;  %v44_v6 = vsel %vm40_vm0, %v375_v2, 0.0  ;;  %v391_v7 = vld [vmem:[%s948_s0 + $0x20] sm:$0xff]  ;;  %v398_v10 = vld [vmem:[%s948_s0 + $0x28] sm:$0xff]  ;;  %v111_v29 = vmul.f32 %v365_v0, %v365_v0 }
   0x3   :  { %v43_v8 = vadd.f32 %v42_v5, %v41_v4  ;;  %v46_v9 = vsel %vm40_vm0, %v380_v3, 0.0  ;;  %v48_v12 = vsel %vm40_vm0, %v391_v7, 0.0  ;;  %v405_v13 = vld [vmem:[%s948_s0 + $0x30] sm:$0xff]  ;;  %v50_v15 = vsel %vm40_vm0, %v398_v10, 0.0  ;;  %v412_v16 = vld [vmem:[%s948_s0 + $0x38] sm:$0xff]  ;;  %v419_v19 = vld [vmem:[%s948_s0 + $0x40] sm:$0xff] }
   0x4   :  { %v52_v18 = vsel %vm40_vm0, %v405_v13, 0.0  ;;  %v54_v21 = vsel %vm40_vm0, %v412_v16, 0.0  ;;  %v426_v22 = vld [vmem:[%s948_s0 + $0x48] sm:$0xff]  ;;  %v56_v24 = vsel %vm40_vm0, %v419_v19, 0.0  ;;  %v433_v25 = vld [vmem:[%s948_s0 + $0x50] sm:$0xff]  ;;  %v438_v27 = vld [vmem:[%s948_s0 + $0x58] sm:$0xff]  ;;  %v112_v30 = vmul.f32 %v370_v1, %v370_v1 }
   0x5   :  { %v45_v11 = vadd.f32 %v44_v6, %v43_v8  ;;  %v58_v28 = vsel %vm40_vm0, %v426_v22, 0.0  ;;  %v113_v31 = vmul.f32 %v375_v2, %v375_v2  ;;  %v60_v33 = vsel %vm40_vm0, %v433_v25, 0.0  ;;  %v455_v35 = vld [vmem:[%s948_s0 + $0x60] sm:$0xff]  ;;  %v467_v42 = vld [vmem:[%s948_s0 + $0x68] sm:$0xff]  ;;  %v477_v48 = vld [vmem:[%s948_s0 + $0x70] sm:$0xff] }
   0x6   :  { %v114_v34 = vmul.f32 %v380_v3, %v380_v3  ;;  %v62_v37 = vsel %vm40_vm0, %v438_v27, 0.0  ;;  %v115_v38 = vmul.f32 %v391_v7, %v391_v7  ;;  %v143_v39 = vsel %vm40_vm0, %v111_v29, 0.0  ;;  %v487_v54 = vld [vmem:[%s948_s0 + $0x78] sm:$0xff]  ;;  %v497_v60 = vld [vmem:[%s948_s0 + $0x80] sm:$0xff]  ;;  %v507_v6 = vld [vmem:[%s948_s0 + $0x88] sm:$0xff] }
   0x7   :  { %v47_v14 = vadd.f32 %v46_v9, %v45_v11  ;;  %v144_v40 = vsel %vm40_vm0, %v112_v30, 0.0  ;;  %v146_v41 = vsel %vm40_vm0, %v113_v31, 0.0  ;;  %v64_v45 = vsel %vm40_vm0, %v455_v35, 0.0 }
   0x8   :  { %v145_v44 = vadd.f32 %v144_v40, %v143_v39  ;;  %v116_v46 = vmul.f32 %v398_v10, %v398_v10  ;;  %v148_v47 = vsel %vm40_vm0, %v114_v34, 0.0  ;;  %v66_v51 = vsel %vm40_vm0, %v467_v42, 0.0  ;;  %v547_v39 = vld [vmem:[%s948_s0 + $0xa8] sm:$0xff] }
   0x9   :  { %v49_v17 = vadd.f32 %v48_v12, %v47_v14  ;;  %v117_v52 = vmul.f32 %v405_v13, %v405_v13  ;;  %v150_v53 = vsel %vm40_vm0, %v115_v38, 0.0  ;;  %v68_v57 = vsel %vm40_vm0, %v477_v48, 0.0 }
   0xa   :  { %v147_v50 = vadd.f32 %v146_v41, %v145_v44  ;;  %v118_v58 = vmul.f32 %v412_v16, %v412_v16  ;;  %v152_v59 = vsel %vm40_vm0, %v116_v46, 0.0  ;;  %v70_v63 = vsel %vm40_vm0, %v487_v54, 0.0  ;;  %v557_v46 = vld [vmem:[%s948_s0 + $0xb0] sm:$0xff] }
   0xb   :  { %v51_v20 = vadd.f32 %v50_v15, %v49_v17  ;;  %v119_v4 = vmul.f32 %v419_v19, %v419_v19  ;;  %v154_v5 = vsel %vm40_vm0, %v117_v52, 0.0  ;;  %v72_v11 = vsel %vm40_vm0, %v497_v60, 0.0  ;;  %v517_v15 = vld [vmem:[%s948_s0 + $0x90] sm:$0xff] }
   0xc   :  { %v149_v56 = vadd.f32 %v148_v47, %v147_v50  ;;  %v120_v12 = vmul.f32 %v426_v22, %v426_v22  ;;  %v156_v14 = vsel %vm40_vm0, %v118_v58, 0.0  ;;  %v76_v29 = vsel %vm40_vm0, %v517_v15, 0.0 }
   0xd   :  { %v53_v23 = vadd.f32 %v52_v18, %v51_v20  ;;  %v74_v20 = vsel %vm40_vm0, %v507_v6, 0.0  ;;  %v122_v30 = vmul.f32 %v438_v27, %v438_v27  ;;  %v124_v44 = vmul.f32 %v467_v42, %v467_v42 }
   0xe   :  { %v151_v62 = vadd.f32 %v150_v53, %v149_v56  ;;  %v160_v31 = vsel %vm40_vm0, %v120_v12, 0.0  ;;  %v82_v50 = vsel %vm40_vm0, %v547_v39, 0.0  ;;  %v567_v53 = vld [vmem:[%s948_s0 + $0xb8] sm:$0xff]  ;;  %v126_v58 = vmul.f32 %v487_v54, %v487_v54 }
   0xf   :  { %v55_v26 = vadd.f32 %v54_v21, %v53_v23  ;;  %v121_v21 = vmul.f32 %v433_v25, %v433_v25  ;;  %v158_v23 = vsel %vm40_vm0, %v119_v4, 0.0  ;;  %v86_v4 = vsel %vm40_vm0, %v567_v53, 0.0 }
  0x10   :  { %v153_v9 = vadd.f32 %v152_v59, %v151_v62  ;;  %v168_v59 = vsel %vm40_vm0, %v124_v44, 0.0 }
  0x11   :  { %v57_v32 = vadd.f32 %v56_v24, %v55_v26  ;;  %v527_v24 = vld [vmem:[%s948_s0 + $0x98] sm:$0xff]  ;;  %v162_v38 = vsel %vm40_vm0, %v121_v21, 0.0 }
  0x12   :  { %v155_v18 = vadd.f32 %v154_v5, %v153_v9  ;;  %v127_v5 = vmul.f32 %v497_v60, %v497_v60  ;;  %v587_v9 = vld [vmem:[%s948_s0 + $0xc8] sm:$0xff] }
  0x13   :  { %v59_v36 = vadd.f32 %v58_v28, %v57_v32  ;;  %v537_v32 = vld [vmem:[%s948_s0 + $0xa0] sm:$0xff] }
  0x14   :  { %v157_v28 = vadd.f32 %v156_v14, %v155_v18  ;;  %v172_v18 = vsel %vm40_vm0, %v126_v58, 0.0  ;;  %v131_v44 = vmul.f32 %v537_v32, %v537_v32 }
  0x15   :  { %v61_v43 = vadd.f32 %v60_v33, %v59_v36  ;;  %v78_v36 = vsel %vm40_vm0, %v527_v24, 0.0 }
  0x16   :  { %v159_v34 = vadd.f32 %v158_v23, %v157_v28  ;;  %v129_v28 = vmul.f32 %v517_v15, %v517_v15 }
  0x17   :  { %v63_v49 = vadd.f32 %v62_v37, %v61_v43  ;;  %v123_v37 = vmul.f32 %v455_v35, %v455_v35  ;;  %v80_v43 = vsel %vm40_vm0, %v537_v32, 0.0 }
  0x18   :  { %v161_v41 = vadd.f32 %v160_v31, %v159_v34 }
  0x19   :  { %v65_v55 = vadd.f32 %v64_v45, %v63_v49  ;;  %v164_v45 = vsel %vm40_vm0, %v122_v30, 0.0  ;;  %v166_v52 = vsel %vm40_vm0, %v123_v37, 0.0  ;;  %v607_v30 = vld [vmem:[%s948_s0 + $0xd8] sm:$0xff] }
  0x1a   :  { %v163_v49 = vadd.f32 %v162_v38, %v161_v41  ;;  %v617_v38 = vld [vmem:[%s948_s0 + $0xe0] sm:$0xff] }
  0x1b   :  { %v67_v61 = vadd.f32 %v66_v51, %v65_v55  ;;  %v125_v51 = vmul.f32 %v477_v48, %v477_v48 }
  0x1c   :  { %v165_v56 = vadd.f32 %v164_v45, %v163_v49  ;;  %v178_v45 = vsel %vm40_vm0, %v129_v28, 0.0 }
  0x1d   :  { %v69_v8 = vadd.f32 %v68_v57, %v67_v61  ;;  %v84_v57 = vsel %vm40_vm0, %v557_v46, 0.0  ;;  %v577_v61 = vld [vmem:[%s948_s0 + $0xc0] sm:$0xff] }
  0x1e   :  { %v88_v14 = vsel %vm40_vm0, %v577_v61, 0.0 }
  0x1f   :  { %v71_v17 = vadd.f32 %v70_v63, %v69_v8  ;;  %v167_v63 = vadd.f32 %v166_v52, %v165_v56  ;;  %v170_v8 = vsel %vm40_vm0, %v125_v51, 0.0  ;;  %v96_v51 = vsel %vm40_vm0, %v617_v38, 0.0  ;;  %v637_v56 = vld [vmem:[%s948_s0 + $0xf0] sm:$0xff] }
  0x20   :  { %v132_v52 = vmul.f32 %v547_v39, %v547_v39 }
  0x21   :  { %v73_v26 = vadd.f32 %v72_v11, %v71_v17  ;;  %v169_v12 = vadd.f32 %v168_v59, %v167_v63  ;;  %v128_v17 = vmul.f32 %v507_v6, %v507_v6  ;;  %v182_v63 = vsel %vm40_vm0, %v131_v44, 0.0 }
  0x22   :  { %v138_v44 = vmul.f32 %v607_v30, %v607_v30 }
  0x23   :  { %v75_v33 = vadd.f32 %v74_v20, %v73_v26  ;;  %v597_v20 = vld [vmem:[%s948_s0 + $0xd0] sm:$0xff]  ;;  %v171_v23 = vadd.f32 %v170_v8, %v169_v12  ;;  %v90_v26 = vsel %vm40_vm0, %v587_v9, 0.0  ;;  %v176_v37 = vsel %vm40_vm0, %v128_v17, 0.0 }
  0x24   :  { %v92_v34 = vsel %vm40_vm0, %v597_v20, 0.0  ;;  %v134_v12 = vmul.f32 %v567_v53, %v567_v53 }
  0x25   :  { %v77_v40 = vadd.f32 %v76_v29, %v75_v33  ;;  %v174_v29 = vsel %vm40_vm0, %v127_v5, 0.0  ;;  %v173_v33 = vadd.f32 %v172_v18, %v171_v23  ;;  %v135_v23 = vmul.f32 %v577_v61, %v577_v61 }
  0x27   :  { %v79_v47 = vadd.f32 %v78_v36, %v77_v40  ;;  %v130_v36 = vmul.f32 %v527_v24, %v527_v24  ;;  %v175_v41 = vadd.f32 %v174_v29, %v173_v33  ;;  %v188_v33 = vsel %vm40_vm0, %v134_v12, 0.0 }
  0x29   :  { %v81_v55 = vadd.f32 %v80_v43, %v79_v47  ;;  %v94_v43 = vsel %vm40_vm0, %v607_v30, 0.0  ;;  %v627_v47 = vld [vmem:[%s948_s0 + $0xe8] sm:$0xff] }
  0x2a   :  { %v98_v59 = vsel %vm40_vm0, %v627_v47, 0.0 }
  0x2b   :  { %v83_v62 = vadd.f32 %v82_v50, %v81_v55  ;;  %v177_v50 = vadd.f32 %v176_v37, %v175_v41  ;;  %v180_v55 = vsel %vm40_vm0, %v130_v36, 0.0  ;;  %v137_v37 = vmul.f32 %v597_v20, %v597_v20 }
  0x2d   :  { %v85_v11 = vadd.f32 %v84_v57, %v83_v62  ;;  %v179_v58 = vadd.f32 %v178_v45, %v177_v50  ;;  %v133_v62 = vmul.f32 %v557_v46, %v557_v46  ;;  %v139_v50 = vmul.f32 %v617_v38, %v617_v38 }
  0x2f   :  { %v87_v21 = vadd.f32 %v86_v4, %v85_v11  ;;  %v647_v4 = vld [vmem:[%s948_s0 + $0xf8] sm:$0xff]  ;;  %v181_v8 = vadd.f32 %v180_v55, %v179_v58  ;;  %v100_v11 = vsel %vm40_vm0, %v637_v56, 0.0  ;;  %v196_v58 = vsel %vm40_vm0, %v138_v44, 0.0 }
  0x31   :  { %v89_v31 = vadd.f32 %v88_v14, %v87_v21  ;;  %v184_v14 = vsel %vm40_vm0, %v132_v52, 0.0  ;;  %v183_v18 = vadd.f32 %v182_v63, %v181_v8  ;;  %v102_v21 = vsel %vm40_vm0, %v647_v4, 0.0 }
  0x32   :  { %v198_v63 = vsel %vm40_vm0, %v139_v50, 0.0 }
  0x33   :  { %v91_v40 = vadd.f32 %v90_v26, %v89_v31  ;;  %v186_v26 = vsel %vm40_vm0, %v133_v62, 0.0  ;;  %v185_v29 = vadd.f32 %v184_v14, %v183_v18  ;;  %v136_v31 = vmul.f32 %v587_v9, %v587_v9 }
  0x34   :  { %v141_v62 = vmul.f32 %v637_v56, %v637_v56 }
  0x35   :  { %v93_v49 = vadd.f32 %v92_v34, %v91_v40  ;;  %v187_v36 = vadd.f32 %v186_v26, %v185_v29  ;;  %v190_v40 = vsel %vm40_vm0, %v135_v23, 0.0  ;;  %v192_v45 = vsel %vm40_vm0, %v136_v31, 0.0 }
  0x37   :  { %v95_v57 = vadd.f32 %v94_v43, %v93_v49  ;;  %v189_v43 = vadd.f32 %v188_v33, %v187_v36 }
  0x39   :  { %v97_v5 = vadd.f32 %v96_v51, %v95_v57  ;;  %v191_v49 = vadd.f32 %v190_v40, %v189_v43  ;;  %v194_v51 = vsel %vm40_vm0, %v137_v37, 0.0  ;;  %v140_v57 = vmul.f32 %v627_v47, %v627_v47 }
  0x3b   :  { %v99_v17 = vadd.f32 %v98_v59, %v97_v5  ;;  %v193_v55 = vadd.f32 %v192_v45, %v191_v49  ;;  %v200_v12 = vsel %vm40_vm0, %v140_v57, 0.0 }
  0x3d   :  { %v101_v28 = vadd.f32 %v100_v11, %v99_v17  ;;  %v195_v59 = vadd.f32 %v194_v51, %v193_v55  ;;  %v142_v11 = vmul.f32 %v647_v4, %v647_v4  ;;  %v202_v17 = vsel %vm40_vm0, %v141_v62, 0.0 }
  0x3f   :  { %v103_v34 = vadd.f32 %v102_v21, %v101_v28  ;;  %v197_v8 = vadd.f32 %v196_v58, %v195_v59  ;;  %v204_v23 = vsel %vm40_vm0, %v142_v11, 0.0 }
  0x41   :  { %v104_v41 = vrot.slane %v103_v34, 4  ;;  %v199_v14 = vadd.f32 %v198_v63, %v197_v8 }
  0x43   :  { %v105_v52 = vadd.f32 %v104_v41, %v103_v34  ;;  %v201_v21 = vadd.f32 %v200_v12, %v199_v14 }
  0x45   :  { %v106_v5 = vrot.slane %v105_v52, 2  ;;  %v203_v26 = vadd.f32 %v202_v17, %v201_v21 }
  0x47   :  { %v107_v18 = vadd.f32 %v106_v5, %v105_v52  ;;  %v205_v29 = vadd.f32 %v204_v23, %v203_v26 }
  0x49   :  { %v108_v28 = vrot.slane %v107_v18, 1  ;;  %v206_v31 = vrot.slane %v205_v29, 4 }
  0x4b   :  { %v109_v33 = vadd.f32 %v108_v28, %v107_v18  ;;  %v207_v34 = vadd.f32 %v206_v31, %v205_v29 }
  0x4d   :  { %v208_v36 = vrot.slane %v207_v34, 2  ;;  %v682_v37 = vmul.f32 0.00390625, %v109_v33 }
  0x4f   :  { %v209_v40 = vadd.f32 %v208_v36, %v207_v34  ;;  %v213_v44 = vmul.f32 %v682_v37, %v682_v37  ;;  %v216_v52 = vsub.f32 %v365_v0, %v682_v37  ;;  %v217_v55 = vsub.f32 %v370_v1, %v682_v37 }
  0x50   :  { %v218_v57 = vsub.f32 %v375_v2, %v682_v37  ;;  %v219_v58 = vsub.f32 %v380_v3, %v682_v37  ;;  %v220_v59 = vsub.f32 %v391_v7, %v682_v37  ;;  %v221_v62 = vsub.f32 %v398_v10, %v682_v37 }
  0x51   :  { %v210_v41 = vrot.slane %v209_v40, 1  ;;  %v222_v63 = vsub.f32 %v405_v13, %v682_v37  ;;  %v223_v0 = vsub.f32 %v412_v16, %v682_v37  ;;  %v224_v1 = vsub.f32 %v419_v19, %v682_v37 }
  0x52   :  { %v225_v2 = vsub.f32 %v426_v22, %v682_v37  ;;  %v226_v3 = vsub.f32 %v433_v25, %v682_v37  ;;  %v227_v7 = vsub.f32 %v438_v27, %v682_v37  ;;  %v228_v10 = vsub.f32 %v455_v35, %v682_v37 }
  0x53   :  { %v211_v43 = vadd.f32 %v210_v41, %v209_v40  ;;  %v229_v13 = vsub.f32 %v467_v42, %v682_v37  ;;  %v230_v16 = vsub.f32 %v477_v48, %v682_v37  ;;  %v231_v19 = vsub.f32 %v487_v54, %v682_v37 }
  0x54   :  { %v232_v22 = vsub.f32 %v497_v60, %v682_v37  ;;  %v233_v25 = vsub.f32 %v507_v6, %v682_v37  ;;  %v234_v27 = vsub.f32 %v517_v15, %v682_v37  ;;  %v235_v35 = vsub.f32 %v527_v24, %v682_v37 }
  0x55   :  { %v212_v45 = vmul.f32 0.00390625, %v211_v43  ;;  %v236_v42 = vsub.f32 %v537_v32, %v682_v37  ;;  %v237_v48 = vsub.f32 %v547_v39, %v682_v37  ;;  %v238_v54 = vsub.f32 %v557_v46, %v682_v37 }
  0x56   :  { %v239_v60 = vsub.f32 %v567_v53, %v682_v37  ;;  %v240_v6 = vsub.f32 %v577_v61, %v682_v37  ;;  %v241_v15 = vsub.f32 %v587_v9, %v682_v37  ;;  %v242_v24 = vsub.f32 %v597_v20, %v682_v37 }
  0x57   :  { %v214_v49 = vsub.f32 %v212_v45, %v213_v44  ;;  %v243_v5 = vsub.f32 %v607_v30, %v682_v37  ;;  %v244_v11 = vsub.f32 %v617_v38, %v682_v37  ;;  %v245_v12 = vsub.f32 %v627_v47, %v682_v37 }
  0x58   :  { %v246_v14 = vsub.f32 %v637_v56, %v682_v37  ;;  %v247_v17 = vsub.f32 %v647_v4, %v682_v37 }
  0x59   :  { %v215_v50 = vmax.f32 %v214_v49, 0.0 }
  0x5b   :  { %v248_v51 = vadd.f32 1e-05, %v215_v50 }
  0x5d   :  { %350 = vrsqrt.f32 %v248_v51 }
  0x67   :  { %v742_v8 = vpop.eup %350 }
  0x68   :  { %v250_v18 = vmul.f32 %v742_v8, %v216_v52  ;;  %v251_v21 = vmul.f32 %v742_v8, %v217_v55  ;;  %v252_v23 = vmul.f32 %v742_v8, %v218_v57  ;;  %v253_v26 = vmul.f32 %v742_v8, %v219_v58 }
  0x69   :  { %v254_v28 = vmul.f32 %v742_v8, %v220_v59  ;;  %v255_v29 = vmul.f32 %v742_v8, %v221_v62  ;;  %v256_v31 = vmul.f32 %v742_v8, %v222_v63  ;;  %v257_v33 = vmul.f32 %v742_v8, %v223_v0 }
  0x6a   :  { %v282_v34 = vmax.f32 %v250_v18, 0.0  ;;  %v283_v36 = vmax.f32 %v251_v21, 0.0  ;;  %v284_v40 = vmax.f32 %v252_v23, 0.0  ;;  %v285_v41 = vmax.f32 %v253_v26, 0.0 }
  0x6b   :  { %v286_v43 = vmax.f32 %v254_v28, 0.0  ;;  %v287_v44 = vmax.f32 %v255_v29, 0.0  ;;  %v288_v45 = vmax.f32 %v256_v31, 0.0  ;;  %v289_v49 = vmax.f32 %v257_v33, 0.0 }
  0x6c   :  { %314 = vst.msk [vmem:[%s949_s1] sm:$0xff] %vm40_vm0, %v282_v34  ;;  %315 = vst.msk [vmem:[%s949_s1 + $0x8] sm:$0xff] %vm40_vm0, %v283_v36  ;;  %v258_v50 = vmul.f32 %v742_v8, %v224_v1  ;;  %v259_v51 = vmul.f32 %v742_v8, %v225_v2  ;;  %v260_v52 = vmul.f32 %v742_v8, %v226_v3 }
  0x6d   :  { %316 = vst.msk [vmem:[%s949_s1 + $0x10] sm:$0xff] %vm40_vm0, %v284_v40  ;;  %317 = vst.msk [vmem:[%s949_s1 + $0x18] sm:$0xff] %vm40_vm0, %v285_v41  ;;  %v261_v55 = vmul.f32 %v742_v8, %v227_v7  ;;  %v262_v57 = vmul.f32 %v742_v8, %v228_v10  ;;  %v263_v58 = vmul.f32 %v742_v8, %v229_v13 }
  0x6e   :  { %318 = vst.msk [vmem:[%s949_s1 + $0x20] sm:$0xff] %vm40_vm0, %v286_v43  ;;  %319 = vst.msk [vmem:[%s949_s1 + $0x28] sm:$0xff] %vm40_vm0, %v287_v44  ;;  %v264_v59 = vmul.f32 %v742_v8, %v230_v16  ;;  %v265_v62 = vmul.f32 %v742_v8, %v231_v19  ;;  %v290_v63 = vmax.f32 %v258_v50, 0.0  ;;  %v291_v0 = vmax.f32 %v259_v51, 0.0 }
  0x6f   :  { %320 = vst.msk [vmem:[%s949_s1 + $0x30] sm:$0xff] %vm40_vm0, %v288_v45  ;;  %321 = vst.msk [vmem:[%s949_s1 + $0x38] sm:$0xff] %vm40_vm0, %v289_v49  ;;  %v292_v1 = vmax.f32 %v260_v52, 0.0  ;;  %v293_v2 = vmax.f32 %v261_v55, 0.0  ;;  %v294_v3 = vmax.f32 %v262_v57, 0.0  ;;  %v295_v7 = vmax.f32 %v263_v58, 0.0 }
  0x70   :  { %v296_v18 = vmax.f32 %v264_v59, 0.0  ;;  %v297_v21 = vmax.f32 %v265_v62, 0.0  ;;  %322 = vst.msk [vmem:[%s949_s1 + $0x40] sm:$0xff] %vm40_vm0, %v290_v63  ;;  %323 = vst.msk [vmem:[%s949_s1 + $0x48] sm:$0xff] %vm40_vm0, %v291_v0  ;;  %v266_v10 = vmul.f32 %v742_v8, %v232_v22  ;;  %v267_v13 = vmul.f32 %v742_v8, %v233_v25 }
  0x71   :  { %324 = vst.msk [vmem:[%s949_s1 + $0x50] sm:$0xff] %vm40_vm0, %v292_v1  ;;  %325 = vst.msk [vmem:[%s949_s1 + $0x58] sm:$0xff] %vm40_vm0, %v293_v2  ;;  %v268_v16 = vmul.f32 %v742_v8, %v234_v27  ;;  %v269_v19 = vmul.f32 %v742_v8, %v235_v35  ;;  %v270_v22 = vmul.f32 %v742_v8, %v236_v42 }
  0x72   :  { %326 = vst.msk [vmem:[%s949_s1 + $0x60] sm:$0xff] %vm40_vm0, %v294_v3  ;;  %327 = vst.msk [vmem:[%s949_s1 + $0x68] sm:$0xff] %vm40_vm0, %v295_v7  ;;  %v271_v25 = vmul.f32 %v742_v8, %v237_v48  ;;  %v272_v27 = vmul.f32 %v742_v8, %v238_v54  ;;  %v273_v35 = vmul.f32 %v742_v8, %v239_v60  ;;  %v298_v23 = vmax.f32 %v266_v10, 0.0 }
  0x73   :  { %328 = vst.msk [vmem:[%s949_s1 + $0x70] sm:$0xff] %vm40_vm0, %v296_v18  ;;  %329 = vst.msk [vmem:[%s949_s1 + $0x78] sm:$0xff] %vm40_vm0, %v297_v21  ;;  %v299_v26 = vmax.f32 %v267_v13, 0.0  ;;  %v300_v32 = vmax.f32 %v268_v16, 0.0  ;;  %v301_v28 = vmax.f32 %v269_v19, 0.0  ;;  %v302_v42 = vmax.f32 %v270_v22, 0.0 }
  0x74   :  { %v303_v29 = vmax.f32 %v271_v25, 0.0  ;;  %v304_v31 = vmax.f32 %v272_v27, 0.0  ;;  %v305_v39 = vmax.f32 %v273_v35, 0.0  ;;  %330 = vst.msk [vmem:[%s949_s1 + $0x80] sm:$0xff] %vm40_vm0, %v298_v23  ;;  %v274_v46 = vmul.f32 %v742_v8, %v240_v6 }
  0x75   :  { %331 = vst.msk [vmem:[%s949_s1 + $0x88] sm:$0xff] %vm40_vm0, %v299_v26  ;;  %332 = vst.msk [vmem:[%s949_s1 + $0x90] sm:$0xff] %vm40_vm0, %v300_v32  ;;  %v275_v53 = vmul.f32 %v742_v8, %v241_v15  ;;  %v276_v48 = vmul.f32 %v742_v8, %v242_v24  ;;  %v277_v54 = vmul.f32 %v742_v8, %v243_v5 }
  0x76   :  { %333 = vst.msk [vmem:[%s949_s1 + $0x98] sm:$0xff] %vm40_vm0, %v301_v28  ;;  %334 = vst.msk [vmem:[%s949_s1 + $0xa0] sm:$0xff] %vm40_vm0, %v302_v42  ;;  %v278_v61 = vmul.f32 %v742_v8, %v244_v11  ;;  %v279_v9 = vmul.f32 %v742_v8, %v245_v12  ;;  %v280_v20 = vmul.f32 %v742_v8, %v246_v14  ;;  %v306_v60 = vmax.f32 %v274_v46, 0.0 }
  0x77   :  { %335 = vst.msk [vmem:[%s949_s1 + $0xa8] sm:$0xff] %vm40_vm0, %v303_v29  ;;  %336 = vst.msk [vmem:[%s949_s1 + $0xb0] sm:$0xff] %vm40_vm0, %v304_v31  ;;  %v281_v30 = vmul.f32 %v742_v8, %v247_v17  ;;  %v307_v6 = vmax.f32 %v275_v53, 0.0  ;;  %v308_v38 = vmax.f32 %v276_v48, 0.0  ;;  %v309_v15 = vmax.f32 %v277_v54, 0.0 }
  0x78   :  { %337 = vst.msk [vmem:[%s949_s1 + $0xb8] sm:$0xff] %vm40_vm0, %v305_v39  ;;  %v310_v24 = vmax.f32 %v278_v61, 0.0  ;;  %v311_v5 = vmax.f32 %v279_v9, 0.0  ;;  %v312_v11 = vmax.f32 %v280_v20, 0.0  ;;  %338 = vst.msk [vmem:[%s949_s1 + $0xc0] sm:$0xff] %vm40_vm0, %v306_v60 }
  0x79   :  { %v313_v47 = vmax.f32 %v281_v30, 0.0  ;;  %339 = vst.msk [vmem:[%s949_s1 + $0xc8] sm:$0xff] %vm40_vm0, %v307_v6  ;;  %340 = vst.msk [vmem:[%s949_s1 + $0xd0] sm:$0xff] %vm40_vm0, %v308_v38 }
  0x7a   :  { %341 = vst.msk [vmem:[%s949_s1 + $0xd8] sm:$0xff] %vm40_vm0, %v309_v15  ;;  %342 = vst.msk [vmem:[%s949_s1 + $0xe0] sm:$0xff] %vm40_vm0, %v310_v24 }
  0x7b   :  { %343 = vst.msk [vmem:[%s949_s1 + $0xe8] sm:$0xff] %vm40_vm0, %v311_v5  ;;  %344 = vst.msk [vmem:[%s949_s1 + $0xf0] sm:$0xff] %vm40_vm0, %v312_v11 }
  0x7c   :  { %345 = vst.msk [vmem:[%s949_s1 + $0xf8] sm:$0xff] %vm40_vm0, %v313_v47 }

// kernel: global_generator_forward.90
= control target key start
LH: loop header
LB: loop body
LE: loop exit
PB: predicated region body
PF: predicated region fallthrough
CT: control target
= control target key end

     0   :  { %s558_s1 = inlined_call_operand.vmem [shape: bf16[256,128], index: 1, kind: input, shape index: {}]   ;;  %s559_s0 = inlined_call_operand.vmem [shape: bf16[64,256], index: 0, kind: input, shape index: {}]   ;;  %s560_s2 = inlined_call_operand.vmem [shape: f32[1,128], index: 2, kind: input, shape index: {}]   ;;  %s561_s3 = inlined_call_operand.vmem [shape: f32[64,128], index: 3, kind: output, shape index: {}]  }
   0x1   :  { %v411_v0 = vld [vmem:[%s558_s1 + $0x40] sm:$0xff]   ;;  %v413_v2 = vld [vmem:[%s558_s1 + $0x48] sm:$0xff]   ;;  %v415_v4 = vld [vmem:[%s558_s1 + $0x50] sm:$0xff]  }
   0x2   :  { %v412_v1 = vld [vmem:[%s558_s1] sm:$0xff]   ;;  %355 = vmatprep.subr.bf16.mxu0 %v411_v0  ;;  %395 = vmatprep.subr.bf16.mxu1 %v411_v0  ;;  %v414_v3 = vld [vmem:[%s558_s1 + $0x8] sm:$0xff]   ;;  %v416_v5 = vld [vmem:[%s558_s1 + $0x10] sm:$0xff]  }
   0x3   :  { %356 = vmatpush3.bf16.msra.mxu0 %v412_v1  ;;  %403 = vmatpush3.bf16.msra.mxu1 %v412_v1  ;;  %v417_v6 = vld [vmem:[%s558_s1 + $0x58] sm:$0xff]   ;;  %v419_v8 = vld [vmem:[%s558_s1 + $0x60] sm:$0xff]   ;;  %v421_v10 = vld [vmem:[%s558_s1 + $0x68] sm:$0xff]  }
   0x4   :  { %357 = vmatprep.subr.bf16.mxu0 %v413_v2  ;;  %396 = vmatprep.subr.bf16.mxu1 %v413_v2  ;;  %v418_v7 = vld [vmem:[%s558_s1 + $0x18] sm:$0xff]   ;;  %v420_v9 = vld [vmem:[%s558_s1 + $0x20] sm:$0xff]   ;;  %v422_v13 = vld [vmem:[%s558_s1 + $0x28] sm:$0xff]  }
   0x5   :  { %v429_v11 = vld [vmem:[%s559_s0 + $0x4] ss:$8 sps:$4 sm:$0xff]   ;;  %v423_v14 = vld [vmem:[%s558_s1 + $0x70] sm:$0xff]   ;;  %v425_v16 = vld [vmem:[%s558_s1 + $0x78] sm:$0xff]  }
   0x6   :  { %v432_v12 = vld [vmem:[%s559_s0 + $0x24] ss:$8 sps:$4 sm:$0xff]   ;;  %243 = vmatprep.mubr.bf16.mxu0 %v429_v11  ;;  %v424_v15 = vld [vmem:[%s558_s1 + $0x30] sm:$0xff]   ;;  %v426_v17 = vld [vmem:[%s558_s1 + $0x38] sm:$0xff]  }
   0x7   :  { %358 = vmatpush3.bf16.msra.mxu0 %v414_v3  ;;  %404 = vmatpush3.bf16.msra.mxu1 %v414_v3  ;;  %v427_v18 = vld [vmem:[%s559_s0] ss:$8 sps:$4 sm:$0xff]   ;;  %v433_v20 = vld [vmem:[%s559_s0 + $0x14] ss:$8 sps:$4 sm:$0xff]   ;;  %v437_v22 = vld [vmem:[%s559_s0 + $0x10] ss:$8 sps:$4 sm:$0xff]  }
   0x8   :  { %359 = vmatprep.subr.bf16.mxu0 %v415_v4  ;;  %397 = vmatprep.subr.bf16.mxu1 %v415_v4  ;;  %v430_v19 = vld [vmem:[%s559_s0 + $0x20] ss:$8 sps:$4 sm:$0xff]   ;;  %v435_v21 = vld [vmem:[%s559_s0 + $0x34] ss:$8 sps:$4 sm:$0xff]   ;;  %v438_v23 = vld [vmem:[%s559_s0 + $0x30] ss:$8 sps:$4 sm:$0xff]  }
   0x9   :  { %259 = vmatprep.mubr.bf16.mxu1 %v432_v12  ;;  %v354_v27 = vld [vmem:[%s560_s2] ss:$0 sm:$0xff] }
   0xb   :  { %360 = vmatpush3.bf16.msra.mxu0 %v416_v5  ;;  %405 = vmatpush3.bf16.msra.mxu1 %v416_v5 }
   0xc   :  { %361 = vmatprep.subr.bf16.mxu0 %v417_v6  ;;  %398 = vmatprep.subr.bf16.mxu1 %v417_v6 }
   0xf   :  { %362 = vmatpush3.bf16.msra.mxu0 %v418_v7  ;;  %406 = vmatpush3.bf16.msra.mxu1 %v418_v7 }
  0x10   :  { %363 = vmatprep.subr.bf16.mxu0 %v419_v8  ;;  %399 = vmatprep.subr.bf16.mxu1 %v419_v8 }
  0x13   :  { %364 = vmatpush3.bf16.msra.mxu0 %v420_v9  ;;  %407 = vmatpush3.bf16.msra.mxu1 %v420_v9 }
  0x14   :  { %365 = vmatprep.subr.bf16.mxu0 %v421_v10  ;;  %400 = vmatprep.subr.bf16.mxu1 %v421_v10 }
  0x17   :  { %366 = vmatpush3.bf16.msra.mxu0 %v422_v13  ;;  %408 = vmatpush3.bf16.msra.mxu1 %v422_v13 }
  0x18   :  { %367 = vmatprep.subr.bf16.mxu0 %v423_v14  ;;  %401 = vmatprep.subr.bf16.mxu1 %v423_v14 }
  0x1b   :  { %368 = vmatpush3.bf16.msra.mxu0 %v424_v15  ;;  %409 = vmatpush3.bf16.msra.mxu1 %v424_v15 }
  0x1c   :  { %369 = vmatprep.subr.bf16.mxu0 %v425_v16  ;;  %402 = vmatprep.subr.bf16.mxu1 %v425_v16 }
  0x1f   :  { %370 = vmatpush3.bf16.msra.mxu0 %v426_v17  ;;  %410 = vmatpush3.bf16.msra.mxu1 %v426_v17 }
  0x22   :  { %244 = vmatmul.mubr.bf16.vlgmr.msra.gmra.mrb[0].mxu0 %v427_v18  ;;  %260 = vmatmul.mubr.bf16.vlgmr.msra.gmra.mrb[0].mxu1 %v430_v19 }
  0x23   :  { %251 = vmatprep.mubr.bf16.mxu0 %v433_v20  ;;  %267 = vmatprep.mubr.bf16.mxu1 %v435_v21 }
  0x2a   :  { %252 = vmatmul.mubr.bf16.gmra.mrb[4].mxu0 %v437_v22  ;;  %268 = vmatmul.mubr.bf16.gmra.mrb[4].mxu1 %v438_v23 }
  0xf5   :  { %v371_v24 = vpop.f32.mrb[0].mxu0  ;;  %v383_v25 = vpop.f32.mrb[0].mxu1 }
  0xf6   :  { %v372_v26 = vpop.f32.mrb[1].mxu0  ;;  %v384_v28 = vpop.f32.mrb[1].mxu1 }
  0xf7   :  { %v373_v29 = vadd.f32 %v372_v26, %v371_v24  ;;  %v385_v30 = vadd.f32 %v384_v28, %v383_v25  ;;  %v374_v31 = vpop.f32.mrb[2].mxu0  ;;  %v386_v32 = vpop.f32.mrb[2].mxu1 }
  0xf8   :  { %v375_v33 = vpop.f32.mrb[3].mxu0  ;;  %v387_v34 = vpop.f32.mrb[3].mxu1 }
  0xf9   :  { %v310_v35 = vadd.f32 %v373_v29, %v354_v27  ;;  %v314_v36 = vadd.f32 %v385_v30, %v354_v27  ;;  %v376_v37 = vadd.f32 %v375_v33, %v374_v31  ;;  %v388_v38 = vadd.f32 %v387_v34, %v386_v32 }
  0xfb   :  { %318 = vst [vmem:[%s561_s3] sm:$0xff] %v310_v35  ;;  %322 = vst [vmem:[%s561_s3 + $0x20] sm:$0xff] %v314_v36  ;;  %v311_v39 = vadd.f32 %v376_v37, %v354_v27  ;;  %v315_v40 = vadd.f32 %v388_v38, %v354_v27 }
  0xfd   :  { %319 = vst [vmem:[%s561_s3 + $0x8] sm:$0xff] %v311_v39  ;;  %323 = vst [vmem:[%s561_s3 + $0x28] sm:$0xff] %v315_v40  ;;  %v377_v41 = vpop.f32.mrb[4].mxu0  ;;  %v389_v42 = vpop.f32.mrb[4].mxu1 }
  0xfe   :  { %v378_v43 = vpop.f32.mrb[5].mxu0  ;;  %v390_v44 = vpop.f32.mrb[5].mxu1 }
  0xff   :  { %v379_v45 = vadd.f32 %v378_v43, %v377_v41  ;;  %v391_v46 = vadd.f32 %v390_v44, %v389_v42  ;;  %v380_v47 = vpop.f32.mrb[6].mxu0  ;;  %v392_v48 = vpop.f32.mrb[6].mxu1 }
 0x100   :  { %v381_v49 = vpop.f32.mrb[7].mxu0  ;;  %v393_v50 = vpop.f32.mrb[7].mxu1 }
 0x101   :  { %v312_v51 = vadd.f32 %v379_v45, %v354_v27  ;;  %v316_v52 = vadd.f32 %v391_v46, %v354_v27  ;;  %v382_v53 = vadd.f32 %v381_v49, %v380_v47  ;;  %v394_v54 = vadd.f32 %v393_v50, %v392_v48 }
 0x103   :  { %320 = vst [vmem:[%s561_s3 + $0x10] sm:$0xff] %v312_v51  ;;  %324 = vst [vmem:[%s561_s3 + $0x30] sm:$0xff] %v316_v52  ;;  %v313_v55 = vadd.f32 %v382_v53, %v354_v27  ;;  %v317_v56 = vadd.f32 %v394_v54, %v354_v27 }
 0x105   :  { %321 = vst [vmem:[%s561_s3 + $0x18] sm:$0xff] %v313_v55  ;;  %325 = vst [vmem:[%s561_s3 + $0x38] sm:$0xff] %v317_v56 }

// kernel: global_generator_forward.91
= control target key start
LH: loop header
LB: loop body
LE: loop exit
PB: predicated region body
PF: predicated region fallthrough
CT: control target
= control target key end

     0   :  { %vm16_vm0 = vcmask 261120   ;;  %s230_s0 = inlined_call_operand.vmem [shape: f32[1,64,32], index: 0, kind: input, shape index: {}]   ;;  %s231_s1 = inlined_call_operand.vmem [shape: f32[1,64,32], index: 1, kind: output, shape index: {}]  }
   0x1   :  { %v125_v0 = vld [vmem:[%s230_s0] sm:$0xff]  ;;  %v130_v1 = vld [vmem:[%s230_s0 + $0x8] sm:$0xff]  ;;  %v135_v2 = vld [vmem:[%s230_s0 + $0x10] sm:$0xff] }
   0x2   :  { %v140_v3 = vld [vmem:[%s230_s0 + $0x18] sm:$0xff]  ;;  %v17_v4 = vsel %vm16_vm0, %v125_v0, 0.0  ;;  %v18_v5 = vsel %vm16_vm0, %v130_v1, 0.0  ;;  %v20_v6 = vsel %vm16_vm0, %v135_v2, 0.0  ;;  %v39_v7 = vmul.f32 %v125_v0, %v125_v0  ;;  %v153_v8 = vld [vmem:[%s230_s0 + $0x20] sm:$0xff]  ;;  %v164_v13 = vld [vmem:[%s230_s0 + $0x28] sm:$0xff] }
   0x3   :  { %v19_v9 = vadd.f32 %v18_v5, %v17_v4  ;;  %v22_v10 = vsel %vm16_vm0, %v140_v3, 0.0  ;;  %v40_v11 = vmul.f32 %v130_v1, %v130_v1  ;;  %v41_v12 = vmul.f32 %v135_v2, %v135_v2  ;;  %v14_v20 = vld [vmem:[%s230_s0 + $0x30] sm:$0xff]  ;;  %v15_v27 = vld [vmem:[%s230_s0 + $0x38] sm:$0xff] }
   0x4   :  { %v42_v15 = vmul.f32 %v140_v3, %v140_v3  ;;  %v24_v16 = vsel %vm16_vm0, %v153_v8, 0.0  ;;  %v43_v17 = vmul.f32 %v153_v8, %v153_v8  ;;  %v47_v18 = vsel %vm16_vm0, %v39_v7, 0.0 }
   0x5   :  { %v21_v14 = vadd.f32 %v20_v6, %v19_v9  ;;  %v48_v19 = vsel %vm16_vm0, %v40_v11, 0.0  ;;  %v50_v23 = vsel %vm16_vm0, %v41_v12, 0.0  ;;  %v26_v24 = vsel %vm16_vm0, %v164_v13, 0.0 }
   0x6   :  { %v49_v22 = vadd.f32 %v48_v19, %v47_v18  ;;  %v44_v25 = vmul.f32 %v164_v13, %v164_v13  ;;  %v52_v26 = vsel %vm16_vm0, %v42_v15, 0.0  ;;  %v28_v30 = vsel %vm16_vm0, %v14_v20, 0.0 }
   0x7   :  { %v23_v21 = vadd.f32 %v22_v10, %v21_v14  ;;  %v45_v31 = vmul.f32 %v14_v20, %v14_v20  ;;  %v54_v32 = vsel %vm16_vm0, %v43_v17, 0.0  ;;  %v30_v35 = vsel %vm16_vm0, %v15_v27, 0.0 }
   0x8   :  { %v51_v29 = vadd.f32 %v50_v23, %v49_v22  ;;  %v46_v36 = vmul.f32 %v15_v27, %v15_v27  ;;  %v56_v37 = vsel %vm16_vm0, %v44_v25, 0.0 }
   0x9   :  { %v25_v28 = vadd.f32 %v24_v16, %v23_v21  ;;  %v58_v40 = vsel %vm16_vm0, %v45_v31, 0.0 }
   0xa   :  { %v53_v34 = vadd.f32 %v52_v26, %v51_v29  ;;  %v60_v43 = vsel %vm16_vm0, %v46_v36, 0.0 }
   0xb   :  { %v27_v33 = vadd.f32 %v26_v24, %v25_v28 }
   0xc   :  { %v55_v39 = vadd.f32 %v54_v32, %v53_v34 }
   0xd   :  { %v29_v38 = vadd.f32 %v28_v30, %v27_v33 }
   0xe   :  { %v57_v42 = vadd.f32 %v56_v37, %v55_v39 }
   0xf   :  { %v31_v41 = vadd.f32 %v30_v35, %v29_v38 }
  0x10   :  { %v59_v45 = vadd.f32 %v58_v40, %v57_v42 }
  0x11   :  { %v32_v44 = vrot.slane %v31_v41, 4 }
  0x12   :  { %v61_v47 = vadd.f32 %v60_v43, %v59_v45 }
  0x13   :  { %v33_v46 = vadd.f32 %v32_v44, %v31_v41 }
  0x14   :  { %v62_v49 = vrot.slane %v61_v47, 4 }
  0x15   :  { %v34_v48 = vrot.slane %v33_v46, 2 }
  0x16   :  { %v63_v51 = vadd.f32 %v62_v49, %v61_v47 }
  0x17   :  { %v35_v50 = vadd.f32 %v34_v48, %v33_v46 }
  0x18   :  { %v64_v53 = vrot.slane %v63_v51, 2 }
  0x19   :  { %v36_v52 = vrot.slane %v35_v50, 1 }
  0x1a   :  { %v65_v55 = vadd.f32 %v64_v53, %v63_v51 }
  0x1b   :  { %v37_v54 = vadd.f32 %v36_v52, %v35_v50 }
  0x1c   :  { %v66_v57 = vrot.slane %v65_v55, 1 }
  0x1d   :  { %v38_v56 = vmul.f32 0.015625, %v37_v54 }
  0x1e   :  { %v67_v58 = vadd.f32 %v66_v57, %v65_v55 }
  0x1f   :  { %v69_v59 = vmul.f32 %v38_v56, %v38_v56  ;;  %v72_v4 = vsub.f32 %v125_v0, %v38_v56  ;;  %v73_v5 = vsub.f32 %v130_v1, %v38_v56  ;;  %v74_v6 = vsub.f32 %v135_v2, %v38_v56 }
  0x20   :  { %v68_v60 = vmul.f32 0.015625, %v67_v58  ;;  %v75_v7 = vsub.f32 %v140_v3, %v38_v56  ;;  %v76_v9 = vsub.f32 %v153_v8, %v38_v56  ;;  %v77_v10 = vsub.f32 %v164_v13, %v38_v56 }
  0x21   :  { %v78_v11 = vsub.f32 %v14_v20, %v38_v56  ;;  %v79_v12 = vsub.f32 %v15_v27, %v38_v56 }
  0x22   :  { %v70_v61 = vsub.f32 %v68_v60, %v69_v59 }
  0x24   :  { %v71_v62 = vmax.f32 %v70_v61, 0.0 }
  0x26   :  { %v80_v63 = vadd.f32 1e-05, %v71_v62 }
  0x28   :  { %110 = vrsqrt.f32 %v80_v63 }
  0x32   :  { %v111_v14 = vpop.eup %110 }
  0x33   :  { %v82_v15 = vmul.f32 %v111_v14, %v72_v4  ;;  %v83_v16 = vmul.f32 %v111_v14, %v73_v5  ;;  %v84_v17 = vmul.f32 %v111_v14, %v74_v6  ;;  %v85_v18 = vmul.f32 %v111_v14, %v75_v7 }
  0x34   :  { %v86_v19 = vmul.f32 %v111_v14, %v76_v9  ;;  %v87_v21 = vmul.f32 %v111_v14, %v77_v10  ;;  %v88_v0 = vmul.f32 %v111_v14, %v78_v11  ;;  %v89_v22 = vmul.f32 %v111_v14, %v79_v12 }
  0x35   :  { %v90_v1 = vmax.f32 %v82_v15, 0.0  ;;  %v91_v23 = vmax.f32 %v83_v16, 0.0  ;;  %v92_v2 = vmax.f32 %v84_v17, 0.0  ;;  %v93_v24 = vmax.f32 %v85_v18, 0.0 }
  0x36   :  { %v94_v3 = vmax.f32 %v86_v19, 0.0  ;;  %v95_v25 = vmax.f32 %v87_v21, 0.0  ;;  %v96_v8 = vmax.f32 %v88_v0, 0.0  ;;  %v97_v26 = vmax.f32 %v89_v22, 0.0 }
  0x37   :  { %98 = vst.msk [vmem:[%s231_s1] sm:$0xff] %vm16_vm0, %v90_v1  ;;  %99 = vst.msk [vmem:[%s231_s1 + $0x8] sm:$0xff] %vm16_vm0, %v91_v23 }
  0x38   :  { %100 = vst.msk [vmem:[%s231_s1 + $0x10] sm:$0xff] %vm16_vm0, %v92_v2  ;;  %101 = vst.msk [vmem:[%s231_s1 + $0x18] sm:$0xff] %vm16_vm0, %v93_v24 }
  0x39   :  { %102 = vst.msk [vmem:[%s231_s1 + $0x20] sm:$0xff] %vm16_vm0, %v94_v3  ;;  %103 = vst.msk [vmem:[%s231_s1 + $0x28] sm:$0xff] %vm16_vm0, %v95_v25 }
  0x3a   :  { %104 = vst.msk [vmem:[%s231_s1 + $0x30] sm:$0xff] %vm16_vm0, %v96_v8  ;;  %105 = vst.msk [vmem:[%s231_s1 + $0x38] sm:$0xff] %vm16_vm0, %v97_v26 }

// kernel: global_generator_forward.93
= control target key start
LH: loop header
LB: loop body
LE: loop exit
PB: predicated region body
PF: predicated region fallthrough
CT: control target
= control target key end

     0   :  { %vm10_vm0 = vcmask 523264   ;;  %s80_s0 = inlined_call_operand.vmem [shape: f32[1,16,64], index: 0, kind: input, shape index: {}]   ;;  %s81_s1 = inlined_call_operand.vmem [shape: f32[1,16,64], index: 1, kind: output, shape index: {}]  }
   0x1   :  { %v8_v0 = vld [vmem:[%s80_s0] sm:$0xff]  ;;  %v9_v1 = vld [vmem:[%s80_s0 + $0x8] sm:$0xff] }
   0x2   :  { %v11_v2 = vsel %vm10_vm0, %v8_v0, 0.0  ;;  %v12_v3 = vsel %vm10_vm0, %v9_v1, 0.0  ;;  %v21_v4 = vmul.f32 %v8_v0, %v8_v0  ;;  %v22_v5 = vmul.f32 %v9_v1, %v9_v1 }
   0x3   :  { %v13_v6 = vadd.f32 %v12_v3, %v11_v2 }
   0x4   :  { %v23_v7 = vsel %vm10_vm0, %v21_v4, 0.0  ;;  %v24_v8 = vsel %vm10_vm0, %v22_v5, 0.0 }
   0x5   :  { %v14_v9 = vrot.slane %v13_v6, 4  ;;  %v25_v10 = vadd.f32 %v24_v8, %v23_v7 }
   0x7   :  { %v15_v11 = vadd.f32 %v14_v9, %v13_v6  ;;  %v26_v12 = vrot.slane %v25_v10, 4 }
   0x9   :  { %v16_v13 = vrot.slane %v15_v11, 2  ;;  %v27_v14 = vadd.f32 %v26_v12, %v25_v10 }
   0xb   :  { %v17_v15 = vadd.f32 %v16_v13, %v15_v11  ;;  %v28_v16 = vrot.slane %v27_v14, 2 }
   0xd   :  { %v18_v17 = vrot.slane %v17_v15, 1  ;;  %v29_v18 = vadd.f32 %v28_v16, %v27_v14 }
   0xf   :  { %v19_v19 = vadd.f32 %v18_v17, %v17_v15  ;;  %v30_v20 = vrot.slane %v29_v18, 1 }
  0x11   :  { %v20_v21 = vmul.f32 0.0625, %v19_v19  ;;  %v31_v22 = vadd.f32 %v30_v20, %v29_v18 }
  0x13   :  { %v32_v23 = vmul.f32 0.0625, %v31_v22  ;;  %v33_v24 = vmul.f32 %v20_v21, %v20_v21  ;;  %v36_v28 = vsub.f32 %v8_v0, %v20_v21  ;;  %v37_v29 = vsub.f32 %v9_v1, %v20_v21 }
  0x15   :  { %v34_v25 = vsub.f32 %v32_v23, %v33_v24 }
  0x17   :  { %v35_v26 = vmax.f32 %v34_v25, 0.0 }
  0x19   :  { %v38_v27 = vadd.f32 1e-05, %v35_v26 }
  0x1b   :  { %50 = vrsqrt.f32 %v38_v27 }
  0x25   :  { %v51_v30 = vpop.eup %50 }
  0x26   :  { %v40_v31 = vmul.f32 %v51_v30, %v36_v28  ;;  %v41_v32 = vmul.f32 %v51_v30, %v37_v29 }
  0x28   :  { %v42_v33 = vmax.f32 %v40_v31, 0.0  ;;  %v43_v34 = vmax.f32 %v41_v32, 0.0 }
  0x2a   :  { %44 = vst.msk [vmem:[%s81_s1] sm:$0xff] %vm10_vm0, %v42_v33  ;;  %45 = vst.msk [vmem:[%s81_s1 + $0x8] sm:$0xff] %vm10_vm0, %v43_v34 }

// kernel: global_generator_forward.92
= control target key start
LH: loop header
LB: loop body
LE: loop exit
PB: predicated region body
PF: predicated region fallthrough
CT: control target
= control target key end

     0   :  { %v450_v1 = vmov 0.0   ;;  %vm451_vm0 = vmmov 0   ;;  %s562_s1 = inlined_call_operand.vmem [shape: bf16[384,128], index: 1, kind: input, shape index: {}]   ;;  %s563_s0 = inlined_call_operand.vmem [shape: bf16[16,384], index: 0, kind: input, shape index: {}]   ;;  %s564_s2 = inlined_call_operand.vmem [shape: f32[1,128], index: 2, kind: input, shape index: {}]   ;;  %s565_s3 = inlined_call_operand.vmem [shape: f32[16,128], index: 3, kind: output, shape index: {}]  }
   0x1   :  { %v422_v0 = vld [vmem:[%s562_s1 + $0x40] sm:$0xff]   ;;  %400 = vmatprep.subr.bf16.mxu1 %v450_v1  ;;  %416 = vmatprep.mubr.msk.bf16.mxu1 %vm451_vm0, %v450_v1  ;;  %v425_v4 = vld [vmem:[%s562_s1 + $0x48] sm:$0xff]   ;;  %v428_v7 = vld [vmem:[%s562_s1 + $0x50] sm:$0xff]  }
   0x2   :  { %v423_v2 = vld [vmem:[%s562_s1] sm:$0xff]   ;;  %369 = vmatprep.subr.bf16.mxu0 %v422_v0  ;;  %v426_v5 = vld [vmem:[%s562_s1 + $0x8] sm:$0xff]   ;;  %v429_v8 = vld [vmem:[%s562_s1 + $0x10] sm:$0xff]  }
   0x3   :  { %v424_v3 = vld [vmem:[%s562_s1 + $0x80] sm:$0xff]   ;;  %370 = vmatpush3.bf16.msra.mxu0 %v423_v2  ;;  %v427_v6 = vld [vmem:[%s562_s1 + $0x88] sm:$0xff]   ;;  %v430_v9 = vld [vmem:[%s562_s1 + $0x90] sm:$0xff]  }
   0x4   :  { %401 = vmatpush3.bf16.msra.mxu1 %v424_v3  ;;  %371 = vmatprep.subr.bf16.mxu0 %v425_v4  ;;  %v431_v10 = vld [vmem:[%s562_s1 + $0x58] sm:$0xff]   ;;  %v434_v13 = vld [vmem:[%s562_s1 + $0x60] sm:$0xff]   ;;  %v437_v16 = vld [vmem:[%s562_s1 + $0x68] sm:$0xff]  }
   0x5   :  { %402 = vmatprep.subr.bf16.mxu1 %v450_v1  ;;  %v432_v11 = vld [vmem:[%s562_s1 + $0x18] sm:$0xff]   ;;  %v435_v14 = vld [vmem:[%s562_s1 + $0x20] sm:$0xff]   ;;  %v438_v17 = vld [vmem:[%s562_s1 + $0x28] sm:$0xff]  }
   0x6   :  { %v433_v12 = vld [vmem:[%s562_s1 + $0x98] sm:$0xff]   ;;  %v436_v15 = vld [vmem:[%s562_s1 + $0xa0] sm:$0xff]   ;;  %v439_v18 = vld [vmem:[%s562_s1 + $0xa8] sm:$0xff]  }
   0x7   :  { %372 = vmatpush3.bf16.msra.mxu0 %v426_v5  ;;  %v440_v19 = vld [vmem:[%s562_s1 + $0x70] sm:$0xff]   ;;  %v443_v22 = vld [vmem:[%s562_s1 + $0x78] sm:$0xff]   ;;  %v446_v26 = vld [vmem:[%s563_s0] ss:$12 sps:$4 sm:$0xff]  }
   0x8   :  { %403 = vmatpush3.bf16.msra.mxu1 %v427_v6  ;;  %373 = vmatprep.subr.bf16.mxu0 %v428_v7  ;;  %v441_v20 = vld [vmem:[%s562_s1 + $0x30] sm:$0xff]   ;;  %v444_v24 = vld [vmem:[%s562_s1 + $0x38] sm:$0xff]   ;;  %v368_v34 = vld [vmem:[%s564_s2] ss:$0 sm:$0xff] }
   0x9   :  { %404 = vmatprep.subr.bf16.mxu1 %v450_v1  ;;  %v442_v21 = vld [vmem:[%s562_s1 + $0xb0] sm:$0xff]   ;;  %v445_v25 = vld [vmem:[%s562_s1 + $0xb8] sm:$0xff]  }
   0xa   :  { %v448_v23 = vld [vmem:[%s563_s0 + $0x4] ss:$12 sps:$4 sm:$0xff]   ;;  %v449_v27 = vld [vmem:[%s563_s0 + $0x8] ss:$12 sps:$4 sm:$0xff]  }
   0xb   :  { %374 = vmatpush3.bf16.msra.mxu0 %v429_v8  ;;  %267 = vmatprep.mubr.bf16.mxu0 %v448_v23 }
   0xc   :  { %405 = vmatpush3.bf16.msra.mxu1 %v430_v9  ;;  %375 = vmatprep.subr.bf16.mxu0 %v431_v10 }
   0xd   :  { %406 = vmatprep.subr.bf16.mxu1 %v450_v1 }
   0xf   :  { %376 = vmatpush3.bf16.msra.mxu0 %v432_v11 }
  0x10   :  { %407 = vmatpush3.bf16.msra.mxu1 %v433_v12  ;;  %377 = vmatprep.subr.bf16.mxu0 %v434_v13 }
  0x11   :  { %408 = vmatprep.subr.bf16.mxu1 %v450_v1 }
  0x13   :  { %378 = vmatpush3.bf16.msra.mxu0 %v435_v14 }
  0x14   :  { %409 = vmatpush3.bf16.msra.mxu1 %v436_v15  ;;  %379 = vmatprep.subr.bf16.mxu0 %v437_v16 }
  0x15   :  { %410 = vmatprep.subr.bf16.mxu1 %v450_v1 }
  0x17   :  { %380 = vmatpush3.bf16.msra.mxu0 %v438_v17 }
  0x18   :  { %411 = vmatpush3.bf16.msra.mxu1 %v439_v18  ;;  %381 = vmatprep.subr.bf16.mxu0 %v440_v19 }
  0x19   :  { %412 = vmatprep.subr.bf16.mxu1 %v450_v1 }
  0x1b   :  { %382 = vmatpush3.bf16.msra.mxu0 %v441_v20 }
  0x1c   :  { %413 = vmatpush3.bf16.msra.mxu1 %v442_v21  ;;  %383 = vmatprep.subr.bf16.mxu0 %v443_v22 }
  0x1d   :  { %414 = vmatprep.subr.bf16.mxu1 %v450_v1 }
  0x1f   :  { %384 = vmatpush3.bf16.msra.mxu0 %v444_v24 }
  0x20   :  { %415 = vmatpush3.bf16.msra.mxu1 %v445_v25 }
  0x22   :  { %268 = vmatmul.mubr.bf16.vlgmr.msra.gmra.mrb[0].mxu0 %v446_v26 }
  0x23   :  { %417 = vmatmul.mubr.bf16.vlgmr.msra.gmra.mrb[0].mxu1 %v449_v27 }
  0xf5   :  { %v385_v28 = vpop.f32.mrb[0].mxu0 }
  0xf6   :  { %v310_v29 = vpop.f32.mrb[0].mxu1  ;;  %v386_v30 = vpop.f32.mrb[1].mxu0 }
  0xf7   :  { %v387_v31 = vadd.f32 %v386_v30, %v385_v28  ;;  %v418_v32 = vpop.f32.mrb[1].mxu1  ;;  %v388_v33 = vpop.f32.mrb[2].mxu0 }
  0xf8   :  { %v313_v35 = vpop.f32.mrb[2].mxu1  ;;  %v389_v36 = vpop.f32.mrb[3].mxu0 }
  0xf9   :  { %v311_v37 = vadd.f32 %v387_v31, %v310_v29  ;;  %v390_v38 = vadd.f32 %v389_v36, %v388_v33  ;;  %v419_v39 = vpop.f32.mrb[3].mxu1 }
  0xfb   :  { %v333_v40 = vadd.f32 %v368_v34, %v311_v37  ;;  %v314_v41 = vadd.f32 %v390_v38, %v313_v35 }
  0xfd   :  { %335 = vst [vmem:[%s565_s3] sm:$0xff] %v333_v40  ;;  %v334_v42 = vadd.f32 %v368_v34, %v314_v41 }
  0xff   :  { %336 = vst [vmem:[%s565_s3 + $0x8] sm:$0xff] %v334_v42 }

// kernel: global_generator_forward.94
= control target key start
LH: loop header
LB: loop body
LE: loop exit
PB: predicated region body
PF: predicated region fallthrough
CT: control target
= control target key end

     0   :  { %8 = vsyncpa [#allocation5], 0  ;;  %s1074_s12 = smov 0   ;;  %s1076_s13 = smov 0   ;;  %s1232_s0 = inlined_call_operand.vmem [shape: bf16[16,1024], index: 0, kind: input, shape index: {}]   ;;  %s1233_s1 = inlined_call_operand.vmem [shape: bf16[1024,128], index: 1, kind: input, shape index: {}]   ;;  %s1234_s2 = inlined_call_operand.hbm [shape: f32[1,128], index: 2, kind: input, shape index: {}]   ;;  %s1235_s3 = inlined_call_operand.vmem [shape: f32[16,128], index: 3, kind: output, shape index: {}]  }
   0x1   :  { %s1078_s14 = smov 0   ;;  %s1080_s15 = smov 0  }
   0x2   :  { %s1082_s16 = smov 0  }
   0x3 LB: > { %s790_s17 = sadd.s32 4294967295, %s1050_s16   ;;  %s26_s18 = sadd.s32 1, %s1046_s15  ;;  %s1050_s16 = sphi %s1082_s16, %s14_s16   ;;  %s1046_s15 = sphi %s1080_s15, %s1249_s15   ;;  %s1042_s14 = sphi %s1078_s14, %s1248_s14   ;;  %s1038_s13 = sphi %s1076_s13, %s1247_s13   ;;  %s1034_s12 = sphi %s1074_s12, %s1246_s12  }
   0x4   : > { %p27_p0 = scmp.ge.s32.totalorder %s26_s18, 2  ;;  %s42_s19 = sadd.s32 1, %s1038_s13 }
   0x5   : > { %p49_p1 = scmp.ne.s32.totalorder %s1038_s13, %s1034_s12  ;;  %p50_p2 = scmp.eq.s32.totalorder %s1050_s16, 0 }
   0x6   : > { %s1251_s18 = smov (%p27_p0, %s26_s18), 0  ;;  %p791_p4 = scmp.ge.s32.totalorder %s1050_s16, 1 }
   0x7   : > { %p1107_p3 = por %p50_p2, %p49_p1  ;;  %s38_s21 = ssub.s32 %s1046_s15, %s1251_s18 }
   0x8   : > { %p148_p5 = scmp.lt.s32.totalorder %s1050_s16, 3  ;;  %p40_p6 = scmp.eq.s32.totalorder %s38_s21, 0 }
   0x9   : > { %s1239_s20 = scalar_select %p1107_p3, 1, 0 }
   0xa   : > { %p1115_p7 = pnand %p791_p4, %p148_p5  ;;  %p1119_p8 = scmp.eq.s32.totalorder %s790_s17, 0 }
   0xb   : > { %s1124_s24 = scalar_select %p40_p6, %s1038_s13, %s42_s19  }
   0xc   : > { %s1240_s22 = scalar_select %p1115_p7, 1, 0 }
   0xd   : > { %s1241_s23 = scalar_select %p1119_p8, 1, 0 }
   0xe   : > { %p894_p9 = pneg %p1115_p7  ;;  %s1052_s25 = smov [#allocation4]  }
   0xf   : > { %s163_s26 = sshll.u32 %s1052_s25, 4  ;;  %s980_s30 = scalar_lea.hbm %s1234_s2, 16  ;;  %s164_s26 = int_to_ptr.vmem [resolvable:$true] %s163_s26 }
  0x10   : > { %p1130_p10 = pnand %p1119_p8, %p894_p9  ;;  %p981_p11 = scmp.ne.s32.totalorder %s1234_s2, %s980_s30 }
  0x11   : > { %p987_p1 = scmp.lt.u32.totalorder %s980_s30, %s1234_s2 }
  0x12   : > { %p982_p12 = pneg %p1130_p10 }
  0x14   : > { %p983_p13 = pnand %p982_p12, %p981_p11 }
  0x16   : > { %p984_p0 = pneg %p983_p13 }
  0x18   : > { %p989_p2 = pnand %p987_p1, %p984_p0 }
  0x1a   : > { %992 = shalt.err (!%p989_p2)
}
  0x1b   : > { %s993_s8 = scalar_lea.vmem %s164_s26, 16  ;;  %s1000_s9 = scalar_lea.vmem %s164_s26, 32 }
  0x1c   : > { %p994_p4 = scmp.ne.s32.totalorder %s164_s26, %s993_s8  ;;  %p1001_p9 = scmp.lt.s32.totalorder %s164_s26, %s164_s26 }
  0x1d   : > { %p1002_p8 = scmp.lt.s32.totalorder %s1000_s9, %s993_s8 }
  0x1e   : > { %p996_p5 = pnand %p994_p4, %p982_p12 }
  0x1f   : > { %p1003_p7 = por %p1002_p8, %p1001_p9 }
  0x20   : > { %p997_p6 = pneg %p996_p5 }
  0x22   : > { %p1004_p3 = pnand %p1003_p7, %p997_p6 }
  0x24   : > { %1007 = shalt.err (!%p1004_p3)
}
  0x25   : > { %897 = dma.hbm_to_vmem [thread:$0]  (!%p1130_p10), %s1234_s2, 16, %s164_s26, [#allocation5]  }
  0x26   : > { %p793_p11 = scmp.ge.s32.totalorder %s1050_s16, 2 }
  0x27   : > { %p1243_p13 = scmp.ne.s32.totalorder (!%p793_p11), %s1239_s20, 0 }
  0x28   : > { %170 = sbr.rel (%p793_p11) target bundleno = 54 (0x36), region = 20 }
  0x2f   : > { %173 = sbr.rel (!%p1243_p13) target bundleno = 54 (0x36), region = 24  ;;  %s175_s17 = sand.u32 (%p1243_p13), 1, %s1038_s13  }
  0x30   : > { %s845_s19 = sshll.u32 (%p1243_p13), %s1046_s15, 4  ;;  %s794_s21 = sshll.u32 (%p1243_p13), %s175_s17, 5 }
  0x31   : > { %s183_s29 = scalar_lea.vmem (%p1243_p13), %s1232_s0, %s845_s19  ;;  %s177_s27 = scalar_lea.vmem (%p1243_p13), [#allocation3], %s794_s21 }
  0x32   : > { %v196_v0 = vld [vmem:[%s183_s29] sm:$0xff] (%p1243_p13)  ;;  %v198_v1 = vld [vmem:[%s183_s29 + $0x8] sm:$0xff] (%p1243_p13) }
  0x33   : > { %v200_v2 = vld [vmem:[%s183_s29 + $0x20] sm:$0xff] (%p1243_p13)  ;;  %197 = vst [vmem:[%s177_s27] sm:$0xff] (%p1243_p13), %v196_v0  ;;  %199 = vst [vmem:[%s177_s27 + $0x8] sm:$0xff] (%p1243_p13), %v198_v1  ;;  %v202_v3 = vld [vmem:[%s183_s29 + $0x28] sm:$0xff] (%p1243_p13) }
  0x34   : > { %201 = vst [vmem:[%s177_s27 + $0x10] sm:$0xff] (%p1243_p13), %v200_v2  ;;  %203 = vst [vmem:[%s177_s27 + $0x18] sm:$0xff] (%p1243_p13), %v202_v3 }
  0x36 PF: > { %p1244_p3 = scmp.ne.s32.totalorder %s1240_s22, 0 }
  0x37   : > { %s227_s20 = sand.u32 (!%p1244_p3), 1, %s1034_s12   ;;  %p1245_p7 = scmp.ne.s32.totalorder (!%p1244_p3), %s1241_s23, 0 }
  0x38   : > { %224 = sbr.rel (%p1244_p3) target bundleno = 340 (0x154), region = 51  ;;  %s798_s26 = sshll.u32 (!%p1244_p3), %s227_s20, 5 }
  0x39   : > { %s1161_s30 = scalar_lea.vmem (!%p1244_p3), [#allocation3], %s798_s26 }
  0x3f   : > { %1029 = dma.done.wait (%p1245_p7), [#allocation5], 16  }
  0x40   : > { %1031 = vsyncadd (%p1245_p7), [#allocation5], 4294967280  ;;  %s800_s4 = sshll.u32 %s1042_s14, 6  ;;  %p802_p10 = scmp.ne.s32.totalorder %s1042_s14, 0 }
  0x41   : > { %p268_p8 = scmp.lt.s32.totalorder %s800_s4, 127  ;;  %v1053_v4 = vmov (!%p802_p10), 0.0  }
  0x42   : > { %289 = sbr.rel (%p802_p10) target bundleno = 73 (0x49), region = 63  ;;  %290 = vst [vmem:[#allocation2] sm:$0xff] (!%p802_p10), %v1053_v4  ;;  %291 = vst [vmem:[#allocation2 + $0x8] sm:$0xff] (!%p802_p10), %v1053_v4 }
  0x43   : > { %s1253_s4 = smov (!%p268_p8, %s800_s4), 127 }
  0x44   : > { %s801_s5 = sshll.u32 %s1253_s4, 2 }
  0x45   : > { %s1171_s22 = scalar_lea.vmem %s1233_s1, %s801_s5 }
  0x49 PF: > { %v942_v5 = vld [vmem:[%s1171_s22 + $0x40] sm:$0xff]   ;;  %v946_v9 = vld [vmem:[%s1171_s22 + $0x48] sm:$0xff]   ;;  %v950_v13 = vld [vmem:[%s1171_s22 + $0x50] sm:$0xff]   ;;  %p839_p12 = scmp.ne.s32.totalorder %s1042_s14, 1 }
  0x4a   : > { %v943_v6 = vld [vmem:[%s1171_s22 + $0xc0] sm:$0xff]   ;;  %846 = vmatprep.subr.bf16.mxu0 %v942_v5  ;;  %v947_v10 = vld [vmem:[%s1171_s22 + $0xc8] sm:$0xff]   ;;  %v951_v14 = vld [vmem:[%s1171_s22 + $0xd0] sm:$0xff]  }
  0x4b   : > { %v944_v7 = vld [vmem:[%s1171_s22] sm:$0xff]   ;;  %868 = vmatprep.subr.bf16.mxu1 %v943_v6  ;;  %v948_v11 = vld [vmem:[%s1171_s22 + $0x8] sm:$0xff]   ;;  %v952_v15 = vld [vmem:[%s1171_s22 + $0x10] sm:$0xff]  }
  0x4c   : > { %v945_v8 = vld [vmem:[%s1171_s22 + $0x80] sm:$0xff]   ;;  %847 = vmatpush3.bf16.msra.mxu0 %v944_v7  ;;  %v949_v12 = vld [vmem:[%s1171_s22 + $0x88] sm:$0xff]   ;;  %v953_v16 = vld [vmem:[%s1171_s22 + $0x90] sm:$0xff]  }
  0x4d   : > { %869 = vmatpush3.bf16.msra.mxu1 %v945_v8  ;;  %848 = vmatprep.subr.bf16.mxu0 %v946_v9  ;;  %v954_v17 = vld [vmem:[%s1171_s22 + $0x58] sm:$0xff]   ;;  %v958_v21 = vld [vmem:[%s1171_s22 + $0x60] sm:$0xff]   ;;  %v962_v25 = vld [vmem:[%s1171_s22 + $0x68] sm:$0xff]  }
  0x4e   : > { %870 = vmatprep.subr.bf16.mxu1 %v947_v10  ;;  %v955_v18 = vld [vmem:[%s1171_s22 + $0xd8] sm:$0xff]   ;;  %v959_v22 = vld [vmem:[%s1171_s22 + $0xe0] sm:$0xff]   ;;  %v963_v26 = vld [vmem:[%s1171_s22 + $0xe8] sm:$0xff]  }
  0x4f   : > { %v956_v19 = vld [vmem:[%s1171_s22 + $0x18] sm:$0xff]   ;;  %v960_v23 = vld [vmem:[%s1171_s22 + $0x20] sm:$0xff]   ;;  %v964_v27 = vld [vmem:[%s1171_s22 + $0x28] sm:$0xff]  }
  0x50   : > { %849 = vmatpush3.bf16.msra.mxu0 %v948_v11  ;;  %v957_v20 = vld [vmem:[%s1171_s22 + $0x98] sm:$0xff]   ;;  %v961_v24 = vld [vmem:[%s1171_s22 + $0xa0] sm:$0xff]   ;;  %v965_v28 = vld [vmem:[%s1171_s22 + $0xa8] sm:$0xff]  }
  0x51   : > { %871 = vmatpush3.bf16.msra.mxu1 %v949_v12  ;;  %850 = vmatprep.subr.bf16.mxu0 %v950_v13  ;;  %v966_v29 = vld [vmem:[%s1171_s22 + $0x70] sm:$0xff]   ;;  %v970_v33 = vld [vmem:[%s1171_s22 + $0x78] sm:$0xff]   ;;  %v292_v50 = vld [vmem:[#allocation2] sm:$0xff] }
  0x52   : > { %872 = vmatprep.subr.bf16.mxu1 %v951_v14  ;;  %v967_v30 = vld [vmem:[%s1171_s22 + $0xf0] sm:$0xff]   ;;  %v971_v34 = vld [vmem:[%s1171_s22 + $0xf8] sm:$0xff]   ;;  %v293_v55 = vld [vmem:[#allocation2 + $0x8] sm:$0xff] }
  0x53   : > { %v968_v31 = vld [vmem:[%s1171_s22 + $0x30] sm:$0xff]   ;;  %v972_v35 = vld [vmem:[%s1171_s22 + $0x38] sm:$0xff]  }
  0x54   : > { %851 = vmatpush3.bf16.msra.mxu0 %v952_v15  ;;  %v969_v32 = vld [vmem:[%s1171_s22 + $0xb0] sm:$0xff]   ;;  %v973_v36 = vld [vmem:[%s1171_s22 + $0xb8] sm:$0xff]  }
  0x55   : > { %873 = vmatpush3.bf16.msra.mxu1 %v953_v16  ;;  %852 = vmatprep.subr.bf16.mxu0 %v954_v17  ;;  %v974_v37 = vld [vmem:[%s1161_s30] ss:$16 sps:$4 sm:$0xff]   ;;  %v976_v38 = vld [vmem:[%s1161_s30 + $0x4] ss:$16 sps:$4 sm:$0xff]   ;;  %v977_v39 = vld [vmem:[%s1161_s30 + $0x8] ss:$16 sps:$4 sm:$0xff]  }
  0x56   : > { %874 = vmatprep.subr.bf16.mxu1 %v955_v18  ;;  %v979_v40 = vld [vmem:[%s1161_s30 + $0xc] ss:$16 sps:$4 sm:$0xff]   ;;  %606 = vmatprep.mubr.bf16.mxu0 %v976_v38  ;;  %v840_v60 = vld [vmem:[#allocation4] ss:$0 sm:$0xff] (!%p839_p12) }
  0x57   : > { %647 = vmatprep.mubr.bf16.mxu1 %v979_v40 }
  0x58   : > { %853 = vmatpush3.bf16.msra.mxu0 %v956_v19 }
  0x59   : > { %875 = vmatpush3.bf16.msra.mxu1 %v957_v20  ;;  %854 = vmatprep.subr.bf16.mxu0 %v958_v21 }
  0x5a   : > { %876 = vmatprep.subr.bf16.mxu1 %v959_v22 }
  0x5c   : > { %855 = vmatpush3.bf16.msra.mxu0 %v960_v23 }
  0x5d   : > { %877 = vmatpush3.bf16.msra.mxu1 %v961_v24  ;;  %856 = vmatprep.subr.bf16.mxu0 %v962_v25 }
  0x5e   : > { %878 = vmatprep.subr.bf16.mxu1 %v963_v26 }
  0x60   : > { %857 = vmatpush3.bf16.msra.mxu0 %v964_v27 }
  0x61   : > { %879 = vmatpush3.bf16.msra.mxu1 %v965_v28  ;;  %858 = vmatprep.subr.bf16.mxu0 %v966_v29 }
  0x62   : > { %880 = vmatprep.subr.bf16.mxu1 %v967_v30 }
  0x64   : > { %859 = vmatpush3.bf16.msra.mxu0 %v968_v31 }
  0x65   : > { %881 = vmatpush3.bf16.msra.mxu1 %v969_v32  ;;  %860 = vmatprep.subr.bf16.mxu0 %v970_v33 }
  0x66   : > { %882 = vmatprep.subr.bf16.mxu1 %v971_v34 }
  0x68   : > { %861 = vmatpush3.bf16.msra.mxu0 %v972_v35 }
  0x69   : > { %883 = vmatpush3.bf16.msra.mxu1 %v973_v36 }
  0x6b   : > { %607 = vmatmul.mubr.bf16.vlgmr.msra.gmra.mrb[0].mxu0 %v974_v37 }
  0x6c   : > { %648 = vmatmul.mubr.bf16.vlgmr.msra.gmra.mrb[0].mxu1 %v977_v39 }
 0x13e   : > { %v862_v41 = vpop.f32.mrb[0].mxu0 }
 0x13f   : > { %v884_v42 = vpop.f32.mrb[0].mxu1  ;;  %v863_v43 = vpop.f32.mrb[1].mxu0 }
 0x140   : > { %v864_v44 = vadd.f32 %v863_v43, %v862_v41  ;;  %v885_v45 = vpop.f32.mrb[1].mxu1  ;;  %v865_v46 = vpop.f32.mrb[2].mxu0 }
 0x141   : > { %v886_v47 = vadd.f32 %v885_v45, %v884_v42  ;;  %v887_v48 = vpop.f32.mrb[2].mxu1  ;;  %v866_v49 = vpop.f32.mrb[3].mxu0 }
 0x142   : > { %v867_v51 = vadd.f32 %v866_v49, %v865_v46  ;;  %v888_v52 = vpop.f32.mrb[3].mxu1 }
 0x143   : > { %v650_v53 = vadd.f32 %v886_v47, %v864_v44  ;;  %v889_v54 = vadd.f32 %v888_v52, %v887_v48  ;;  %663 = sbr.rel (%p839_p12) target bundleno = 340 (0x154), region = 67 }
 0x145   : > { %v656_v56 = vadd.f32 %v650_v53, %v292_v50  ;;  %v653_v57 = vadd.f32 %v889_v54, %v867_v51 }
 0x147   : > { %658 = vst [vmem:[#allocation2] sm:$0xff] %v656_v56  ;;  %v657_v58 = vadd.f32 %v653_v57, %v293_v55 }
 0x149   : > { %659 = vst [vmem:[#allocation2 + $0x8] sm:$0xff] %v657_v58 }
 0x14e   : > { %v664_v59 = vld [vmem:[#allocation2] sm:$0xff] }
 0x14f   : > { %v673_v62 = vadd.f32 %v840_v60, %v664_v59 }
 0x150   : > { %v665_v61 = vld [vmem:[#allocation2 + $0x8] sm:$0xff] }
 0x151   : > { %v674_v63 = vadd.f32 %v840_v60, %v665_v61  ;;  %675 = vst [vmem:[%s1235_s3] sm:$0xff] %v673_v62 }
 0x153   : > { %676 = vst [vmem:[%s1235_s3 + $0x8] sm:$0xff] %v674_v63 }
 0x154 PF: > { %s14_s16 = sadd.s32 1, %s1050_s16   ;;  %s1246_s12 = smov %s1038_s13 }
 0x155   : > { %p11_p0 = scmp.ge.s32.totalorder %s14_s16, 4   ;;  %s1247_s13 = smov %s1124_s24 }
 0x156   : > { %s1248_s14 = smov %s1046_s15  ;;  %s1249_s15 = smov %s1251_s18 }
 0x157   :  { %13 = sbr.rel (!%p11_p0) target bundleno = 3 (0x3), region = 107 }
 0x15e   :  { %705 = vsyncpa [#allocation5], 1 }
 0x15f   :  { %707 = vsyncpa [#allocation5 + $0x1], 1 }

// kernel: global_generator_forward.95
= control target key start
LH: loop header
LB: loop body
LE: loop exit
PB: predicated region body
PF: predicated region fallthrough
CT: control target
= control target key end

     0   :  { %vm9_vm0 = vcmask 1043456   ;;  %s58_s0 = inlined_call_operand.vmem [shape: f32[1,4,128], index: 0, kind: input, shape index: {}]   ;;  %s59_s1 = inlined_call_operand.vmem [shape: f32[1,4,128], index: 1, kind: output, shape index: {}]  }
   0x1   :  { %v8_v0 = vld [vmem:[%s58_s0] sm:$0xf] }
   0x2   :  { %v10_v1 = vsel %vm9_vm0, %v8_v0, 0.0  ;;  %v18_v2 = vmul.f32 %v8_v0, %v8_v0 }
   0x3   :  { %v11_v3 = vrot.slane %v10_v1, 4 }
   0x4   :  { %v19_v4 = vsel %vm9_vm0, %v18_v2, 0.0 }
   0x5   :  { %v12_v5 = vadd.f32 %v11_v3, %v10_v1  ;;  %v20_v6 = vrot.slane %v19_v4, 4 }
   0x7   :  { %v13_v7 = vrot.slane %v12_v5, 2  ;;  %v21_v8 = vadd.f32 %v20_v6, %v19_v4 }
   0x9   :  { %v14_v9 = vadd.f32 %v13_v7, %v12_v5  ;;  %v22_v10 = vrot.slane %v21_v8, 2 }
   0xb   :  { %v15_v11 = vrot.slane %v14_v9, 1  ;;  %v23_v12 = vadd.f32 %v22_v10, %v21_v8 }
   0xd   :  { %v16_v13 = vadd.f32 %v15_v11, %v14_v9  ;;  %v24_v14 = vrot.slane %v23_v12, 1 }
   0xf   :  { %v17_v15 = vmul.f32 0.25, %v16_v13  ;;  %v25_v16 = vadd.f32 %v24_v14, %v23_v12 }
  0x11   :  { %v26_v17 = vmul.f32 0.25, %v25_v16  ;;  %v27_v18 = vmul.f32 %v17_v15, %v17_v15  ;;  %v30_v22 = vsub.f32 %v8_v0, %v17_v15 }
  0x13   :  { %v28_v19 = vsub.f32 %v26_v17, %v27_v18 }
  0x15   :  { %v29_v20 = vmax.f32 %v28_v19, 0.0 }
  0x17   :  { %v31_v21 = vadd.f32 1e-05, %v29_v20 }
  0x19   :  { %40 = vrsqrt.f32 %v31_v21 }
  0x23   :  { %v41_v23 = vpop.eup %40 }
  0x24   :  { %v33_v24 = vmul.f32 %v41_v23, %v30_v22 }
  0x26   :  { %v34_v25 = vmax.f32 %v33_v24, 0.0 }
  0x28   :  { %35 = vst [vmem:[%s59_s1] sm:$0xf] %v34_v25 }

// kernel: global_generator_forward.96
= control target key start
LH: loop header
LB: loop body
LE: loop exit
PB: predicated region body
PF: predicated region fallthrough
CT: control target
= control target key end

     0   :  { %v210_v0 = vmov 0.0   ;;  %vm211_vm0 = vmmov 0   ;;  %s268_s1 = inlined_call_operand.vmem [shape: bf16[128,128], index: 1, kind: input, shape index: {}]   ;;  %s269_s0 = inlined_call_operand.vmem [shape: bf16[16,128], index: 0, kind: input, shape index: {}]   ;;  %s270_s2 = inlined_call_operand.vmem [shape: f32[1,128], index: 2, kind: input, shape index: {}]   ;;  %s271_s3 = inlined_call_operand.vmem [shape: f32[16,128], index: 3, kind: output, shape index: {}]  }
   0x1   :  { %179 = vmatprep.subr.bf16.mxu0 %v210_v0  ;;  %v201_v1 = vld [vmem:[%s268_s1] sm:$0xff]   ;;  %195 = vmatprep.mubr.msk.bf16.mxu0 %vm211_vm0, %v210_v0  ;;  %v202_v2 = vld [vmem:[%s268_s1 + $0x8] sm:$0xff]   ;;  %v203_v3 = vld [vmem:[%s268_s1 + $0x10] sm:$0xff]  }
   0x2   :  { %180 = vmatpush3.bf16.msra.mxu0 %v201_v1  ;;  %v204_v4 = vld [vmem:[%s268_s1 + $0x18] sm:$0xff]   ;;  %v205_v5 = vld [vmem:[%s268_s1 + $0x20] sm:$0xff]   ;;  %v206_v6 = vld [vmem:[%s268_s1 + $0x28] sm:$0xff]  }
   0x3   :  { %181 = vmatprep.subr.bf16.mxu0 %v210_v0  ;;  %v207_v7 = vld [vmem:[%s268_s1 + $0x30] sm:$0xff]   ;;  %v208_v8 = vld [vmem:[%s268_s1 + $0x38] sm:$0xff]   ;;  %v209_v9 = vld [vmem:[%s269_s0] sm:$0xff]  }
   0x4   :  { %v169_v10 = vld [vmem:[%s270_s2] ss:$0 sm:$0xff] }
   0x6   :  { %182 = vmatpush3.bf16.msra.mxu0 %v202_v2 }
   0x7   :  { %183 = vmatprep.subr.bf16.mxu0 %v210_v0 }
   0xa   :  { %184 = vmatpush3.bf16.msra.mxu0 %v203_v3 }
   0xb   :  { %185 = vmatprep.subr.bf16.mxu0 %v210_v0 }
   0xe   :  { %186 = vmatpush3.bf16.msra.mxu0 %v204_v4 }
   0xf   :  { %187 = vmatprep.subr.bf16.mxu0 %v210_v0 }
  0x12   :  { %188 = vmatpush3.bf16.msra.mxu0 %v205_v5 }
  0x13   :  { %189 = vmatprep.subr.bf16.mxu0 %v210_v0 }
  0x16   :  { %190 = vmatpush3.bf16.msra.mxu0 %v206_v6 }
  0x17   :  { %191 = vmatprep.subr.bf16.mxu0 %v210_v0 }
  0x1a   :  { %192 = vmatpush3.bf16.msra.mxu0 %v207_v7 }
  0x1b   :  { %193 = vmatprep.subr.bf16.mxu0 %v210_v0 }
  0x1e   :  { %194 = vmatpush3.bf16.msra.mxu0 %v208_v8 }
  0x21   :  { %196 = vmatmul.mubr.bf16.vlgmr.msra.gmra.mrb[0].mxu0 %v209_v9 }
  0xf4   :  { %v129_v11 = vpop.f32.mrb[0].mxu0 }
  0xf5   :  { %v152_v12 = vadd.f32 %v169_v10, %v129_v11  ;;  %v197_v13 = vpop.f32.mrb[1].mxu0 }
  0xf6   :  { %v132_v14 = vpop.f32.mrb[2].mxu0 }
  0xf7   :  { %154 = vst [vmem:[%s271_s3] sm:$0xff] %v152_v12  ;;  %v153_v15 = vadd.f32 %v169_v10, %v132_v14  ;;  %v198_v16 = vpop.f32.mrb[3].mxu0 }
  0xf9   :  { %155 = vst [vmem:[%s271_s3 + $0x8] sm:$0xff] %v153_v15 }

// kernel: global_generator_forward.97
= control target key start
LH: loop header
LB: loop body
LE: loop exit
PB: predicated region body
PF: predicated region fallthrough
CT: control target
= control target key end

     0   :  { %vm9_vm0 = vcmask 257024   ;;  %s61_s0 = inlined_call_operand.vmem [shape: f32[1,4,32], index: 0, kind: input, shape index: {}]   ;;  %s62_s1 = inlined_call_operand.vmem [shape: f32[1,4,32], index: 1, kind: output, shape index: {}]  }
   0x1   :  { %v8_v0 = vld [vmem:[%s61_s0] sm:$0xf] }
   0x2   :  { %v10_v1 = vsel %vm9_vm0, %v8_v0, 0.0  ;;  %v18_v2 = vmul.f32 %v8_v0, %v8_v0 }
   0x3   :  { %v11_v3 = vrot.slane %v10_v1, 4 }
   0x4   :  { %v19_v4 = vsel %vm9_vm0, %v18_v2, 0.0 }
   0x5   :  { %v12_v5 = vadd.f32 %v11_v3, %v10_v1  ;;  %v20_v6 = vrot.slane %v19_v4, 4 }
   0x7   :  { %v13_v7 = vrot.slane %v12_v5, 2  ;;  %v21_v8 = vadd.f32 %v20_v6, %v19_v4 }
   0x9   :  { %v14_v9 = vadd.f32 %v13_v7, %v12_v5  ;;  %v22_v10 = vrot.slane %v21_v8, 2 }
   0xb   :  { %v15_v11 = vrot.slane %v14_v9, 1  ;;  %v23_v12 = vadd.f32 %v22_v10, %v21_v8 }
   0xd   :  { %v16_v13 = vadd.f32 %v15_v11, %v14_v9  ;;  %v24_v14 = vrot.slane %v23_v12, 1 }
   0xf   :  { %v17_v15 = vmul.f32 0.25, %v16_v13  ;;  %v25_v16 = vadd.f32 %v24_v14, %v23_v12 }
  0x11   :  { %v26_v17 = vmul.f32 0.25, %v25_v16  ;;  %v27_v18 = vmul.f32 %v17_v15, %v17_v15  ;;  %v30_v22 = vsub.f32 %v8_v0, %v17_v15 }
  0x13   :  { %v28_v19 = vsub.f32 %v26_v17, %v27_v18 }
  0x15   :  { %v29_v20 = vmax.f32 %v28_v19, 0.0 }
  0x17   :  { %v31_v21 = vadd.f32 1e-05, %v29_v20 }
  0x19   :  { %40 = vrsqrt.f32 %v31_v21 }
  0x23   :  { %v41_v23 = vpop.eup %40 }
  0x24   :  { %v33_v24 = vmul.f32 %v41_v23, %v30_v22 }
  0x26   :  { %v34_v25 = vmax.f32 %v33_v24, 0.0 }
  0x28   :  { %35 = vst.msk [vmem:[%s62_s1] sm:$0xf] %vm9_vm0, %v34_v25 }

// kernel: global_generator_forward.101
= control target key start
LH: loop header
LB: loop body
LE: loop exit
PB: predicated region body
PF: predicated region fallthrough
CT: control target
= control target key end

     0   :  { %vm12_vm0 = vcmask 1043456   ;;  %s71_s0 = inlined_call_operand.vmem [shape: f32[1,4,128], index: 0, kind: input, shape index: {}]   ;;  %s72_s1 = inlined_call_operand.vmem [shape: f32[1,4,128], index: 1, kind: input, shape index: {}]   ;;  %s73_s2 = inlined_call_operand.vmem [shape: f32[1,4,128], index: 2, kind: output, shape index: {}]  }
   0x1   :  { %v11_v0 = vld [vmem:[%s71_s0] sm:$0xf] }
   0x2   :  { %v13_v1 = vsel %vm12_vm0, %v11_v0, 0.0  ;;  %v21_v2 = vmul.f32 %v11_v0, %v11_v0  ;;  %v37_v24 = vld [vmem:[%s72_s1] sm:$0xf] }
   0x3   :  { %v14_v3 = vrot.slane %v13_v1, 4 }
   0x4   :  { %v22_v4 = vsel %vm12_vm0, %v21_v2, 0.0 }
   0x5   :  { %v15_v5 = vadd.f32 %v14_v3, %v13_v1  ;;  %v23_v6 = vrot.slane %v22_v4, 4 }
   0x7   :  { %v16_v7 = vrot.slane %v15_v5, 2  ;;  %v24_v8 = vadd.f32 %v23_v6, %v22_v4 }
   0x9   :  { %v17_v9 = vadd.f32 %v16_v7, %v15_v5  ;;  %v25_v10 = vrot.slane %v24_v8, 2 }
   0xb   :  { %v18_v11 = vrot.slane %v17_v9, 1  ;;  %v26_v12 = vadd.f32 %v25_v10, %v24_v8 }
   0xd   :  { %v19_v13 = vadd.f32 %v18_v11, %v17_v9  ;;  %v27_v14 = vrot.slane %v26_v12, 1 }
   0xf   :  { %v20_v15 = vmul.f32 0.25, %v19_v13  ;;  %v28_v16 = vadd.f32 %v27_v14, %v26_v12 }
  0x11   :  { %v29_v17 = vmul.f32 0.25, %v28_v16  ;;  %v30_v18 = vmul.f32 %v20_v15, %v20_v15  ;;  %v33_v22 = vsub.f32 %v11_v0, %v20_v15 }
  0x13   :  { %v31_v19 = vsub.f32 %v29_v17, %v30_v18 }
  0x15   :  { %v32_v20 = vmax.f32 %v31_v19, 0.0 }
  0x17   :  { %v34_v21 = vadd.f32 1e-05, %v32_v20 }
  0x19   :  { %45 = vrsqrt.f32 %v34_v21 }
  0x23   :  { %v46_v23 = vpop.eup %45 }
  0x24   :  { %v36_v25 = vmul.f32 %v46_v23, %v33_v22 }
  0x26   :  { %v38_v26 = vadd.f32 %v37_v24, %v36_v25 }
  0x28   :  { %v39_v27 = vmax.f32 %v38_v26, 0.0 }
  0x2a   :  { %40 = vst [vmem:[%s73_s2] sm:$0xf] %v39_v27 }

// kernel: global_generator_forward.149
= control target key start
LH: loop header
LB: loop body
LE: loop exit
PB: predicated region body
PF: predicated region fallthrough
CT: control target
= control target key end

     0   :  { %vm15_vm0 = vcmask 1043456   ;;  %s84_s0 = inlined_call_operand.vmem [shape: f32[1,4,128], index: 0, kind: input, shape index: {}]   ;;  %s85_s1 = inlined_call_operand.vmem [shape: f32[1,4,128], index: 1, kind: input, shape index: {}]   ;;  %s86_s2 = inlined_call_operand.vmem [shape: f32[1,4,128], index: 2, kind: input, shape index: {}]   ;;  %s87_s3 = inlined_call_operand.vmem [shape: f32[1,4,128], index: 3, kind: output, shape index: {}]  }
   0x1   :  { %v14_v0 = vld [vmem:[%s84_s0] sm:$0xf] }
   0x2   :  { %v16_v1 = vsel %vm15_vm0, %v14_v0, 0.0  ;;  %v24_v2 = vmul.f32 %v14_v0, %v14_v0  ;;  %v40_v24 = vld [vmem:[%s85_s1] sm:$0xf] }
   0x3   :  { %v17_v3 = vrot.slane %v16_v1, 4  ;;  %v43_v27 = vld [vmem:[%s86_s2] sm:$0xf] }
   0x4   :  { %v25_v4 = vsel %vm15_vm0, %v24_v2, 0.0 }
   0x5   :  { %v18_v5 = vadd.f32 %v17_v3, %v16_v1  ;;  %v26_v6 = vrot.slane %v25_v4, 4 }
   0x7   :  { %v19_v7 = vrot.slane %v18_v5, 2  ;;  %v27_v8 = vadd.f32 %v26_v6, %v25_v4 }
   0x9   :  { %v20_v9 = vadd.f32 %v19_v7, %v18_v5  ;;  %v28_v10 = vrot.slane %v27_v8, 2 }
   0xb   :  { %v21_v11 = vrot.slane %v20_v9, 1  ;;  %v29_v12 = vadd.f32 %v28_v10, %v27_v8 }
   0xd   :  { %v22_v13 = vadd.f32 %v21_v11, %v20_v9  ;;  %v30_v14 = vrot.slane %v29_v12, 1 }
   0xf   :  { %v23_v15 = vmul.f32 0.25, %v22_v13  ;;  %v31_v16 = vadd.f32 %v30_v14, %v29_v12 }
  0x11   :  { %v32_v17 = vmul.f32 0.25, %v31_v16  ;;  %v33_v18 = vmul.f32 %v23_v15, %v23_v15  ;;  %v36_v22 = vsub.f32 %v14_v0, %v23_v15 }
  0x13   :  { %v34_v19 = vsub.f32 %v32_v17, %v33_v18 }
  0x15   :  { %v35_v20 = vmax.f32 %v34_v19, 0.0 }
  0x17   :  { %v37_v21 = vadd.f32 1e-05, %v35_v20 }
  0x19   :  { %50 = vrsqrt.f32 %v37_v21 }
  0x23   :  { %v51_v23 = vpop.eup %50 }
  0x24   :  { %v39_v25 = vmul.f32 %v51_v23, %v36_v22 }
  0x26   :  { %v41_v26 = vadd.f32 %v40_v24, %v39_v25 }
  0x28   :  { %v42_v28 = vmax.f32 %v41_v26, 0.0 }
  0x2a   :  { %v44_v29 = vadd.f32 %v43_v27, %v42_v28 }
  0x2c   :  { %45 = vst [vmem:[%s87_s3] sm:$0xf] %v44_v29 }

// kernel: global_generator_forward.100
= control target key start
LH: loop header
LB: loop body
LE: loop exit
PB: predicated region body
PF: predicated region fallthrough
CT: control target
= control target key end

     0   :  { %8 = vsyncpa [#allocation4], 0  ;;  %s248_s12 = smov [#allocation3]   ;;  %s316_s0 = inlined_call_operand.vmem [shape: bf16[16,128], index: 0, kind: input, shape index: {}]   ;;  %s317_s1 = inlined_call_operand.vmem [shape: bf16[128,128], index: 1, kind: input, shape index: {}]   ;;  %s318_s2 = inlined_call_operand.hbm [shape: f32[1,128], index: 2, kind: input, shape index: {}]   ;;  %s319_s3 = inlined_call_operand.vmem [shape: f32[16,128], index: 3, kind: output, shape index: {}]  }
   0x1   :  { %s19_s13 = sshll.u32 %s248_s12, 4  ;;  %s224_s16 = scalar_lea.hbm %s318_s2, 16  ;;  %s20_s13 = int_to_ptr.vmem [resolvable:$true] %s19_s13 }
   0x2   :  { %p225_p0 = scmp.ne.s32.totalorder %s318_s2, %s224_s16  ;;  %p228_p1 = scmp.lt.u32.totalorder %s224_s16, %s318_s2 }
   0x4   :  { %p230_p2 = pnand %p228_p1, %p225_p0 }
   0x6   :  { %233 = shalt.err (!%p230_p2)
}
   0x7   :  { %s234_s21 = scalar_lea.vmem %s20_s13, 16  ;;  %s238_s22 = scalar_lea.vmem %s20_s13, 32 }
   0x8   :  { %p235_p3 = scmp.ne.s32.totalorder %s20_s13, %s234_s21  ;;  %p239_p4 = scmp.lt.s32.totalorder %s20_s13, %s20_s13 }
   0x9   :  { %p240_p5 = scmp.lt.s32.totalorder %s238_s22, %s234_s21 }
   0xb   :  { %p241_p6 = por %p240_p5, %p239_p4 }
   0xd   :  { %p242_p7 = pnand %p241_p6, %p235_p3 }
   0xf   :  { %245 = shalt.err (!%p242_p7)
}
  0x10   :  { %22 = dma.hbm_to_vmem [thread:$0]  %s318_s2, 16, %s20_s13, [#allocation4]  }
  0x11   :  { %246 = dma.done.wait [#allocation4], 16  }
  0x12   :  { %247 = vsyncadd [#allocation4], 4294967280  ;;  %v249_v0 = vmov 0.0   ;;  %vm250_vm0 = vmmov 0   ;;  %v215_v1 = vld [vmem:[%s317_s1] sm:$0xff]   ;;  %v216_v2 = vld [vmem:[%s317_s1 + $0x8] sm:$0xff]  }
  0x13   :  { %192 = vmatprep.subr.bf16.mxu0 %v249_v0  ;;  %208 = vmatprep.mubr.msk.bf16.mxu0 %vm250_vm0, %v249_v0  ;;  %v217_v3 = vld [vmem:[%s317_s1 + $0x10] sm:$0xff]   ;;  %v218_v4 = vld [vmem:[%s317_s1 + $0x18] sm:$0xff]   ;;  %v219_v5 = vld [vmem:[%s317_s1 + $0x20] sm:$0xff]  }
  0x14   :  { %193 = vmatpush3.bf16.msra.mxu0 %v215_v1  ;;  %v220_v6 = vld [vmem:[%s317_s1 + $0x28] sm:$0xff]   ;;  %v221_v7 = vld [vmem:[%s317_s1 + $0x30] sm:$0xff]   ;;  %v222_v8 = vld [vmem:[%s317_s1 + $0x38] sm:$0xff]  }
  0x15   :  { %194 = vmatprep.subr.bf16.mxu0 %v249_v0  ;;  %v223_v9 = vld [vmem:[%s316_s0] sm:$0xff]  }
  0x16   :  { %v182_v10 = vld [vmem:[#allocation3] ss:$0 sm:$0xff] }
  0x18   :  { %195 = vmatpush3.bf16.msra.mxu0 %v216_v2 }
  0x19   :  { %196 = vmatprep.subr.bf16.mxu0 %v249_v0 }
  0x1c   :  { %197 = vmatpush3.bf16.msra.mxu0 %v217_v3 }
  0x1d   :  { %198 = vmatprep.subr.bf16.mxu0 %v249_v0 }
  0x20   :  { %199 = vmatpush3.bf16.msra.mxu0 %v218_v4 }
  0x21   :  { %200 = vmatprep.subr.bf16.mxu0 %v249_v0 }
  0x24   :  { %201 = vmatpush3.bf16.msra.mxu0 %v219_v5 }
  0x25   :  { %202 = vmatprep.subr.bf16.mxu0 %v249_v0 }
  0x28   :  { %203 = vmatpush3.bf16.msra.mxu0 %v220_v6 }
  0x29   :  { %204 = vmatprep.subr.bf16.mxu0 %v249_v0 }
  0x2c   :  { %205 = vmatpush3.bf16.msra.mxu0 %v221_v7 }
  0x2d   :  { %206 = vmatprep.subr.bf16.mxu0 %v249_v0 }
  0x30   :  { %207 = vmatpush3.bf16.msra.mxu0 %v222_v8 }
  0x33   :  { %209 = vmatmul.mubr.bf16.vlgmr.msra.gmra.mrb[0].mxu0 %v223_v9 }
 0x106   :  { %v141_v11 = vpop.f32.mrb[0].mxu0 }
 0x107   :  { %v164_v12 = vadd.f32 %v182_v10, %v141_v11  ;;  %v210_v13 = vpop.f32.mrb[1].mxu0 }
 0x108   :  { %v144_v14 = vpop.f32.mrb[2].mxu0 }
 0x109   :  { %166 = vst [vmem:[%s319_s3] sm:$0xff] %v164_v12  ;;  %v165_v15 = vadd.f32 %v182_v10, %v144_v14  ;;  %v211_v16 = vpop.f32.mrb[3].mxu0 }
 0x10b   :  { %167 = vst [vmem:[%s319_s3 + $0x8] sm:$0xff] %v165_v15 }
 0x10c   :  { %172 = vsyncpa [#allocation4], 1 }

// kernel: global_generator_forward.152
= control target key start
LH: loop header
LB: loop body
LE: loop exit
PB: predicated region body
PF: predicated region fallthrough
CT: control target
= control target key end

     0   :  { %s371_s1 = inlined_call_operand.vmem [shape: bf16[256,128], index: 1, kind: input, shape index: {}]   ;;  %s372_s0 = inlined_call_operand.vmem [shape: bf16[16,256], index: 0, kind: input, shape index: {}]   ;;  %s373_s2 = inlined_call_operand.vmem [shape: f32[1,128], index: 2, kind: input, shape index: {}]   ;;  %s374_s3 = inlined_call_operand.vmem [shape: f32[16,128], index: 3, kind: output, shape index: {}]  }
   0x1   :  { %v269_v0 = vld [vmem:[%s371_s1 + $0x40] sm:$0xff]   ;;  %v271_v2 = vld [vmem:[%s371_s1 + $0x48] sm:$0xff]   ;;  %v273_v4 = vld [vmem:[%s371_s1 + $0x50] sm:$0xff]  }
   0x2   :  { %v270_v1 = vld [vmem:[%s371_s1] sm:$0xff]   ;;  %247 = vmatprep.subr.bf16.mxu0 %v269_v0  ;;  %v272_v3 = vld [vmem:[%s371_s1 + $0x8] sm:$0xff]   ;;  %v274_v5 = vld [vmem:[%s371_s1 + $0x10] sm:$0xff]  }
   0x3   :  { %248 = vmatpush3.bf16.msra.mxu0 %v270_v1  ;;  %v275_v6 = vld [vmem:[%s371_s1 + $0x58] sm:$0xff]   ;;  %v277_v8 = vld [vmem:[%s371_s1 + $0x60] sm:$0xff]   ;;  %v279_v10 = vld [vmem:[%s371_s1 + $0x68] sm:$0xff]  }
   0x4   :  { %249 = vmatprep.subr.bf16.mxu0 %v271_v2  ;;  %v276_v7 = vld [vmem:[%s371_s1 + $0x18] sm:$0xff]   ;;  %v278_v9 = vld [vmem:[%s371_s1 + $0x20] sm:$0xff]   ;;  %v280_v12 = vld [vmem:[%s371_s1 + $0x28] sm:$0xff]  }
   0x5   :  { %v287_v11 = vld [vmem:[%s372_s0 + $0x4] ss:$8 sps:$4 sm:$0xff]   ;;  %v281_v13 = vld [vmem:[%s371_s1 + $0x70] sm:$0xff]   ;;  %v283_v15 = vld [vmem:[%s371_s1 + $0x78] sm:$0xff]  }
   0x6   :  { %195 = vmatprep.mubr.bf16.mxu0 %v287_v11  ;;  %v282_v14 = vld [vmem:[%s371_s1 + $0x30] sm:$0xff]   ;;  %v284_v16 = vld [vmem:[%s371_s1 + $0x38] sm:$0xff]   ;;  %v285_v17 = vld [vmem:[%s372_s0] ss:$8 sps:$4 sm:$0xff]  }
   0x7   :  { %250 = vmatpush3.bf16.msra.mxu0 %v272_v3  ;;  %v246_v20 = vld [vmem:[%s373_s2] ss:$0 sm:$0xff] }
   0x8   :  { %251 = vmatprep.subr.bf16.mxu0 %v273_v4 }
   0xb   :  { %252 = vmatpush3.bf16.msra.mxu0 %v274_v5 }
   0xc   :  { %253 = vmatprep.subr.bf16.mxu0 %v275_v6 }
   0xf   :  { %254 = vmatpush3.bf16.msra.mxu0 %v276_v7 }
  0x10   :  { %255 = vmatprep.subr.bf16.mxu0 %v277_v8 }
  0x13   :  { %256 = vmatpush3.bf16.msra.mxu0 %v278_v9 }
  0x14   :  { %257 = vmatprep.subr.bf16.mxu0 %v279_v10 }
  0x17   :  { %258 = vmatpush3.bf16.msra.mxu0 %v280_v12 }
  0x18   :  { %259 = vmatprep.subr.bf16.mxu0 %v281_v13 }
  0x1b   :  { %260 = vmatpush3.bf16.msra.mxu0 %v282_v14 }
  0x1c   :  { %261 = vmatprep.subr.bf16.mxu0 %v283_v15 }
  0x1f   :  { %262 = vmatpush3.bf16.msra.mxu0 %v284_v16 }
  0x22   :  { %196 = vmatmul.mubr.bf16.vlgmr.msra.gmra.mrb[0].mxu0 %v285_v17 }
  0xf5   :  { %v263_v18 = vpop.f32.mrb[0].mxu0 }
  0xf6   :  { %v264_v19 = vpop.f32.mrb[1].mxu0 }
  0xf7   :  { %v265_v21 = vadd.f32 %v264_v19, %v263_v18  ;;  %v266_v22 = vpop.f32.mrb[2].mxu0 }
  0xf8   :  { %v267_v23 = vpop.f32.mrb[3].mxu0 }
  0xf9   :  { %v220_v24 = vadd.f32 %v265_v21, %v246_v20  ;;  %v268_v25 = vadd.f32 %v267_v23, %v266_v22 }
  0xfb   :  { %222 = vst [vmem:[%s374_s3] sm:$0xff] %v220_v24  ;;  %v221_v26 = vadd.f32 %v268_v25, %v246_v20 }
  0xfd   :  { %223 = vst [vmem:[%s374_s3 + $0x8] sm:$0xff] %v221_v26 }

// kernel: global_generator_forward.154
= control target key start
LH: loop header
LB: loop body
LE: loop exit
PB: predicated region body
PF: predicated region fallthrough
CT: control target
= control target key end

     0   :  { %vm13_vm0 = vcmask 523264   ;;  %s98_s0 = inlined_call_operand.vmem [shape: f32[1,16,64], index: 0, kind: input, shape index: {}]   ;;  %s99_s1 = inlined_call_operand.vmem [shape: f32[1,16,64], index: 1, kind: input, shape index: {}]   ;;  %s100_s2 = inlined_call_operand.vmem [shape: f32[1,16,64], index: 2, kind: output, shape index: {}]  }
   0x1   :  { %v11_v0 = vld [vmem:[%s98_s0] sm:$0xff]  ;;  %v12_v1 = vld [vmem:[%s98_s0 + $0x8] sm:$0xff] }
   0x2   :  { %v14_v2 = vsel %vm13_vm0, %v11_v0, 0.0  ;;  %v15_v3 = vsel %vm13_vm0, %v12_v1, 0.0  ;;  %v24_v4 = vmul.f32 %v11_v0, %v11_v0  ;;  %v25_v5 = vmul.f32 %v12_v1, %v12_v1  ;;  %v47_v33 = vld [vmem:[%s99_s1] sm:$0xff]  ;;  %v48_v34 = vld [vmem:[%s99_s1 + $0x8] sm:$0xff] }
   0x3   :  { %v16_v6 = vadd.f32 %v15_v3, %v14_v2 }
   0x4   :  { %v26_v7 = vsel %vm13_vm0, %v24_v4, 0.0  ;;  %v27_v8 = vsel %vm13_vm0, %v25_v5, 0.0 }
   0x5   :  { %v17_v9 = vrot.slane %v16_v6, 4  ;;  %v28_v10 = vadd.f32 %v27_v8, %v26_v7 }
   0x7   :  { %v18_v11 = vadd.f32 %v17_v9, %v16_v6  ;;  %v29_v12 = vrot.slane %v28_v10, 4 }
   0x9   :  { %v19_v13 = vrot.slane %v18_v11, 2  ;;  %v30_v14 = vadd.f32 %v29_v12, %v28_v10 }
   0xb   :  { %v20_v15 = vadd.f32 %v19_v13, %v18_v11  ;;  %v31_v16 = vrot.slane %v30_v14, 2 }
   0xd   :  { %v21_v17 = vrot.slane %v20_v15, 1  ;;  %v32_v18 = vadd.f32 %v31_v16, %v30_v14 }
   0xf   :  { %v22_v19 = vadd.f32 %v21_v17, %v20_v15  ;;  %v33_v20 = vrot.slane %v32_v18, 1 }
  0x11   :  { %v23_v21 = vmul.f32 0.0625, %v22_v19  ;;  %v34_v22 = vadd.f32 %v33_v20, %v32_v18 }
  0x13   :  { %v35_v23 = vmul.f32 0.0625, %v34_v22  ;;  %v36_v24 = vmul.f32 %v23_v21, %v23_v21  ;;  %v39_v28 = vsub.f32 %v11_v0, %v23_v21  ;;  %v40_v29 = vsub.f32 %v12_v1, %v23_v21 }
  0x15   :  { %v37_v25 = vsub.f32 %v35_v23, %v36_v24 }
  0x17   :  { %v38_v26 = vmax.f32 %v37_v25, 0.0 }
  0x19   :  { %v41_v27 = vadd.f32 1e-05, %v38_v26 }
  0x1b   :  { %57 = vrsqrt.f32 %v41_v27 }
  0x25   :  { %v58_v30 = vpop.eup %57 }
  0x26   :  { %v43_v31 = vmul.f32 %v58_v30, %v39_v28  ;;  %v44_v32 = vmul.f32 %v58_v30, %v40_v29 }
  0x28   :  { %v45_v35 = vmax.f32 %v43_v31, 0.0  ;;  %v46_v36 = vmax.f32 %v44_v32, 0.0 }
  0x2a   :  { %v49_v37 = vadd.f32 %v47_v33, %v45_v35  ;;  %v50_v38 = vadd.f32 %v48_v34, %v46_v36 }
  0x2c   :  { %51 = vst.msk [vmem:[%s100_s2] sm:$0xff] %vm13_vm0, %v49_v37  ;;  %52 = vst.msk [vmem:[%s100_s2 + $0x8] sm:$0xff] %vm13_vm0, %v50_v38 }

// kernel: global_generator_forward.153
= control target key start
LH: loop header
LB: loop body
LE: loop exit
PB: predicated region body
PF: predicated region fallthrough
CT: control target
= control target key end

     0   :  { %s665_s1 = inlined_call_operand.vmem [shape: bf16[512,128], index: 1, kind: input, shape index: {}]   ;;  %s666_s0 = inlined_call_operand.vmem [shape: bf16[16,512], index: 0, kind: input, shape index: {}]   ;;  %s667_s2 = inlined_call_operand.vmem [shape: f32[1,128], index: 2, kind: input, shape index: {}]   ;;  %s668_s3 = inlined_call_operand.vmem [shape: f32[16,128], index: 3, kind: output, shape index: {}]  }
   0x1   :  { %v490_v0 = vld [vmem:[%s665_s1 + $0x40] sm:$0xff]   ;;  %v494_v4 = vld [vmem:[%s665_s1 + $0x48] sm:$0xff]   ;;  %v498_v8 = vld [vmem:[%s665_s1 + $0x50] sm:$0xff]  }
   0x2   :  { %v491_v1 = vld [vmem:[%s665_s1 + $0xc0] sm:$0xff]   ;;  %446 = vmatprep.subr.bf16.mxu0 %v490_v0  ;;  %v495_v5 = vld [vmem:[%s665_s1 + $0xc8] sm:$0xff]   ;;  %v499_v9 = vld [vmem:[%s665_s1 + $0xd0] sm:$0xff]  }
   0x3   :  { %v492_v2 = vld [vmem:[%s665_s1] sm:$0xff]   ;;  %468 = vmatprep.subr.bf16.mxu1 %v491_v1  ;;  %v496_v6 = vld [vmem:[%s665_s1 + $0x8] sm:$0xff]   ;;  %v500_v10 = vld [vmem:[%s665_s1 + $0x10] sm:$0xff]  }
   0x4   :  { %v493_v3 = vld [vmem:[%s665_s1 + $0x80] sm:$0xff]   ;;  %447 = vmatpush3.bf16.msra.mxu0 %v492_v2  ;;  %v497_v7 = vld [vmem:[%s665_s1 + $0x88] sm:$0xff]   ;;  %v501_v11 = vld [vmem:[%s665_s1 + $0x90] sm:$0xff]  }
   0x5   :  { %469 = vmatpush3.bf16.msra.mxu1 %v493_v3  ;;  %448 = vmatprep.subr.bf16.mxu0 %v494_v4  ;;  %v502_v12 = vld [vmem:[%s665_s1 + $0x58] sm:$0xff]   ;;  %v506_v16 = vld [vmem:[%s665_s1 + $0x60] sm:$0xff]   ;;  %v510_v20 = vld [vmem:[%s665_s1 + $0x68] sm:$0xff]  }
   0x6   :  { %470 = vmatprep.subr.bf16.mxu1 %v495_v5  ;;  %v503_v13 = vld [vmem:[%s665_s1 + $0xd8] sm:$0xff]   ;;  %v507_v17 = vld [vmem:[%s665_s1 + $0xe0] sm:$0xff]   ;;  %v511_v21 = vld [vmem:[%s665_s1 + $0xe8] sm:$0xff]  }
   0x7   :  { %v504_v14 = vld [vmem:[%s665_s1 + $0x18] sm:$0xff]   ;;  %v508_v18 = vld [vmem:[%s665_s1 + $0x20] sm:$0xff]   ;;  %v512_v22 = vld [vmem:[%s665_s1 + $0x28] sm:$0xff]  }
   0x8   :  { %449 = vmatpush3.bf16.msra.mxu0 %v496_v6  ;;  %v505_v15 = vld [vmem:[%s665_s1 + $0x98] sm:$0xff]   ;;  %v509_v19 = vld [vmem:[%s665_s1 + $0xa0] sm:$0xff]   ;;  %v513_v23 = vld [vmem:[%s665_s1 + $0xa8] sm:$0xff]  }
   0x9   :  { %471 = vmatpush3.bf16.msra.mxu1 %v497_v7  ;;  %450 = vmatprep.subr.bf16.mxu0 %v498_v8  ;;  %v514_v24 = vld [vmem:[%s665_s1 + $0x70] sm:$0xff]   ;;  %v518_v28 = vld [vmem:[%s665_s1 + $0x78] sm:$0xff]   ;;  %v445_v45 = vld [vmem:[%s667_s2] ss:$0 sm:$0xff] }
   0xa   :  { %472 = vmatprep.subr.bf16.mxu1 %v499_v9  ;;  %v515_v25 = vld [vmem:[%s665_s1 + $0xf0] sm:$0xff]   ;;  %v519_v29 = vld [vmem:[%s665_s1 + $0xf8] sm:$0xff]  }
   0xb   :  { %v516_v26 = vld [vmem:[%s665_s1 + $0x30] sm:$0xff]   ;;  %v520_v30 = vld [vmem:[%s665_s1 + $0x38] sm:$0xff]  }
   0xc   :  { %451 = vmatpush3.bf16.msra.mxu0 %v500_v10  ;;  %v517_v27 = vld [vmem:[%s665_s1 + $0xb0] sm:$0xff]   ;;  %v521_v31 = vld [vmem:[%s665_s1 + $0xb8] sm:$0xff]  }
   0xd   :  { %473 = vmatpush3.bf16.msra.mxu1 %v501_v11  ;;  %452 = vmatprep.subr.bf16.mxu0 %v502_v12  ;;  %v522_v32 = vld [vmem:[%s666_s0] ss:$16 sps:$4 sm:$0xff]   ;;  %v524_v33 = vld [vmem:[%s666_s0 + $0x4] ss:$16 sps:$4 sm:$0xff]   ;;  %v525_v34 = vld [vmem:[%s666_s0 + $0x8] ss:$16 sps:$4 sm:$0xff]  }
   0xe   :  { %474 = vmatprep.subr.bf16.mxu1 %v503_v13  ;;  %v527_v35 = vld [vmem:[%s666_s0 + $0xc] ss:$16 sps:$4 sm:$0xff]   ;;  %335 = vmatprep.mubr.bf16.mxu0 %v524_v33 }
   0xf   :  { %376 = vmatprep.mubr.bf16.mxu1 %v527_v35 }
  0x10   :  { %453 = vmatpush3.bf16.msra.mxu0 %v504_v14 }
  0x11   :  { %475 = vmatpush3.bf16.msra.mxu1 %v505_v15  ;;  %454 = vmatprep.subr.bf16.mxu0 %v506_v16 }
  0x12   :  { %476 = vmatprep.subr.bf16.mxu1 %v507_v17 }
  0x14   :  { %455 = vmatpush3.bf16.msra.mxu0 %v508_v18 }
  0x15   :  { %477 = vmatpush3.bf16.msra.mxu1 %v509_v19  ;;  %456 = vmatprep.subr.bf16.mxu0 %v510_v20 }
  0x16   :  { %478 = vmatprep.subr.bf16.mxu1 %v511_v21 }
  0x18   :  { %457 = vmatpush3.bf16.msra.mxu0 %v512_v22 }
  0x19   :  { %479 = vmatpush3.bf16.msra.mxu1 %v513_v23  ;;  %458 = vmatprep.subr.bf16.mxu0 %v514_v24 }
  0x1a   :  { %480 = vmatprep.subr.bf16.mxu1 %v515_v25 }
  0x1c   :  { %459 = vmatpush3.bf16.msra.mxu0 %v516_v26 }
  0x1d   :  { %481 = vmatpush3.bf16.msra.mxu1 %v517_v27  ;;  %460 = vmatprep.subr.bf16.mxu0 %v518_v28 }
  0x1e   :  { %482 = vmatprep.subr.bf16.mxu1 %v519_v29 }
  0x20   :  { %461 = vmatpush3.bf16.msra.mxu0 %v520_v30 }
  0x21   :  { %483 = vmatpush3.bf16.msra.mxu1 %v521_v31 }
  0x23   :  { %336 = vmatmul.mubr.bf16.vlgmr.msra.gmra.mrb[0].mxu0 %v522_v32 }
  0x24   :  { %377 = vmatmul.mubr.bf16.vlgmr.msra.gmra.mrb[0].mxu1 %v525_v34 }
  0xf6   :  { %v462_v36 = vpop.f32.mrb[0].mxu0 }
  0xf7   :  { %v484_v37 = vpop.f32.mrb[0].mxu1  ;;  %v463_v38 = vpop.f32.mrb[1].mxu0 }
  0xf8   :  { %v464_v39 = vadd.f32 %v463_v38, %v462_v36  ;;  %v485_v40 = vpop.f32.mrb[1].mxu1  ;;  %v465_v41 = vpop.f32.mrb[2].mxu0 }
  0xf9   :  { %v486_v42 = vadd.f32 %v485_v40, %v484_v37  ;;  %v487_v43 = vpop.f32.mrb[2].mxu1  ;;  %v466_v44 = vpop.f32.mrb[3].mxu0 }
  0xfa   :  { %v467_v46 = vadd.f32 %v466_v44, %v465_v41  ;;  %v488_v47 = vpop.f32.mrb[3].mxu1 }
  0xfb   :  { %v379_v48 = vadd.f32 %v486_v42, %v464_v39  ;;  %v489_v49 = vadd.f32 %v488_v47, %v487_v43 }
  0xfd   :  { %v401_v50 = vadd.f32 %v445_v45, %v379_v48  ;;  %v382_v51 = vadd.f32 %v489_v49, %v467_v46 }
  0xff   :  { %403 = vst [vmem:[%s668_s3] sm:$0xff] %v401_v50  ;;  %v402_v52 = vadd.f32 %v445_v45, %v382_v51 }
 0x101   :  { %404 = vst [vmem:[%s668_s3 + $0x8] sm:$0xff] %v402_v52 }

// kernel: global_generator_forward.159
= control target key start
LH: loop header
LB: loop body
LE: loop exit
PB: predicated region body
PF: predicated region fallthrough
CT: control target
= control target key end

     0   :  { %vm19_vm0 = vcmask 261120   ;;  %s284_s0 = inlined_call_operand.vmem [shape: f32[1,64,32], index: 0, kind: input, shape index: {}]   ;;  %s285_s1 = inlined_call_operand.vmem [shape: f32[1,64,32], index: 1, kind: input, shape index: {}]   ;;  %s286_s2 = inlined_call_operand.vmem [shape: f32[1,64,32], index: 2, kind: output, shape index: {}]  }
   0x1   :  { %v149_v0 = vld [vmem:[%s284_s0] sm:$0xff]  ;;  %v154_v1 = vld [vmem:[%s284_s0 + $0x8] sm:$0xff]  ;;  %v159_v2 = vld [vmem:[%s284_s0 + $0x10] sm:$0xff] }
   0x2   :  { %v164_v3 = vld [vmem:[%s284_s0 + $0x18] sm:$0xff]  ;;  %v20_v4 = vsel %vm19_vm0, %v149_v0, 0.0  ;;  %v21_v5 = vsel %vm19_vm0, %v154_v1, 0.0  ;;  %v23_v6 = vsel %vm19_vm0, %v159_v2, 0.0  ;;  %v42_v7 = vmul.f32 %v149_v0, %v149_v0  ;;  %v177_v8 = vld [vmem:[%s284_s0 + $0x20] sm:$0xff]  ;;  %v188_v13 = vld [vmem:[%s284_s0 + $0x28] sm:$0xff] }
   0x3   :  { %v22_v9 = vadd.f32 %v21_v5, %v20_v4  ;;  %v25_v10 = vsel %vm19_vm0, %v164_v3, 0.0  ;;  %v43_v11 = vmul.f32 %v154_v1, %v154_v1  ;;  %v44_v12 = vmul.f32 %v159_v2, %v159_v2  ;;  %v201_v20 = vld [vmem:[%s284_s0 + $0x30] sm:$0xff]  ;;  %v18_v27 = vld [vmem:[%s284_s0 + $0x38] sm:$0xff] }
   0x4   :  { %v45_v15 = vmul.f32 %v164_v3, %v164_v3  ;;  %v27_v16 = vsel %vm19_vm0, %v177_v8, 0.0  ;;  %v46_v17 = vmul.f32 %v177_v8, %v177_v8  ;;  %v50_v18 = vsel %vm19_vm0, %v42_v7, 0.0 }
   0x5   :  { %v24_v14 = vadd.f32 %v23_v6, %v22_v9  ;;  %v51_v19 = vsel %vm19_vm0, %v43_v11, 0.0  ;;  %v53_v23 = vsel %vm19_vm0, %v44_v12, 0.0  ;;  %v29_v24 = vsel %vm19_vm0, %v188_v13, 0.0 }
   0x6   :  { %v52_v22 = vadd.f32 %v51_v19, %v50_v18  ;;  %v47_v25 = vmul.f32 %v188_v13, %v188_v13  ;;  %v55_v26 = vsel %vm19_vm0, %v45_v15, 0.0  ;;  %v31_v30 = vsel %vm19_vm0, %v201_v20, 0.0  ;;  %v105_v18 = vld [vmem:[%s285_s1 + $0x20] sm:$0xff] }
   0x7   :  { %v26_v21 = vadd.f32 %v25_v10, %v24_v14  ;;  %v48_v31 = vmul.f32 %v201_v20, %v201_v20  ;;  %v57_v32 = vsel %vm19_vm0, %v46_v17, 0.0  ;;  %v33_v35 = vsel %vm19_vm0, %v18_v27, 0.0 }
   0x8   :  { %v54_v29 = vadd.f32 %v53_v23, %v52_v22  ;;  %v49_v36 = vmul.f32 %v18_v27, %v18_v27  ;;  %v59_v37 = vsel %vm19_vm0, %v47_v25, 0.0 }
   0x9   :  { %v28_v28 = vadd.f32 %v27_v16, %v26_v21  ;;  %v61_v40 = vsel %vm19_vm0, %v48_v31, 0.0  ;;  %v101_v16 = vld [vmem:[%s285_s1] sm:$0xff] }
   0xa   :  { %v56_v34 = vadd.f32 %v55_v26, %v54_v29  ;;  %v63_v43 = vsel %vm19_vm0, %v49_v36, 0.0 }
   0xb   :  { %v30_v33 = vadd.f32 %v29_v24, %v28_v28  ;;  %v108_v28 = vld [vmem:[%s285_s1 + $0x38] sm:$0xff] }
   0xc   :  { %v58_v39 = vadd.f32 %v57_v32, %v56_v34 }
   0xd   :  { %v32_v38 = vadd.f32 %v31_v30, %v30_v33 }
   0xe   :  { %v60_v42 = vadd.f32 %v59_v37, %v58_v39 }
   0xf   :  { %v34_v41 = vadd.f32 %v33_v35, %v32_v38 }
  0x10   :  { %v62_v45 = vadd.f32 %v61_v40, %v60_v42 }
  0x11   :  { %v35_v44 = vrot.slane %v34_v41, 4 }
  0x12   :  { %v64_v47 = vadd.f32 %v63_v43, %v62_v45 }
  0x13   :  { %v36_v46 = vadd.f32 %v35_v44, %v34_v41 }
  0x14   :  { %v65_v49 = vrot.slane %v64_v47, 4 }
  0x15   :  { %v37_v48 = vrot.slane %v36_v46, 2 }
  0x16   :  { %v66_v51 = vadd.f32 %v65_v49, %v64_v47 }
  0x17   :  { %v38_v50 = vadd.f32 %v37_v48, %v36_v46 }
  0x18   :  { %v67_v53 = vrot.slane %v66_v51, 2 }
  0x19   :  { %v39_v52 = vrot.slane %v38_v50, 1 }
  0x1a   :  { %v68_v55 = vadd.f32 %v67_v53, %v66_v51 }
  0x1b   :  { %v40_v54 = vadd.f32 %v39_v52, %v38_v50 }
  0x1c   :  { %v69_v57 = vrot.slane %v68_v55, 1 }
  0x1d   :  { %v41_v56 = vmul.f32 0.015625, %v40_v54 }
  0x1e   :  { %v70_v58 = vadd.f32 %v69_v57, %v68_v55 }
  0x1f   :  { %v72_v59 = vmul.f32 %v41_v56, %v41_v56  ;;  %v75_v4 = vsub.f32 %v149_v0, %v41_v56  ;;  %v76_v5 = vsub.f32 %v154_v1, %v41_v56  ;;  %v77_v6 = vsub.f32 %v159_v2, %v41_v56  ;;  %v102_v1 = vld [vmem:[%s285_s1 + $0x8] sm:$0xff] }
  0x20   :  { %v71_v60 = vmul.f32 0.015625, %v70_v58  ;;  %v78_v7 = vsub.f32 %v164_v3, %v41_v56  ;;  %v79_v9 = vsub.f32 %v177_v8, %v41_v56  ;;  %v80_v10 = vsub.f32 %v188_v13, %v41_v56  ;;  %v103_v3 = vld [vmem:[%s285_s1 + $0x10] sm:$0xff]  ;;  %v104_v13 = vld [vmem:[%s285_s1 + $0x18] sm:$0xff] }
  0x21   :  { %v81_v11 = vsub.f32 %v201_v20, %v41_v56  ;;  %v82_v12 = vsub.f32 %v18_v27, %v41_v56  ;;  %v106_v20 = vld [vmem:[%s285_s1 + $0x28] sm:$0xff]  ;;  %v107_v27 = vld [vmem:[%s285_s1 + $0x30] sm:$0xff] }
  0x22   :  { %v73_v61 = vsub.f32 %v71_v60, %v72_v59 }
  0x24   :  { %v74_v62 = vmax.f32 %v73_v61, 0.0 }
  0x26   :  { %v83_v63 = vadd.f32 1e-05, %v74_v62 }
  0x28   :  { %129 = vrsqrt.f32 %v83_v63 }
  0x32   :  { %v130_v14 = vpop.eup %129 }
  0x33   :  { %v85_v15 = vmul.f32 %v130_v14, %v75_v4  ;;  %v86_v0 = vmul.f32 %v130_v14, %v76_v5  ;;  %v87_v2 = vmul.f32 %v130_v14, %v77_v6  ;;  %v88_v8 = vmul.f32 %v130_v14, %v78_v7 }
  0x34   :  { %v89_v17 = vmul.f32 %v130_v14, %v79_v9  ;;  %v90_v19 = vmul.f32 %v130_v14, %v80_v10  ;;  %v91_v21 = vmul.f32 %v130_v14, %v81_v11  ;;  %v92_v22 = vmul.f32 %v130_v14, %v82_v12 }
  0x35   :  { %v93_v23 = vmax.f32 %v85_v15, 0.0  ;;  %v94_v24 = vmax.f32 %v86_v0, 0.0  ;;  %v95_v25 = vmax.f32 %v87_v2, 0.0  ;;  %v96_v26 = vmax.f32 %v88_v8, 0.0 }
  0x36   :  { %v97_v29 = vmax.f32 %v89_v17, 0.0  ;;  %v98_v30 = vmax.f32 %v90_v19, 0.0  ;;  %v99_v31 = vmax.f32 %v91_v21, 0.0  ;;  %v100_v32 = vmax.f32 %v92_v22, 0.0 }
  0x37   :  { %v109_v33 = vadd.f32 %v101_v16, %v93_v23  ;;  %v110_v34 = vadd.f32 %v102_v1, %v94_v24  ;;  %v111_v35 = vadd.f32 %v103_v3, %v95_v25  ;;  %v112_v36 = vadd.f32 %v104_v13, %v96_v26 }
  0x38   :  { %v113_v37 = vadd.f32 %v105_v18, %v97_v29  ;;  %v114_v38 = vadd.f32 %v106_v20, %v98_v30  ;;  %v115_v39 = vadd.f32 %v107_v27, %v99_v31  ;;  %v116_v40 = vadd.f32 %v108_v28, %v100_v32 }
  0x39   :  { %117 = vst.msk [vmem:[%s286_s2] sm:$0xff] %vm19_vm0, %v109_v33  ;;  %118 = vst.msk [vmem:[%s286_s2 + $0x8] sm:$0xff] %vm19_vm0, %v110_v34 }
  0x3a   :  { %119 = vst.msk [vmem:[%s286_s2 + $0x10] sm:$0xff] %vm19_vm0, %v111_v35  ;;  %120 = vst.msk [vmem:[%s286_s2 + $0x18] sm:$0xff] %vm19_vm0, %v112_v36 }
  0x3b   :  { %121 = vst.msk [vmem:[%s286_s2 + $0x20] sm:$0xff] %vm19_vm0, %v113_v37  ;;  %122 = vst.msk [vmem:[%s286_s2 + $0x28] sm:$0xff] %vm19_vm0, %v114_v38 }
  0x3c   :  { %123 = vst.msk [vmem:[%s286_s2 + $0x30] sm:$0xff] %vm19_vm0, %v115_v39  ;;  %124 = vst.msk [vmem:[%s286_s2 + $0x38] sm:$0xff] %vm19_vm0, %v116_v40 }

// kernel: global_generator_forward.160
= control target key start
LH: loop header
LB: loop body
LE: loop exit
PB: predicated region body
PF: predicated region fallthrough
CT: control target
= control target key end

     0   :  { %s410_s1 = inlined_call_operand.vmem [shape: bf16[128,128], index: 1, kind: input, shape index: {}]   ;;  %s411_s0 = inlined_call_operand.vmem [shape: bf16[64,128], index: 0, kind: input, shape index: {}]   ;;  %s412_s2 = inlined_call_operand.vmem [shape: f32[1,128], index: 2, kind: input, shape index: {}]   ;;  %s413_s3 = inlined_call_operand.vmem [shape: f32[64,128], index: 3, kind: output, shape index: {}]  }
   0x1   :  { %v315_v0 = vld [vmem:[%s410_s1] sm:$0xff]   ;;  %v316_v1 = vld [vmem:[%s410_s1 + $0x8] sm:$0xff]   ;;  %v317_v2 = vld [vmem:[%s410_s1 + $0x10] sm:$0xff]  }
   0x2   :  { %275 = vmatprep.subr.bf16.mxu0 %v315_v0  ;;  %299 = vmatprep.subr.bf16.mxu1 %v315_v0  ;;  %v318_v3 = vld [vmem:[%s410_s1 + $0x18] sm:$0xff]   ;;  %v323_v4 = vld [vmem:[%s411_s0] sm:$0xff]   ;;  %v324_v5 = vld [vmem:[%s411_s0 + $0x10] sm:$0xff]  }
   0x3   :  { %276 = vmatpush3.bf16.msra.mxu0 %v315_v0  ;;  %307 = vmatpush3.bf16.msra.mxu1 %v315_v0  ;;  %v319_v6 = vld [vmem:[%s410_s1 + $0x20] sm:$0xff]   ;;  %v320_v7 = vld [vmem:[%s410_s1 + $0x28] sm:$0xff]   ;;  %v321_v8 = vld [vmem:[%s410_s1 + $0x30] sm:$0xff]  }
   0x4   :  { %277 = vmatprep.subr.bf16.mxu0 %v316_v1  ;;  %300 = vmatprep.subr.bf16.mxu1 %v316_v1  ;;  %v322_v9 = vld [vmem:[%s410_s1 + $0x38] sm:$0xff]   ;;  %v325_v10 = vld [vmem:[%s411_s0 + $0x8] sm:$0xff]   ;;  %v262_v12 = vld [vmem:[%s412_s2] ss:$0 sm:$0xff] }
   0x5   :  { %291 = vmatprep.mubr.bf16.mxu0 %v323_v4  ;;  %295 = vmatprep.mubr.bf16.mxu1 %v324_v5  ;;  %v326_v11 = vld [vmem:[%s411_s0 + $0x18] sm:$0xff]  }
   0x7   :  { %278 = vmatpush3.bf16.msra.mxu0 %v316_v1  ;;  %308 = vmatpush3.bf16.msra.mxu1 %v316_v1 }
   0x8   :  { %279 = vmatprep.subr.bf16.mxu0 %v317_v2  ;;  %301 = vmatprep.subr.bf16.mxu1 %v317_v2 }
   0xb   :  { %280 = vmatpush3.bf16.msra.mxu0 %v317_v2  ;;  %309 = vmatpush3.bf16.msra.mxu1 %v317_v2 }
   0xc   :  { %281 = vmatprep.subr.bf16.mxu0 %v318_v3  ;;  %302 = vmatprep.subr.bf16.mxu1 %v318_v3 }
   0xf   :  { %282 = vmatpush3.bf16.msra.mxu0 %v318_v3  ;;  %310 = vmatpush3.bf16.msra.mxu1 %v318_v3 }
  0x10   :  { %283 = vmatprep.subr.bf16.mxu0 %v319_v6  ;;  %303 = vmatprep.subr.bf16.mxu1 %v319_v6 }
  0x13   :  { %284 = vmatpush3.bf16.msra.mxu0 %v319_v6  ;;  %311 = vmatpush3.bf16.msra.mxu1 %v319_v6 }
  0x14   :  { %285 = vmatprep.subr.bf16.mxu0 %v320_v7  ;;  %304 = vmatprep.subr.bf16.mxu1 %v320_v7 }
  0x17   :  { %286 = vmatpush3.bf16.msra.mxu0 %v320_v7  ;;  %312 = vmatpush3.bf16.msra.mxu1 %v320_v7 }
  0x18   :  { %287 = vmatprep.subr.bf16.mxu0 %v321_v8  ;;  %305 = vmatprep.subr.bf16.mxu1 %v321_v8 }
  0x1b   :  { %288 = vmatpush3.bf16.msra.mxu0 %v321_v8  ;;  %313 = vmatpush3.bf16.msra.mxu1 %v321_v8 }
  0x1c   :  { %289 = vmatprep.subr.bf16.mxu0 %v322_v9  ;;  %306 = vmatprep.subr.bf16.mxu1 %v322_v9 }
  0x1f   :  { %290 = vmatpush3.bf16.msra.mxu0 %v322_v9  ;;  %314 = vmatpush3.bf16.msra.mxu1 %v322_v9 }
  0x22   :  { %292 = vmatmul.mubr.bf16.vlgmr.msra.gmra.mrb[0].mxu0 %v325_v10  ;;  %296 = vmatmul.mubr.bf16.vlgmr.msra.gmra.mrb[0].mxu1 %v326_v11 }
  0xf5   :  { %v293_v13 = vpop.f32.mrb[0].mxu0  ;;  %v297_v14 = vpop.f32.mrb[0].mxu1 }
  0xf6   :  { %v232_v15 = vadd.f32 %v293_v13, %v262_v12  ;;  %v236_v16 = vadd.f32 %v297_v14, %v262_v12  ;;  %v165_v17 = vpop.f32.mrb[1].mxu0  ;;  %v181_v18 = vpop.f32.mrb[1].mxu1 }
  0xf7   :  { %v230_v19 = vadd.f32 %v262_v12, %v165_v17  ;;  %v234_v20 = vadd.f32 %v262_v12, %v181_v18  ;;  %v294_v21 = vpop.f32.mrb[2].mxu0  ;;  %v298_v22 = vpop.f32.mrb[2].mxu1 }
  0xf8   :  { %240 = vst [vmem:[%s413_s3 + $0x10] sm:$0xff] %v232_v15  ;;  %244 = vst [vmem:[%s413_s3 + $0x30] sm:$0xff] %v236_v16  ;;  %v233_v23 = vadd.f32 %v294_v21, %v262_v12  ;;  %v237_v24 = vadd.f32 %v298_v22, %v262_v12  ;;  %v168_v25 = vpop.f32.mrb[3].mxu0  ;;  %v184_v26 = vpop.f32.mrb[3].mxu1 }
  0xf9   :  { %238 = vst [vmem:[%s413_s3] sm:$0xff] %v230_v19  ;;  %242 = vst [vmem:[%s413_s3 + $0x20] sm:$0xff] %v234_v20  ;;  %v231_v27 = vadd.f32 %v262_v12, %v168_v25  ;;  %v235_v28 = vadd.f32 %v262_v12, %v184_v26 }
  0xfa   :  { %241 = vst [vmem:[%s413_s3 + $0x18] sm:$0xff] %v233_v23  ;;  %245 = vst [vmem:[%s413_s3 + $0x38] sm:$0xff] %v237_v24 }
  0xfb   :  { %239 = vst [vmem:[%s413_s3 + $0x8] sm:$0xff] %v231_v27  ;;  %243 = vst [vmem:[%s413_s3 + $0x28] sm:$0xff] %v235_v28 }

// kernel: global_generator_forward.164
= control target key start
LH: loop header
LB: loop body
LE: loop exit
PB: predicated region body
PF: predicated region fallthrough
CT: control target
= control target key end

     0   :  { %vm43_vm0 = vcmask 130048   ;;  %s1152_s0 = inlined_call_operand.vmem [shape: f32[1,256,16], index: 0, kind: input, shape index: {}]   ;;  %s1153_s1 = inlined_call_operand.vmem [shape: f32[1,256,16], index: 1, kind: input, shape index: {}]   ;;  %s1154_s2 = inlined_call_operand.vmem [shape: f32[1,256,16], index: 2, kind: output, shape index: {}]  }
   0x1   :  { %v437_v0 = vld [vmem:[%s1152_s0] sm:$0xff]  ;;  %v442_v1 = vld [vmem:[%s1152_s0 + $0x8] sm:$0xff]  ;;  %v447_v2 = vld [vmem:[%s1152_s0 + $0x10] sm:$0xff] }
   0x2   :  { %v452_v3 = vld [vmem:[%s1152_s0 + $0x18] sm:$0xff]  ;;  %v44_v4 = vsel %vm43_vm0, %v437_v0, 0.0  ;;  %v45_v5 = vsel %vm43_vm0, %v442_v1, 0.0  ;;  %v47_v6 = vsel %vm43_vm0, %v447_v2, 0.0  ;;  %v463_v7 = vld [vmem:[%s1152_s0 + $0x20] sm:$0xff]  ;;  %v470_v10 = vld [vmem:[%s1152_s0 + $0x28] sm:$0xff]  ;;  %v114_v29 = vmul.f32 %v437_v0, %v437_v0 }
   0x3   :  { %v46_v8 = vadd.f32 %v45_v5, %v44_v4  ;;  %v49_v9 = vsel %vm43_vm0, %v452_v3, 0.0  ;;  %v51_v12 = vsel %vm43_vm0, %v463_v7, 0.0  ;;  %v477_v13 = vld [vmem:[%s1152_s0 + $0x30] sm:$0xff]  ;;  %v53_v15 = vsel %vm43_vm0, %v470_v10, 0.0  ;;  %v484_v16 = vld [vmem:[%s1152_s0 + $0x38] sm:$0xff]  ;;  %v491_v19 = vld [vmem:[%s1152_s0 + $0x40] sm:$0xff] }
   0x4   :  { %v55_v18 = vsel %vm43_vm0, %v477_v13, 0.0  ;;  %v57_v21 = vsel %vm43_vm0, %v484_v16, 0.0  ;;  %v498_v22 = vld [vmem:[%s1152_s0 + $0x48] sm:$0xff]  ;;  %v59_v24 = vsel %vm43_vm0, %v491_v19, 0.0  ;;  %v505_v25 = vld [vmem:[%s1152_s0 + $0x50] sm:$0xff]  ;;  %v510_v27 = vld [vmem:[%s1152_s0 + $0x58] sm:$0xff]  ;;  %v115_v30 = vmul.f32 %v442_v1, %v442_v1 }
   0x5   :  { %v48_v11 = vadd.f32 %v47_v6, %v46_v8  ;;  %v61_v28 = vsel %vm43_vm0, %v498_v22, 0.0  ;;  %v116_v31 = vmul.f32 %v447_v2, %v447_v2  ;;  %v63_v33 = vsel %vm43_vm0, %v505_v25, 0.0  ;;  %v527_v35 = vld [vmem:[%s1152_s0 + $0x60] sm:$0xff]  ;;  %v539_v42 = vld [vmem:[%s1152_s0 + $0x68] sm:$0xff]  ;;  %v549_v48 = vld [vmem:[%s1152_s0 + $0x70] sm:$0xff] }
   0x6   :  { %v117_v34 = vmul.f32 %v452_v3, %v452_v3  ;;  %v65_v37 = vsel %vm43_vm0, %v510_v27, 0.0  ;;  %v118_v38 = vmul.f32 %v463_v7, %v463_v7  ;;  %v146_v39 = vsel %vm43_vm0, %v114_v29, 0.0  ;;  %v559_v54 = vld [vmem:[%s1152_s0 + $0x78] sm:$0xff]  ;;  %v569_v60 = vld [vmem:[%s1152_s0 + $0x80] sm:$0xff]  ;;  %v579_v6 = vld [vmem:[%s1152_s0 + $0x88] sm:$0xff] }
   0x7   :  { %v50_v14 = vadd.f32 %v49_v9, %v48_v11  ;;  %v147_v40 = vsel %vm43_vm0, %v115_v30, 0.0  ;;  %v149_v41 = vsel %vm43_vm0, %v116_v31, 0.0  ;;  %v67_v45 = vsel %vm43_vm0, %v527_v35, 0.0 }
   0x8   :  { %v148_v44 = vadd.f32 %v147_v40, %v146_v39  ;;  %v119_v46 = vmul.f32 %v470_v10, %v470_v10  ;;  %v151_v47 = vsel %vm43_vm0, %v117_v34, 0.0  ;;  %v69_v51 = vsel %vm43_vm0, %v539_v42, 0.0  ;;  %v619_v39 = vld [vmem:[%s1152_s0 + $0xa8] sm:$0xff] }
   0x9   :  { %v52_v17 = vadd.f32 %v51_v12, %v50_v14  ;;  %v120_v52 = vmul.f32 %v477_v13, %v477_v13  ;;  %v153_v53 = vsel %vm43_vm0, %v118_v38, 0.0  ;;  %v71_v57 = vsel %vm43_vm0, %v549_v48, 0.0 }
   0xa   :  { %v150_v50 = vadd.f32 %v149_v41, %v148_v44  ;;  %v121_v58 = vmul.f32 %v484_v16, %v484_v16  ;;  %v155_v59 = vsel %vm43_vm0, %v119_v46, 0.0  ;;  %v73_v63 = vsel %vm43_vm0, %v559_v54, 0.0  ;;  %v629_v46 = vld [vmem:[%s1152_s0 + $0xb0] sm:$0xff] }
   0xb   :  { %v54_v20 = vadd.f32 %v53_v15, %v52_v17  ;;  %v122_v4 = vmul.f32 %v491_v19, %v491_v19  ;;  %v157_v5 = vsel %vm43_vm0, %v120_v52, 0.0  ;;  %v75_v11 = vsel %vm43_vm0, %v569_v60, 0.0  ;;  %v589_v15 = vld [vmem:[%s1152_s0 + $0x90] sm:$0xff] }
   0xc   :  { %v152_v56 = vadd.f32 %v151_v47, %v150_v50  ;;  %v123_v12 = vmul.f32 %v498_v22, %v498_v22  ;;  %v159_v14 = vsel %vm43_vm0, %v121_v58, 0.0  ;;  %v79_v29 = vsel %vm43_vm0, %v589_v15, 0.0 }
   0xd   :  { %v56_v23 = vadd.f32 %v55_v18, %v54_v20  ;;  %v77_v20 = vsel %vm43_vm0, %v579_v6, 0.0  ;;  %v125_v30 = vmul.f32 %v510_v27, %v510_v27  ;;  %v127_v44 = vmul.f32 %v539_v42, %v539_v42 }
   0xe   :  { %v154_v62 = vadd.f32 %v153_v53, %v152_v56  ;;  %v163_v31 = vsel %vm43_vm0, %v123_v12, 0.0  ;;  %v85_v50 = vsel %vm43_vm0, %v619_v39, 0.0  ;;  %v639_v53 = vld [vmem:[%s1152_s0 + $0xb8] sm:$0xff]  ;;  %v129_v58 = vmul.f32 %v559_v54, %v559_v54 }
   0xf   :  { %v58_v26 = vadd.f32 %v57_v21, %v56_v23  ;;  %v124_v21 = vmul.f32 %v505_v25, %v505_v25  ;;  %v161_v23 = vsel %vm43_vm0, %v122_v4, 0.0  ;;  %v89_v4 = vsel %vm43_vm0, %v639_v53, 0.0 }
  0x10   :  { %v156_v9 = vadd.f32 %v155_v59, %v154_v62  ;;  %v171_v59 = vsel %vm43_vm0, %v127_v44, 0.0 }
  0x11   :  { %v60_v32 = vadd.f32 %v59_v24, %v58_v26  ;;  %v599_v24 = vld [vmem:[%s1152_s0 + $0x98] sm:$0xff]  ;;  %v165_v38 = vsel %vm43_vm0, %v124_v21, 0.0 }
  0x12   :  { %v158_v18 = vadd.f32 %v157_v5, %v156_v9  ;;  %v130_v5 = vmul.f32 %v569_v60, %v569_v60  ;;  %v659_v9 = vld [vmem:[%s1152_s0 + $0xc8] sm:$0xff] }
  0x13   :  { %v62_v36 = vadd.f32 %v61_v28, %v60_v32  ;;  %v609_v32 = vld [vmem:[%s1152_s0 + $0xa0] sm:$0xff] }
  0x14   :  { %v160_v28 = vadd.f32 %v159_v14, %v158_v18  ;;  %v175_v18 = vsel %vm43_vm0, %v129_v58, 0.0  ;;  %v134_v44 = vmul.f32 %v609_v32, %v609_v32 }
  0x15   :  { %v64_v43 = vadd.f32 %v63_v33, %v62_v36  ;;  %v81_v36 = vsel %vm43_vm0, %v599_v24, 0.0 }
  0x16   :  { %v162_v34 = vadd.f32 %v161_v23, %v160_v28  ;;  %v132_v28 = vmul.f32 %v589_v15, %v589_v15 }
  0x17   :  { %v66_v49 = vadd.f32 %v65_v37, %v64_v43  ;;  %v126_v37 = vmul.f32 %v527_v35, %v527_v35  ;;  %v83_v43 = vsel %vm43_vm0, %v609_v32, 0.0 }
  0x18   :  { %v164_v41 = vadd.f32 %v163_v31, %v162_v34 }
  0x19   :  { %v68_v55 = vadd.f32 %v67_v45, %v66_v49  ;;  %v167_v45 = vsel %vm43_vm0, %v125_v30, 0.0  ;;  %v169_v52 = vsel %vm43_vm0, %v126_v37, 0.0  ;;  %v679_v30 = vld [vmem:[%s1152_s0 + $0xd8] sm:$0xff] }
  0x1a   :  { %v166_v49 = vadd.f32 %v165_v38, %v164_v41  ;;  %v689_v38 = vld [vmem:[%s1152_s0 + $0xe0] sm:$0xff] }
  0x1b   :  { %v70_v61 = vadd.f32 %v69_v51, %v68_v55  ;;  %v128_v51 = vmul.f32 %v549_v48, %v549_v48 }
  0x1c   :  { %v168_v56 = vadd.f32 %v167_v45, %v166_v49  ;;  %v181_v45 = vsel %vm43_vm0, %v132_v28, 0.0 }
  0x1d   :  { %v72_v8 = vadd.f32 %v71_v57, %v70_v61  ;;  %v87_v57 = vsel %vm43_vm0, %v629_v46, 0.0  ;;  %v649_v61 = vld [vmem:[%s1152_s0 + $0xc0] sm:$0xff] }
  0x1e   :  { %v91_v14 = vsel %vm43_vm0, %v649_v61, 0.0 }
  0x1f   :  { %v74_v17 = vadd.f32 %v73_v63, %v72_v8  ;;  %v170_v63 = vadd.f32 %v169_v52, %v168_v56  ;;  %v173_v8 = vsel %vm43_vm0, %v128_v51, 0.0  ;;  %v99_v51 = vsel %vm43_vm0, %v689_v38, 0.0  ;;  %v709_v56 = vld [vmem:[%s1152_s0 + $0xf0] sm:$0xff] }
  0x20   :  { %v135_v52 = vmul.f32 %v619_v39, %v619_v39 }
  0x21   :  { %v76_v26 = vadd.f32 %v75_v11, %v74_v17  ;;  %v172_v12 = vadd.f32 %v171_v59, %v170_v63  ;;  %v131_v17 = vmul.f32 %v579_v6, %v579_v6  ;;  %v185_v63 = vsel %vm43_vm0, %v134_v44, 0.0 }
  0x22   :  { %v141_v44 = vmul.f32 %v679_v30, %v679_v30 }
  0x23   :  { %v78_v33 = vadd.f32 %v77_v20, %v76_v26  ;;  %v669_v20 = vld [vmem:[%s1152_s0 + $0xd0] sm:$0xff]  ;;  %v174_v23 = vadd.f32 %v173_v8, %v172_v12  ;;  %v93_v26 = vsel %vm43_vm0, %v659_v9, 0.0  ;;  %v179_v37 = vsel %vm43_vm0, %v131_v17, 0.0 }
  0x24   :  { %v95_v34 = vsel %vm43_vm0, %v669_v20, 0.0  ;;  %v137_v12 = vmul.f32 %v639_v53, %v639_v53 }
  0x25   :  { %v80_v40 = vadd.f32 %v79_v29, %v78_v33  ;;  %v177_v29 = vsel %vm43_vm0, %v130_v5, 0.0  ;;  %v176_v33 = vadd.f32 %v175_v18, %v174_v23  ;;  %v138_v23 = vmul.f32 %v649_v61, %v649_v61 }
  0x27   :  { %v82_v47 = vadd.f32 %v81_v36, %v80_v40  ;;  %v133_v36 = vmul.f32 %v599_v24, %v599_v24  ;;  %v178_v41 = vadd.f32 %v177_v29, %v176_v33  ;;  %v191_v33 = vsel %vm43_vm0, %v137_v12, 0.0 }
  0x29   :  { %v84_v55 = vadd.f32 %v83_v43, %v82_v47  ;;  %v97_v43 = vsel %vm43_vm0, %v679_v30, 0.0  ;;  %v699_v47 = vld [vmem:[%s1152_s0 + $0xe8] sm:$0xff] }
  0x2a   :  { %v101_v59 = vsel %vm43_vm0, %v699_v47, 0.0 }
  0x2b   :  { %v86_v62 = vadd.f32 %v85_v50, %v84_v55  ;;  %v180_v50 = vadd.f32 %v179_v37, %v178_v41  ;;  %v183_v55 = vsel %vm43_vm0, %v133_v36, 0.0  ;;  %v140_v37 = vmul.f32 %v669_v20, %v669_v20 }
  0x2d   :  { %v88_v11 = vadd.f32 %v87_v57, %v86_v62  ;;  %v182_v58 = vadd.f32 %v181_v45, %v180_v50  ;;  %v136_v62 = vmul.f32 %v629_v46, %v629_v46  ;;  %v142_v50 = vmul.f32 %v689_v38, %v689_v38 }
  0x2f   :  { %v90_v21 = vadd.f32 %v89_v4, %v88_v11  ;;  %v719_v4 = vld [vmem:[%s1152_s0 + $0xf8] sm:$0xff]  ;;  %v184_v8 = vadd.f32 %v183_v55, %v182_v58  ;;  %v103_v11 = vsel %vm43_vm0, %v709_v56, 0.0  ;;  %v199_v58 = vsel %vm43_vm0, %v141_v44, 0.0 }
  0x31   :  { %v92_v31 = vadd.f32 %v91_v14, %v90_v21  ;;  %v187_v14 = vsel %vm43_vm0, %v135_v52, 0.0  ;;  %v186_v18 = vadd.f32 %v185_v63, %v184_v8  ;;  %v105_v21 = vsel %vm43_vm0, %v719_v4, 0.0 }
  0x32   :  { %v201_v63 = vsel %vm43_vm0, %v142_v50, 0.0 }
  0x33   :  { %v94_v40 = vadd.f32 %v93_v26, %v92_v31  ;;  %v189_v26 = vsel %vm43_vm0, %v136_v62, 0.0  ;;  %v188_v29 = vadd.f32 %v187_v14, %v186_v18  ;;  %v139_v31 = vmul.f32 %v659_v9, %v659_v9 }
  0x34   :  { %v144_v62 = vmul.f32 %v709_v56, %v709_v56 }
  0x35   :  { %v96_v49 = vadd.f32 %v95_v34, %v94_v40  ;;  %v190_v36 = vadd.f32 %v189_v26, %v188_v29  ;;  %v193_v40 = vsel %vm43_vm0, %v138_v23, 0.0  ;;  %v195_v45 = vsel %vm43_vm0, %v139_v31, 0.0 }
  0x37   :  { %v98_v57 = vadd.f32 %v97_v43, %v96_v49  ;;  %v192_v43 = vadd.f32 %v191_v33, %v190_v36 }
  0x39   :  { %v100_v5 = vadd.f32 %v99_v51, %v98_v57  ;;  %v194_v49 = vadd.f32 %v193_v40, %v192_v43  ;;  %v197_v51 = vsel %vm43_vm0, %v140_v37, 0.0  ;;  %v143_v57 = vmul.f32 %v699_v47, %v699_v47 }
  0x3b   :  { %v102_v17 = vadd.f32 %v101_v59, %v100_v5  ;;  %v196_v55 = vadd.f32 %v195_v45, %v194_v49  ;;  %v203_v12 = vsel %vm43_vm0, %v143_v57, 0.0 }
  0x3d   :  { %v104_v28 = vadd.f32 %v103_v11, %v102_v17  ;;  %v198_v59 = vadd.f32 %v197_v51, %v196_v55  ;;  %v145_v11 = vmul.f32 %v719_v4, %v719_v4  ;;  %v205_v17 = vsel %vm43_vm0, %v144_v62, 0.0 }
  0x3f   :  { %v106_v34 = vadd.f32 %v105_v21, %v104_v28  ;;  %v200_v8 = vadd.f32 %v199_v58, %v198_v59  ;;  %v207_v23 = vsel %vm43_vm0, %v145_v11, 0.0 }
  0x41   :  { %v107_v41 = vrot.slane %v106_v34, 4  ;;  %v202_v14 = vadd.f32 %v201_v63, %v200_v8 }
  0x43   :  { %v108_v52 = vadd.f32 %v107_v41, %v106_v34  ;;  %v204_v21 = vadd.f32 %v203_v12, %v202_v14 }
  0x45   :  { %v109_v5 = vrot.slane %v108_v52, 2  ;;  %v206_v26 = vadd.f32 %v205_v17, %v204_v21 }
  0x47   :  { %v110_v18 = vadd.f32 %v109_v5, %v108_v52  ;;  %v208_v29 = vadd.f32 %v207_v23, %v206_v26 }
  0x49   :  { %v111_v28 = vrot.slane %v110_v18, 1  ;;  %v209_v31 = vrot.slane %v208_v29, 4 }
  0x4b   :  { %v112_v33 = vadd.f32 %v111_v28, %v110_v18  ;;  %v210_v34 = vadd.f32 %v209_v31, %v208_v29 }
  0x4d   :  { %v211_v36 = vrot.slane %v210_v34, 2  ;;  %v754_v37 = vmul.f32 0.00390625, %v112_v33 }
  0x4f   :  { %v212_v40 = vadd.f32 %v211_v36, %v210_v34  ;;  %v216_v44 = vmul.f32 %v754_v37, %v754_v37  ;;  %v219_v52 = vsub.f32 %v437_v0, %v754_v37  ;;  %v220_v55 = vsub.f32 %v442_v1, %v754_v37 }
  0x50   :  { %v221_v57 = vsub.f32 %v447_v2, %v754_v37  ;;  %v222_v58 = vsub.f32 %v452_v3, %v754_v37  ;;  %v223_v59 = vsub.f32 %v463_v7, %v754_v37  ;;  %v224_v62 = vsub.f32 %v470_v10, %v754_v37 }
  0x51   :  { %v213_v41 = vrot.slane %v212_v40, 1  ;;  %v225_v63 = vsub.f32 %v477_v13, %v754_v37  ;;  %v226_v0 = vsub.f32 %v484_v16, %v754_v37  ;;  %v227_v1 = vsub.f32 %v491_v19, %v754_v37 }
  0x52   :  { %v228_v2 = vsub.f32 %v498_v22, %v754_v37  ;;  %v229_v3 = vsub.f32 %v505_v25, %v754_v37  ;;  %v230_v7 = vsub.f32 %v510_v27, %v754_v37  ;;  %v231_v10 = vsub.f32 %v527_v35, %v754_v37  ;;  %v328_v25 = vld [vmem:[%s1153_s1 + $0x58] sm:$0xff] }
  0x53   :  { %v214_v43 = vadd.f32 %v213_v41, %v212_v40  ;;  %v232_v13 = vsub.f32 %v539_v42, %v754_v37  ;;  %v233_v16 = vsub.f32 %v549_v48, %v754_v37  ;;  %v234_v5 = vsub.f32 %v559_v54, %v754_v37 }
  0x54   :  { %v235_v8 = vsub.f32 %v569_v60, %v754_v37  ;;  %v236_v11 = vsub.f32 %v579_v6, %v754_v37 }
  0x55   :  { %v215_v45 = vmul.f32 0.00390625, %v214_v43 }
  0x57   :  { %v217_v49 = vsub.f32 %v215_v45, %v216_v44  ;;  %v317_v44 = vld [vmem:[%s1153_s1] sm:$0xff] }
  0x59   :  { %v218_v50 = vmax.f32 %v217_v49, 0.0  ;;  %v318_v49 = vld [vmem:[%s1153_s1 + $0x8] sm:$0xff] }
  0x5b   :  { %v251_v51 = vadd.f32 1e-05, %v218_v50 }
  0x5d   :  { %417 = vrsqrt.f32 %v251_v51  ;;  %v319_v51 = vld [vmem:[%s1153_s1 + $0x10] sm:$0xff] }
  0x67   :  { %v814_v33 = vpop.eup %417 }
  0x68   :  { %v253_v43 = vmul.f32 %v814_v33, %v219_v52  ;;  %v254_v45 = vmul.f32 %v814_v33, %v220_v55  ;;  %v255_v50 = vmul.f32 %v814_v33, %v221_v57  ;;  %v256_v41 = vmul.f32 %v814_v33, %v222_v58  ;;  %v320_v52 = vld [vmem:[%s1153_s1 + $0x18] sm:$0xff]  ;;  %v321_v55 = vld [vmem:[%s1153_s1 + $0x20] sm:$0xff]  ;;  %v322_v57 = vld [vmem:[%s1153_s1 + $0x28] sm:$0xff] }
  0x69   :  { %v257_v40 = vmul.f32 %v814_v33, %v223_v59  ;;  %v258_v36 = vmul.f32 %v814_v33, %v224_v62  ;;  %v259_v34 = vmul.f32 %v814_v33, %v225_v63  ;;  %v260_v58 = vmul.f32 %v814_v33, %v226_v0  ;;  %v323_v59 = vld [vmem:[%s1153_s1 + $0x30] sm:$0xff]  ;;  %v324_v62 = vld [vmem:[%s1153_s1 + $0x38] sm:$0xff] }
  0x6a   :  { %v285_v31 = vmax.f32 %v253_v43, 0.0  ;;  %v286_v29 = vmax.f32 %v254_v45, 0.0  ;;  %v287_v28 = vmax.f32 %v255_v50, 0.0  ;;  %v288_v26 = vmax.f32 %v256_v41, 0.0 }
  0x6b   :  { %v289_v23 = vmax.f32 %v257_v40, 0.0  ;;  %v290_v21 = vmax.f32 %v258_v36, 0.0  ;;  %v291_v18 = vmax.f32 %v259_v34, 0.0  ;;  %v292_v17 = vmax.f32 %v260_v58, 0.0  ;;  %v334_v58 = vld [vmem:[%s1153_s1 + $0x88] sm:$0xff] }
  0x6c   :  { %v349_v14 = vadd.f32 %v317_v44, %v285_v31  ;;  %v350_v63 = vadd.f32 %v318_v49, %v286_v29  ;;  %v351_v12 = vadd.f32 %v319_v51, %v287_v28  ;;  %v352_v0 = vadd.f32 %v320_v52, %v288_v26  ;;  %v332_v28 = vld [vmem:[%s1153_s1 + $0x78] sm:$0xff] }
  0x6d   :  { %v353_v43 = vadd.f32 %v321_v55, %v289_v23  ;;  %v354_v45 = vadd.f32 %v322_v57, %v290_v21  ;;  %v355_v50 = vadd.f32 %v323_v59, %v291_v18  ;;  %v356_v41 = vadd.f32 %v324_v62, %v292_v17  ;;  %v325_v17 = vld [vmem:[%s1153_s1 + $0x40] sm:$0xff] }
  0x6e   :  { %381 = vst.msk [vmem:[%s1154_s2] sm:$0xff] %vm43_vm0, %v349_v14  ;;  %382 = vst.msk [vmem:[%s1154_s2 + $0x8] sm:$0xff] %vm43_vm0, %v350_v63  ;;  %v261_v14 = vmul.f32 %v814_v33, %v227_v1  ;;  %v262_v18 = vmul.f32 %v814_v33, %v228_v2  ;;  %v263_v19 = vmul.f32 %v814_v33, %v229_v3  ;;  %v327_v1 = vld [vmem:[%s1153_s1 + $0x50] sm:$0xff]  ;;  %v329_v2 = vld [vmem:[%s1153_s1 + $0x60] sm:$0xff] }
  0x6f   :  { %383 = vst.msk [vmem:[%s1154_s2 + $0x10] sm:$0xff] %vm43_vm0, %v351_v12  ;;  %384 = vst.msk [vmem:[%s1154_s2 + $0x18] sm:$0xff] %vm43_vm0, %v352_v0  ;;  %v326_v12 = vld [vmem:[%s1153_s1 + $0x48] sm:$0xff]  ;;  %v264_v22 = vmul.f32 %v814_v33, %v230_v7  ;;  %v265_v27 = vmul.f32 %v814_v33, %v231_v10  ;;  %v266_v3 = vmul.f32 %v814_v33, %v232_v13  ;;  %v331_v13 = vld [vmem:[%s1153_s1 + $0x70] sm:$0xff] }
  0x70   :  { %385 = vst.msk [vmem:[%s1154_s2 + $0x20] sm:$0xff] %vm43_vm0, %v353_v43  ;;  %386 = vst.msk [vmem:[%s1154_s2 + $0x28] sm:$0xff] %vm43_vm0, %v354_v45  ;;  %v330_v7 = vld [vmem:[%s1153_s1 + $0x68] sm:$0xff]  ;;  %v267_v35 = vmul.f32 %v814_v33, %v233_v16  ;;  %v268_v10 = vmul.f32 %v814_v33, %v234_v5  ;;  %v293_v21 = vmax.f32 %v261_v14, 0.0  ;;  %v294_v23 = vmax.f32 %v262_v18, 0.0  ;;  %v333_v55 = vld [vmem:[%s1153_s1 + $0x80] sm:$0xff] }
  0x71   :  { %387 = vst.msk [vmem:[%s1154_s2 + $0x30] sm:$0xff] %vm43_vm0, %v355_v50  ;;  %388 = vst.msk [vmem:[%s1154_s2 + $0x38] sm:$0xff] %vm43_vm0, %v356_v41  ;;  %v295_v26 = vmax.f32 %v263_v19, 0.0  ;;  %v296_v42 = vmax.f32 %v264_v22, 0.0  ;;  %v297_v48 = vmax.f32 %v265_v27, 0.0  ;;  %v298_v29 = vmax.f32 %v266_v3, 0.0 }
  0x72   :  { %v299_v16 = vmax.f32 %v267_v35, 0.0  ;;  %v300_v31 = vmax.f32 %v268_v10, 0.0  ;;  %v357_v34 = vadd.f32 %v325_v17, %v293_v21  ;;  %v358_v54 = vadd.f32 %v326_v12, %v294_v23  ;;  %v337_v63 = vld [vmem:[%s1153_s1 + $0xa0] sm:$0xff]  ;;  %v338_v45 = vld [vmem:[%s1153_s1 + $0xa8] sm:$0xff]  ;;  %v339_v19 = vld [vmem:[%s1153_s1 + $0xb0] sm:$0xff] }
  0x73   :  { %v359_v36 = vadd.f32 %v327_v1, %v295_v26  ;;  %v360_v5 = vadd.f32 %v328_v25, %v296_v42  ;;  %v361_v40 = vadd.f32 %v329_v2, %v297_v48  ;;  %v362_v44 = vadd.f32 %v330_v7, %v298_v29  ;;  %v340_v1 = vld [vmem:[%s1153_s1 + $0xb8] sm:$0xff]  ;;  %v342_v29 = vld [vmem:[%s1153_s1 + $0xc8] sm:$0xff] }
  0x74   :  { %v363_v49 = vadd.f32 %v331_v13, %v299_v16  ;;  %v364_v51 = vadd.f32 %v332_v28, %v300_v31  ;;  %389 = vst.msk [vmem:[%s1154_s2 + $0x40] sm:$0xff] %vm43_vm0, %v357_v34  ;;  %390 = vst.msk [vmem:[%s1154_s2 + $0x48] sm:$0xff] %vm43_vm0, %v358_v54  ;;  %v269_v52 = vmul.f32 %v814_v33, %v235_v8  ;;  %v335_v8 = vld [vmem:[%s1153_s1 + $0x90] sm:$0xff]  ;;  %v341_v13 = vld [vmem:[%s1153_s1 + $0xc0] sm:$0xff] }
  0x75   :  { %391 = vst.msk [vmem:[%s1154_s2 + $0x50] sm:$0xff] %vm43_vm0, %v359_v36  ;;  %392 = vst.msk [vmem:[%s1154_s2 + $0x58] sm:$0xff] %vm43_vm0, %v360_v5  ;;  %v270_v57 = vmul.f32 %v814_v33, %v236_v11  ;;  %v1155_v59 = vsub.f32 %v589_v15, %v754_v37  ;;  %v1156_v62 = vsub.f32 %v599_v24, %v754_v37  ;;  %v336_v15 = vld [vmem:[%s1153_s1 + $0x98] sm:$0xff]  ;;  %v343_v31 = vld [vmem:[%s1153_s1 + $0xd0] sm:$0xff] }
  0x76   :  { %393 = vst.msk [vmem:[%s1154_s2 + $0x60] sm:$0xff] %vm43_vm0, %v361_v40  ;;  %394 = vst.msk [vmem:[%s1154_s2 + $0x68] sm:$0xff] %vm43_vm0, %v362_v44  ;;  %v1157_v24 = vsub.f32 %v609_v32, %v754_v37  ;;  %v1158_v0 = vsub.f32 %v619_v39, %v754_v37  ;;  %v1159_v50 = vsub.f32 %v629_v46, %v754_v37  ;;  %v301_v17 = vmax.f32 %v269_v52, 0.0  ;;  %v345_v36 = vld [vmem:[%s1153_s1 + $0xe0] sm:$0xff]  ;;  %v346_v44 = vld [vmem:[%s1153_s1 + $0xe8] sm:$0xff] }
  0x77   :  { %v271_v60 = vmul.f32 %v814_v33, %v1155_v59  ;;  %v272_v6 = vmul.f32 %v814_v33, %v1156_v62  ;;  %395 = vst.msk [vmem:[%s1154_s2 + $0x70] sm:$0xff] %vm43_vm0, %v363_v49  ;;  %396 = vst.msk [vmem:[%s1154_s2 + $0x78] sm:$0xff] %vm43_vm0, %v364_v51  ;;  %v1160_v41 = vsub.f32 %v639_v53, %v754_v37  ;;  %v302_v18 = vmax.f32 %v270_v57, 0.0  ;;  %v347_v59 = vld [vmem:[%s1153_s1 + $0xf0] sm:$0xff] }
  0x78   :  { %v273_v11 = vmul.f32 %v814_v33, %v1157_v24  ;;  %v274_v43 = vmul.f32 %v814_v33, %v1158_v0  ;;  %v275_v32 = vmul.f32 %v814_v33, %v1159_v50  ;;  %v365_v2 = vadd.f32 %v333_v55, %v301_v17 }
  0x79   :  { %v276_v14 = vmul.f32 %v814_v33, %v1160_v41  ;;  %v303_v12 = vmax.f32 %v271_v60, 0.0  ;;  %v304_v39 = vmax.f32 %v272_v6, 0.0  ;;  %v366_v53 = vadd.f32 %v334_v58, %v302_v18  ;;  %v348_v60 = vld [vmem:[%s1153_s1 + $0xf8] sm:$0xff] }
  0x7a   :  { %v305_v46 = vmax.f32 %v273_v11, 0.0  ;;  %v306_v22 = vmax.f32 %v274_v43, 0.0  ;;  %v307_v25 = vmax.f32 %v275_v32, 0.0  ;;  %397 = vst.msk [vmem:[%s1154_s2 + $0x80] sm:$0xff] %vm43_vm0, %v365_v2  ;;  %v1161_v26 = vsub.f32 %v649_v61, %v754_v37 }
  0x7b   :  { %v308_v27 = vmax.f32 %v276_v14, 0.0  ;;  %v367_v3 = vadd.f32 %v335_v8, %v303_v12  ;;  %v368_v7 = vadd.f32 %v336_v15, %v304_v39  ;;  %398 = vst.msk [vmem:[%s1154_s2 + $0x88] sm:$0xff] %vm43_vm0, %v366_v53  ;;  %v1162_v28 = vsub.f32 %v659_v9, %v754_v37 }
  0x7c   :  { %v369_v35 = vadd.f32 %v337_v63, %v305_v46  ;;  %v370_v10 = vadd.f32 %v338_v45, %v306_v22  ;;  %v371_v21 = vadd.f32 %v339_v19, %v307_v25  ;;  %v277_v42 = vmul.f32 %v814_v33, %v1161_v26 }
  0x7d   :  { %v372_v23 = vadd.f32 %v340_v1, %v308_v27  ;;  %399 = vst.msk [vmem:[%s1154_s2 + $0x90] sm:$0xff] %vm43_vm0, %v367_v3  ;;  %400 = vst.msk [vmem:[%s1154_s2 + $0x98] sm:$0xff] %vm43_vm0, %v368_v7  ;;  %v278_v48 = vmul.f32 %v814_v33, %v1162_v28  ;;  %v1163_v16 = vsub.f32 %v669_v20, %v754_v37  ;;  %v344_v20 = vld [vmem:[%s1153_s1 + $0xd8] sm:$0xff] }
  0x7e   :  { %v1164_v34 = vsub.f32 %v679_v30, %v754_v37  ;;  %401 = vst.msk [vmem:[%s1154_s2 + $0xa0] sm:$0xff] %vm43_vm0, %v369_v35  ;;  %402 = vst.msk [vmem:[%s1154_s2 + $0xa8] sm:$0xff] %vm43_vm0, %v370_v10  ;;  %v1165_v30 = vsub.f32 %v689_v38, %v754_v37  ;;  %v1166_v5 = vsub.f32 %v699_v47, %v754_v37  ;;  %v309_v55 = vmax.f32 %v277_v42, 0.0 }
  0x7f   :  { %v279_v61 = vmul.f32 %v814_v33, %v1163_v16  ;;  %403 = vst.msk [vmem:[%s1154_s2 + $0xb0] sm:$0xff] %vm43_vm0, %v371_v21  ;;  %404 = vst.msk [vmem:[%s1154_s2 + $0xb8] sm:$0xff] %vm43_vm0, %v372_v23  ;;  %v1167_v49 = vsub.f32 %v709_v56, %v754_v37  ;;  %v1168_v51 = vsub.f32 %v719_v4, %v754_v37  ;;  %v310_v57 = vmax.f32 %v278_v48, 0.0 }
  0x80   :  { %v280_v9 = vmul.f32 %v814_v33, %v1164_v34  ;;  %v281_v54 = vmul.f32 %v814_v33, %v1165_v30  ;;  %v282_v40 = vmul.f32 %v814_v33, %v1166_v5  ;;  %v373_v15 = vadd.f32 %v341_v13, %v309_v55 }
  0x81   :  { %v283_v38 = vmul.f32 %v814_v33, %v1167_v49  ;;  %v284_v52 = vmul.f32 %v814_v33, %v1168_v51  ;;  %v311_v58 = vmax.f32 %v279_v61, 0.0  ;;  %v374_v4 = vadd.f32 %v342_v29, %v310_v57 }
  0x82   :  { %v312_v47 = vmax.f32 %v280_v9, 0.0  ;;  %v313_v56 = vmax.f32 %v281_v54, 0.0  ;;  %v314_v8 = vmax.f32 %v282_v40, 0.0  ;;  %405 = vst.msk [vmem:[%s1154_s2 + $0xc0] sm:$0xff] %vm43_vm0, %v373_v15 }
  0x83   :  { %v315_v62 = vmax.f32 %v283_v38, 0.0  ;;  %v316_v6 = vmax.f32 %v284_v52, 0.0  ;;  %v375_v37 = vadd.f32 %v343_v31, %v311_v58  ;;  %406 = vst.msk [vmem:[%s1154_s2 + $0xc8] sm:$0xff] %vm43_vm0, %v374_v4 }
  0x84   :  { %v376_v33 = vadd.f32 %v344_v20, %v312_v47  ;;  %v377_v24 = vadd.f32 %v345_v36, %v313_v56  ;;  %v378_v11 = vadd.f32 %v346_v44, %v314_v8 }
  0x85   :  { %v379_v63 = vadd.f32 %v347_v59, %v315_v62  ;;  %v380_v0 = vadd.f32 %v348_v60, %v316_v6  ;;  %407 = vst.msk [vmem:[%s1154_s2 + $0xd0] sm:$0xff] %vm43_vm0, %v375_v37 }
  0x86   :  { %408 = vst.msk [vmem:[%s1154_s2 + $0xd8] sm:$0xff] %vm43_vm0, %v376_v33  ;;  %409 = vst.msk [vmem:[%s1154_s2 + $0xe0] sm:$0xff] %vm43_vm0, %v377_v24 }
  0x87   :  { %410 = vst.msk [vmem:[%s1154_s2 + $0xe8] sm:$0xff] %vm43_vm0, %v378_v11  ;;  %411 = vst.msk [vmem:[%s1154_s2 + $0xf0] sm:$0xff] %vm43_vm0, %v379_v63 }
  0x88   :  { %412 = vst.msk [vmem:[%s1154_s2 + $0xf8] sm:$0xff] %vm43_vm0, %v380_v0 }

// kernel: global_generator_forward.170
= control target key start
LH: loop header
LB: loop body
LE: loop exit
PB: predicated region body
PF: predicated region fallthrough
CT: control target
= control target key end

     0   :  { %s2114_s12 = smov 0   ;;  %s2116_s13 = smov 0   ;;  %s2387_s0 = inlined_call_operand.vmem [shape: bf16[1024,512], index: 0, kind: input, shape index: {}]   ;;  %s2388_s1 = inlined_call_operand.vmem [shape: bf16[512,128], index: 1, kind: input, shape index: {}]   ;;  %s2389_s2 = inlined_call_operand.vmem [shape: f32[1,128], index: 2, kind: input, shape index: {}]   ;;  %s2390_s3 = inlined_call_operand.vmem [shape: f32[1024,128], index: 3, kind: output, shape index: {}]  }
   0x1   :  { %s2118_s14 = smov 0  }
   0x2 LB: > { %s32_s15 = sadd.s32 1, %s2088_s13  ;;  %p1588_p0 = scmp.ge.s32.totalorder %s2092_s14, 1  ;;  %s2092_s14 = sphi %s2118_s14, %s13_s14   ;;  %s2088_s13 = sphi %s2116_s13, %s2392_s13   ;;  %s2084_s12 = sphi %s2114_s12, %s2391_s12  }
   0x3   : > { %p34_p1 = scmp.ge.s32.totalorder %s32_s15, 4  ;;  %p191_p2 = scmp.lt.s32.totalorder %s2092_s14, 5 }
   0x5   : > { %s2394_s15 = smov (%p34_p1, %s32_s15), 0  ;;  %p192_p3 = pnand %p1588_p0, %p191_p2 }
   0x6   : > { %v1942_v0 = vld [vmem:[%s2388_s1 + $0x40] sm:$0xff] (!%p192_p3)   ;;  %v1946_v4 = vld [vmem:[%s2388_s1 + $0x48] sm:$0xff] (!%p192_p3)   ;;  %v1950_v8 = vld [vmem:[%s2388_s1 + $0x50] sm:$0xff] (!%p192_p3)   ;;  %s1589_s25 = sshll.u32 (!%p192_p3), %s2084_s12, 5 }
   0x7   : > { %195 = sbr.rel (%p192_p3) target bundleno = 383 (0x17f), region = 32  ;;  %v1943_v1 = vld [vmem:[%s2388_s1 + $0xc0] sm:$0xff] (!%p192_p3)   ;;  %1694 = vmatprep.subr.bf16.mxu0 (!%p192_p3), %v1942_v0  ;;  %v1947_v5 = vld [vmem:[%s2388_s1 + $0xc8] sm:$0xff] (!%p192_p3)   ;;  %v1951_v9 = vld [vmem:[%s2388_s1 + $0xd0] sm:$0xff] (!%p192_p3)   ;;  %p236_p4 = scmp.lt.s32.totalorder (!%p192_p3), %s1589_s25, 127 }
   0x8   : > { %v1944_v2 = vld [vmem:[%s2388_s1] sm:$0xff] (!%p192_p3)   ;;  %1806 = vmatprep.subr.bf16.mxu1 (!%p192_p3), %v1943_v1  ;;  %v1948_v6 = vld [vmem:[%s2388_s1 + $0x8] sm:$0xff] (!%p192_p3)   ;;  %v1952_v10 = vld [vmem:[%s2388_s1 + $0x10] sm:$0xff] (!%p192_p3)  }
   0x9   : > { %v1945_v3 = vld [vmem:[%s2388_s1 + $0x80] sm:$0xff] (!%p192_p3)   ;;  %1695 = vmatpush3.bf16.msra.mxu0 (!%p192_p3), %v1944_v2  ;;  %v1949_v7 = vld [vmem:[%s2388_s1 + $0x88] sm:$0xff] (!%p192_p3)   ;;  %v1953_v11 = vld [vmem:[%s2388_s1 + $0x90] sm:$0xff] (!%p192_p3)  }
   0xa   : > { %1807 = vmatpush3.bf16.msra.mxu1 (!%p192_p3), %v1945_v3  ;;  %1696 = vmatprep.subr.bf16.mxu0 (!%p192_p3), %v1946_v4  ;;  %v1954_v12 = vld [vmem:[%s2388_s1 + $0x58] sm:$0xff] (!%p192_p3)   ;;  %v1958_v16 = vld [vmem:[%s2388_s1 + $0x60] sm:$0xff] (!%p192_p3)   ;;  %v1962_v20 = vld [vmem:[%s2388_s1 + $0x68] sm:$0xff] (!%p192_p3)  }
   0xb   : > { %1808 = vmatprep.subr.bf16.mxu1 (!%p192_p3), %v1947_v5  ;;  %v1955_v13 = vld [vmem:[%s2388_s1 + $0xd8] sm:$0xff] (!%p192_p3)   ;;  %v1959_v17 = vld [vmem:[%s2388_s1 + $0xe0] sm:$0xff] (!%p192_p3)   ;;  %v1963_v21 = vld [vmem:[%s2388_s1 + $0xe8] sm:$0xff] (!%p192_p3)  }
   0xc   : > { %v1956_v14 = vld [vmem:[%s2388_s1 + $0x18] sm:$0xff] (!%p192_p3)   ;;  %v1960_v18 = vld [vmem:[%s2388_s1 + $0x20] sm:$0xff] (!%p192_p3)   ;;  %v1964_v22 = vld [vmem:[%s2388_s1 + $0x28] sm:$0xff] (!%p192_p3)  }
   0xd   : > { %1697 = vmatpush3.bf16.msra.mxu0 (!%p192_p3), %v1948_v6  ;;  %v1957_v15 = vld [vmem:[%s2388_s1 + $0x98] sm:$0xff] (!%p192_p3)   ;;  %v1961_v19 = vld [vmem:[%s2388_s1 + $0xa0] sm:$0xff] (!%p192_p3)   ;;  %v1965_v23 = vld [vmem:[%s2388_s1 + $0xa8] sm:$0xff] (!%p192_p3)  }
   0xe   : > { %1809 = vmatpush3.bf16.msra.mxu1 %v1949_v7  ;;  %1698 = vmatprep.subr.bf16.mxu0 %v1950_v8  ;;  %s2396_s25 = smov (!%p236_p4, %s1589_s25), 127  ;;  %v1966_v24 = vld [vmem:[%s2388_s1 + $0x70] sm:$0xff]   ;;  %v1970_v28 = vld [vmem:[%s2388_s1 + $0x78] sm:$0xff]  }
   0xf   : > { %1810 = vmatprep.subr.bf16.mxu1 %v1951_v9  ;;  %v1967_v25 = vld [vmem:[%s2388_s1 + $0xf0] sm:$0xff]   ;;  %s1693_s24 = sshll.u32 %s2396_s25, 4  ;;  %v1971_v29 = vld [vmem:[%s2388_s1 + $0xf8] sm:$0xff]   ;;  %s1593_s11 = sshll.u32 %s2396_s25, 3 }
  0x10   : > { %v1968_v26 = vld [vmem:[%s2388_s1 + $0x30] sm:$0xff]   ;;  %s2231_s12 = scalar_lea.vmem %s2387_s0, %s1693_s24  ;;  %v1972_v30 = vld [vmem:[%s2388_s1 + $0x38] sm:$0xff]   ;;  %s2312_s20 = scalar_lea.vmem %s2390_s3, %s1593_s11 }
  0x11   : > { %1699 = vmatpush3.bf16.msra.mxu0 %v1952_v10  ;;  %v1969_v27 = vld [vmem:[%s2388_s1 + $0xb0] sm:$0xff]   ;;  %v1973_v31 = vld [vmem:[%s2388_s1 + $0xb8] sm:$0xff]  }
  0x12   : > { %1811 = vmatpush3.bf16.msra.mxu1 %v1953_v11  ;;  %1700 = vmatprep.subr.bf16.mxu0 %v1954_v12  ;;  %v1974_v32 = vld [vmem:[%s2231_s12] ss:$16 sps:$4 sm:$0xff]   ;;  %v1976_v33 = vld [vmem:[%s2231_s12 + $0x4] ss:$16 sps:$4 sm:$0xff]   ;;  %v1977_v34 = vld [vmem:[%s2231_s12 + $0x8] ss:$16 sps:$4 sm:$0xff]  }
  0x13   : > { %1812 = vmatprep.subr.bf16.mxu1 %v1955_v13  ;;  %v1979_v35 = vld [vmem:[%s2231_s12 + $0xc] ss:$16 sps:$4 sm:$0xff]   ;;  %1008 = vmatprep.mubr.bf16.mxu0 %v1976_v33  ;;  %v1980_v36 = vld [vmem:[%s2231_s12 + $0x24] ss:$16 sps:$4 sm:$0xff]   ;;  %v1984_v38 = vld [vmem:[%s2231_s12 + $0x20] ss:$16 sps:$4 sm:$0xff]  }
  0x14   : > { %1169 = vmatprep.mubr.bf16.mxu1 %v1979_v35  ;;  %v1982_v37 = vld [vmem:[%s2231_s12 + $0x2c] ss:$16 sps:$4 sm:$0xff]   ;;  %v1985_v39 = vld [vmem:[%s2231_s12 + $0x28] ss:$16 sps:$4 sm:$0xff]   ;;  %v1986_v40 = vld [vmem:[%s2231_s12 + $0x44] ss:$16 sps:$4 sm:$0xff]  }
  0x15   : > { %1701 = vmatpush3.bf16.msra.mxu0 %v1956_v14  ;;  %v1988_v41 = vld [vmem:[%s2231_s12 + $0x4c] ss:$16 sps:$4 sm:$0xff]   ;;  %v1990_v42 = vld [vmem:[%s2231_s12 + $0x40] ss:$16 sps:$4 sm:$0xff]   ;;  %v1991_v43 = vld [vmem:[%s2231_s12 + $0x48] ss:$16 sps:$4 sm:$0xff]  }
  0x16   : > { %1813 = vmatpush3.bf16.msra.mxu1 %v1957_v15  ;;  %1702 = vmatprep.subr.bf16.mxu0 %v1958_v16  ;;  %v1992_v44 = vld [vmem:[%s2231_s12 + $0x64] ss:$16 sps:$4 sm:$0xff]   ;;  %v1994_v45 = vld [vmem:[%s2231_s12 + $0x6c] ss:$16 sps:$4 sm:$0xff]   ;;  %v1996_v46 = vld [vmem:[%s2231_s12 + $0x60] ss:$16 sps:$4 sm:$0xff]  }
  0x17   : > { %1814 = vmatprep.subr.bf16.mxu1 %v1959_v17  ;;  %v1997_v47 = vld [vmem:[%s2231_s12 + $0x68] ss:$16 sps:$4 sm:$0xff]   ;;  %v1998_v48 = vld [vmem:[%s2231_s12 + $0x84] ss:$16 sps:$4 sm:$0xff]   ;;  %v2000_v49 = vld [vmem:[%s2231_s12 + $0x8c] ss:$16 sps:$4 sm:$0xff]  }
  0x18   : > { %v2002_v50 = vld [vmem:[%s2231_s12 + $0x80] ss:$16 sps:$4 sm:$0xff]   ;;  %v2003_v51 = vld [vmem:[%s2231_s12 + $0x88] ss:$16 sps:$4 sm:$0xff]   ;;  %v2004_v52 = vld [vmem:[%s2231_s12 + $0xa4] ss:$16 sps:$4 sm:$0xff]  }
  0x19   : > { %1703 = vmatpush3.bf16.msra.mxu0 %v1960_v18  ;;  %v2006_v53 = vld [vmem:[%s2231_s12 + $0xac] ss:$16 sps:$4 sm:$0xff]   ;;  %v2008_v54 = vld [vmem:[%s2231_s12 + $0xa0] ss:$16 sps:$4 sm:$0xff]   ;;  %v2009_v55 = vld [vmem:[%s2231_s12 + $0xa8] ss:$16 sps:$4 sm:$0xff]  }
  0x1a   : > { %1815 = vmatpush3.bf16.msra.mxu1 %v1961_v19  ;;  %1704 = vmatprep.subr.bf16.mxu0 %v1962_v20  ;;  %v2010_v56 = vld [vmem:[%s2231_s12 + $0xc4] ss:$16 sps:$4 sm:$0xff]   ;;  %v2012_v57 = vld [vmem:[%s2231_s12 + $0xcc] ss:$16 sps:$4 sm:$0xff]   ;;  %v2014_v58 = vld [vmem:[%s2231_s12 + $0xc0] ss:$16 sps:$4 sm:$0xff]  }
  0x1b   : > { %1816 = vmatprep.subr.bf16.mxu1 %v1963_v21  ;;  %v2015_v59 = vld [vmem:[%s2231_s12 + $0xc8] ss:$16 sps:$4 sm:$0xff]   ;;  %v2016_v60 = vld [vmem:[%s2231_s12 + $0xe4] ss:$16 sps:$4 sm:$0xff]   ;;  %v2018_v61 = vld [vmem:[%s2231_s12 + $0xec] ss:$16 sps:$4 sm:$0xff]  }
  0x1c   : > { %v2020_v62 = vld [vmem:[%s2231_s12 + $0xe0] ss:$16 sps:$4 sm:$0xff]   ;;  %v2021_v63 = vld [vmem:[%s2231_s12 + $0xe8] ss:$16 sps:$4 sm:$0xff]   ;;  %v2022_v0 = vld [vmem:[%s2231_s12 + $0x104] ss:$16 sps:$4 sm:$0xff]  }
  0x1d   : > { %1705 = vmatpush3.bf16.msra.mxu0 %v1964_v22  ;;  %v2024_v1 = vld [vmem:[%s2231_s12 + $0x10c] ss:$16 sps:$4 sm:$0xff]   ;;  %v2026_v2 = vld [vmem:[%s2231_s12 + $0x100] ss:$16 sps:$4 sm:$0xff]   ;;  %v2027_v3 = vld [vmem:[%s2231_s12 + $0x108] ss:$16 sps:$4 sm:$0xff]  }
  0x1e   : > { %1817 = vmatpush3.bf16.msra.mxu1 %v1965_v23  ;;  %1706 = vmatprep.subr.bf16.mxu0 %v1966_v24  ;;  %v2028_v4 = vld [vmem:[%s2231_s12 + $0x124] ss:$16 sps:$4 sm:$0xff]   ;;  %v2030_v5 = vld [vmem:[%s2231_s12 + $0x12c] ss:$16 sps:$4 sm:$0xff]   ;;  %v2032_v6 = vld [vmem:[%s2231_s12 + $0x120] ss:$16 sps:$4 sm:$0xff]  }
  0x1f   : > { %1818 = vmatprep.subr.bf16.mxu1 %v1967_v25  ;;  %v2033_v7 = vld [vmem:[%s2231_s12 + $0x128] ss:$16 sps:$4 sm:$0xff]   ;;  %v2034_v8 = vld [vmem:[%s2231_s12 + $0x144] ss:$16 sps:$4 sm:$0xff]   ;;  %v2036_v9 = vld [vmem:[%s2231_s12 + $0x14c] ss:$16 sps:$4 sm:$0xff]  }
  0x20   : > { %v2038_v10 = vld [vmem:[%s2231_s12 + $0x140] ss:$16 sps:$4 sm:$0xff]   ;;  %v2039_v11 = vld [vmem:[%s2231_s12 + $0x148] ss:$16 sps:$4 sm:$0xff]   ;;  %v2040_v12 = vld [vmem:[%s2231_s12 + $0x164] ss:$16 sps:$4 sm:$0xff]  }
  0x21   : > { %1707 = vmatpush3.bf16.msra.mxu0 %v1968_v26  ;;  %v2042_v13 = vld [vmem:[%s2231_s12 + $0x16c] ss:$16 sps:$4 sm:$0xff]   ;;  %v2044_v14 = vld [vmem:[%s2231_s12 + $0x160] ss:$16 sps:$4 sm:$0xff]   ;;  %v2045_v15 = vld [vmem:[%s2231_s12 + $0x168] ss:$16 sps:$4 sm:$0xff]  }
  0x22   : > { %1819 = vmatpush3.bf16.msra.mxu1 %v1969_v27  ;;  %1708 = vmatprep.subr.bf16.mxu0 %v1970_v28  ;;  %v2046_v16 = vld [vmem:[%s2231_s12 + $0x184] ss:$16 sps:$4 sm:$0xff]   ;;  %v2048_v17 = vld [vmem:[%s2231_s12 + $0x18c] ss:$16 sps:$4 sm:$0xff]   ;;  %v2050_v18 = vld [vmem:[%s2231_s12 + $0x180] ss:$16 sps:$4 sm:$0xff]  }
  0x23   : > { %1820 = vmatprep.subr.bf16.mxu1 %v1971_v29  ;;  %v2051_v19 = vld [vmem:[%s2231_s12 + $0x188] ss:$16 sps:$4 sm:$0xff]   ;;  %v2052_v20 = vld [vmem:[%s2231_s12 + $0x1a4] ss:$16 sps:$4 sm:$0xff]   ;;  %v2054_v21 = vld [vmem:[%s2231_s12 + $0x1ac] ss:$16 sps:$4 sm:$0xff]  }
  0x24   : > { %v2056_v22 = vld [vmem:[%s2231_s12 + $0x1a0] ss:$16 sps:$4 sm:$0xff]   ;;  %v2057_v23 = vld [vmem:[%s2231_s12 + $0x1a8] ss:$16 sps:$4 sm:$0xff]   ;;  %v2058_v24 = vld [vmem:[%s2231_s12 + $0x1c4] ss:$16 sps:$4 sm:$0xff]  }
  0x25   : > { %1709 = vmatpush3.bf16.msra.mxu0 %v1972_v30  ;;  %v2060_v25 = vld [vmem:[%s2231_s12 + $0x1cc] ss:$16 sps:$4 sm:$0xff]   ;;  %v2062_v26 = vld [vmem:[%s2231_s12 + $0x1c0] ss:$16 sps:$4 sm:$0xff]   ;;  %v2063_v27 = vld [vmem:[%s2231_s12 + $0x1c8] ss:$16 sps:$4 sm:$0xff]  }
  0x26   : > { %1821 = vmatpush3.bf16.msra.mxu1 %v1973_v31  ;;  %v2064_v28 = vld [vmem:[%s2231_s12 + $0x1e4] ss:$16 sps:$4 sm:$0xff]   ;;  %v2066_v29 = vld [vmem:[%s2231_s12 + $0x1ec] ss:$16 sps:$4 sm:$0xff]   ;;  %v2068_v30 = vld [vmem:[%s2231_s12 + $0x1e0] ss:$16 sps:$4 sm:$0xff]  }
  0x27   : > { %v2069_v31 = vld [vmem:[%s2231_s12 + $0x1e8] ss:$16 sps:$4 sm:$0xff]  }
  0x28   : > { %1009 = vmatmul.mubr.bf16.vlgmr.msra.gmra.mrb[0].mxu0 %v1974_v32 }
  0x29   : > { %1170 = vmatmul.mubr.bf16.vlgmr.msra.gmra.mrb[0].mxu1 %v1977_v34  ;;  %1016 = vmatprep.mubr.bf16.mxu0 %v1980_v36 }
  0x2a   : > { %1177 = vmatprep.mubr.bf16.mxu1 %v1982_v37 }
  0x30   : > { %1017 = vmatmul.mubr.bf16.gmra.mrb[4].mxu0 %v1984_v38 }
  0x31   : > { %1178 = vmatmul.mubr.bf16.gmra.mrb[4].mxu1 %v1985_v39  ;;  %1024 = vmatprep.mubr.bf16.mxu0 %v1986_v40 }
  0x32   : > { %1185 = vmatprep.mubr.bf16.mxu1 %v1988_v41  ;;  %v2307_v41 = vld [vmem:[%s2389_s2] ss:$0 sm:$0xff] }
  0x38   : > { %1025 = vmatmul.mubr.bf16.gmra.mrb[8].mxu0 %v1990_v42 }
  0x39   : > { %1186 = vmatmul.mubr.bf16.gmra.mrb[8].mxu1 %v1991_v43  ;;  %1032 = vmatprep.mubr.bf16.mxu0 %v1992_v44 }
  0x3a   : > { %1193 = vmatprep.mubr.bf16.mxu1 %v1994_v45 }
  0x40   : > { %1033 = vmatmul.mubr.bf16.gmra.mrb[12].mxu0 %v1996_v46 }
  0x41   : > { %1194 = vmatmul.mubr.bf16.gmra.mrb[12].mxu1 %v1997_v47  ;;  %1040 = vmatprep.mubr.bf16.mxu0 %v1998_v48 }
  0x42   : > { %1201 = vmatprep.mubr.bf16.mxu1 %v2000_v49 }
  0x48   : > { %1041 = vmatmul.mubr.bf16.gmra.mrb[16].mxu0 %v2002_v50 }
  0x49   : > { %1202 = vmatmul.mubr.bf16.gmra.mrb[16].mxu1 %v2003_v51  ;;  %1048 = vmatprep.mubr.bf16.mxu0 %v2004_v52 }
  0x4a   : > { %1209 = vmatprep.mubr.bf16.mxu1 %v2006_v53 }
  0x50   : > { %1049 = vmatmul.mubr.bf16.gmra.mrb[20].mxu0 %v2008_v54 }
  0x51   : > { %1210 = vmatmul.mubr.bf16.gmra.mrb[20].mxu1 %v2009_v55  ;;  %1056 = vmatprep.mubr.bf16.mxu0 %v2010_v56 }
  0x52   : > { %1217 = vmatprep.mubr.bf16.mxu1 %v2012_v57 }
  0x58   : > { %1057 = vmatmul.mubr.bf16.gmra.mrb[24].mxu0 %v2014_v58 }
  0x59   : > { %1218 = vmatmul.mubr.bf16.gmra.mrb[24].mxu1 %v2015_v59  ;;  %1064 = vmatprep.mubr.bf16.mxu0 %v2016_v60 }
  0x5a   : > { %1225 = vmatprep.mubr.bf16.mxu1 %v2018_v61 }
  0x60   : > { %1065 = vmatmul.mubr.bf16.gmra.mrb[28].mxu0 %v2020_v62 }
  0x61   : > { %1226 = vmatmul.mubr.bf16.gmra.mrb[28].mxu1 %v2021_v63  ;;  %1072 = vmatprep.mubr.bf16.mxu0 %v2022_v0 }
  0x62   : > { %1233 = vmatprep.mubr.bf16.mxu1 %v2024_v1 }
  0x68   : > { %1073 = vmatmul.mubr.bf16.gmra.mrb[32].mxu0 %v2026_v2 }
  0x69   : > { %1234 = vmatmul.mubr.bf16.gmra.mrb[32].mxu1 %v2027_v3  ;;  %1080 = vmatprep.mubr.bf16.mxu0 %v2028_v4 }
  0x6a   : > { %1241 = vmatprep.mubr.bf16.mxu1 %v2030_v5 }
  0x70   : > { %1081 = vmatmul.mubr.bf16.gmra.mrb[36].mxu0 %v2032_v6 }
  0x71   : > { %1242 = vmatmul.mubr.bf16.gmra.mrb[36].mxu1 %v2033_v7  ;;  %1088 = vmatprep.mubr.bf16.mxu0 %v2034_v8 }
  0x72   : > { %1249 = vmatprep.mubr.bf16.mxu1 %v2036_v9 }
  0x78   : > { %1089 = vmatmul.mubr.bf16.gmra.mrb[40].mxu0 %v2038_v10 }
  0x79   : > { %1250 = vmatmul.mubr.bf16.gmra.mrb[40].mxu1 %v2039_v11  ;;  %1096 = vmatprep.mubr.bf16.mxu0 %v2040_v12 }
  0x7a   : > { %1257 = vmatprep.mubr.bf16.mxu1 %v2042_v13 }
  0x80   : > { %1097 = vmatmul.mubr.bf16.gmra.mrb[44].mxu0 %v2044_v14 }
  0x81   : > { %1258 = vmatmul.mubr.bf16.gmra.mrb[44].mxu1 %v2045_v15  ;;  %1104 = vmatprep.mubr.bf16.mxu0 %v2046_v16 }
  0x82   : > { %1265 = vmatprep.mubr.bf16.mxu1 %v2048_v17 }
  0x88   : > { %1105 = vmatmul.mubr.bf16.gmra.mrb[48].mxu0 %v2050_v18 }
  0x89   : > { %1266 = vmatmul.mubr.bf16.gmra.mrb[48].mxu1 %v2051_v19  ;;  %1112 = vmatprep.mubr.bf16.mxu0 %v2052_v20 }
  0x8a   : > { %1273 = vmatprep.mubr.bf16.mxu1 %v2054_v21 }
  0x90   : > { %1113 = vmatmul.mubr.bf16.gmra.mrb[52].mxu0 %v2056_v22 }
  0x91   : > { %1274 = vmatmul.mubr.bf16.gmra.mrb[52].mxu1 %v2057_v23  ;;  %1120 = vmatprep.mubr.bf16.mxu0 %v2058_v24 }
  0x92   : > { %1281 = vmatprep.mubr.bf16.mxu1 %v2060_v25 }
  0x98   : > { %1121 = vmatmul.mubr.bf16.gmra.mrb[56].mxu0 %v2062_v26 }
  0x99   : > { %1282 = vmatmul.mubr.bf16.gmra.mrb[56].mxu1 %v2063_v27  ;;  %1128 = vmatprep.mubr.bf16.mxu0 %v2064_v28 }
  0x9a   : > { %1289 = vmatprep.mubr.bf16.mxu1 %v2066_v29 }
  0xa0   : > { %1129 = vmatmul.mubr.bf16.gmra.mrb[60].mxu0 %v2068_v30 }
  0xa1   : > { %1290 = vmatmul.mubr.bf16.gmra.mrb[60].mxu1 %v2069_v31 }
  0xfb   : > { %v1710_v32 = vpop.f32.mrb[0].mxu0 }
  0xfc   : > { %v1822_v33 = vpop.f32.mrb[0].mxu1  ;;  %v1711_v34 = vpop.f32.mrb[1].mxu0 }
  0xfd   : > { %v1712_v35 = vadd.f32 %v1711_v34, %v1710_v32  ;;  %v1823_v36 = vpop.f32.mrb[1].mxu1  ;;  %v1713_v37 = vpop.f32.mrb[2].mxu0 }
  0xfe   : > { %v1824_v38 = vadd.f32 %v1823_v36, %v1822_v33  ;;  %v1825_v39 = vpop.f32.mrb[2].mxu1  ;;  %v1714_v40 = vpop.f32.mrb[3].mxu0 }
  0xff   : > { %v1715_v42 = vadd.f32 %v1714_v40, %v1713_v37  ;;  %v1826_v43 = vpop.f32.mrb[3].mxu1 }
 0x100   : > { %v1172_v44 = vadd.f32 %v1824_v38, %v1712_v35  ;;  %v1827_v45 = vadd.f32 %v1826_v43, %v1825_v39 }
 0x102   : > { %v1404_v46 = vadd.f32 %v2307_v41, %v1172_v44  ;;  %v1175_v47 = vadd.f32 %v1827_v45, %v1715_v42 }
 0x103   : > { %v1716_v48 = vpop.f32.mrb[4].mxu0 }
 0x104   : > { %1436 = vst [vmem:[%s2312_s20] sm:$0xff] %v1404_v46  ;;  %v1405_v49 = vadd.f32 %v2307_v41, %v1175_v47  ;;  %v1828_v50 = vpop.f32.mrb[4].mxu1  ;;  %v1717_v51 = vpop.f32.mrb[5].mxu0 }
 0x105   : > { %v1718_v52 = vadd.f32 %v1717_v51, %v1716_v48  ;;  %v1829_v53 = vpop.f32.mrb[5].mxu1  ;;  %v1719_v54 = vpop.f32.mrb[6].mxu0 }
 0x106   : > { %1437 = vst [vmem:[%s2312_s20 + $0x8] sm:$0xff] %v1405_v49  ;;  %v1830_v55 = vadd.f32 %v1829_v53, %v1828_v50  ;;  %v1831_v56 = vpop.f32.mrb[6].mxu1  ;;  %v1720_v57 = vpop.f32.mrb[7].mxu0 }
 0x107   : > { %v1721_v58 = vadd.f32 %v1720_v57, %v1719_v54  ;;  %v1832_v59 = vpop.f32.mrb[7].mxu1 }
 0x108   : > { %v1180_v60 = vadd.f32 %v1830_v55, %v1718_v52  ;;  %v1833_v61 = vadd.f32 %v1832_v59, %v1831_v56 }
 0x10a   : > { %v1406_v62 = vadd.f32 %v2307_v41, %v1180_v60  ;;  %v1183_v63 = vadd.f32 %v1833_v61, %v1721_v58 }
 0x10b   : > { %v1722_v0 = vpop.f32.mrb[8].mxu0 }
 0x10c   : > { %1438 = vst [vmem:[%s2312_s20 + $0x10] sm:$0xff] %v1406_v62  ;;  %v1407_v1 = vadd.f32 %v2307_v41, %v1183_v63  ;;  %v1834_v2 = vpop.f32.mrb[8].mxu1  ;;  %v1723_v3 = vpop.f32.mrb[9].mxu0 }
 0x10d   : > { %v1724_v4 = vadd.f32 %v1723_v3, %v1722_v0  ;;  %v1835_v5 = vpop.f32.mrb[9].mxu1  ;;  %v1725_v6 = vpop.f32.mrb[10].mxu0 }
 0x10e   : > { %1439 = vst [vmem:[%s2312_s20 + $0x18] sm:$0xff] %v1407_v1  ;;  %v1836_v7 = vadd.f32 %v1835_v5, %v1834_v2  ;;  %v1837_v8 = vpop.f32.mrb[10].mxu1  ;;  %v1726_v9 = vpop.f32.mrb[11].mxu0 }
 0x10f   : > { %v1727_v10 = vadd.f32 %v1726_v9, %v1725_v6  ;;  %v1838_v11 = vpop.f32.mrb[11].mxu1 }
 0x110   : > { %v1188_v12 = vadd.f32 %v1836_v7, %v1724_v4  ;;  %v1839_v13 = vadd.f32 %v1838_v11, %v1837_v8 }
 0x112   : > { %v1408_v14 = vadd.f32 %v2307_v41, %v1188_v12  ;;  %v1191_v15 = vadd.f32 %v1839_v13, %v1727_v10 }
 0x113   : > { %v1728_v16 = vpop.f32.mrb[12].mxu0 }
 0x114   : > { %1440 = vst [vmem:[%s2312_s20 + $0x20] sm:$0xff] %v1408_v14  ;;  %v1409_v17 = vadd.f32 %v2307_v41, %v1191_v15  ;;  %v1840_v18 = vpop.f32.mrb[12].mxu1  ;;  %v1729_v19 = vpop.f32.mrb[13].mxu0 }
 0x115   : > { %v1730_v20 = vadd.f32 %v1729_v19, %v1728_v16  ;;  %v1841_v21 = vpop.f32.mrb[13].mxu1  ;;  %v1731_v22 = vpop.f32.mrb[14].mxu0 }
 0x116   : > { %1441 = vst [vmem:[%s2312_s20 + $0x28] sm:$0xff] %v1409_v17  ;;  %v1842_v23 = vadd.f32 %v1841_v21, %v1840_v18  ;;  %v1843_v24 = vpop.f32.mrb[14].mxu1  ;;  %v1732_v25 = vpop.f32.mrb[15].mxu0 }
 0x117   : > { %v1733_v26 = vadd.f32 %v1732_v25, %v1731_v22  ;;  %v1844_v27 = vpop.f32.mrb[15].mxu1 }
 0x118   : > { %v1196_v28 = vadd.f32 %v1842_v23, %v1730_v20  ;;  %v1845_v29 = vadd.f32 %v1844_v27, %v1843_v24 }
 0x11a   : > { %v1410_v30 = vadd.f32 %v2307_v41, %v1196_v28  ;;  %v1199_v31 = vadd.f32 %v1845_v29, %v1733_v26 }
 0x11b   : > { %v1734_v32 = vpop.f32.mrb[16].mxu0 }
 0x11c   : > { %1442 = vst [vmem:[%s2312_s20 + $0x30] sm:$0xff] %v1410_v30  ;;  %v1411_v33 = vadd.f32 %v2307_v41, %v1199_v31  ;;  %v1846_v34 = vpop.f32.mrb[16].mxu1  ;;  %v1735_v35 = vpop.f32.mrb[17].mxu0 }
 0x11d   : > { %v1736_v36 = vadd.f32 %v1735_v35, %v1734_v32  ;;  %v1847_v37 = vpop.f32.mrb[17].mxu1  ;;  %v1737_v38 = vpop.f32.mrb[18].mxu0 }
 0x11e   : > { %1443 = vst [vmem:[%s2312_s20 + $0x38] sm:$0xff] %v1411_v33  ;;  %v1848_v39 = vadd.f32 %v1847_v37, %v1846_v34  ;;  %v1849_v40 = vpop.f32.mrb[18].mxu1  ;;  %v1738_v42 = vpop.f32.mrb[19].mxu0 }
 0x11f   : > { %v1739_v43 = vadd.f32 %v1738_v42, %v1737_v38  ;;  %v1850_v44 = vpop.f32.mrb[19].mxu1 }
 0x120   : > { %v1204_v45 = vadd.f32 %v1848_v39, %v1736_v36  ;;  %v1851_v46 = vadd.f32 %v1850_v44, %v1849_v40 }
 0x122   : > { %v1412_v47 = vadd.f32 %v2307_v41, %v1204_v45  ;;  %v1207_v48 = vadd.f32 %v1851_v46, %v1739_v43 }
 0x123   : > { %v1740_v49 = vpop.f32.mrb[20].mxu0 }
 0x124   : > { %1444 = vst [vmem:[%s2312_s20 + $0x40] sm:$0xff] %v1412_v47  ;;  %v1413_v50 = vadd.f32 %v2307_v41, %v1207_v48  ;;  %v1852_v51 = vpop.f32.mrb[20].mxu1  ;;  %v1741_v52 = vpop.f32.mrb[21].mxu0 }
 0x125   : > { %v1742_v53 = vadd.f32 %v1741_v52, %v1740_v49  ;;  %v1853_v54 = vpop.f32.mrb[21].mxu1  ;;  %v1743_v55 = vpop.f32.mrb[22].mxu0 }
 0x126   : > { %1445 = vst [vmem:[%s2312_s20 + $0x48] sm:$0xff] %v1413_v50  ;;  %v1854_v56 = vadd.f32 %v1853_v54, %v1852_v51  ;;  %v1855_v57 = vpop.f32.mrb[22].mxu1  ;;  %v1744_v58 = vpop.f32.mrb[23].mxu0 }
 0x127   : > { %v1745_v59 = vadd.f32 %v1744_v58, %v1743_v55  ;;  %v1856_v60 = vpop.f32.mrb[23].mxu1 }
 0x128   : > { %v1212_v61 = vadd.f32 %v1854_v56, %v1742_v53  ;;  %v1857_v62 = vadd.f32 %v1856_v60, %v1855_v57 }
 0x12a   : > { %v1414_v63 = vadd.f32 %v2307_v41, %v1212_v61  ;;  %v1215_v0 = vadd.f32 %v1857_v62, %v1745_v59 }
 0x12b   : > { %v1746_v1 = vpop.f32.mrb[24].mxu0 }
 0x12c   : > { %1446 = vst [vmem:[%s2312_s20 + $0x50] sm:$0xff] %v1414_v63  ;;  %v1415_v2 = vadd.f32 %v2307_v41, %v1215_v0  ;;  %v1858_v3 = vpop.f32.mrb[24].mxu1  ;;  %v1747_v4 = vpop.f32.mrb[25].mxu0 }
 0x12d   : > { %v1748_v5 = vadd.f32 %v1747_v4, %v1746_v1  ;;  %v1859_v6 = vpop.f32.mrb[25].mxu1  ;;  %v1749_v7 = vpop.f32.mrb[26].mxu0 }
 0x12e   : > { %1447 = vst [vmem:[%s2312_s20 + $0x58] sm:$0xff] %v1415_v2  ;;  %v1860_v8 = vadd.f32 %v1859_v6, %v1858_v3  ;;  %v1861_v9 = vpop.f32.mrb[26].mxu1  ;;  %v1750_v10 = vpop.f32.mrb[27].mxu0 }
 0x12f   : > { %v1751_v11 = vadd.f32 %v1750_v10, %v1749_v7  ;;  %v1862_v12 = vpop.f32.mrb[27].mxu1 }
 0x130   : > { %v1220_v13 = vadd.f32 %v1860_v8, %v1748_v5  ;;  %v1863_v14 = vadd.f32 %v1862_v12, %v1861_v9 }
 0x132   : > { %v1416_v15 = vadd.f32 %v2307_v41, %v1220_v13  ;;  %v1223_v16 = vadd.f32 %v1863_v14, %v1751_v11 }
 0x133   : > { %v1752_v17 = vpop.f32.mrb[28].mxu0 }
 0x134   : > { %1448 = vst [vmem:[%s2312_s20 + $0x60] sm:$0xff] %v1416_v15  ;;  %v1417_v18 = vadd.f32 %v2307_v41, %v1223_v16  ;;  %v1864_v19 = vpop.f32.mrb[28].mxu1  ;;  %v1753_v20 = vpop.f32.mrb[29].mxu0 }
 0x135   : > { %v1754_v21 = vadd.f32 %v1753_v20, %v1752_v17  ;;  %v1865_v22 = vpop.f32.mrb[29].mxu1  ;;  %v1755_v23 = vpop.f32.mrb[30].mxu0 }
 0x136   : > { %1449 = vst [vmem:[%s2312_s20 + $0x68] sm:$0xff] %v1417_v18  ;;  %v1866_v24 = vadd.f32 %v1865_v22, %v1864_v19  ;;  %v1867_v25 = vpop.f32.mrb[30].mxu1  ;;  %v1756_v26 = vpop.f32.mrb[31].mxu0 }
 0x137   : > { %v1757_v27 = vadd.f32 %v1756_v26, %v1755_v23  ;;  %v1868_v28 = vpop.f32.mrb[31].mxu1 }
 0x138   : > { %v1228_v29 = vadd.f32 %v1866_v24, %v1754_v21  ;;  %v1869_v30 = vadd.f32 %v1868_v28, %v1867_v25 }
 0x13a   : > { %v1418_v31 = vadd.f32 %v2307_v41, %v1228_v29  ;;  %v1231_v32 = vadd.f32 %v1869_v30, %v1757_v27 }
 0x13b   : > { %v1758_v33 = vpop.f32.mrb[32].mxu0 }
 0x13c   : > { %1450 = vst [vmem:[%s2312_s20 + $0x70] sm:$0xff] %v1418_v31  ;;  %v1419_v34 = vadd.f32 %v2307_v41, %v1231_v32  ;;  %v1870_v35 = vpop.f32.mrb[32].mxu1  ;;  %v1759_v36 = vpop.f32.mrb[33].mxu0 }
 0x13d   : > { %v1760_v37 = vadd.f32 %v1759_v36, %v1758_v33  ;;  %v1871_v38 = vpop.f32.mrb[33].mxu1  ;;  %v1761_v39 = vpop.f32.mrb[34].mxu0 }
 0x13e   : > { %1451 = vst [vmem:[%s2312_s20 + $0x78] sm:$0xff] %v1419_v34  ;;  %v1872_v40 = vadd.f32 %v1871_v38, %v1870_v35  ;;  %v1873_v42 = vpop.f32.mrb[34].mxu1  ;;  %v1762_v43 = vpop.f32.mrb[35].mxu0 }
 0x13f   : > { %v1763_v44 = vadd.f32 %v1762_v43, %v1761_v39  ;;  %v1874_v45 = vpop.f32.mrb[35].mxu1 }
 0x140   : > { %v1236_v46 = vadd.f32 %v1872_v40, %v1760_v37  ;;  %v1875_v47 = vadd.f32 %v1874_v45, %v1873_v42 }
 0x142   : > { %v1420_v48 = vadd.f32 %v2307_v41, %v1236_v46  ;;  %v1239_v49 = vadd.f32 %v1875_v47, %v1763_v44 }
 0x143   : > { %v1764_v50 = vpop.f32.mrb[36].mxu0 }
 0x144   : > { %1452 = vst [vmem:[%s2312_s20 + $0x80] sm:$0xff] %v1420_v48  ;;  %v1421_v51 = vadd.f32 %v2307_v41, %v1239_v49  ;;  %v1876_v52 = vpop.f32.mrb[36].mxu1  ;;  %v1765_v53 = vpop.f32.mrb[37].mxu0 }
 0x145   : > { %v1766_v54 = vadd.f32 %v1765_v53, %v1764_v50  ;;  %v1877_v55 = vpop.f32.mrb[37].mxu1  ;;  %v1767_v56 = vpop.f32.mrb[38].mxu0 }
 0x146   : > { %1453 = vst [vmem:[%s2312_s20 + $0x88] sm:$0xff] %v1421_v51  ;;  %v1878_v57 = vadd.f32 %v1877_v55, %v1876_v52  ;;  %v1879_v58 = vpop.f32.mrb[38].mxu1  ;;  %v1768_v59 = vpop.f32.mrb[39].mxu0 }
 0x147   : > { %v1769_v60 = vadd.f32 %v1768_v59, %v1767_v56  ;;  %v1880_v61 = vpop.f32.mrb[39].mxu1 }
 0x148   : > { %v1244_v62 = vadd.f32 %v1878_v57, %v1766_v54  ;;  %v1881_v63 = vadd.f32 %v1880_v61, %v1879_v58 }
 0x14a   : > { %v1422_v0 = vadd.f32 %v2307_v41, %v1244_v62  ;;  %v1247_v1 = vadd.f32 %v1881_v63, %v1769_v60 }
 0x14b   : > { %v1770_v2 = vpop.f32.mrb[40].mxu0 }
 0x14c   : > { %1454 = vst [vmem:[%s2312_s20 + $0x90] sm:$0xff] %v1422_v0  ;;  %v1423_v3 = vadd.f32 %v2307_v41, %v1247_v1  ;;  %v1882_v4 = vpop.f32.mrb[40].mxu1  ;;  %v1771_v5 = vpop.f32.mrb[41].mxu0 }
 0x14d   : > { %v1772_v6 = vadd.f32 %v1771_v5, %v1770_v2  ;;  %v1883_v7 = vpop.f32.mrb[41].mxu1  ;;  %v1773_v8 = vpop.f32.mrb[42].mxu0 }
 0x14e   : > { %1455 = vst [vmem:[%s2312_s20 + $0x98] sm:$0xff] %v1423_v3  ;;  %v1884_v9 = vadd.f32 %v1883_v7, %v1882_v4  ;;  %v1885_v10 = vpop.f32.mrb[42].mxu1  ;;  %v1774_v11 = vpop.f32.mrb[43].mxu0 }
 0x14f   : > { %v1775_v12 = vadd.f32 %v1774_v11, %v1773_v8  ;;  %v1886_v13 = vpop.f32.mrb[43].mxu1 }
 0x150   : > { %v1252_v14 = vadd.f32 %v1884_v9, %v1772_v6  ;;  %v1887_v15 = vadd.f32 %v1886_v13, %v1885_v10 }
 0x152   : > { %v1424_v16 = vadd.f32 %v2307_v41, %v1252_v14  ;;  %v1255_v17 = vadd.f32 %v1887_v15, %v1775_v12 }
 0x153   : > { %v1776_v18 = vpop.f32.mrb[44].mxu0 }
 0x154   : > { %1456 = vst [vmem:[%s2312_s20 + $0xa0] sm:$0xff] %v1424_v16  ;;  %v1425_v19 = vadd.f32 %v2307_v41, %v1255_v17  ;;  %v1888_v20 = vpop.f32.mrb[44].mxu1  ;;  %v1777_v21 = vpop.f32.mrb[45].mxu0 }
 0x155   : > { %v1778_v22 = vadd.f32 %v1777_v21, %v1776_v18  ;;  %v1889_v23 = vpop.f32.mrb[45].mxu1  ;;  %v1779_v24 = vpop.f32.mrb[46].mxu0 }
 0x156   : > { %1457 = vst [vmem:[%s2312_s20 + $0xa8] sm:$0xff] %v1425_v19  ;;  %v1890_v25 = vadd.f32 %v1889_v23, %v1888_v20  ;;  %v1891_v26 = vpop.f32.mrb[46].mxu1  ;;  %v1780_v27 = vpop.f32.mrb[47].mxu0 }
 0x157   : > { %v1781_v28 = vadd.f32 %v1780_v27, %v1779_v24  ;;  %v1892_v29 = vpop.f32.mrb[47].mxu1 }
 0x158   : > { %v1260_v30 = vadd.f32 %v1890_v25, %v1778_v22  ;;  %v1893_v31 = vadd.f32 %v1892_v29, %v1891_v26 }
 0x15a   : > { %v1426_v32 = vadd.f32 %v2307_v41, %v1260_v30  ;;  %v1263_v33 = vadd.f32 %v1893_v31, %v1781_v28 }
 0x15b   : > { %v1782_v34 = vpop.f32.mrb[48].mxu0 }
 0x15c   : > { %1458 = vst [vmem:[%s2312_s20 + $0xb0] sm:$0xff] %v1426_v32  ;;  %v1427_v35 = vadd.f32 %v2307_v41, %v1263_v33  ;;  %v1894_v36 = vpop.f32.mrb[48].mxu1  ;;  %v1783_v37 = vpop.f32.mrb[49].mxu0 }
 0x15d   : > { %v1784_v38 = vadd.f32 %v1783_v37, %v1782_v34  ;;  %v1895_v39 = vpop.f32.mrb[49].mxu1  ;;  %v1785_v40 = vpop.f32.mrb[50].mxu0 }
 0x15e   : > { %1459 = vst [vmem:[%s2312_s20 + $0xb8] sm:$0xff] %v1427_v35  ;;  %v1896_v42 = vadd.f32 %v1895_v39, %v1894_v36  ;;  %v1897_v43 = vpop.f32.mrb[50].mxu1  ;;  %v1786_v44 = vpop.f32.mrb[51].mxu0 }
 0x15f   : > { %v1787_v45 = vadd.f32 %v1786_v44, %v1785_v40  ;;  %v1898_v46 = vpop.f32.mrb[51].mxu1 }
 0x160   : > { %v1268_v47 = vadd.f32 %v1896_v42, %v1784_v38  ;;  %v1899_v48 = vadd.f32 %v1898_v46, %v1897_v43 }
 0x162   : > { %v1428_v49 = vadd.f32 %v2307_v41, %v1268_v47  ;;  %v1271_v50 = vadd.f32 %v1899_v48, %v1787_v45 }
 0x163   : > { %v1788_v51 = vpop.f32.mrb[52].mxu0 }
 0x164   : > { %1460 = vst [vmem:[%s2312_s20 + $0xc0] sm:$0xff] %v1428_v49  ;;  %v1429_v52 = vadd.f32 %v2307_v41, %v1271_v50  ;;  %v1900_v53 = vpop.f32.mrb[52].mxu1  ;;  %v1789_v54 = vpop.f32.mrb[53].mxu0 }
 0x165   : > { %v1790_v55 = vadd.f32 %v1789_v54, %v1788_v51  ;;  %v1901_v56 = vpop.f32.mrb[53].mxu1  ;;  %v1791_v57 = vpop.f32.mrb[54].mxu0 }
 0x166   : > { %1461 = vst [vmem:[%s2312_s20 + $0xc8] sm:$0xff] %v1429_v52  ;;  %v1902_v58 = vadd.f32 %v1901_v56, %v1900_v53  ;;  %v1903_v59 = vpop.f32.mrb[54].mxu1  ;;  %v1792_v60 = vpop.f32.mrb[55].mxu0 }
 0x167   : > { %v1793_v61 = vadd.f32 %v1792_v60, %v1791_v57  ;;  %v1904_v62 = vpop.f32.mrb[55].mxu1 }
 0x168   : > { %v1276_v63 = vadd.f32 %v1902_v58, %v1790_v55  ;;  %v1905_v0 = vadd.f32 %v1904_v62, %v1903_v59 }
 0x16a   : > { %v1430_v1 = vadd.f32 %v2307_v41, %v1276_v63  ;;  %v1279_v2 = vadd.f32 %v1905_v0, %v1793_v61 }
 0x16b   : > { %v1794_v3 = vpop.f32.mrb[56].mxu0 }
 0x16c   : > { %1462 = vst [vmem:[%s2312_s20 + $0xd0] sm:$0xff] %v1430_v1  ;;  %v1431_v4 = vadd.f32 %v2307_v41, %v1279_v2  ;;  %v1906_v5 = vpop.f32.mrb[56].mxu1  ;;  %v1795_v6 = vpop.f32.mrb[57].mxu0 }
 0x16d   : > { %v1796_v7 = vadd.f32 %v1795_v6, %v1794_v3  ;;  %v1907_v8 = vpop.f32.mrb[57].mxu1  ;;  %v1797_v9 = vpop.f32.mrb[58].mxu0 }
 0x16e   : > { %1463 = vst [vmem:[%s2312_s20 + $0xd8] sm:$0xff] %v1431_v4  ;;  %v1908_v10 = vadd.f32 %v1907_v8, %v1906_v5  ;;  %v1909_v11 = vpop.f32.mrb[58].mxu1  ;;  %v1798_v12 = vpop.f32.mrb[59].mxu0 }
 0x16f   : > { %v1799_v13 = vadd.f32 %v1798_v12, %v1797_v9  ;;  %v1910_v14 = vpop.f32.mrb[59].mxu1 }
 0x170   : > { %v1284_v15 = vadd.f32 %v1908_v10, %v1796_v7  ;;  %v1911_v16 = vadd.f32 %v1910_v14, %v1909_v11 }
 0x172   : > { %v1432_v17 = vadd.f32 %v2307_v41, %v1284_v15  ;;  %v1287_v18 = vadd.f32 %v1911_v16, %v1799_v13 }
 0x173   : > { %v1800_v19 = vpop.f32.mrb[60].mxu0 }
 0x174   : > { %1464 = vst [vmem:[%s2312_s20 + $0xe0] sm:$0xff] %v1432_v17  ;;  %v1433_v20 = vadd.f32 %v2307_v41, %v1287_v18  ;;  %v1912_v21 = vpop.f32.mrb[60].mxu1  ;;  %v1801_v22 = vpop.f32.mrb[61].mxu0 }
 0x175   : > { %v1802_v23 = vadd.f32 %v1801_v22, %v1800_v19  ;;  %v1913_v24 = vpop.f32.mrb[61].mxu1  ;;  %v1803_v25 = vpop.f32.mrb[62].mxu0 }
 0x176   : > { %1465 = vst [vmem:[%s2312_s20 + $0xe8] sm:$0xff] %v1433_v20  ;;  %v1914_v26 = vadd.f32 %v1913_v24, %v1912_v21  ;;  %v1915_v27 = vpop.f32.mrb[62].mxu1  ;;  %v1804_v28 = vpop.f32.mrb[63].mxu0 }
 0x177   : > { %v1805_v29 = vadd.f32 %v1804_v28, %v1803_v25  ;;  %v1916_v30 = vpop.f32.mrb[63].mxu1 }
 0x178   : > { %v1292_v31 = vadd.f32 %v1914_v26, %v1802_v23  ;;  %v1917_v32 = vadd.f32 %v1916_v30, %v1915_v27 }
 0x17a   : > { %v1434_v33 = vadd.f32 %v2307_v41, %v1292_v31  ;;  %v1295_v34 = vadd.f32 %v1917_v32, %v1805_v29 }
 0x17c   : > { %1466 = vst [vmem:[%s2312_s20 + $0xf0] sm:$0xff] %v1434_v33  ;;  %v1435_v35 = vadd.f32 %v2307_v41, %v1295_v34 }
 0x17e   : > { %1467 = vst [vmem:[%s2312_s20 + $0xf8] sm:$0xff] %v1435_v35 }
 0x17f PF: > { %s13_s14 = sadd.s32 1, %s2092_s14   ;;  %s2391_s12 = smov %s2088_s13 }
 0x180   : > { %p10_p5 = scmp.ge.s32.totalorder %s13_s14, 6   ;;  %s2392_s13 = smov %s2394_s15 }
 0x182   :  { %12 = sbr.rel (!%p10_p5) target bundleno = 2 (0x2), region = 76 }

// kernel: global_generator_forward.171
= control target key start
LH: loop header
LB: loop body
LE: loop exit
PB: predicated region body
PF: predicated region fallthrough
CT: control target
= control target key end

     0   :  { %vm264_vm0 = vcmask 23552   ;;  %s1559_s0 = inlined_call_operand.vmem [shape: f32[1,1024,3], index: 0, kind: input, shape index: {}]   ;;  %s1560_s1 = inlined_call_operand.vmem [shape: f32[1,1024,3], index: 1, kind: output, shape index: {}]  }
   0x1   :  { %v8_v0 = vld [vmem:[%s1559_s0] sm:$0xff]  ;;  %v9_v1 = vld [vmem:[%s1559_s0 + $0x8] sm:$0xff]  ;;  %v10_v2 = vld [vmem:[%s1559_s0 + $0x10] sm:$0xff] }
   0x2   :  { %397 = vtanh.f32 %v8_v0  ;;  %v11_v3 = vld [vmem:[%s1559_s0 + $0x18] sm:$0xff]  ;;  %v12_v4 = vld [vmem:[%s1559_s0 + $0x20] sm:$0xff]  ;;  %v13_v5 = vld [vmem:[%s1559_s0 + $0x28] sm:$0xff] }
   0x3   :  { %399 = vtanh.f32 %v9_v1  ;;  %v14_v6 = vld [vmem:[%s1559_s0 + $0x30] sm:$0xff]  ;;  %v15_v7 = vld [vmem:[%s1559_s0 + $0x38] sm:$0xff]  ;;  %v16_v8 = vld [vmem:[%s1559_s0 + $0x40] sm:$0xff] }
   0x4   :  { %401 = vtanh.f32 %v10_v2  ;;  %v17_v9 = vld [vmem:[%s1559_s0 + $0x48] sm:$0xff]  ;;  %v18_v10 = vld [vmem:[%s1559_s0 + $0x50] sm:$0xff]  ;;  %v19_v11 = vld [vmem:[%s1559_s0 + $0x58] sm:$0xff] }
   0x5   :  { %403 = vtanh.f32 %v11_v3  ;;  %v20_v12 = vld [vmem:[%s1559_s0 + $0x60] sm:$0xff]  ;;  %v21_v14 = vld [vmem:[%s1559_s0 + $0x68] sm:$0xff]  ;;  %v22_v16 = vld [vmem:[%s1559_s0 + $0x70] sm:$0xff] }
   0x6   :  { %405 = vtanh.f32 %v12_v4  ;;  %v23_v18 = vld [vmem:[%s1559_s0 + $0x78] sm:$0xff]  ;;  %v24_v20 = vld [vmem:[%s1559_s0 + $0x80] sm:$0xff]  ;;  %v25_v22 = vld [vmem:[%s1559_s0 + $0x88] sm:$0xff] }
   0x7   :  { %407 = vtanh.f32 %v13_v5  ;;  %v26_v24 = vld [vmem:[%s1559_s0 + $0x90] sm:$0xff]  ;;  %v27_v26 = vld [vmem:[%s1559_s0 + $0x98] sm:$0xff]  ;;  %v28_v28 = vld [vmem:[%s1559_s0 + $0xa0] sm:$0xff] }
   0x8   :  { %409 = vtanh.f32 %v14_v6  ;;  %v29_v30 = vld [vmem:[%s1559_s0 + $0xa8] sm:$0xff]  ;;  %v30_v32 = vld [vmem:[%s1559_s0 + $0xb0] sm:$0xff]  ;;  %v31_v34 = vld [vmem:[%s1559_s0 + $0xb8] sm:$0xff] }
   0x9   :  { %411 = vtanh.f32 %v15_v7  ;;  %v32_v36 = vld [vmem:[%s1559_s0 + $0xc0] sm:$0xff]  ;;  %v33_v38 = vld [vmem:[%s1559_s0 + $0xc8] sm:$0xff]  ;;  %v34_v40 = vld [vmem:[%s1559_s0 + $0xd0] sm:$0xff] }
   0xa   :  { %413 = vtanh.f32 %v16_v8  ;;  %v35_v42 = vld [vmem:[%s1559_s0 + $0xd8] sm:$0xff]  ;;  %v36_v44 = vld [vmem:[%s1559_s0 + $0xe0] sm:$0xff]  ;;  %v37_v46 = vld [vmem:[%s1559_s0 + $0xe8] sm:$0xff] }
   0xb   :  { %415 = vtanh.f32 %v17_v9  ;;  %v38_v48 = vld [vmem:[%s1559_s0 + $0xf0] sm:$0xff]  ;;  %v39_v50 = vld [vmem:[%s1559_s0 + $0xf8] sm:$0xff]  ;;  %v40_v52 = vld [vmem:[%s1559_s0 + $0x100] sm:$0xff] }
   0xc   :  { %v398_v13 = vpop.eup %397  ;;  %417 = vtanh.f32 %v18_v10  ;;  %v41_v54 = vld [vmem:[%s1559_s0 + $0x108] sm:$0xff]  ;;  %v42_v56 = vld [vmem:[%s1559_s0 + $0x110] sm:$0xff]  ;;  %v43_v58 = vld [vmem:[%s1559_s0 + $0x118] sm:$0xff] }
   0xd   :  { %v400_v15 = vpop.eup %399  ;;  %265 = vst.msk [vmem:[%s1560_s1] sm:$0xff] %vm264_vm0, %v398_v13  ;;  %419 = vtanh.f32 %v19_v11  ;;  %v44_v60 = vld [vmem:[%s1559_s0 + $0x120] sm:$0xff]  ;;  %v45_v62 = vld [vmem:[%s1559_s0 + $0x128] sm:$0xff]  ;;  %v46_v0 = vld [vmem:[%s1559_s0 + $0x130] sm:$0xff] }
   0xe   :  { %v402_v17 = vpop.eup %401  ;;  %266 = vst.msk [vmem:[%s1560_s1 + $0x8] sm:$0xff] %vm264_vm0, %v400_v15  ;;  %421 = vtanh.f32 %v20_v12  ;;  %v47_v2 = vld [vmem:[%s1559_s0 + $0x138] sm:$0xff]  ;;  %v48_v4 = vld [vmem:[%s1559_s0 + $0x140] sm:$0xff]  ;;  %v49_v6 = vld [vmem:[%s1559_s0 + $0x148] sm:$0xff] }
   0xf   :  { %v404_v19 = vpop.eup %403  ;;  %267 = vst.msk [vmem:[%s1560_s1 + $0x10] sm:$0xff] %vm264_vm0, %v402_v17  ;;  %423 = vtanh.f32 %v21_v14  ;;  %v50_v8 = vld [vmem:[%s1559_s0 + $0x150] sm:$0xff]  ;;  %v51_v10 = vld [vmem:[%s1559_s0 + $0x158] sm:$0xff]  ;;  %v52_v12 = vld [vmem:[%s1559_s0 + $0x160] sm:$0xff] }
  0x10   :  { %v406_v21 = vpop.eup %405  ;;  %268 = vst.msk [vmem:[%s1560_s1 + $0x18] sm:$0xff] %vm264_vm0, %v404_v19  ;;  %425 = vtanh.f32 %v22_v16  ;;  %v53_v14 = vld [vmem:[%s1559_s0 + $0x168] sm:$0xff]  ;;  %v54_v16 = vld [vmem:[%s1559_s0 + $0x170] sm:$0xff] }
  0x11   :  { %v408_v23 = vpop.eup %407  ;;  %269 = vst.msk [vmem:[%s1560_s1 + $0x20] sm:$0xff] %vm264_vm0, %v406_v21  ;;  %427 = vtanh.f32 %v23_v18  ;;  %v55_v18 = vld [vmem:[%s1559_s0 + $0x178] sm:$0xff] }
  0x12   :  { %v410_v25 = vpop.eup %409  ;;  %270 = vst.msk [vmem:[%s1560_s1 + $0x28] sm:$0xff] %vm264_vm0, %v408_v23  ;;  %429 = vtanh.f32 %v24_v20  ;;  %v56_v20 = vld [vmem:[%s1559_s0 + $0x180] sm:$0xff] }
  0x13   :  { %v412_v27 = vpop.eup %411  ;;  %271 = vst.msk [vmem:[%s1560_s1 + $0x30] sm:$0xff] %vm264_vm0, %v410_v25  ;;  %431 = vtanh.f32 %v25_v22  ;;  %v57_v22 = vld [vmem:[%s1559_s0 + $0x188] sm:$0xff] }
  0x14   :  { %v414_v29 = vpop.eup %413  ;;  %272 = vst.msk [vmem:[%s1560_s1 + $0x38] sm:$0xff] %vm264_vm0, %v412_v27  ;;  %433 = vtanh.f32 %v26_v24  ;;  %v58_v24 = vld [vmem:[%s1559_s0 + $0x190] sm:$0xff] }
  0x15   :  { %v416_v31 = vpop.eup %415  ;;  %273 = vst.msk [vmem:[%s1560_s1 + $0x40] sm:$0xff] %vm264_vm0, %v414_v29  ;;  %435 = vtanh.f32 %v27_v26  ;;  %v59_v26 = vld [vmem:[%s1559_s0 + $0x198] sm:$0xff] }
  0x16   :  { %v418_v33 = vpop.eup %417  ;;  %274 = vst.msk [vmem:[%s1560_s1 + $0x48] sm:$0xff] %vm264_vm0, %v416_v31  ;;  %437 = vtanh.f32 %v28_v28  ;;  %v60_v28 = vld [vmem:[%s1559_s0 + $0x1a0] sm:$0xff] }
  0x17   :  { %v420_v35 = vpop.eup %419  ;;  %275 = vst.msk [vmem:[%s1560_s1 + $0x50] sm:$0xff] %vm264_vm0, %v418_v33  ;;  %439 = vtanh.f32 %v29_v30  ;;  %v61_v30 = vld [vmem:[%s1559_s0 + $0x1a8] sm:$0xff] }
  0x18   :  { %v422_v37 = vpop.eup %421  ;;  %276 = vst.msk [vmem:[%s1560_s1 + $0x58] sm:$0xff] %vm264_vm0, %v420_v35  ;;  %441 = vtanh.f32 %v30_v32  ;;  %v62_v32 = vld [vmem:[%s1559_s0 + $0x1b0] sm:$0xff] }
  0x19   :  { %v424_v39 = vpop.eup %423  ;;  %277 = vst.msk [vmem:[%s1560_s1 + $0x60] sm:$0xff] %vm264_vm0, %v422_v37  ;;  %443 = vtanh.f32 %v31_v34  ;;  %v63_v34 = vld [vmem:[%s1559_s0 + $0x1b8] sm:$0xff] }
  0x1a   :  { %v426_v41 = vpop.eup %425  ;;  %278 = vst.msk [vmem:[%s1560_s1 + $0x68] sm:$0xff] %vm264_vm0, %v424_v39  ;;  %445 = vtanh.f32 %v32_v36  ;;  %v64_v36 = vld [vmem:[%s1559_s0 + $0x1c0] sm:$0xff] }
  0x1b   :  { %v428_v43 = vpop.eup %427  ;;  %279 = vst.msk [vmem:[%s1560_s1 + $0x70] sm:$0xff] %vm264_vm0, %v426_v41  ;;  %447 = vtanh.f32 %v33_v38  ;;  %v65_v38 = vld [vmem:[%s1559_s0 + $0x1c8] sm:$0xff] }
  0x1c   :  { %v430_v45 = vpop.eup %429  ;;  %280 = vst.msk [vmem:[%s1560_s1 + $0x78] sm:$0xff] %vm264_vm0, %v428_v43  ;;  %449 = vtanh.f32 %v34_v40  ;;  %v66_v40 = vld [vmem:[%s1559_s0 + $0x1d0] sm:$0xff] }
  0x1d   :  { %v432_v47 = vpop.eup %431  ;;  %281 = vst.msk [vmem:[%s1560_s1 + $0x80] sm:$0xff] %vm264_vm0, %v430_v45  ;;  %451 = vtanh.f32 %v35_v42  ;;  %v67_v42 = vld [vmem:[%s1559_s0 + $0x1d8] sm:$0xff] }
  0x1e   :  { %v434_v49 = vpop.eup %433  ;;  %282 = vst.msk [vmem:[%s1560_s1 + $0x88] sm:$0xff] %vm264_vm0, %v432_v47  ;;  %453 = vtanh.f32 %v36_v44  ;;  %v68_v44 = vld [vmem:[%s1559_s0 + $0x1e0] sm:$0xff] }
  0x1f   :  { %v436_v51 = vpop.eup %435  ;;  %283 = vst.msk [vmem:[%s1560_s1 + $0x90] sm:$0xff] %vm264_vm0, %v434_v49  ;;  %455 = vtanh.f32 %v37_v46  ;;  %v69_v46 = vld [vmem:[%s1559_s0 + $0x1e8] sm:$0xff] }
  0x20   :  { %v438_v53 = vpop.eup %437  ;;  %284 = vst.msk [vmem:[%s1560_s1 + $0x98] sm:$0xff] %vm264_vm0, %v436_v51  ;;  %457 = vtanh.f32 %v38_v48  ;;  %v70_v48 = vld [vmem:[%s1559_s0 + $0x1f0] sm:$0xff] }
  0x21   :  { %v440_v55 = vpop.eup %439  ;;  %285 = vst.msk [vmem:[%s1560_s1 + $0xa0] sm:$0xff] %vm264_vm0, %v438_v53  ;;  %459 = vtanh.f32 %v39_v50  ;;  %v71_v50 = vld [vmem:[%s1559_s0 + $0x1f8] sm:$0xff] }
  0x22   :  { %v442_v57 = vpop.eup %441  ;;  %286 = vst.msk [vmem:[%s1560_s1 + $0xa8] sm:$0xff] %vm264_vm0, %v440_v55  ;;  %461 = vtanh.f32 %v40_v52  ;;  %v72_v52 = vld [vmem:[%s1559_s0 + $0x200] sm:$0xff] }
  0x23   :  { %v444_v59 = vpop.eup %443  ;;  %287 = vst.msk [vmem:[%s1560_s1 + $0xb0] sm:$0xff] %vm264_vm0, %v442_v57  ;;  %463 = vtanh.f32 %v41_v54  ;;  %v73_v54 = vld [vmem:[%s1559_s0 + $0x208] sm:$0xff] }
  0x24   :  { %v446_v61 = vpop.eup %445  ;;  %288 = vst.msk [vmem:[%s1560_s1 + $0xb8] sm:$0xff] %vm264_vm0, %v444_v59  ;;  %465 = vtanh.f32 %v42_v56  ;;  %v74_v56 = vld [vmem:[%s1559_s0 + $0x210] sm:$0xff] }
  0x25   :  { %v448_v63 = vpop.eup %447  ;;  %289 = vst.msk [vmem:[%s1560_s1 + $0xc0] sm:$0xff] %vm264_vm0, %v446_v61  ;;  %467 = vtanh.f32 %v43_v58  ;;  %v75_v58 = vld [vmem:[%s1559_s0 + $0x218] sm:$0xff] }
  0x26   :  { %v450_v1 = vpop.eup %449  ;;  %290 = vst.msk [vmem:[%s1560_s1 + $0xc8] sm:$0xff] %vm264_vm0, %v448_v63  ;;  %469 = vtanh.f32 %v44_v60  ;;  %v76_v60 = vld [vmem:[%s1559_s0 + $0x220] sm:$0xff] }
  0x27   :  { %v452_v3 = vpop.eup %451  ;;  %291 = vst.msk [vmem:[%s1560_s1 + $0xd0] sm:$0xff] %vm264_vm0, %v450_v1  ;;  %471 = vtanh.f32 %v45_v62  ;;  %v77_v62 = vld [vmem:[%s1559_s0 + $0x228] sm:$0xff] }
  0x28   :  { %v454_v5 = vpop.eup %453  ;;  %292 = vst.msk [vmem:[%s1560_s1 + $0xd8] sm:$0xff] %vm264_vm0, %v452_v3  ;;  %473 = vtanh.f32 %v46_v0  ;;  %v78_v0 = vld [vmem:[%s1559_s0 + $0x230] sm:$0xff] }
  0x29   :  { %v456_v7 = vpop.eup %455  ;;  %293 = vst.msk [vmem:[%s1560_s1 + $0xe0] sm:$0xff] %vm264_vm0, %v454_v5  ;;  %475 = vtanh.f32 %v47_v2  ;;  %v79_v2 = vld [vmem:[%s1559_s0 + $0x238] sm:$0xff] }
  0x2a   :  { %v458_v9 = vpop.eup %457  ;;  %294 = vst.msk [vmem:[%s1560_s1 + $0xe8] sm:$0xff] %vm264_vm0, %v456_v7  ;;  %477 = vtanh.f32 %v48_v4  ;;  %v80_v4 = vld [vmem:[%s1559_s0 + $0x240] sm:$0xff] }
  0x2b   :  { %v460_v11 = vpop.eup %459  ;;  %295 = vst.msk [vmem:[%s1560_s1 + $0xf0] sm:$0xff] %vm264_vm0, %v458_v9  ;;  %479 = vtanh.f32 %v49_v6  ;;  %v81_v6 = vld [vmem:[%s1559_s0 + $0x248] sm:$0xff] }
  0x2c   :  { %v462_v13 = vpop.eup %461  ;;  %296 = vst.msk [vmem:[%s1560_s1 + $0xf8] sm:$0xff] %vm264_vm0, %v460_v11  ;;  %481 = vtanh.f32 %v50_v8  ;;  %v82_v8 = vld [vmem:[%s1559_s0 + $0x250] sm:$0xff] }
  0x2d   :  { %v464_v15 = vpop.eup %463  ;;  %297 = vst.msk [vmem:[%s1560_s1 + $0x100] sm:$0xff] %vm264_vm0, %v462_v13  ;;  %483 = vtanh.f32 %v51_v10  ;;  %v83_v10 = vld [vmem:[%s1559_s0 + $0x258] sm:$0xff] }
  0x2e   :  { %v466_v17 = vpop.eup %465  ;;  %298 = vst.msk [vmem:[%s1560_s1 + $0x108] sm:$0xff] %vm264_vm0, %v464_v15  ;;  %485 = vtanh.f32 %v52_v12  ;;  %v84_v12 = vld [vmem:[%s1559_s0 + $0x260] sm:$0xff] }
  0x2f   :  { %v468_v19 = vpop.eup %467  ;;  %299 = vst.msk [vmem:[%s1560_s1 + $0x110] sm:$0xff] %vm264_vm0, %v466_v17  ;;  %487 = vtanh.f32 %v53_v14  ;;  %v85_v14 = vld [vmem:[%s1559_s0 + $0x268] sm:$0xff] }
  0x30   :  { %v470_v21 = vpop.eup %469  ;;  %300 = vst.msk [vmem:[%s1560_s1 + $0x118] sm:$0xff] %vm264_vm0, %v468_v19  ;;  %489 = vtanh.f32 %v54_v16  ;;  %v86_v16 = vld [vmem:[%s1559_s0 + $0x270] sm:$0xff] }
  0x31   :  { %v472_v23 = vpop.eup %471  ;;  %301 = vst.msk [vmem:[%s1560_s1 + $0x120] sm:$0xff] %vm264_vm0, %v470_v21  ;;  %491 = vtanh.f32 %v55_v18  ;;  %v87_v18 = vld [vmem:[%s1559_s0 + $0x278] sm:$0xff] }
  0x32   :  { %v474_v25 = vpop.eup %473  ;;  %302 = vst.msk [vmem:[%s1560_s1 + $0x128] sm:$0xff] %vm264_vm0, %v472_v23  ;;  %493 = vtanh.f32 %v56_v20  ;;  %v88_v20 = vld [vmem:[%s1559_s0 + $0x280] sm:$0xff] }
  0x33   :  { %v476_v27 = vpop.eup %475  ;;  %303 = vst.msk [vmem:[%s1560_s1 + $0x130] sm:$0xff] %vm264_vm0, %v474_v25  ;;  %495 = vtanh.f32 %v57_v22  ;;  %v89_v22 = vld [vmem:[%s1559_s0 + $0x288] sm:$0xff] }
  0x34   :  { %v478_v29 = vpop.eup %477  ;;  %304 = vst.msk [vmem:[%s1560_s1 + $0x138] sm:$0xff] %vm264_vm0, %v476_v27  ;;  %497 = vtanh.f32 %v58_v24  ;;  %v90_v24 = vld [vmem:[%s1559_s0 + $0x290] sm:$0xff] }
  0x35   :  { %v480_v31 = vpop.eup %479  ;;  %305 = vst.msk [vmem:[%s1560_s1 + $0x140] sm:$0xff] %vm264_vm0, %v478_v29  ;;  %499 = vtanh.f32 %v59_v26  ;;  %v91_v26 = vld [vmem:[%s1559_s0 + $0x298] sm:$0xff] }
  0x36   :  { %v482_v33 = vpop.eup %481  ;;  %306 = vst.msk [vmem:[%s1560_s1 + $0x148] sm:$0xff] %vm264_vm0, %v480_v31  ;;  %501 = vtanh.f32 %v60_v28  ;;  %v92_v28 = vld [vmem:[%s1559_s0 + $0x2a0] sm:$0xff] }
  0x37   :  { %v484_v35 = vpop.eup %483  ;;  %307 = vst.msk [vmem:[%s1560_s1 + $0x150] sm:$0xff] %vm264_vm0, %v482_v33  ;;  %503 = vtanh.f32 %v61_v30  ;;  %v93_v30 = vld [vmem:[%s1559_s0 + $0x2a8] sm:$0xff] }
  0x38   :  { %v486_v37 = vpop.eup %485  ;;  %308 = vst.msk [vmem:[%s1560_s1 + $0x158] sm:$0xff] %vm264_vm0, %v484_v35  ;;  %505 = vtanh.f32 %v62_v32  ;;  %v94_v32 = vld [vmem:[%s1559_s0 + $0x2b0] sm:$0xff] }
  0x39   :  { %v488_v39 = vpop.eup %487  ;;  %309 = vst.msk [vmem:[%s1560_s1 + $0x160] sm:$0xff] %vm264_vm0, %v486_v37  ;;  %507 = vtanh.f32 %v63_v34  ;;  %v95_v34 = vld [vmem:[%s1559_s0 + $0x2b8] sm:$0xff] }
  0x3a   :  { %v490_v41 = vpop.eup %489  ;;  %310 = vst.msk [vmem:[%s1560_s1 + $0x168] sm:$0xff] %vm264_vm0, %v488_v39  ;;  %509 = vtanh.f32 %v64_v36  ;;  %v96_v36 = vld [vmem:[%s1559_s0 + $0x2c0] sm:$0xff] }
  0x3b   :  { %v492_v43 = vpop.eup %491  ;;  %311 = vst.msk [vmem:[%s1560_s1 + $0x170] sm:$0xff] %vm264_vm0, %v490_v41  ;;  %511 = vtanh.f32 %v65_v38  ;;  %v97_v38 = vld [vmem:[%s1559_s0 + $0x2c8] sm:$0xff] }
  0x3c   :  { %v494_v45 = vpop.eup %493  ;;  %312 = vst.msk [vmem:[%s1560_s1 + $0x178] sm:$0xff] %vm264_vm0, %v492_v43  ;;  %513 = vtanh.f32 %v66_v40  ;;  %v98_v40 = vld [vmem:[%s1559_s0 + $0x2d0] sm:$0xff] }
  0x3d   :  { %v496_v47 = vpop.eup %495  ;;  %313 = vst.msk [vmem:[%s1560_s1 + $0x180] sm:$0xff] %vm264_vm0, %v494_v45  ;;  %515 = vtanh.f32 %v67_v42  ;;  %v99_v42 = vld [vmem:[%s1559_s0 + $0x2d8] sm:$0xff] }
  0x3e   :  { %v498_v49 = vpop.eup %497  ;;  %314 = vst.msk [vmem:[%s1560_s1 + $0x188] sm:$0xff] %vm264_vm0, %v496_v47  ;;  %517 = vtanh.f32 %v68_v44  ;;  %v100_v44 = vld [vmem:[%s1559_s0 + $0x2e0] sm:$0xff] }
  0x3f   :  { %v500_v51 = vpop.eup %499  ;;  %315 = vst.msk [vmem:[%s1560_s1 + $0x190] sm:$0xff] %vm264_vm0, %v498_v49  ;;  %519 = vtanh.f32 %v69_v46  ;;  %v101_v46 = vld [vmem:[%s1559_s0 + $0x2e8] sm:$0xff] }
  0x40   :  { %v502_v53 = vpop.eup %501  ;;  %316 = vst.msk [vmem:[%s1560_s1 + $0x198] sm:$0xff] %vm264_vm0, %v500_v51  ;;  %521 = vtanh.f32 %v70_v48  ;;  %v102_v48 = vld [vmem:[%s1559_s0 + $0x2f0] sm:$0xff] }
  0x41   :  { %v504_v55 = vpop.eup %503  ;;  %317 = vst.msk [vmem:[%s1560_s1 + $0x1a0] sm:$0xff] %vm264_vm0, %v502_v53  ;;  %523 = vtanh.f32 %v71_v50  ;;  %v103_v50 = vld [vmem:[%s1559_s0 + $0x2f8] sm:$0xff] }
  0x42   :  { %v506_v57 = vpop.eup %505  ;;  %318 = vst.msk [vmem:[%s1560_s1 + $0x1a8] sm:$0xff] %vm264_vm0, %v504_v55  ;;  %525 = vtanh.f32 %v72_v52  ;;  %v104_v52 = vld [vmem:[%s1559_s0 + $0x300] sm:$0xff] }
  0x43   :  { %v508_v59 = vpop.eup %507  ;;  %319 = vst.msk [vmem:[%s1560_s1 + $0x1b0] sm:$0xff] %vm264_vm0, %v506_v57  ;;  %527 = vtanh.f32 %v73_v54  ;;  %v105_v54 = vld [vmem:[%s1559_s0 + $0x308] sm:$0xff] }
  0x44   :  { %v510_v61 = vpop.eup %509  ;;  %320 = vst.msk [vmem:[%s1560_s1 + $0x1b8] sm:$0xff] %vm264_vm0, %v508_v59  ;;  %529 = vtanh.f32 %v74_v56  ;;  %v106_v56 = vld [vmem:[%s1559_s0 + $0x310] sm:$0xff] }
  0x45   :  { %v512_v63 = vpop.eup %511  ;;  %321 = vst.msk [vmem:[%s1560_s1 + $0x1c0] sm:$0xff] %vm264_vm0, %v510_v61  ;;  %531 = vtanh.f32 %v75_v58  ;;  %v107_v58 = vld [vmem:[%s1559_s0 + $0x318] sm:$0xff] }
  0x46   :  { %v514_v1 = vpop.eup %513  ;;  %322 = vst.msk [vmem:[%s1560_s1 + $0x1c8] sm:$0xff] %vm264_vm0, %v512_v63  ;;  %533 = vtanh.f32 %v76_v60  ;;  %v108_v60 = vld [vmem:[%s1559_s0 + $0x320] sm:$0xff] }
  0x47   :  { %v516_v3 = vpop.eup %515  ;;  %323 = vst.msk [vmem:[%s1560_s1 + $0x1d0] sm:$0xff] %vm264_vm0, %v514_v1  ;;  %535 = vtanh.f32 %v77_v62  ;;  %v109_v62 = vld [vmem:[%s1559_s0 + $0x328] sm:$0xff] }
  0x48   :  { %v518_v5 = vpop.eup %517  ;;  %324 = vst.msk [vmem:[%s1560_s1 + $0x1d8] sm:$0xff] %vm264_vm0, %v516_v3  ;;  %537 = vtanh.f32 %v78_v0  ;;  %v110_v0 = vld [vmem:[%s1559_s0 + $0x330] sm:$0xff] }
  0x49   :  { %v520_v7 = vpop.eup %519  ;;  %325 = vst.msk [vmem:[%s1560_s1 + $0x1e0] sm:$0xff] %vm264_vm0, %v518_v5  ;;  %539 = vtanh.f32 %v79_v2  ;;  %v111_v2 = vld [vmem:[%s1559_s0 + $0x338] sm:$0xff] }
  0x4a   :  { %v522_v9 = vpop.eup %521  ;;  %326 = vst.msk [vmem:[%s1560_s1 + $0x1e8] sm:$0xff] %vm264_vm0, %v520_v7  ;;  %541 = vtanh.f32 %v80_v4  ;;  %v112_v4 = vld [vmem:[%s1559_s0 + $0x340] sm:$0xff] }
  0x4b   :  { %v524_v11 = vpop.eup %523  ;;  %327 = vst.msk [vmem:[%s1560_s1 + $0x1f0] sm:$0xff] %vm264_vm0, %v522_v9  ;;  %543 = vtanh.f32 %v81_v6  ;;  %v113_v6 = vld [vmem:[%s1559_s0 + $0x348] sm:$0xff] }
  0x4c   :  { %v526_v13 = vpop.eup %525  ;;  %328 = vst.msk [vmem:[%s1560_s1 + $0x1f8] sm:$0xff] %vm264_vm0, %v524_v11  ;;  %545 = vtanh.f32 %v82_v8  ;;  %v114_v8 = vld [vmem:[%s1559_s0 + $0x350] sm:$0xff] }
  0x4d   :  { %v528_v15 = vpop.eup %527  ;;  %329 = vst.msk [vmem:[%s1560_s1 + $0x200] sm:$0xff] %vm264_vm0, %v526_v13  ;;  %547 = vtanh.f32 %v83_v10  ;;  %v115_v10 = vld [vmem:[%s1559_s0 + $0x358] sm:$0xff] }
  0x4e   :  { %v530_v17 = vpop.eup %529  ;;  %330 = vst.msk [vmem:[%s1560_s1 + $0x208] sm:$0xff] %vm264_vm0, %v528_v15  ;;  %549 = vtanh.f32 %v84_v12  ;;  %v116_v12 = vld [vmem:[%s1559_s0 + $0x360] sm:$0xff] }
  0x4f   :  { %v532_v19 = vpop.eup %531  ;;  %331 = vst.msk [vmem:[%s1560_s1 + $0x210] sm:$0xff] %vm264_vm0, %v530_v17  ;;  %551 = vtanh.f32 %v85_v14  ;;  %v117_v14 = vld [vmem:[%s1559_s0 + $0x368] sm:$0xff] }
  0x50   :  { %v534_v21 = vpop.eup %533  ;;  %332 = vst.msk [vmem:[%s1560_s1 + $0x218] sm:$0xff] %vm264_vm0, %v532_v19  ;;  %553 = vtanh.f32 %v86_v16  ;;  %v118_v16 = vld [vmem:[%s1559_s0 + $0x370] sm:$0xff] }
  0x51   :  { %v536_v23 = vpop.eup %535  ;;  %333 = vst.msk [vmem:[%s1560_s1 + $0x220] sm:$0xff] %vm264_vm0, %v534_v21  ;;  %555 = vtanh.f32 %v87_v18  ;;  %v119_v18 = vld [vmem:[%s1559_s0 + $0x378] sm:$0xff] }
  0x52   :  { %v538_v25 = vpop.eup %537  ;;  %334 = vst.msk [vmem:[%s1560_s1 + $0x228] sm:$0xff] %vm264_vm0, %v536_v23  ;;  %557 = vtanh.f32 %v88_v20  ;;  %v120_v20 = vld [vmem:[%s1559_s0 + $0x380] sm:$0xff] }
  0x53   :  { %v540_v27 = vpop.eup %539  ;;  %335 = vst.msk [vmem:[%s1560_s1 + $0x230] sm:$0xff] %vm264_vm0, %v538_v25  ;;  %559 = vtanh.f32 %v89_v22  ;;  %v121_v22 = vld [vmem:[%s1559_s0 + $0x388] sm:$0xff] }
  0x54   :  { %v542_v29 = vpop.eup %541  ;;  %336 = vst.msk [vmem:[%s1560_s1 + $0x238] sm:$0xff] %vm264_vm0, %v540_v27  ;;  %561 = vtanh.f32 %v90_v24  ;;  %v122_v24 = vld [vmem:[%s1559_s0 + $0x390] sm:$0xff] }
  0x55   :  { %v544_v31 = vpop.eup %543  ;;  %337 = vst.msk [vmem:[%s1560_s1 + $0x240] sm:$0xff] %vm264_vm0, %v542_v29  ;;  %563 = vtanh.f32 %v91_v26  ;;  %v123_v26 = vld [vmem:[%s1559_s0 + $0x398] sm:$0xff] }
  0x56   :  { %v546_v33 = vpop.eup %545  ;;  %338 = vst.msk [vmem:[%s1560_s1 + $0x248] sm:$0xff] %vm264_vm0, %v544_v31  ;;  %565 = vtanh.f32 %v92_v28  ;;  %v124_v28 = vld [vmem:[%s1559_s0 + $0x3a0] sm:$0xff] }
  0x57   :  { %v548_v35 = vpop.eup %547  ;;  %339 = vst.msk [vmem:[%s1560_s1 + $0x250] sm:$0xff] %vm264_vm0, %v546_v33  ;;  %567 = vtanh.f32 %v93_v30  ;;  %v125_v30 = vld [vmem:[%s1559_s0 + $0x3a8] sm:$0xff] }
  0x58   :  { %v550_v37 = vpop.eup %549  ;;  %340 = vst.msk [vmem:[%s1560_s1 + $0x258] sm:$0xff] %vm264_vm0, %v548_v35  ;;  %569 = vtanh.f32 %v94_v32  ;;  %v126_v32 = vld [vmem:[%s1559_s0 + $0x3b0] sm:$0xff] }
  0x59   :  { %v552_v39 = vpop.eup %551  ;;  %341 = vst.msk [vmem:[%s1560_s1 + $0x260] sm:$0xff] %vm264_vm0, %v550_v37  ;;  %571 = vtanh.f32 %v95_v34  ;;  %v127_v34 = vld [vmem:[%s1559_s0 + $0x3b8] sm:$0xff] }
  0x5a   :  { %v554_v41 = vpop.eup %553  ;;  %342 = vst.msk [vmem:[%s1560_s1 + $0x268] sm:$0xff] %vm264_vm0, %v552_v39  ;;  %573 = vtanh.f32 %v96_v36  ;;  %v128_v36 = vld [vmem:[%s1559_s0 + $0x3c0] sm:$0xff] }
  0x5b   :  { %v556_v43 = vpop.eup %555  ;;  %343 = vst.msk [vmem:[%s1560_s1 + $0x270] sm:$0xff] %vm264_vm0, %v554_v41  ;;  %575 = vtanh.f32 %v97_v38  ;;  %v129_v38 = vld [vmem:[%s1559_s0 + $0x3c8] sm:$0xff] }
  0x5c   :  { %v558_v45 = vpop.eup %557  ;;  %344 = vst.msk [vmem:[%s1560_s1 + $0x278] sm:$0xff] %vm264_vm0, %v556_v43  ;;  %577 = vtanh.f32 %v98_v40  ;;  %v130_v40 = vld [vmem:[%s1559_s0 + $0x3d0] sm:$0xff] }
  0x5d   :  { %v560_v47 = vpop.eup %559  ;;  %345 = vst.msk [vmem:[%s1560_s1 + $0x280] sm:$0xff] %vm264_vm0, %v558_v45  ;;  %579 = vtanh.f32 %v99_v42  ;;  %v131_v42 = vld [vmem:[%s1559_s0 + $0x3d8] sm:$0xff] }
  0x5e   :  { %v562_v49 = vpop.eup %561  ;;  %346 = vst.msk [vmem:[%s1560_s1 + $0x288] sm:$0xff] %vm264_vm0, %v560_v47  ;;  %581 = vtanh.f32 %v100_v44  ;;  %v132_v44 = vld [vmem:[%s1559_s0 + $0x3e0] sm:$0xff] }
  0x5f   :  { %v564_v51 = vpop.eup %563  ;;  %347 = vst.msk [vmem:[%s1560_s1 + $0x290] sm:$0xff] %vm264_vm0, %v562_v49  ;;  %583 = vtanh.f32 %v101_v46  ;;  %v133_v46 = vld [vmem:[%s1559_s0 + $0x3e8] sm:$0xff] }
  0x60   :  { %v566_v53 = vpop.eup %565  ;;  %348 = vst.msk [vmem:[%s1560_s1 + $0x298] sm:$0xff] %vm264_vm0, %v564_v51  ;;  %585 = vtanh.f32 %v102_v48  ;;  %v134_v48 = vld [vmem:[%s1559_s0 + $0x3f0] sm:$0xff] }
  0x61   :  { %v568_v55 = vpop.eup %567  ;;  %349 = vst.msk [vmem:[%s1560_s1 + $0x2a0] sm:$0xff] %vm264_vm0, %v566_v53  ;;  %587 = vtanh.f32 %v103_v50  ;;  %v135_v50 = vld [vmem:[%s1559_s0 + $0x3f8] sm:$0xff] }
  0x62   :  { %v570_v57 = vpop.eup %569  ;;  %350 = vst.msk [vmem:[%s1560_s1 + $0x2a8] sm:$0xff] %vm264_vm0, %v568_v55  ;;  %589 = vtanh.f32 %v104_v52 }
  0x63   :  { %v572_v59 = vpop.eup %571  ;;  %351 = vst.msk [vmem:[%s1560_s1 + $0x2b0] sm:$0xff] %vm264_vm0, %v570_v57  ;;  %591 = vtanh.f32 %v105_v54 }
  0x64   :  { %v574_v61 = vpop.eup %573  ;;  %352 = vst.msk [vmem:[%s1560_s1 + $0x2b8] sm:$0xff] %vm264_vm0, %v572_v59  ;;  %593 = vtanh.f32 %v106_v56 }
  0x65   :  { %v576_v63 = vpop.eup %575  ;;  %353 = vst.msk [vmem:[%s1560_s1 + $0x2c0] sm:$0xff] %vm264_vm0, %v574_v61  ;;  %595 = vtanh.f32 %v107_v58 }
  0x66   :  { %v578_v1 = vpop.eup %577  ;;  %354 = vst.msk [vmem:[%s1560_s1 + $0x2c8] sm:$0xff] %vm264_vm0, %v576_v63  ;;  %597 = vtanh.f32 %v108_v60 }
  0x67   :  { %v580_v3 = vpop.eup %579  ;;  %355 = vst.msk [vmem:[%s1560_s1 + $0x2d0] sm:$0xff] %vm264_vm0, %v578_v1  ;;  %599 = vtanh.f32 %v109_v62 }
  0x68   :  { %v582_v5 = vpop.eup %581  ;;  %356 = vst.msk [vmem:[%s1560_s1 + $0x2d8] sm:$0xff] %vm264_vm0, %v580_v3  ;;  %601 = vtanh.f32 %v110_v0 }
  0x69   :  { %v584_v7 = vpop.eup %583  ;;  %357 = vst.msk [vmem:[%s1560_s1 + $0x2e0] sm:$0xff] %vm264_vm0, %v582_v5  ;;  %603 = vtanh.f32 %v111_v2 }
  0x6a   :  { %v586_v9 = vpop.eup %585  ;;  %358 = vst.msk [vmem:[%s1560_s1 + $0x2e8] sm:$0xff] %vm264_vm0, %v584_v7  ;;  %605 = vtanh.f32 %v112_v4 }
  0x6b   :  { %v588_v11 = vpop.eup %587  ;;  %359 = vst.msk [vmem:[%s1560_s1 + $0x2f0] sm:$0xff] %vm264_vm0, %v586_v9  ;;  %607 = vtanh.f32 %v113_v6 }
  0x6c   :  { %v590_v13 = vpop.eup %589  ;;  %360 = vst.msk [vmem:[%s1560_s1 + $0x2f8] sm:$0xff] %vm264_vm0, %v588_v11  ;;  %609 = vtanh.f32 %v114_v8 }
  0x6d   :  { %v592_v15 = vpop.eup %591  ;;  %361 = vst.msk [vmem:[%s1560_s1 + $0x300] sm:$0xff] %vm264_vm0, %v590_v13  ;;  %611 = vtanh.f32 %v115_v10 }
  0x6e   :  { %v594_v17 = vpop.eup %593  ;;  %362 = vst.msk [vmem:[%s1560_s1 + $0x308] sm:$0xff] %vm264_vm0, %v592_v15  ;;  %613 = vtanh.f32 %v116_v12 }
  0x6f   :  { %v596_v19 = vpop.eup %595  ;;  %363 = vst.msk [vmem:[%s1560_s1 + $0x310] sm:$0xff] %vm264_vm0, %v594_v17  ;;  %615 = vtanh.f32 %v117_v14 }
  0x70   :  { %v598_v21 = vpop.eup %597  ;;  %364 = vst.msk [vmem:[%s1560_s1 + $0x318] sm:$0xff] %vm264_vm0, %v596_v19  ;;  %617 = vtanh.f32 %v118_v16 }
  0x71   :  { %v600_v23 = vpop.eup %599  ;;  %365 = vst.msk [vmem:[%s1560_s1 + $0x320] sm:$0xff] %vm264_vm0, %v598_v21  ;;  %619 = vtanh.f32 %v119_v18 }
  0x72   :  { %v602_v25 = vpop.eup %601  ;;  %366 = vst.msk [vmem:[%s1560_s1 + $0x328] sm:$0xff] %vm264_vm0, %v600_v23  ;;  %621 = vtanh.f32 %v120_v20 }
  0x73   :  { %v604_v27 = vpop.eup %603  ;;  %367 = vst.msk [vmem:[%s1560_s1 + $0x330] sm:$0xff] %vm264_vm0, %v602_v25  ;;  %623 = vtanh.f32 %v121_v22 }
  0x74   :  { %v606_v29 = vpop.eup %605  ;;  %368 = vst.msk [vmem:[%s1560_s1 + $0x338] sm:$0xff] %vm264_vm0, %v604_v27  ;;  %625 = vtanh.f32 %v122_v24 }
  0x75   :  { %v608_v31 = vpop.eup %607  ;;  %369 = vst.msk [vmem:[%s1560_s1 + $0x340] sm:$0xff] %vm264_vm0, %v606_v29  ;;  %627 = vtanh.f32 %v123_v26 }
  0x76   :  { %v610_v33 = vpop.eup %609  ;;  %370 = vst.msk [vmem:[%s1560_s1 + $0x348] sm:$0xff] %vm264_vm0, %v608_v31  ;;  %629 = vtanh.f32 %v124_v28 }
  0x77   :  { %v612_v35 = vpop.eup %611  ;;  %371 = vst.msk [vmem:[%s1560_s1 + $0x350] sm:$0xff] %vm264_vm0, %v610_v33  ;;  %631 = vtanh.f32 %v125_v30 }
  0x78   :  { %v614_v37 = vpop.eup %613  ;;  %372 = vst.msk [vmem:[%s1560_s1 + $0x358] sm:$0xff] %vm264_vm0, %v612_v35  ;;  %633 = vtanh.f32 %v126_v32 }
  0x79   :  { %v616_v39 = vpop.eup %615  ;;  %373 = vst.msk [vmem:[%s1560_s1 + $0x360] sm:$0xff] %vm264_vm0, %v614_v37  ;;  %635 = vtanh.f32 %v127_v34 }
  0x7a   :  { %v618_v41 = vpop.eup %617  ;;  %374 = vst.msk [vmem:[%s1560_s1 + $0x368] sm:$0xff] %vm264_vm0, %v616_v39  ;;  %637 = vtanh.f32 %v128_v36 }
  0x7b   :  { %v620_v43 = vpop.eup %619  ;;  %375 = vst.msk [vmem:[%s1560_s1 + $0x370] sm:$0xff] %vm264_vm0, %v618_v41  ;;  %639 = vtanh.f32 %v129_v38 }
  0x7c   :  { %v622_v45 = vpop.eup %621  ;;  %376 = vst.msk [vmem:[%s1560_s1 + $0x378] sm:$0xff] %vm264_vm0, %v620_v43  ;;  %641 = vtanh.f32 %v130_v40 }
  0x7d   :  { %v624_v47 = vpop.eup %623  ;;  %377 = vst.msk [vmem:[%s1560_s1 + $0x380] sm:$0xff] %vm264_vm0, %v622_v45  ;;  %643 = vtanh.f32 %v131_v42 }
  0x7e   :  { %v626_v49 = vpop.eup %625  ;;  %378 = vst.msk [vmem:[%s1560_s1 + $0x388] sm:$0xff] %vm264_vm0, %v624_v47  ;;  %645 = vtanh.f32 %v132_v44 }
  0x7f   :  { %v628_v51 = vpop.eup %627  ;;  %379 = vst.msk [vmem:[%s1560_s1 + $0x390] sm:$0xff] %vm264_vm0, %v626_v49  ;;  %647 = vtanh.f32 %v133_v46 }
  0x80   :  { %v630_v52 = vpop.eup %629  ;;  %380 = vst.msk [vmem:[%s1560_s1 + $0x398] sm:$0xff] %vm264_vm0, %v628_v51  ;;  %649 = vtanh.f32 %v134_v48 }
  0x81   :  { %v632_v53 = vpop.eup %631  ;;  %381 = vst.msk [vmem:[%s1560_s1 + $0x3a0] sm:$0xff] %vm264_vm0, %v630_v52  ;;  %651 = vtanh.f32 %v135_v50 }
  0x82   :  { %v634_v54 = vpop.eup %633  ;;  %382 = vst.msk [vmem:[%s1560_s1 + $0x3a8] sm:$0xff] %vm264_vm0, %v632_v53 }
  0x83   :  { %v636_v55 = vpop.eup %635  ;;  %383 = vst.msk [vmem:[%s1560_s1 + $0x3b0] sm:$0xff] %vm264_vm0, %v634_v54 }
  0x84   :  { %v638_v56 = vpop.eup %637  ;;  %384 = vst.msk [vmem:[%s1560_s1 + $0x3b8] sm:$0xff] %vm264_vm0, %v636_v55 }
  0x85   :  { %v640_v57 = vpop.eup %639  ;;  %385 = vst.msk [vmem:[%s1560_s1 + $0x3c0] sm:$0xff] %vm264_vm0, %v638_v56 }
  0x86   :  { %v642_v58 = vpop.eup %641  ;;  %386 = vst.msk [vmem:[%s1560_s1 + $0x3c8] sm:$0xff] %vm264_vm0, %v640_v57 }
  0x87   :  { %v644_v59 = vpop.eup %643  ;;  %387 = vst.msk [vmem:[%s1560_s1 + $0x3d0] sm:$0xff] %vm264_vm0, %v642_v58 }
  0x88   :  { %v646_v60 = vpop.eup %645  ;;  %388 = vst.msk [vmem:[%s1560_s1 + $0x3d8] sm:$0xff] %vm264_vm0, %v644_v59 }
  0x89   :  { %v648_v61 = vpop.eup %647  ;;  %389 = vst.msk [vmem:[%s1560_s1 + $0x3e0] sm:$0xff] %vm264_vm0, %v646_v60 }
  0x8a   :  { %v650_v62 = vpop.eup %649  ;;  %390 = vst.msk [vmem:[%s1560_s1 + $0x3e8] sm:$0xff] %vm264_vm0, %v648_v61 }
  0x8b   :  { %v652_v63 = vpop.eup %651  ;;  %391 = vst.msk [vmem:[%s1560_s1 + $0x3f0] sm:$0xff] %vm264_vm0, %v650_v62 }
  0x8c   :  { %392 = vst.msk [vmem:[%s1560_s1 + $0x3f8] sm:$0xff] %vm264_vm0, %v652_v63 }

</bundles_post_ra>
